<compile_context>
chip_gen: v7x
topology: tpu7x:2x2x1
jax: 0.10.0
libtpu: 0.0.40
codegen_flags: <defaults>
</compile_context>

<pallas_src>
import math

import numpy as np
import jax
import jax.numpy as jnp
from jax import lax
from jax.experimental import pallas as pl
from jax.experimental.pallas import tpu as pltpu

# Keep f32 matmul/conv semantics so the Pallas kernel and the lax.conv reference
# agree to tight tolerance on TPU.
jax.config.update("jax_default_matmul_precision", "highest")

NEG_SLOPE = 0.01  # PyTorch LeakyReLU default negative_slope.


def make_fused_kernel(n_layers):
    """Fused 5-layer conv kernel.

    Ref order: x_ref, (colop, rowsel, bias) * n_layers, o_ref
      x_ref      : (1, H, W*Cin)          lane-dense packed input (one image)
      colop_ref  : (3, Win*Cin, Wout*Cout) banded horizontal-tap operator per kh
      rowsel_ref : (3, Hout, Hin)          row selection/shift operator per kh
      bias_ref   : (1, Wout*Cout)          bias broadcast over rows
      o_ref      : (1, Hf, Wf*Cout)        lane-dense packed output (one image)
    """

    def kernel(*refs):
        x_ref = refs[0]
        o_ref = refs[-1]
        op_refs = refs[1:-1]

        x = x_ref[...][0]  # (Hin, Win*Cin) value, stays on-chip for all layers
        for layer in range(n_layers):
            colop_ref = op_refs[3 * layer + 0]
            rowsel_ref = op_refs[3 * layer + 1]
            bias_ref = op_refs[3 * layer + 2]

            hout = rowsel_ref.shape[1]
            nout = colop_ref.shape[2]
            acc = jnp.zeros((hout, nout), jnp.float32)
            for kh in range(3):  # static unroll: 3 tap rows
                rows = jnp.dot(rowsel_ref[kh], x,
                               preferred_element_type=jnp.float32)
                acc = acc + jnp.dot(rows, colop_ref[kh],
                                    preferred_element_type=jnp.float32)
            acc = acc + bias_ref[...]
            if layer < n_layers - 1:  # LeakyReLU after conv1..conv4 only
                acc = jnp.where(acc > 0, acc, NEG_SLOPE * acc)
            x = acc

        o_ref[...] = x[None]

    return kernel


def build_layer_operators(w_hwio, bias, stride, hin, win):
    """Host-side prep: turn a (3,3,Cin,Cout) conv weight into matmul operators."""
    cin, cout = int(w_hwio.shape[2]), int(w_hwio.shape[3])
    hout = (hin - 1) // stride + 1   # padding=1, kernel=3
    wout = (win - 1) // stride + 1

    colops, rowsels = [], []
    for kh in range(3):
        # Column operator: ColOp[wi*Cin+ci, wo*Cout+co] = W[kh, kw, ci, co]
        # where kw = wi - stride*wo + 1 (zero outside the 3-tap band / padding).
        col = jnp.zeros((win * cin, wout * cout), jnp.float32)
        for kw in range(3):
            a = np.zeros((win, wout), np.float32)
            for wo in range(wout):
                wi = stride * wo + kw - 1
                if 0 <= wi < win:
                    a[wi, wo] = 1.0
            col = col + jnp.kron(jnp.asarray(a), w_hwio[kh, kw])
        colops.append(col)

        # Row selector: RowSel[ho, hi] = 1 iff hi == stride*ho + kh - 1
        # (rows falling outside [0, Hin) are the zero padding).
        sel = np.zeros((hout, hin), np.float32)
        for ho in range(hout):
            hi = stride * ho + kh - 1
            if 0 <= hi < hin:
                sel[ho, hi] = 1.0
        rowsels.append(jnp.asarray(sel))

    colop = jnp.stack(colops)                                  # (3, Win*Cin, Wout*Cout)
    rowsel = jnp.stack(rowsels)                                # (3, Hout, Hin)
    bias_row = jnp.tile(bias, wout)[None, :].astype(jnp.float32)  # (1, Wout*Cout)
    return colop, rowsel, bias_row, hout, wout


def hyper_encoder_forward(x_nchw, params):
    """HyperEncoder forward. Input/output in NCHW (PyTorch convention)."""
    B, C, H, W = x_nchw.shape
    strides = (1, 1, 2, 1, 2)

    # Pack NCHW -> lane-dense (B, H, W*C).
    x_pack = jnp.transpose(x_nchw, (0, 2, 3, 1)).reshape(B, H, W * C)

    # Parameter-only prep (pure function of the weights; cacheable).
    ops = []
    hin, win = H, W
    for (w_hwio, b), s in zip(params, strides):
        colop, rowsel, bias_row, hin, win = build_layer_operators(
            w_hwio, b, s, hin, win)
        ops.append((colop, rowsel, bias_row))
    hf, wf = hin, win
    cf = int(params[-1][0].shape[3])

    kernel = make_fused_kernel(len(params))
    flat_ops = [a for trio in ops for a in trio]

    in_specs = [pl.BlockSpec((1, H, W * C), lambda b: (b, 0, 0))]
    for colop, rowsel, bias_row in ops:
        in_specs.append(pl.BlockSpec(colop.shape, lambda b: (0, 0, 0)))
        in_specs.append(pl.BlockSpec(rowsel.shape, lambda b: (0, 0, 0)))
        in_specs.append(pl.BlockSpec(bias_row.shape, lambda b: (0, 0)))

    out = pl.pallas_call(
        kernel,
        out_shape=jax.ShapeDtypeStruct((B, hf, wf * cf), jnp.float32),
        grid=(B,),
        in_specs=in_specs,
        out_specs=pl.BlockSpec((1, hf, wf * cf), lambda b: (b, 0, 0)),
        compiler_params=pltpu.CompilerParams(
            dimension_semantics=("parallel",)),
    )(x_pack, *flat_ops)

    # Unpack (B, Hf, Wf*Cout) -> NHWC -> NCHW.
    return jnp.transpose(out.reshape(B, hf, wf, cf), (0, 3, 1, 2))


def init_conv_params(key, cin, cout):
    """Deterministic init matching PyTorch Conv2d default bounds."""
    kw_key, kb_key = jax.random.split(key)
    fan_in = cin * 3 * 3
    bound = 1.0 / math.sqrt(fan_in)
    w_oihw = jax.random.uniform(kw_key, (cout, cin, 3, 3),
                                minval=-bound, maxval=bound, dtype=jnp.float32)
    bias = jax.random.uniform(kb_key, (cout,),
                              minval=-bound, maxval=bound, dtype=jnp.float32)
    w_hwio = jnp.transpose(w_oihw, (2, 3, 1, 0))  # (3, 3, Cin, Cout)
    return w_hwio, bias


def hyper_encoder_reference(x_nchw, params):
    """Pure-JAX reference (lax.conv) for a correctness cross-check."""
    x = jnp.transpose(x_nchw, (0, 2, 3, 1))
    strides = (1, 1, 2, 1, 2)
    for i, (w, b) in enumerate(params):
        x = lax.conv_general_dilated(
            x, w, window_strides=(strides[i], strides[i]),
            padding=((1, 1), (1, 1)),
            dimension_numbers=("NHWC", "HWIO", "NHWC"))
        x = x + b
        if i < 4:
            x = jnp.where(x > 0, x, NEG_SLOPE * x)
    return jnp.transpose(x, (0, 3, 1, 2))


if __name__ == "__main__":
    key = jax.random.PRNGKey(0)
    k_x, k_p = jax.random.split(key)

    # Small shapes consistent with the module (channel_in == channel_out).
    B, C, H, W = 2, 8, 16, 16
    x = jax.random.normal(k_x, (B, C, H, W), dtype=jnp.float32)  # NCHW

    param_keys = jax.random.split(k_p, 5)
    params = [init_conv_params(param_keys[i], C, C) for i in range(5)]

    out = jax.block_until_ready(hyper_encoder_forward(x, params))

    # Spatial size: 16 -> 16 -> 16 -> 8 -> 8 -> 4
    assert out.shape == (B, C, 4, 4), out.shape

    ref = jax.block_until_ready(hyper_encoder_reference(x, params))
    assert jnp.allclose(out, ref, rtol=1e-3, atol=1e-3), \
        float(jnp.max(jnp.abs(out - ref)))

    print("KERNEL_OK")
</pallas_src>

<mosaic_0001>
module attributes {stable_mosaic.version = 11 : i64} {
  func.func @kernel(%arg0: i32, %arg1: memref<1x16x128xf32, #tpu.memory_space<vmem>>, %arg2: memref<3x128x128xf32, #tpu.memory_space<vmem>>, %arg3: memref<3x16x16xf32, #tpu.memory_space<vmem>>, %arg4: memref<1x128xf32, #tpu.memory_space<vmem>>, %arg5: memref<3x128x128xf32, #tpu.memory_space<vmem>>, %arg6: memref<3x16x16xf32, #tpu.memory_space<vmem>>, %arg7: memref<1x128xf32, #tpu.memory_space<vmem>>, %arg8: memref<3x128x64xf32, #tpu.memory_space<vmem>>, %arg9: memref<3x8x16xf32, #tpu.memory_space<vmem>>, %arg10: memref<1x64xf32, #tpu.memory_space<vmem>>, %arg11: memref<3x64x64xf32, #tpu.memory_space<vmem>>, %arg12: memref<3x8x8xf32, #tpu.memory_space<vmem>>, %arg13: memref<1x64xf32, #tpu.memory_space<vmem>>, %arg14: memref<3x64x32xf32, #tpu.memory_space<vmem>>, %arg15: memref<3x4x8xf32, #tpu.memory_space<vmem>>, %arg16: memref<1x32xf32, #tpu.memory_space<vmem>>, %arg17: memref<1x4x32xf32, #tpu.memory_space<vmem>>) attributes {dimension_semantics = [#tpu.dimension_semantics<parallel>], iteration_bounds = array<i64: 2>, scalar_prefetch = 0 : i64, scratch_operands = 0 : i64, tpu.core_type = #tpu.core_type<tc>, window_params = [{transform_indices = @transform_0, window_bounds = array<i64: 1, 16, 128>}, {pipeline_mode = #tpu.pipeline_mode<synchronous>, transform_indices = @transform_1, window_bounds = array<i64: 3, 128, 128>}, {pipeline_mode = #tpu.pipeline_mode<synchronous>, transform_indices = @transform_2, window_bounds = array<i64: 3, 16, 16>}, {pipeline_mode = #tpu.pipeline_mode<synchronous>, transform_indices = @transform_3, window_bounds = array<i64: 1, 128>}, {pipeline_mode = #tpu.pipeline_mode<synchronous>, transform_indices = @transform_4, window_bounds = array<i64: 3, 128, 128>}, {pipeline_mode = #tpu.pipeline_mode<synchronous>, transform_indices = @transform_5, window_bounds = array<i64: 3, 16, 16>}, {pipeline_mode = #tpu.pipeline_mode<synchronous>, transform_indices = @transform_6, window_bounds = array<i64: 1, 128>}, {pipeline_mode = #tpu.pipeline_mode<synchronous>, transform_indices = @transform_7, window_bounds = array<i64: 3, 128, 64>}, {pipeline_mode = #tpu.pipeline_mode<synchronous>, transform_indices = @transform_8, window_bounds = array<i64: 3, 8, 16>}, {pipeline_mode = #tpu.pipeline_mode<synchronous>, transform_indices = @transform_9, window_bounds = array<i64: 1, 64>}, {pipeline_mode = #tpu.pipeline_mode<synchronous>, transform_indices = @transform_10, window_bounds = array<i64: 3, 64, 64>}, {pipeline_mode = #tpu.pipeline_mode<synchronous>, transform_indices = @transform_11, window_bounds = array<i64: 3, 8, 8>}, {pipeline_mode = #tpu.pipeline_mode<synchronous>, transform_indices = @transform_12, window_bounds = array<i64: 1, 64>}, {pipeline_mode = #tpu.pipeline_mode<synchronous>, transform_indices = @transform_13, window_bounds = array<i64: 3, 64, 32>}, {pipeline_mode = #tpu.pipeline_mode<synchronous>, transform_indices = @transform_14, window_bounds = array<i64: 3, 4, 8>}, {pipeline_mode = #tpu.pipeline_mode<synchronous>, transform_indices = @transform_15, window_bounds = array<i64: 1, 32>}, {transform_indices = @transform_16, window_bounds = array<i64: 1, 4, 32>}]} {
    %c0 = arith.constant 0 : index
    %c0_0 = arith.constant 0 : index
    %c0_1 = arith.constant 0 : index
    %0 = vector.load %arg1[%c0, %c0_0, %c0_1] : memref<1x16x128xf32, #tpu.memory_space<vmem>>, vector<1x16x128xf32>
    %1 = vector.shape_cast %0 : vector<1x16x128xf32> to vector<16x128xf32>
    %cst = arith.constant 0.000000e+00 : f32
    %2 = vector.broadcast %cst : f32 to vector<16x128xf32>
    %c0_2 = arith.constant 0 : index
    %c0_3 = arith.constant 0 : index
    %c0_4 = arith.constant 0 : index
    %3 = vector.load %arg3[%c0_2, %c0_3, %c0_4] : memref<3x16x16xf32, #tpu.memory_space<vmem>>, vector<1x16x16xf32>
    %4 = vector.shape_cast %3 : vector<1x16x16xf32> to vector<16x16xf32>
    %cst_5 = arith.constant dense<0.000000e+00> : vector<16x128xf32>
    %5 = tpu.matmul %4, %1, %cst_5 {dimension_numbers = #tpu.dot_dimension_numbers<[1], [0], [0], [1], [0, 0, 1, 1], [], []>, precision = #tpu.contract_precision<fp32>} : vector<16x16xf32>, vector<16x128xf32>, vector<16x128xf32> -> vector<16x128xf32>
    %c0_6 = arith.constant 0 : index
    %c0_7 = arith.constant 0 : index
    %c0_8 = arith.constant 0 : index
    %6 = vector.load %arg2[%c0_6, %c0_7, %c0_8] : memref<3x128x128xf32, #tpu.memory_space<vmem>>, vector<1x128x128xf32>
    %7 = vector.shape_cast %6 : vector<1x128x128xf32> to vector<128x128xf32>
    %cst_9 = arith.constant dense<0.000000e+00> : vector<16x128xf32>
    %8 = tpu.matmul %5, %7, %cst_9 {dimension_numbers = #tpu.dot_dimension_numbers<[1], [0], [0], [1], [0, 0, 1, 1], [], []>, precision = #tpu.contract_precision<fp32>} : vector<16x128xf32>, vector<128x128xf32>, vector<16x128xf32> -> vector<16x128xf32>
    %9 = arith.addf %2, %8 : vector<16x128xf32>
    %c1 = arith.constant 1 : index
    %c0_10 = arith.constant 0 : index
    %c0_11 = arith.constant 0 : index
    %10 = vector.load %arg3[%c1, %c0_10, %c0_11] : memref<3x16x16xf32, #tpu.memory_space<vmem>>, vector<1x16x16xf32>
    %11 = vector.shape_cast %10 : vector<1x16x16xf32> to vector<16x16xf32>
    %cst_12 = arith.constant dense<0.000000e+00> : vector<16x128xf32>
    %12 = tpu.matmul %11, %1, %cst_12 {dimension_numbers = #tpu.dot_dimension_numbers<[1], [0], [0], [1], [0, 0, 1, 1], [], []>, precision = #tpu.contract_precision<fp32>} : vector<16x16xf32>, vector<16x128xf32>, vector<16x128xf32> -> vector<16x128xf32>
    %c1_13 = arith.constant 1 : index
    %c0_14 = arith.constant 0 : index
    %c0_15 = arith.constant 0 : index
    %13 = vector.load %arg2[%c1_13, %c0_14, %c0_15] : memref<3x128x128xf32, #tpu.memory_space<vmem>>, vector<1x128x128xf32>
    %14 = vector.shape_cast %13 : vector<1x128x128xf32> to vector<128x128xf32>
    %cst_16 = arith.constant dense<0.000000e+00> : vector<16x128xf32>
    %15 = tpu.matmul %12, %14, %cst_16 {dimension_numbers = #tpu.dot_dimension_numbers<[1], [0], [0], [1], [0, 0, 1, 1], [], []>, precision = #tpu.contract_precision<fp32>} : vector<16x128xf32>, vector<128x128xf32>, vector<16x128xf32> -> vector<16x128xf32>
    %16 = arith.addf %9, %15 : vector<16x128xf32>
    %c2 = arith.constant 2 : index
    %c0_17 = arith.constant 0 : index
    %c0_18 = arith.constant 0 : index
    %17 = vector.load %arg3[%c2, %c0_17, %c0_18] : memref<3x16x16xf32, #tpu.memory_space<vmem>>, vector<1x16x16xf32>
    %18 = vector.shape_cast %17 : vector<1x16x16xf32> to vector<16x16xf32>
    %cst_19 = arith.constant dense<0.000000e+00> : vector<16x128xf32>
    %19 = tpu.matmul %18, %1, %cst_19 {dimension_numbers = #tpu.dot_dimension_numbers<[1], [0], [0], [1], [0, 0, 1, 1], [], []>, precision = #tpu.contract_precision<fp32>} : vector<16x16xf32>, vector<16x128xf32>, vector<16x128xf32> -> vector<16x128xf32>
    %c2_20 = arith.constant 2 : index
    %c0_21 = arith.constant 0 : index
    %c0_22 = arith.constant 0 : index
    %20 = vector.load %arg2[%c2_20, %c0_21, %c0_22] : memref<3x128x128xf32, #tpu.memory_space<vmem>>, vector<1x128x128xf32>
    %21 = vector.shape_cast %20 : vector<1x128x128xf32> to vector<128x128xf32>
    %cst_23 = arith.constant dense<0.000000e+00> : vector<16x128xf32>
    %22 = tpu.matmul %19, %21, %cst_23 {dimension_numbers = #tpu.dot_dimension_numbers<[1], [0], [0], [1], [0, 0, 1, 1], [], []>, precision = #tpu.contract_precision<fp32>} : vector<16x128xf32>, vector<128x128xf32>, vector<16x128xf32> -> vector<16x128xf32>
    %23 = arith.addf %16, %22 : vector<16x128xf32>
    %c0_24 = arith.constant 0 : index
    %c0_25 = arith.constant 0 : index
    %24 = vector.load %arg4[%c0_24, %c0_25] : memref<1x128xf32, #tpu.memory_space<vmem>>, vector<1x128xf32>
    %25 = vector.broadcast %24 : vector<1x128xf32> to vector<16x128xf32>
    %26 = arith.addf %23, %25 : vector<16x128xf32>
    %cst_26 = arith.constant 0.000000e+00 : f32
    %27 = vector.broadcast %cst_26 : f32 to vector<16x128xf32>
    %28 = arith.cmpf ogt, %26, %27 : vector<16x128xf32>
    %cst_27 = arith.constant 0.00999999977 : f32
    %29 = vector.broadcast %cst_27 : f32 to vector<16x128xf32>
    %30 = arith.mulf %29, %26 : vector<16x128xf32>
    %31 = arith.select %28, %26, %30 : vector<16x128xi1>, vector<16x128xf32>
    %cst_28 = arith.constant 0.000000e+00 : f32
    %32 = vector.broadcast %cst_28 : f32 to vector<16x128xf32>
    %c0_29 = arith.constant 0 : index
    %c0_30 = arith.constant 0 : index
    %c0_31 = arith.constant 0 : index
    %33 = vector.load %arg6[%c0_29, %c0_30, %c0_31] : memref<3x16x16xf32, #tpu.memory_space<vmem>>, vector<1x16x16xf32>
    %34 = vector.shape_cast %33 : vector<1x16x16xf32> to vector<16x16xf32>
    %cst_32 = arith.constant dense<0.000000e+00> : vector<16x128xf32>
    %35 = tpu.matmul %34, %31, %cst_32 {dimension_numbers = #tpu.dot_dimension_numbers<[1], [0], [0], [1], [0, 0, 1, 1], [], []>, precision = #tpu.contract_precision<fp32>} : vector<16x16xf32>, vector<16x128xf32>, vector<16x128xf32> -> vector<16x128xf32>
    %c0_33 = arith.constant 0 : index
    %c0_34 = arith.constant 0 : index
    %c0_35 = arith.constant 0 : index
    %36 = vector.load %arg5[%c0_33, %c0_34, %c0_35] : memref<3x128x128xf32, #tpu.memory_space<vmem>>, vector<1x128x128xf32>
    %37 = vector.shape_cast %36 : vector<1x128x128xf32> to vector<128x128xf32>
    %cst_36 = arith.constant dense<0.000000e+00> : vector<16x128xf32>
    %38 = tpu.matmul %35, %37, %cst_36 {dimension_numbers = #tpu.dot_dimension_numbers<[1], [0], [0], [1], [0, 0, 1, 1], [], []>, precision = #tpu.contract_precision<fp32>} : vector<16x128xf32>, vector<128x128xf32>, vector<16x128xf32> -> vector<16x128xf32>
    %39 = arith.addf %32, %38 : vector<16x128xf32>
    %c1_37 = arith.constant 1 : index
    %c0_38 = arith.constant 0 : index
    %c0_39 = arith.constant 0 : index
    %40 = vector.load %arg6[%c1_37, %c0_38, %c0_39] : memref<3x16x16xf32, #tpu.memory_space<vmem>>, vector<1x16x16xf32>
    %41 = vector.shape_cast %40 : vector<1x16x16xf32> to vector<16x16xf32>
    %cst_40 = arith.constant dense<0.000000e+00> : vector<16x128xf32>
    %42 = tpu.matmul %41, %31, %cst_40 {dimension_numbers = #tpu.dot_dimension_numbers<[1], [0], [0], [1], [0, 0, 1, 1], [], []>, precision = #tpu.contract_precision<fp32>} : vector<16x16xf32>, vector<16x128xf32>, vector<16x128xf32> -> vector<16x128xf32>
    %c1_41 = arith.constant 1 : index
    %c0_42 = arith.constant 0 : index
    %c0_43 = arith.constant 0 : index
    %43 = vector.load %arg5[%c1_41, %c0_42, %c0_43] : memref<3x128x128xf32, #tpu.memory_space<vmem>>, vector<1x128x128xf32>
    %44 = vector.shape_cast %43 : vector<1x128x128xf32> to vector<128x128xf32>
    %cst_44 = arith.constant dense<0.000000e+00> : vector<16x128xf32>
    %45 = tpu.matmul %42, %44, %cst_44 {dimension_numbers = #tpu.dot_dimension_numbers<[1], [0], [0], [1], [0, 0, 1, 1], [], []>, precision = #tpu.contract_precision<fp32>} : vector<16x128xf32>, vector<128x128xf32>, vector<16x128xf32> -> vector<16x128xf32>
    %46 = arith.addf %39, %45 : vector<16x128xf32>
    %c2_45 = arith.constant 2 : index
    %c0_46 = arith.constant 0 : index
    %c0_47 = arith.constant 0 : index
    %47 = vector.load %arg6[%c2_45, %c0_46, %c0_47] : memref<3x16x16xf32, #tpu.memory_space<vmem>>, vector<1x16x16xf32>
    %48 = vector.shape_cast %47 : vector<1x16x16xf32> to vector<16x16xf32>
    %cst_48 = arith.constant dense<0.000000e+00> : vector<16x128xf32>
    %49 = tpu.matmul %48, %31, %cst_48 {dimension_numbers = #tpu.dot_dimension_numbers<[1], [0], [0], [1], [0, 0, 1, 1], [], []>, precision = #tpu.contract_precision<fp32>} : vector<16x16xf32>, vector<16x128xf32>, vector<16x128xf32> -> vector<16x128xf32>
    %c2_49 = arith.constant 2 : index
    %c0_50 = arith.constant 0 : index
    %c0_51 = arith.constant 0 : index
    %50 = vector.load %arg5[%c2_49, %c0_50, %c0_51] : memref<3x128x128xf32, #tpu.memory_space<vmem>>, vector<1x128x128xf32>
    %51 = vector.shape_cast %50 : vector<1x128x128xf32> to vector<128x128xf32>
    %cst_52 = arith.constant dense<0.000000e+00> : vector<16x128xf32>
    %52 = tpu.matmul %49, %51, %cst_52 {dimension_numbers = #tpu.dot_dimension_numbers<[1], [0], [0], [1], [0, 0, 1, 1], [], []>, precision = #tpu.contract_precision<fp32>} : vector<16x128xf32>, vector<128x128xf32>, vector<16x128xf32> -> vector<16x128xf32>
    %53 = arith.addf %46, %52 : vector<16x128xf32>
    %c0_53 = arith.constant 0 : index
    %c0_54 = arith.constant 0 : index
    %54 = vector.load %arg7[%c0_53, %c0_54] : memref<1x128xf32, #tpu.memory_space<vmem>>, vector<1x128xf32>
    %55 = vector.broadcast %54 : vector<1x128xf32> to vector<16x128xf32>
    %56 = arith.addf %53, %55 : vector<16x128xf32>
    %cst_55 = arith.constant 0.000000e+00 : f32
    %57 = vector.broadcast %cst_55 : f32 to vector<16x128xf32>
    %58 = arith.cmpf ogt, %56, %57 : vector<16x128xf32>
    %cst_56 = arith.constant 0.00999999977 : f32
    %59 = vector.broadcast %cst_56 : f32 to vector<16x128xf32>
    %60 = arith.mulf %59, %56 : vector<16x128xf32>
    %61 = arith.select %58, %56, %60 : vector<16x128xi1>, vector<16x128xf32>
    %cst_57 = arith.constant 0.000000e+00 : f32
    %62 = vector.broadcast %cst_57 : f32 to vector<8x64xf32>
    %c0_58 = arith.constant 0 : index
    %c0_59 = arith.constant 0 : index
    %c0_60 = arith.constant 0 : index
    %63 = vector.load %arg9[%c0_58, %c0_59, %c0_60] : memref<3x8x16xf32, #tpu.memory_space<vmem>>, vector<1x8x16xf32>
    %64 = vector.shape_cast %63 : vector<1x8x16xf32> to vector<8x16xf32>
    %cst_61 = arith.constant dense<0.000000e+00> : vector<8x128xf32>
    %65 = tpu.matmul %64, %61, %cst_61 {dimension_numbers = #tpu.dot_dimension_numbers<[1], [0], [0], [1], [0, 0, 1, 1], [], []>, precision = #tpu.contract_precision<fp32>} : vector<8x16xf32>, vector<16x128xf32>, vector<8x128xf32> -> vector<8x128xf32>
    %c0_62 = arith.constant 0 : index
    %c0_63 = arith.constant 0 : index
    %c0_64 = arith.constant 0 : index
    %66 = vector.load %arg8[%c0_62, %c0_63, %c0_64] : memref<3x128x64xf32, #tpu.memory_space<vmem>>, vector<1x128x64xf32>
    %67 = vector.shape_cast %66 : vector<1x128x64xf32> to vector<128x64xf32>
    %cst_65 = arith.constant dense<0.000000e+00> : vector<8x64xf32>
    %68 = tpu.matmul %65, %67, %cst_65 {dimension_numbers = #tpu.dot_dimension_numbers<[1], [0], [0], [1], [0, 0, 1, 1], [], []>, precision = #tpu.contract_precision<fp32>} : vector<8x128xf32>, vector<128x64xf32>, vector<8x64xf32> -> vector<8x64xf32>
    %69 = arith.addf %62, %68 : vector<8x64xf32>
    %c1_66 = arith.constant 1 : index
    %c0_67 = arith.constant 0 : index
    %c0_68 = arith.constant 0 : index
    %70 = vector.load %arg9[%c1_66, %c0_67, %c0_68] : memref<3x8x16xf32, #tpu.memory_space<vmem>>, vector<1x8x16xf32>
    %71 = vector.shape_cast %70 : vector<1x8x16xf32> to vector<8x16xf32>
    %cst_69 = arith.constant dense<0.000000e+00> : vector<8x128xf32>
    %72 = tpu.matmul %71, %61, %cst_69 {dimension_numbers = #tpu.dot_dimension_numbers<[1], [0], [0], [1], [0, 0, 1, 1], [], []>, precision = #tpu.contract_precision<fp32>} : vector<8x16xf32>, vector<16x128xf32>, vector<8x128xf32> -> vector<8x128xf32>
    %c1_70 = arith.constant 1 : index
    %c0_71 = arith.constant 0 : index
    %c0_72 = arith.constant 0 : index
    %73 = vector.load %arg8[%c1_70, %c0_71, %c0_72] : memref<3x128x64xf32, #tpu.memory_space<vmem>>, vector<1x128x64xf32>
    %74 = vector.shape_cast %73 : vector<1x128x64xf32> to vector<128x64xf32>
    %cst_73 = arith.constant dense<0.000000e+00> : vector<8x64xf32>
    %75 = tpu.matmul %72, %74, %cst_73 {dimension_numbers = #tpu.dot_dimension_numbers<[1], [0], [0], [1], [0, 0, 1, 1], [], []>, precision = #tpu.contract_precision<fp32>} : vector<8x128xf32>, vector<128x64xf32>, vector<8x64xf32> -> vector<8x64xf32>
    %76 = arith.addf %69, %75 : vector<8x64xf32>
    %c2_74 = arith.constant 2 : index
    %c0_75 = arith.constant 0 : index
    %c0_76 = arith.constant 0 : index
    %77 = vector.load %arg9[%c2_74, %c0_75, %c0_76] : memref<3x8x16xf32, #tpu.memory_space<vmem>>, vector<1x8x16xf32>
    %78 = vector.shape_cast %77 : vector<1x8x16xf32> to vector<8x16xf32>
    %cst_77 = arith.constant dense<0.000000e+00> : vector<8x128xf32>
    %79 = tpu.matmul %78, %61, %cst_77 {dimension_numbers = #tpu.dot_dimension_numbers<[1], [0], [0], [1], [0, 0, 1, 1], [], []>, precision = #tpu.contract_precision<fp32>} : vector<8x16xf32>, vector<16x128xf32>, vector<8x128xf32> -> vector<8x128xf32>
    %c2_78 = arith.constant 2 : index
    %c0_79 = arith.constant 0 : index
    %c0_80 = arith.constant 0 : index
    %80 = vector.load %arg8[%c2_78, %c0_79, %c0_80] : memref<3x128x64xf32, #tpu.memory_space<vmem>>, vector<1x128x64xf32>
    %81 = vector.shape_cast %80 : vector<1x128x64xf32> to vector<128x64xf32>
    %cst_81 = arith.constant dense<0.000000e+00> : vector<8x64xf32>
    %82 = tpu.matmul %79, %81, %cst_81 {dimension_numbers = #tpu.dot_dimension_numbers<[1], [0], [0], [1], [0, 0, 1, 1], [], []>, precision = #tpu.contract_precision<fp32>} : vector<8x128xf32>, vector<128x64xf32>, vector<8x64xf32> -> vector<8x64xf32>
    %83 = arith.addf %76, %82 : vector<8x64xf32>
    %c0_82 = arith.constant 0 : index
    %c0_83 = arith.constant 0 : index
    %84 = vector.load %arg10[%c0_82, %c0_83] : memref<1x64xf32, #tpu.memory_space<vmem>>, vector<1x64xf32>
    %85 = vector.broadcast %84 : vector<1x64xf32> to vector<8x64xf32>
    %86 = arith.addf %83, %85 : vector<8x64xf32>
    %cst_84 = arith.constant 0.000000e+00 : f32
    %87 = vector.broadcast %cst_84 : f32 to vector<8x64xf32>
    %88 = arith.cmpf ogt, %86, %87 : vector<8x64xf32>
    %cst_85 = arith.constant 0.00999999977 : f32
    %89 = vector.broadcast %cst_85 : f32 to vector<8x64xf32>
    %90 = arith.mulf %89, %86 : vector<8x64xf32>
    %91 = arith.select %88, %86, %90 : vector<8x64xi1>, vector<8x64xf32>
    %cst_86 = arith.constant 0.000000e+00 : f32
    %92 = vector.broadcast %cst_86 : f32 to vector<8x64xf32>
    %c0_87 = arith.constant 0 : index
    %c0_88 = arith.constant 0 : index
    %c0_89 = arith.constant 0 : index
    %93 = vector.load %arg12[%c0_87, %c0_88, %c0_89] : memref<3x8x8xf32, #tpu.memory_space<vmem>>, vector<1x8x8xf32>
    %94 = vector.shape_cast %93 : vector<1x8x8xf32> to vector<8x8xf32>
    %cst_90 = arith.constant dense<0.000000e+00> : vector<8x64xf32>
    %95 = tpu.matmul %94, %91, %cst_90 {dimension_numbers = #tpu.dot_dimension_numbers<[1], [0], [0], [1], [0, 0, 1, 1], [], []>, precision = #tpu.contract_precision<fp32>} : vector<8x8xf32>, vector<8x64xf32>, vector<8x64xf32> -> vector<8x64xf32>
    %c0_91 = arith.constant 0 : index
    %c0_92 = arith.constant 0 : index
    %c0_93 = arith.constant 0 : index
    %96 = vector.load %arg11[%c0_91, %c0_92, %c0_93] : memref<3x64x64xf32, #tpu.memory_space<vmem>>, vector<1x64x64xf32>
    %97 = vector.shape_cast %96 : vector<1x64x64xf32> to vector<64x64xf32>
    %cst_94 = arith.constant dense<0.000000e+00> : vector<8x64xf32>
    %98 = tpu.matmul %95, %97, %cst_94 {dimension_numbers = #tpu.dot_dimension_numbers<[1], [0], [0], [1], [0, 0, 1, 1], [], []>, precision = #tpu.contract_precision<fp32>} : vector<8x64xf32>, vector<64x64xf32>, vector<8x64xf32> -> vector<8x64xf32>
    %99 = arith.addf %92, %98 : vector<8x64xf32>
    %c1_95 = arith.constant 1 : index
    %c0_96 = arith.constant 0 : index
    %c0_97 = arith.constant 0 : index
    %100 = vector.load %arg12[%c1_95, %c0_96, %c0_97] : memref<3x8x8xf32, #tpu.memory_space<vmem>>, vector<1x8x8xf32>
    %101 = vector.shape_cast %100 : vector<1x8x8xf32> to vector<8x8xf32>
    %cst_98 = arith.constant dense<0.000000e+00> : vector<8x64xf32>
    %102 = tpu.matmul %101, %91, %cst_98 {dimension_numbers = #tpu.dot_dimension_numbers<[1], [0], [0], [1], [0, 0, 1, 1], [], []>, precision = #tpu.contract_precision<fp32>} : vector<8x8xf32>, vector<8x64xf32>, vector<8x64xf32> -> vector<8x64xf32>
    %c1_99 = arith.constant 1 : index
    %c0_100 = arith.constant 0 : index
    %c0_101 = arith.constant 0 : index
    %103 = vector.load %arg11[%c1_99, %c0_100, %c0_101] : memref<3x64x64xf32, #tpu.memory_space<vmem>>, vector<1x64x64xf32>
    %104 = vector.shape_cast %103 : vector<1x64x64xf32> to vector<64x64xf32>
    %cst_102 = arith.constant dense<0.000000e+00> : vector<8x64xf32>
    %105 = tpu.matmul %102, %104, %cst_102 {dimension_numbers = #tpu.dot_dimension_numbers<[1], [0], [0], [1], [0, 0, 1, 1], [], []>, precision = #tpu.contract_precision<fp32>} : vector<8x64xf32>, vector<64x64xf32>, vector<8x64xf32> -> vector<8x64xf32>
    %106 = arith.addf %99, %105 : vector<8x64xf32>
    %c2_103 = arith.constant 2 : index
    %c0_104 = arith.constant 0 : index
    %c0_105 = arith.constant 0 : index
    %107 = vector.load %arg12[%c2_103, %c0_104, %c0_105] : memref<3x8x8xf32, #tpu.memory_space<vmem>>, vector<1x8x8xf32>
    %108 = vector.shape_cast %107 : vector<1x8x8xf32> to vector<8x8xf32>
    %cst_106 = arith.constant dense<0.000000e+00> : vector<8x64xf32>
    %109 = tpu.matmul %108, %91, %cst_106 {dimension_numbers = #tpu.dot_dimension_numbers<[1], [0], [0], [1], [0, 0, 1, 1], [], []>, precision = #tpu.contract_precision<fp32>} : vector<8x8xf32>, vector<8x64xf32>, vector<8x64xf32> -> vector<8x64xf32>
    %c2_107 = arith.constant 2 : index
    %c0_108 = arith.constant 0 : index
    %c0_109 = arith.constant 0 : index
    %110 = vector.load %arg11[%c2_107, %c0_108, %c0_109] : memref<3x64x64xf32, #tpu.memory_space<vmem>>, vector<1x64x64xf32>
    %111 = vector.shape_cast %110 : vector<1x64x64xf32> to vector<64x64xf32>
    %cst_110 = arith.constant dense<0.000000e+00> : vector<8x64xf32>
    %112 = tpu.matmul %109, %111, %cst_110 {dimension_numbers = #tpu.dot_dimension_numbers<[1], [0], [0], [1], [0, 0, 1, 1], [], []>, precision = #tpu.contract_precision<fp32>} : vector<8x64xf32>, vector<64x64xf32>, vector<8x64xf32> -> vector<8x64xf32>
    %113 = arith.addf %106, %112 : vector<8x64xf32>
    %c0_111 = arith.constant 0 : index
    %c0_112 = arith.constant 0 : index
    %114 = vector.load %arg13[%c0_111, %c0_112] : memref<1x64xf32, #tpu.memory_space<vmem>>, vector<1x64xf32>
    %115 = vector.broadcast %114 : vector<1x64xf32> to vector<8x64xf32>
    %116 = arith.addf %113, %115 : vector<8x64xf32>
    %cst_113 = arith.constant 0.000000e+00 : f32
    %117 = vector.broadcast %cst_113 : f32 to vector<8x64xf32>
    %118 = arith.cmpf ogt, %116, %117 : vector<8x64xf32>
    %cst_114 = arith.constant 0.00999999977 : f32
    %119 = vector.broadcast %cst_114 : f32 to vector<8x64xf32>
    %120 = arith.mulf %119, %116 : vector<8x64xf32>
    %121 = arith.select %118, %116, %120 : vector<8x64xi1>, vector<8x64xf32>
    %cst_115 = arith.constant 0.000000e+00 : f32
    %122 = vector.broadcast %cst_115 : f32 to vector<4x32xf32>
    %c0_116 = arith.constant 0 : index
    %c0_117 = arith.constant 0 : index
    %c0_118 = arith.constant 0 : index
    %123 = vector.load %arg15[%c0_116, %c0_117, %c0_118] : memref<3x4x8xf32, #tpu.memory_space<vmem>>, vector<1x4x8xf32>
    %124 = vector.shape_cast %123 : vector<1x4x8xf32> to vector<4x8xf32>
    %cst_119 = arith.constant dense<0.000000e+00> : vector<4x64xf32>
    %125 = tpu.matmul %124, %121, %cst_119 {dimension_numbers = #tpu.dot_dimension_numbers<[1], [0], [0], [1], [0, 0, 1, 1], [], []>, precision = #tpu.contract_precision<fp32>} : vector<4x8xf32>, vector<8x64xf32>, vector<4x64xf32> -> vector<4x64xf32>
    %c0_120 = arith.constant 0 : index
    %c0_121 = arith.constant 0 : index
    %c0_122 = arith.constant 0 : index
    %126 = vector.load %arg14[%c0_120, %c0_121, %c0_122] : memref<3x64x32xf32, #tpu.memory_space<vmem>>, vector<1x64x32xf32>
    %127 = vector.shape_cast %126 : vector<1x64x32xf32> to vector<64x32xf32>
    %cst_123 = arith.constant dense<0.000000e+00> : vector<4x32xf32>
    %128 = tpu.matmul %125, %127, %cst_123 {dimension_numbers = #tpu.dot_dimension_numbers<[1], [0], [0], [1], [0, 0, 1, 1], [], []>, precision = #tpu.contract_precision<fp32>} : vector<4x64xf32>, vector<64x32xf32>, vector<4x32xf32> -> vector<4x32xf32>
    %129 = arith.addf %122, %128 : vector<4x32xf32>
    %c1_124 = arith.constant 1 : index
    %c0_125 = arith.constant 0 : index
    %c0_126 = arith.constant 0 : index
    %130 = vector.load %arg15[%c1_124, %c0_125, %c0_126] : memref<3x4x8xf32, #tpu.memory_space<vmem>>, vector<1x4x8xf32>
    %131 = vector.shape_cast %130 : vector<1x4x8xf32> to vector<4x8xf32>
    %cst_127 = arith.constant dense<0.000000e+00> : vector<4x64xf32>
    %132 = tpu.matmul %131, %121, %cst_127 {dimension_numbers = #tpu.dot_dimension_numbers<[1], [0], [0], [1], [0, 0, 1, 1], [], []>, precision = #tpu.contract_precision<fp32>} : vector<4x8xf32>, vector<8x64xf32>, vector<4x64xf32> -> vector<4x64xf32>
    %c1_128 = arith.constant 1 : index
    %c0_129 = arith.constant 0 : index
    %c0_130 = arith.constant 0 : index
    %133 = vector.load %arg14[%c1_128, %c0_129, %c0_130] : memref<3x64x32xf32, #tpu.memory_space<vmem>>, vector<1x64x32xf32>
    %134 = vector.shape_cast %133 : vector<1x64x32xf32> to vector<64x32xf32>
    %cst_131 = arith.constant dense<0.000000e+00> : vector<4x32xf32>
    %135 = tpu.matmul %132, %134, %cst_131 {dimension_numbers = #tpu.dot_dimension_numbers<[1], [0], [0], [1], [0, 0, 1, 1], [], []>, precision = #tpu.contract_precision<fp32>} : vector<4x64xf32>, vector<64x32xf32>, vector<4x32xf32> -> vector<4x32xf32>
    %136 = arith.addf %129, %135 : vector<4x32xf32>
    %c2_132 = arith.constant 2 : index
    %c0_133 = arith.constant 0 : index
    %c0_134 = arith.constant 0 : index
    %137 = vector.load %arg15[%c2_132, %c0_133, %c0_134] : memref<3x4x8xf32, #tpu.memory_space<vmem>>, vector<1x4x8xf32>
    %138 = vector.shape_cast %137 : vector<1x4x8xf32> to vector<4x8xf32>
    %cst_135 = arith.constant dense<0.000000e+00> : vector<4x64xf32>
    %139 = tpu.matmul %138, %121, %cst_135 {dimension_numbers = #tpu.dot_dimension_numbers<[1], [0], [0], [1], [0, 0, 1, 1], [], []>, precision = #tpu.contract_precision<fp32>} : vector<4x8xf32>, vector<8x64xf32>, vector<4x64xf32> -> vector<4x64xf32>
    %c2_136 = arith.constant 2 : index
    %c0_137 = arith.constant 0 : index
    %c0_138 = arith.constant 0 : index
    %140 = vector.load %arg14[%c2_136, %c0_137, %c0_138] : memref<3x64x32xf32, #tpu.memory_space<vmem>>, vector<1x64x32xf32>
    %141 = vector.shape_cast %140 : vector<1x64x32xf32> to vector<64x32xf32>
    %cst_139 = arith.constant dense<0.000000e+00> : vector<4x32xf32>
    %142 = tpu.matmul %139, %141, %cst_139 {dimension_numbers = #tpu.dot_dimension_numbers<[1], [0], [0], [1], [0, 0, 1, 1], [], []>, precision = #tpu.contract_precision<fp32>} : vector<4x64xf32>, vector<64x32xf32>, vector<4x32xf32> -> vector<4x32xf32>
    %143 = arith.addf %136, %142 : vector<4x32xf32>
    %c0_140 = arith.constant 0 : index
    %c0_141 = arith.constant 0 : index
    %144 = vector.load %arg16[%c0_140, %c0_141] : memref<1x32xf32, #tpu.memory_space<vmem>>, vector<1x32xf32>
    %145 = vector.broadcast %144 : vector<1x32xf32> to vector<4x32xf32>
    %146 = arith.addf %143, %145 : vector<4x32xf32>
    %147 = vector.shape_cast %146 : vector<4x32xf32> to vector<1x4x32xf32>
    %c0_142 = arith.constant 0 : index
    %c0_143 = arith.constant 0 : index
    %c0_144 = arith.constant 0 : index
    %148 = vector.load %arg17[%c0_142, %c0_143, %c0_144] : memref<1x4x32xf32, #tpu.memory_space<vmem>>, vector<1x4x32xf32>
    tpu.vector_store %arg17[%c0_142, %c0_143, %c0_144], %147 {strides = array<i32>} : memref<1x4x32xf32, #tpu.memory_space<vmem>>, vector<1x4x32xf32>,
    return
  }
  func.func @transform_0(%arg0: i32) -> (i32, i32, i32) {
    %c0_i32 = arith.constant 0 : i32
    %c0_i32_0 = arith.constant 0 : i32
    %c0_i32_1 = arith.constant 0 : i32
    return %arg0, %c0_i32, %c0_i32_0 : i32, i32, i32
  }
  func.func @transform_1(%arg0: i32) -> (i32, i32, i32) {
    %c0_i32 = arith.constant 0 : i32
    %c0_i32_0 = arith.constant 0 : i32
    %c0_i32_1 = arith.constant 0 : i32
    %c0_i32_2 = arith.constant 0 : i32
    return %c0_i32, %c0_i32_0, %c0_i32_1 : i32, i32, i32
  }
  func.func @transform_2(%arg0: i32) -> (i32, i32, i32) {
    %c0_i32 = arith.constant 0 : i32
    %c0_i32_0 = arith.constant 0 : i32
    %c0_i32_1 = arith.constant 0 : i32
    %c0_i32_2 = arith.constant 0 : i32
    return %c0_i32, %c0_i32_0, %c0_i32_1 : i32, i32, i32
  }
  func.func @transform_3(%arg0: i32) -> (i32, i32) {
    %c0_i32 = arith.constant 0 : i32
    %c0_i32_0 = arith.constant 0 : i32
    %c0_i32_1 = arith.constant 0 : i32
    return %c0_i32, %c0_i32_0 : i32, i32
  }
  func.func @transform_4(%arg0: i32) -> (i32, i32, i32) {
    %c0_i32 = arith.constant 0 : i32
    %c0_i32_0 = arith.constant 0 : i32
    %c0_i32_1 = arith.constant 0 : i32
    %c0_i32_2 = arith.constant 0 : i32
    return %c0_i32, %c0_i32_0, %c0_i32_1 : i32, i32, i32
  }
  func.func @transform_5(%arg0: i32) -> (i32, i32, i32) {
    %c0_i32 = arith.constant 0 : i32
    %c0_i32_0 = arith.constant 0 : i32
    %c0_i32_1 = arith.constant 0 : i32
    %c0_i32_2 = arith.constant 0 : i32
    return %c0_i32, %c0_i32_0, %c0_i32_1 : i32, i32, i32
  }
  func.func @transform_6(%arg0: i32) -> (i32, i32) {
    %c0_i32 = arith.constant 0 : i32
    %c0_i32_0 = arith.constant 0 : i32
    %c0_i32_1 = arith.constant 0 : i32
    return %c0_i32, %c0_i32_0 : i32, i32
  }
  func.func @transform_7(%arg0: i32) -> (i32, i32, i32) {
    %c0_i32 = arith.constant 0 : i32
    %c0_i32_0 = arith.constant 0 : i32
    %c0_i32_1 = arith.constant 0 : i32
    %c0_i32_2 = arith.constant 0 : i32
    return %c0_i32, %c0_i32_0, %c0_i32_1 : i32, i32, i32
  }
  func.func @transform_8(%arg0: i32) -> (i32, i32, i32) {
    %c0_i32 = arith.constant 0 : i32
    %c0_i32_0 = arith.constant 0 : i32
    %c0_i32_1 = arith.constant 0 : i32
    %c0_i32_2 = arith.constant 0 : i32
    return %c0_i32, %c0_i32_0, %c0_i32_1 : i32, i32, i32
  }
  func.func @transform_9(%arg0: i32) -> (i32, i32) {
    %c0_i32 = arith.constant 0 : i32
    %c0_i32_0 = arith.constant 0 : i32
    %c0_i32_1 = arith.constant 0 : i32
    return %c0_i32, %c0_i32_0 : i32, i32
  }
  func.func @transform_10(%arg0: i32) -> (i32, i32, i32) {
    %c0_i32 = arith.constant 0 : i32
    %c0_i32_0 = arith.constant 0 : i32
    %c0_i32_1 = arith.constant 0 : i32
    %c0_i32_2 = arith.constant 0 : i32
    return %c0_i32, %c0_i32_0, %c0_i32_1 : i32, i32, i32
  }
  func.func @transform_11(%arg0: i32) -> (i32, i32, i32) {
    %c0_i32 = arith.constant 0 : i32
    %c0_i32_0 = arith.constant 0 : i32
    %c0_i32_1 = arith.constant 0 : i32
    %c0_i32_2 = arith.constant 0 : i32
    return %c0_i32, %c0_i32_0, %c0_i32_1 : i32, i32, i32
  }
  func.func @transform_12(%arg0: i32) -> (i32, i32) {
    %c0_i32 = arith.constant 0 : i32
    %c0_i32_0 = arith.constant 0 : i32
    %c0_i32_1 = arith.constant 0 : i32
    return %c0_i32, %c0_i32_0 : i32, i32
  }
  func.func @transform_13(%arg0: i32) -> (i32, i32, i32) {
    %c0_i32 = arith.constant 0 : i32
    %c0_i32_0 = arith.constant 0 : i32
    %c0_i32_1 = arith.constant 0 : i32
    %c0_i32_2 = arith.constant 0 : i32
    return %c0_i32, %c0_i32_0, %c0_i32_1 : i32, i32, i32
  }
  func.func @transform_14(%arg0: i32) -> (i32, i32, i32) {
    %c0_i32 = arith.constant 0 : i32
    %c0_i32_0 = arith.constant 0 : i32
    %c0_i32_1 = arith.constant 0 : i32
    %c0_i32_2 = arith.constant 0 : i32
    return %c0_i32, %c0_i32_0, %c0_i32_1 : i32, i32, i32
  }
  func.func @transform_15(%arg0: i32) -> (i32, i32) {
    %c0_i32 = arith.constant 0 : i32
    %c0_i32_0 = arith.constant 0 : i32
    %c0_i32_1 = arith.constant 0 : i32
    return %c0_i32, %c0_i32_0 : i32, i32
  }
  func.func @transform_16(%arg0: i32) -> (i32, i32, i32) {
    %c0_i32 = arith.constant 0 : i32
    %c0_i32_0 = arith.constant 0 : i32
    %c0_i32_1 = arith.constant 0 : i32
    return %arg0, %c0_i32, %c0_i32_0 : i32, i32, i32
  }
}

</mosaic_0001>

<bundles_post_ra>
// kernel: tpu_custom_call.1
= control target key start
LH: loop header
LB: loop body
LE: loop exit
PB: predicated region body
PF: predicated region fallthrough
CT: control target
= control target key end

     0   :  { %s29804_s0 = inlined_call_operand.hbm [shape: f32[2,16,128], index: 0, kind: input, shape index: {}]   ;;  %s29805_s1 = inlined_call_operand.vmem [shape: f32[3,128,128], index: 1, kind: input, shape index: {}]   ;;  %s29806_s2 = inlined_call_operand.vmem [shape: f32[3,16,16], index: 2, kind: input, shape index: {}]   ;;  %s29807_s3 = inlined_call_operand.vmem [shape: f32[1,128], index: 3, kind: input, shape index: {}]   ;;  %s29808_s4 = inlined_call_operand.vmem [shape: f32[3,128,128], index: 4, kind: input, shape index: {}]   ;;  %s29809_s5 = inlined_call_operand.vmem [shape: f32[3,16,16], index: 5, kind: input, shape index: {}]   ;;  %s29810_s6 = inlined_call_operand.vmem [shape: f32[1,128], index: 6, kind: input, shape index: {}]   ;;  %s29811_s7 = inlined_call_operand.vmem [shape: f32[3,128,64], index: 7, kind: input, shape index: {}]   ;;  %s29812_s8 = inlined_call_operand.hbm [shape: f32[3,8,16], index: 8, kind: input, shape index: {}]   ;;  %s29813_s9 = inlined_call_operand.vmem [shape: f32[1,64], index: 9, kind: input, shape index: {}]   ;;  %s29814_s10 = inlined_call_operand.hbm [shape: f32[3,64,64], index: 10, kind: input, shape index: {}]   ;;  %s29815_s11 = inlined_call_operand.vmem [shape: f32[3,8,8], index: 11, kind: input, shape index: {}]   ;;  %s29816_s12 = inlined_call_operand.vmem [shape: f32[1,64], index: 12, kind: input, shape index: {}]   ;;  %s29817_s13 = inlined_call_operand.vmem [shape: f32[3,64,32], index: 13, kind: input, shape index: {}]   ;;  %s29818_s14 = inlined_call_operand.vmem [shape: f32[3,4,8], index: 14, kind: input, shape index: {}]   ;;  %s29819_s15 = inlined_call_operand.vmem [shape: f32[1,32], index: 15, kind: input, shape index: {}]   ;;  %s29820_s16 = inlined_call_operand.hbm [shape: f32[2,4,32], index: 16, kind: output, shape index: {}]  }
   0x1   :  { %29865 = sst [smem:[#allocation14_spill]] %s29804_s0 }
   0x2   :  { %29866 = sst [smem:[#allocation15_spill]] %s29805_s1 }
   0x3   :  { %29867 = sst [smem:[#allocation16_spill]] %s29812_s8 }
   0x4   :  { %29868 = sst [smem:[#allocation17_spill]] %s29816_s12 }
   0x5   :  { %29869 = sst [smem:[#allocation18_spill]] %s29817_s13 }
   0x6   :  { %29870 = sst [smem:[#allocation19_spill]] %s29818_s14 }
   0x7   :  { %29871 = sst [smem:[#allocation20_spill]] %s29819_s15 }
   0x8   :  { %29872 = sst [smem:[#allocation21_spill]] %s29820_s16 }
   0x9   :  { %21 = vsyncpa [#allocation3], 0 }
   0xa   :  { %23 = vsyncpa [#allocation3 + $0x1], 0 }
   0xb   :  { %24 = vsyncpa [#allocation6], 0 }
   0xc   :  { %25 = vsyncpa [#allocation4], 0 }
   0xd   :  { %27 = vsyncpa [#allocation4 + $0x1], 0  ;;  %s24957_s21 = smov 0   ;;  %s24959_s22 = smov 0  }
   0xe   :  { %s24961_s23 = smov 0   ;;  %s24963_s24 = smov 0  }
   0xf LB: > { %29873 = sst [smem:[#allocation12_spill]] %s24849_s21  ;;  %s24978_s25 = sadd.s32 4294967295, %s24861_s24   ;;  %s24861_s24 = sphi %s24963_s24, %s29936_s24   ;;  %s24857_s23 = sphi %s24961_s23, %s29935_s23   ;;  %s24853_s22 = sphi %s24959_s22, %s29934_s22   ;;  %s24849_s21 = sphi %s24957_s21, %s29933_s21  }
  0x10   : > { %s17374_s26 = sadd.s32 4294967294, %s24861_s24   ;;  %p53_p0 = scmp.ne.s32.totalorder %s24853_s22, %s24849_s21 }
  0x11   : > { %p29825_p1 = scmp.eq.s32.totalorder %s24978_s25, 0  ;;  %p398_p3 = scmp.eq.s32.totalorder %s17374_s26, 1 }
  0x12   : > { %p17375_p5 = scmp.ge.s32.totalorder %s24861_s24, 1  ;;  %p405_p7 = scmp.lt.s32.totalorder %s24861_s24, 3 }
  0x13   : > { %p24987_p4 = por %p29825_p1, %p53_p0  ;;  %p24992_p6 = por %p398_p3, %p53_p0 }
  0x14   : > { %p24997_p8 = pnand %p17375_p5, %p405_p7  ;;  %s24863_s30 = smov [#allocation5]  }
  0x15   : > { %s29874_s27 = scalar_select %p24987_p4, 1, 0 }
  0x16   : > { %s29875_s28 = scalar_select %p24992_p6, 1, 0 }
  0x17   : > { %s438_s0 = sshll.u32 %s24863_s30, 4  ;;  %p24645_p9 = pneg %p24997_p8  ;;  %s25001_s0 = int_to_ptr.vmem [resolvable:$true] %s438_s0 }
  0x18   : > { %29876 = sst [smem:[#allocation13_spill]] %s29875_s28  ;;  %s24864_s18 = smov [#allocation7]  }
  0x19   : > { %p25008_p11 = pnand %p24645_p9, %p29825_p1  ;;  %s454_s19 = sshll.u32 %s24864_s18, 4  ;;  %s25012_s19 = int_to_ptr.vmem [resolvable:$true] %s454_s19 }
  0x1a   : > { %s29879_s8 = sld [smem:[#allocation16_spill]] }
  0x1b   : > { %p24707_p13 = pneg %p25008_p11 }
  0x20   : > { %s24705_s30 = scalar_lea.hbm %s29879_s8, 384 }
  0x21   : > { %p24706_p12 = scmp.ne.s32.totalorder %s29879_s8, %s24705_s30  ;;  %p24712_p5 = scmp.lt.u32.totalorder %s24705_s30, %s29879_s8 }
  0x23   : > { %p24708_p0 = pnand %p24707_p13, %p24706_p12 }
  0x25   : > { %p24709_p3 = pneg %p24708_p0 }
  0x27   : > { %p24714_p7 = pnand %p24712_p5, %p24709_p3 }
  0x29   : > { %24717 = shalt.err (!%p24714_p7)
}
  0x2a   : > { %s24718_s18 = scalar_lea.vmem %s25001_s0, 384  ;;  %p24726_p2 = scmp.lt.s32.totalorder %s25001_s0, %s25001_s0 }
  0x2b   : > { %p24719_p9 = scmp.ne.s32.totalorder %s25001_s0, %s24718_s18  ;;  %p24727_p12 = scmp.lt.s32.totalorder %s24718_s18, %s24718_s18 }
  0x2d   : > { %p24721_p10 = pnand %p24719_p9, %p24707_p13  ;;  %p24728_p0 = por %p24727_p12, %p24726_p2 }
  0x2f   : > { %p24722_p1 = pneg %p24721_p10 }
  0x31   : > { %p24729_p6 = pnand %p24728_p0, %p24722_p1 }
  0x33   : > { %24732 = shalt.err (!%p24729_p6)
}
  0x34   : > { %s29828_s15 = smov 128   ;;  %s29829_s16 = smov 8  }
  0x35   : > { %24648 = dma.hbm_to_vmem [thread:$0]  (!%p25008_p11), %s29879_s8, 384, %s25001_s0, [#allocation6], %s29828_s15, %s29828_s15, %s29829_s16  }
  0x36   : > { %s24733_s30 = scalar_lea.hbm %s29814_s10, 3072 }
  0x37   : > { %p24734_p1 = scmp.ne.s32.totalorder %s29814_s10, %s24733_s30  ;;  %p24740_p10 = scmp.lt.u32.totalorder %s24733_s30, %s29814_s10 }
  0x39   : > { %p24736_p2 = pnand %p24734_p1, %p24707_p13 }
  0x3b   : > { %p24737_p6 = pneg %p24736_p2 }
  0x3d   : > { %p24742_p3 = pnand %p24740_p10, %p24737_p6 }
  0x3f   : > { %24745 = shalt.err (!%p24742_p3)
}
  0x40   : > { %s24746_s0 = scalar_lea.vmem %s25012_s19, 3072  ;;  %p24754_p12 = scmp.lt.s32.totalorder %s25012_s19, %s25012_s19 }
  0x41   : > { %p24747_p5 = scmp.ne.s32.totalorder %s25012_s19, %s24746_s0  ;;  %p24755_p0 = scmp.lt.s32.totalorder %s24746_s0, %s24746_s0 }
  0x43   : > { %p24749_p7 = pnand %p24747_p5, %p24707_p13  ;;  %p24756_p1 = por %p24755_p0, %p24754_p12 }
  0x45   : > { %p24750_p9 = pneg %p24749_p7 }
  0x47   : > { %p24757_p2 = pnand %p24756_p1, %p24750_p9 }
  0x49   : > { %24760 = shalt.err (!%p24757_p2)
}
  0x4a   : > { %24651 = dma.hbm_to_vmem [thread:$0]  (!%p25008_p11), %s29814_s10, 3072, %s25012_s19, [#allocation6], %s29828_s15, %s29828_s15, %s29829_s16  }
  0x4b   : > { %s25073_s14 = sadd.s32 1, %s24861_s24   ;;  %s40_s17 = sadd.s32 1, %s24857_s23 }
  0x4c   : > { %s37_s21 = ssub.s32 %s24861_s24, %s25073_s14  ;;  %p47_p13 = scmp.ne.s32.totalorder %s24857_s23, %s24853_s22 }
  0x4d   : > { %p38_p6 = scmp.eq.s32.totalorder %s37_s21, 0  ;;  %p48_p10 = scmp.eq.s32.totalorder %s24861_s24, 0 }
  0x4e   : > { %p29880_p3 = scmp.eq.s32.totalorder %s24978_s25, 1  ;;  %p24662_p7 = scmp.lt.s32.totalorder %s24861_s24, 2 }
  0x4f   : > { %s25089_s20 = scalar_select %p38_p6, %s24857_s23, %s40_s17  }
  0x50   : > { %p25083_p5 = por %p29880_p3, %p47_p13  ;;  %p49_p9 = por %p48_p10, %p47_p13 }
  0x51   : > { %s483_s26 = sand.u32 1, %s24857_s23   ;;  %s17520_s19 = sshll.u32 %s24861_s24, 8 }
  0x52   : > { %s29881_s28 = scalar_select %p25083_p5, 1, 0 }
  0x53   : > { %s17379_s30 = sshll.u32 %s483_s26, 4  ;;  %s29882_s12 = sld [smem:[#allocation14_spill]] }
  0x54   : > { %s487_s21 = scalar_lea.vmem [#allocation2], %s17379_s30  ;;  %p25100_p11 = pnand %p24662_p7, %p49_p9 }
  0x55   : > { %s494_s15 = sshll.u32 %s487_s21, 4  ;;  %s25104_s16 = scalar_lea.sflag [#allocation3], %s483_s26  ;;  %s25098_s15 = int_to_ptr.vmem [resolvable:$true] %s494_s15 }
  0x56   : > { %p24763_p0 = pneg %p25100_p11 }
  0x59   : > { %s25096_s13 = scalar_lea.hbm %s29882_s12, %s17520_s19  ;;  %s24766_s18 = scalar_lea.hbm %s29882_s12, 512 }
  0x5a   : > { %s24761_s8 = scalar_lea.hbm %s25096_s13, 256  ;;  %p24767_p13 = scmp.lt.u32.totalorder %s25096_s13, %s29882_s12 }
  0x5b   : > { %p24762_p12 = scmp.ne.s32.totalorder %s25096_s13, %s24761_s8  ;;  %p24768_p6 = scmp.lt.u32.totalorder %s24766_s18, %s24761_s8 }
  0x5c   : > { %p24770_p3 = scmp.lt.u32.totalorder %s24761_s8, %s25096_s13 }
  0x5d   : > { %p24764_p1 = pnand %p24763_p0, %p24762_p12  ;;  %p24769_p10 = por %p24768_p6, %p24767_p13 }
  0x5f   : > { %p24765_p2 = pneg %p24764_p1  ;;  %p24771_p7 = por %p24770_p3, %p24769_p10 }
  0x61   : > { %p24772_p9 = pnand %p24771_p7, %p24765_p2 }
  0x63   : > { %24775 = shalt.err (!%p24772_p9)
}
  0x64   : > { %s24776_s26 = scalar_lea.vmem %s25098_s15, 256  ;;  %s24867_s30 = smov [#allocation2]  }
  0x65   : > { %p24777_p12 = scmp.ne.s32.totalorder %s25098_s15, %s24776_s26  ;;  %s24781_s19 = sshll.u32 %s24867_s30, 4  ;;  %s24782_s19 = int_to_ptr.vmem [resolvable:$false] %s24781_s19 }
  0x66   : > { %s24783_s0 = scalar_lea.vmem %s24782_s19, 512  ;;  %p24784_p4 = scmp.lt.s32.totalorder %s25098_s15, %s24782_s19 }
  0x67   : > { %p24779_p1 = pnand %p24777_p12, %p24763_p0  ;;  %p24785_p13 = scmp.lt.s32.totalorder %s24783_s0, %s24776_s26 }
  0x69   : > { %p24780_p5 = pneg %p24779_p1  ;;  %p24786_p6 = por %p24785_p13, %p24784_p4 }
  0x6b   : > { %p24787_p10 = pnand %p24786_p6, %p24780_p5 }
  0x6d   : > { %24790 = shalt.err (!%p24787_p10)
}
  0x6e   : > { %s29884_s8 = smov 8   ;;  %s29885_s18 = smov 128  }
  0x6f   : > { %24655 = dma.hbm_to_vmem [thread:$0]  (!%p25100_p11), %s25096_s13, 256, %s25098_s15, %s25104_s16, %s29885_s18, %s29885_s18, %s29884_s8  }
  0x70   : > { %506 = sbr.rel (%p24997_p8) target bundleno = 5220 (0x1464), region = 84  ;;  %s25138_s21 = sand.u32 (!%p24997_p8), 1, %s24853_s22  }
  0x71   : > { %s17383_s26 = sshll.u32 (!%p24997_p8), %s25138_s21, 4  ;;  %s509_s30 = scalar_lea.sflag (!%p24997_p8), [#allocation3], %s25138_s21 }
  0x72   : > { %s512_s19 = scalar_lea.vmem (!%p24997_p8), [#allocation2], %s17383_s26  ;;  %p29886_p4 = scmp.ne.s32.totalorder (!%p24997_p8), %s29874_s27, 0 }
  0x77   : > { %24836 = dma.done.wait (%p29886_p4), %s509_s30, 256  }
  0x78   : > { %24838 = vsyncadd (%p29886_p4), %s509_s30, 4294967040  ;;  %p29887_p5 = scmp.eq.s32.totalorder %s24978_s25, 0 }
  0x7a   : > { %24840 = dma.done.wait (%p29887_p5), [#allocation6], 3456   ;;  %p29888_p11 = pmov %p29887_p5 }
  0x7b   : > { %vm573_vm0 = vcmask 130048   ;;  %v569_v0 = vld [vmem:[%s512_s19] sm:$0xff]  ;;  %v570_v1 = vld [vmem:[%s512_s19 + $0x8] sm:$0xff]  ;;  %s29889_s1 = sld [smem:[#allocation15_spill]]  ;;  %vm24869_vm3 = vmmov 0   ;;  %vm11251_vm6 = vcmask 64512  }
  0x7c   : > { %24842 = vsyncadd (%p29888_p11), [#allocation6], 4294963840  ;;  %v571_v2 = vld [vmem:[%s29806_s2] sm:$0xff]  ;;  %v581_v3 = vand.u32 4294901760, %v569_v0  ;;  %v584_v4 = vand.u32 4294901760, %v570_v1  ;;  %v572_v6 = vld [vmem:[%s29806_s2 + $0x8] sm:$0xff] }
  0x7d   : > { %v575_v5 = vsel %vm573_vm0, %v571_v2, 0  ;;  %v17387_v7 = vld [vmem:[%s29806_s2 + $0x10] sm:$0xff]  ;;  %v578_v9 = vsel %vm573_vm0, %v572_v6, 0  ;;  %v17388_v24 = vld [vmem:[%s29806_s2 + $0x18] sm:$0xff]  ;;  %vm12169_vm8 = vcmask 523264   ;;  %s29923_s16 = sld [smem:[#allocation19_spill]] }
  0x7e   : > { %v25160_v8 = vand.u32 4294901760, %v575_v5  ;;  %v1102_v10 = vsel %vm573_vm0, %v17387_v7, 0  ;;  %v25164_v11 = vpack.c.bf16 %v584_v4, %v581_v3  ;;  %v25166_v12 = vand.u32 4294901760, %v578_v9  ;;  %s29924_s8 = sld [smem:[#allocation17_spill]]  ;;  %s29925_s30 = sld [smem:[#allocation18_spill]] }
  0x7f   : > { %v669_v13 = vsub.f32 %v569_v0, %v581_v3  ;;  %v676_v14 = vsub.f32 %v570_v1, %v584_v4  ;;  %v1174_v16 = vand.u32 4294901760, %v1102_v10  ;;  %v1105_v30 = vsel %vm573_vm0, %v17388_v24, 0  ;;  %s17386_s18 = sshll.u32 %s25138_s21, 2  ;;  %s29926_s29 = sld [smem:[#allocation20_spill]] }
  0x80   : > { %v648_v15 = vsub.f32 %v575_v5, %v25160_v8  ;;  %22202 = vmatprep.subr.bf16.mxu0 %v25164_v11  ;;  %v658_v17 = vsub.f32 %v578_v9, %v25166_v12  ;;  %v1184_v34 = vand.u32 4294901760, %v1105_v30  ;;  %s17517_s15 = sshll.u32 %s24978_s25, 6  ;;  %s568_s27 = scalar_lea.vmem [#allocation8], %s17386_s18  ;;  %vm17269_vm10 = vcmask 257024  }
  0x81   : > { %v670_v18 = vand.u32 4294901760, %v669_v13  ;;  %v677_v19 = vand.u32 4294901760, %v676_v14  ;;  %22204 = vmatpush3.bf16.msra.mxu0 %v25164_v11  ;;  %19122 = vmatprep.mubr.f32.mxu1 %v1174_v16  ;;  %v25178_v33 = vpack.c.bf16 %v676_v14, %v669_v13  ;;  %v1175_v35 = vsub.f32 %v1102_v10, %v1174_v16  ;;  %v17389_v40 = vld [vmem:[%s29889_s1 + $0x80] sm:$0xff]  ;;  %v17390_v41 = vld [vmem:[%s29889_s1 + $0x88] sm:$0xff]  ;;  %v25218_v45 = vld [vmem:[%s29889_s1 + $0x90] sm:$0xff]  ;;  %s17285_s13 = sshll.u32 %s568_s27, 4  ;;  %s29762_s13 = int_to_ptr.vmem [resolvable:$true] %s17285_s13 }
  0x82   : > { %v649_v20 = vand.u32 4294901760, %v648_v15  ;;  %v659_v21 = vand.u32 4294901760, %v658_v17  ;;  %v1185_v36 = vsub.f32 %v1105_v30, %v1184_v34  ;;  %v1627_v43 = vand.u32 4294901760, %v17389_v40  ;;  %v25223_v46 = vld [vmem:[%s29889_s1 + $0x98] sm:$0xff]  ;;  %v25234_v52 = vld [vmem:[%s29889_s1 + $0xa0] sm:$0xff]  ;;  %v25239_v53 = vld [vmem:[%s29889_s1 + $0xa8] sm:$0xff] }
  0x83   : > { %v671_v22 = vsub.f32 %v669_v13, %v670_v18  ;;  %v678_v23 = vsub.f32 %v676_v14, %v677_v19  ;;  %v1176_v37 = vand.u32 4294901760, %v1175_v35  ;;  %v25192_v38 = vpack.c.bf16 %v677_v19, %v670_v18  ;;  %v17395_v59 = vld [vmem:[%s29889_s1 + $0xb0] sm:$0xff]  ;;  %v17396_v60 = vld [vmem:[%s29889_s1 + $0xb8] sm:$0xff]  ;;  %v17397_v0 = vld [vmem:[%s29889_s1 + $0xc0] sm:$0xff]  ;;  %s17272_s26 = scalar_lea.sflag [#allocation4], %s25138_s21  ;;  %s24791_s19 = scalar_lea.vmem %s29762_s13, 64 }
  0x84   : > { %v650_v25 = vsub.f32 %v648_v15, %v649_v20  ;;  %v660_v26 = vsub.f32 %v658_v17, %v659_v21  ;;  %v1186_v39 = vand.u32 4294901760, %v1185_v36  ;;  %v1630_v44 = vand.u32 4294901760, %v17390_v41  ;;  %v17398_v1 = vld [vmem:[%s29889_s1 + $0xc8] sm:$0xff]  ;;  %v17399_v5 = vld [vmem:[%s29889_s1 + $0xd0] sm:$0xff]  ;;  %v17400_v6 = vld [vmem:[%s29889_s1 + $0xd8] sm:$0xff]  ;;  %p24792_p8 = scmp.ne.s32.totalorder %s29762_s13, %s24791_s19  ;;  %p29928_p0 = scmp.ne.s32.totalorder %s29881_s28, 0 }
  0x85   : > { %v672_v27 = vand.u32 4294901760, %v671_v22  ;;  %v679_v28 = vand.u32 4294901760, %v678_v23  ;;  %v1177_v42 = vsub.f32 %v1175_v35, %v1176_v37  ;;  %v1633_v50 = vand.u32 4294901760, %v25218_v45  ;;  %v17401_v10 = vld [vmem:[%s29889_s1 + $0xe0] sm:$0xff]  ;;  %v17403_v18 = vld [vmem:[%s29889_s1 + $0xf0] sm:$0xff]  ;;  %v17404_v19 = vld [vmem:[%s29889_s1 + $0xf8] sm:$0xff] }
  0x86   : > { %v651_v29 = vand.u32 4294901760, %v650_v25  ;;  %v661_v31 = vand.u32 4294901760, %v660_v26  ;;  %v1187_v47 = vsub.f32 %v1185_v36, %v1186_v39  ;;  %v25226_v49 = vpack.c.bf16 %v1630_v44, %v1627_v43  ;;  %p24793_p2 = pnand %p24792_p8, %p29928_p0  ;;  %s24871_s25 = smov [#allocation8]  }
  0x87   : > { %v25176_v32 = vpack.c.bf16 %v679_v28, %v672_v27  ;;  %v1178_v48 = vand.u32 4294901760, %v1177_v42  ;;  %v1636_v51 = vand.u32 4294901760, %v25223_v46  ;;  %v1639_v56 = vand.u32 4294901760, %v25234_v52  ;;  %s24795_s18 = sshll.u32 %s24871_s25, 4  ;;  %s24796_s18 = int_to_ptr.vmem [resolvable:$false] %s24795_s18 }
  0x88   : > { %19073 = vmatprep.mubr.f32.mxu0 %v651_v29  ;;  %v1188_v54 = vand.u32 4294901760, %v1187_v47  ;;  %v1642_v57 = vand.u32 4294901760, %v25239_v53  ;;  %v1645_v61 = vand.u32 4294901760, %v17395_v59  ;;  %v1648_v62 = vand.u32 4294901760, %v17396_v60  ;;  %p24794_p3 = pneg %p24793_p2  ;;  %p24798_p7 = scmp.lt.s32.totalorder %s29762_s13, %s24796_s18 }
  0x89   : > { %19074 = vmatmul.mubr.f32.vlgmr.msra.gmra.mrb[0].mxu0 %v661_v31  ;;  %22230 = vmatprep.subr.bf16.mxu1 %v25176_v32  ;;  %v25248_v55 = vpack.c.bf16 %v1636_v51, %v1633_v50  ;;  %v1651_v2 = vand.u32 4294901760, %v17397_v0  ;;  %v1654_v3 = vand.u32 4294901760, %v17398_v1  ;;  %v1657_v7 = vand.u32 4294901760, %v17399_v5 }
  0x8a   : > { %22232 = vmatpush3.bf16.msra.mxu1 %v25176_v32  ;;  %22206 = vmatprep.subr.bf16.mxu0 %v25176_v32  ;;  %v25258_v58 = vpack.c.bf16 %v1642_v57, %v1639_v56  ;;  %v25269_v63 = vpack.c.bf16 %v1648_v62, %v1645_v61  ;;  %v1663_v13 = vand.u32 4294901760, %v17401_v10  ;;  %v25328_v30 = vsub.f32 %v17395_v59, %v1645_v61 }
  0x8b   : > { %22208 = vmatpush3.bf16.msra.mxu0 %v25176_v32  ;;  %19080 = vmatprep.mubr.f32.mxu0 %v25160_v8  ;;  %v25279_v4 = vpack.c.bf16 %v1654_v3, %v1651_v2  ;;  %v25330_v31 = vsub.f32 %v17396_v60, %v1648_v62 }
  0x8c   : > { %22234 = vmatprep.subr.bf16.mxu1 %v25178_v33  ;;  %22210 = vmatprep.subr.bf16.mxu0 %v25178_v33 }
  0x8d   : > { %19123 = vmatmul.mubr.f32.vlgmr.msra.gmra.mrb[0].mxu1 %v1184_v34 }
  0x8e   : > { %22236 = vmatpush3.bf16.msra.mxu1 %v25178_v33  ;;  %19129 = vmatprep.mubr.f32.mxu1 %v1175_v35  ;;  %v29840_v35 = vand.u32 4294901760, %v25330_v31 }
  0x8f   : > { %22238 = vmatprep.subr.bf16.mxu1 %v25164_v11 }
  0x91   : > { %19081 = vmatmul.mubr.f32.vlgmr.msra.gmra.mrb[0].mxu0 %v25166_v12 }
  0x92   : > { %22212 = vmatpush3.bf16.msra.mxu0 %v25178_v33  ;;  %19087 = vmatprep.mubr.f32.mxu0 %v648_v15 }
  0x93   : > { %22214 = vmatprep.subr.bf16.mxu0 %v25164_v11 }
  0x95   : > { %19130 = vmatmul.mubr.f32.vlgmr.msra.gmra.mrb[0].mxu1 %v1185_v36 }
  0x96   : > { %22240 = vmatpush3.bf16.msra.mxu1 %v25164_v11  ;;  %19136 = vmatprep.mubr.f32.mxu1 %v1176_v37  ;;  %v25337_v37 = vsub.f32 %v17397_v0, %v1651_v2 }
  0x97   : > { %22242 = vmatprep.subr.bf16.mxu1 %v25192_v38 }
  0x98   : > { %v29839_v42 = vand.u32 4294901760, %v25337_v37 }
  0x99   : > { %19088 = vmatmul.mubr.f32.vlgmr.msra.gmra.mrb[0].mxu0 %v658_v17  ;;  %v25303_v17 = vsub.f32 %v17390_v41, %v1630_v44 }
  0x9a   : > { %22216 = vmatpush3.bf16.msra.mxu0 %v25164_v11  ;;  %19094 = vmatprep.mubr.f32.mxu0 %v649_v20  ;;  %v1669_v20 = vand.u32 4294901760, %v17403_v18  ;;  %v1787_v47 = vsub.f32 %v25337_v37, %v29839_v42 }
  0x9b   : > { %22218 = vmatprep.subr.bf16.mxu0 %v25192_v38  ;;  %v1737_v23 = vand.u32 4294901760, %v25303_v17 }
  0x9c   : > { %v1788_v61 = vand.u32 4294901760, %v1787_v47 }
  0x9d   : > { %19137 = vmatmul.mubr.f32.vlgmr.msra.gmra.mrb[0].mxu1 %v1186_v39  ;;  %v1738_v26 = vsub.f32 %v25303_v17, %v1737_v23  ;;  %v25339_v39 = vsub.f32 %v17398_v1, %v1654_v3 }
  0x9e   : > { %22244 = vmatpush3.bf16.msra.mxu1 %v25192_v38  ;;  %19143 = vmatprep.mubr.f32.mxu1 %v1174_v16 }
  0x9f   : > { %22246 = vmatprep.subr.bf16.mxu1 %v25164_v11  ;;  %v1739_v28 = vand.u32 4294901760, %v1738_v26 }
  0xa1   : > { %19095 = vmatmul.mubr.f32.vlgmr.msra.gmra.mrb[0].mxu0 %v659_v21  ;;  %v1672_v21 = vand.u32 4294901760, %v17404_v19 }
  0xa2   : > { %22220 = vmatpush3.bf16.msra.mxu0 %v25192_v38  ;;  %19101 = vmatprep.mubr.f32.mxu0 %v25160_v8 }
  0xa3   : > { %22222 = vmatprep.subr.bf16.mxu0 %v25164_v11  ;;  %v25315_v24 = vpack.c.bf16 %v1672_v21, %v1669_v20 }
  0xa5   : > { %19144 = vmatmul.mubr.f32.vlgmr.msra.gmra.mrb[0].mxu1 %v1184_v34 }
  0xa6   : > { %22248 = vmatpush3.bf16.msra.mxu1 %v25164_v11  ;;  %19150 = vmatprep.mubr.f32.mxu1 %v1174_v16  ;;  %v25301_v16 = vsub.f32 %v17389_v40, %v1627_v43  ;;  %v1780_v40 = vsub.f32 %v25330_v31, %v29840_v35  ;;  %v29838_v43 = vand.u32 4294901760, %v25339_v39 }
  0xa7   : > { %22634 = vmatprep.subr.bf16.mxu1 %v25164_v11 }
  0xa8   : > { %v1730_v22 = vand.u32 4294901760, %v25301_v16  ;;  %v1781_v44 = vand.u32 4294901760, %v1780_v40  ;;  %v25379_v40 = vsub.f32 %v17403_v18, %v1669_v20 }
  0xa9   : > { %19102 = vmatmul.mubr.f32.vlgmr.msra.gmra.mrb[0].mxu0 %v25166_v12 }
  0xaa   : > { %22224 = vmatpush3.bf16.msra.mxu0 %v25164_v11  ;;  %19108 = vmatprep.mubr.f32.mxu0 %v25160_v8  ;;  %v1660_v8 = vand.u32 4294901760, %v17400_v6  ;;  %v1731_v25 = vsub.f32 %v25301_v16, %v1730_v22 }
  0xab   : > { %22226 = vmatprep.subr.bf16.mxu0 %v25164_v11 }
  0xac   : > { %v25289_v9 = vpack.c.bf16 %v1660_v8, %v1657_v7  ;;  %v1732_v27 = vand.u32 4294901760, %v1731_v25  ;;  %v25354_v59 = vsub.f32 %v17400_v6, %v1660_v8  ;;  %v25368_v6 = vsub.f32 %v17401_v10, %v1663_v13 }
  0xad   : > { %19151 = vmatmul.mubr.f32.vlgmr.msra.gmra.mrb[0].mxu1 %v1184_v34  ;;  %v1772_v34 = vand.u32 4294901760, %v25328_v30 }
  0xae   : > { %22636 = vmatpush3.bf16.msra.mxu1 %v25164_v11  ;;  %v25325_v29 = vpack.c.bf16 %v1739_v28, %v1732_v27  ;;  %v29836_v1 = vand.u32 4294901760, %v25354_v59  ;;  %v29835_v26 = vand.u32 4294901760, %v25368_v6 }
  0xaf   : > { %22638 = vmatprep.subr.bf16.mxu1 %v25176_v32  ;;  %v1773_v36 = vsub.f32 %v25328_v30, %v1772_v34 }
  0xb1   : > { %19109 = vmatmul.mubr.f32.vlgmr.msra.gmra.mrb[0].mxu0 %v25166_v12  ;;  %v17402_v12 = vld [vmem:[%s29889_s1 + $0xe8] sm:$0xff]  ;;  %v1774_v41 = vand.u32 4294901760, %v1773_v36  ;;  %v1815_v36 = vsub.f32 %v25368_v6, %v29835_v26 }
  0xb2   : > { %22228 = vmatpush3.bf16.msra.mxu0 %v25164_v11  ;;  %19115 = vmatprep.mubr.f32.mxu0 %v1178_v48  ;;  %v1666_v14 = vand.u32 4294901760, %v17402_v12  ;;  %v1794_v48 = vsub.f32 %v25339_v39, %v29838_v43 }
  0xb3   : > { %22250 = vmatprep.subr.bf16.mxu0 %v25226_v49  ;;  %v25356_v60 = vpack.c.bf16 %v1781_v44, %v1774_v41  ;;  %v25381_v41 = vsub.f32 %v17404_v19, %v1672_v21 }
  0xb4   : > { %v25299_v15 = vpack.c.bf16 %v1666_v14, %v1663_v13  ;;  %v1795_v62 = vand.u32 4294901760, %v1794_v48  ;;  %v29833_v13 = vand.u32 4294901760, %v25379_v40 }
  0xb5   : > { %19116 = vmatmul.mubr.f32.vlgmr.msra.gmra.mrb[2].mxu0 %v1188_v54  ;;  %v25352_v54 = vsub.f32 %v17399_v5, %v1657_v7  ;;  %v1808_v5 = vsub.f32 %v25354_v59, %v29836_v1  ;;  %v25370_v7 = vsub.f32 %v17402_v12, %v1666_v14  ;;  %v1816_v12 = vand.u32 4294901760, %v1815_v36  ;;  %v17405_v36 = vld [vmem:[%s29806_s2 + $0x20] sm:$0xff] }
  0xb6   : > { %22252 = vmatpush3.bf16.msra.mxu0 %v25226_v49  ;;  %v25360_v2 = vpack.c.bf16 %v1795_v62, %v1788_v61  ;;  %v29832_v14 = vand.u32 4294901760, %v25381_v41  ;;  %v1829_v47 = vsub.f32 %v25379_v40, %v29833_v13  ;;  %v25400_v61 = vpack.c.bf16 %v25303_v17, %v25301_v16 }
  0xb7   : > { %22254 = vmatprep.subr.bf16.mxu0 %v25248_v55  ;;  %v29837_v0 = vand.u32 4294901760, %v25352_v54  ;;  %v1809_v25 = vand.u32 4294901760, %v1808_v5  ;;  %v29834_v27 = vand.u32 4294901760, %v25370_v7  ;;  %v25404_v62 = vpack.c.bf16 %v25330_v31, %v25328_v30 }
  0xb8   : > { %v1836_v18 = vsub.f32 %v25381_v41, %v29832_v14  ;;  %v1830_v20 = vand.u32 4294901760, %v1829_v47  ;;  %v25412_v5 = vpack.c.bf16 %v25354_v59, %v25352_v54  ;;  %v29890_v17 = vand.u32 4294901760, %v25330_v31 }
  0xb9   : > { %v1801_v3 = vsub.f32 %v25352_v54, %v29837_v0  ;;  %v1822_v10 = vsub.f32 %v25370_v7, %v29834_v27  ;;  %v29895_v30 = vand.u32 4294901760, %v25368_v6  ;;  %v29896_v31 = vand.u32 4294901760, %v25370_v7 }
  0xba   : > { %22256 = vmatpush3.bf16.msra.mxu0 %v25248_v55  ;;  %v1837_v21 = vand.u32 4294901760, %v1836_v18 }
  0xbb   : > { %22258 = vmatprep.subr.bf16.mxu0 %v25258_v58  ;;  %v1802_v8 = vand.u32 4294901760, %v1801_v3  ;;  %v1823_v44 = vand.u32 4294901760, %v1822_v10  ;;  %v25408_v3 = vpack.c.bf16 %v25339_v39, %v25337_v37  ;;  %v2998_v10 = vsel %vm573_vm0, %v17405_v36, 0 }
  0xbc   : > { %v25396_v48 = vpack.c.bf16 %v1837_v21, %v1830_v20 }
  0xbd   : > { %v25374_v28 = vpack.c.bf16 %v1809_v25, %v1802_v8  ;;  %v25394_v19 = vpack.c.bf16 %v1823_v44, %v1816_v12  ;;  %v25416_v8 = vpack.c.bf16 %v25370_v7, %v25368_v6  ;;  %v25420_v25 = vpack.c.bf16 %v25381_v41, %v25379_v40  ;;  %v17406_v12 = vld [vmem:[%s29806_s2 + $0x28] sm:$0xff]  ;;  %v1084_v6 = vld [vmem:[%s29889_s1 + $0x10] sm:$0xff]  ;;  %v1085_v7 = vld [vmem:[%s29889_s1 + $0x18] sm:$0xff] }
  0xbe   : > { %22260 = vmatpush3.bf16.msra.mxu0 %v25258_v58  ;;  %v3070_v44 = vand.u32 4294901760, %v2998_v10  ;;  %v3001_v47 = vsel %vm573_vm0, %v17406_v12, 0 }
  0xbf   : > { %22262 = vmatprep.subr.bf16.mxu0 %v25269_v63  ;;  %v3080_v18 = vand.u32 4294901760, %v3001_v47 }
  0xc0   : > { %v3071_v20 = vsub.f32 %v2998_v10, %v3070_v44 }
  0xc1   : > { %v3081_v21 = vsub.f32 %v3001_v47, %v3080_v18 }
  0xc2   : > { %22264 = vmatpush3.bf16.msra.mxu0 %v25269_v63  ;;  %v3072_v14 = vand.u32 4294901760, %v3071_v20 }
  0xc3   : > { %22266 = vmatprep.subr.bf16.mxu0 %v25279_v4  ;;  %v3082_v13 = vand.u32 4294901760, %v3081_v21 }
  0xc4   : > { %v3073_v27 = vsub.f32 %v3071_v20, %v3072_v14 }
  0xc5   : > { %v3083_v26 = vsub.f32 %v3081_v21, %v3082_v13 }
  0xc6   : > { %22268 = vmatpush3.bf16.msra.mxu0 %v25279_v4  ;;  %v3074_v1 = vand.u32 4294901760, %v3073_v27 }
  0xc7   : > { %22270 = vmatprep.subr.bf16.mxu0 %v25289_v9  ;;  %v3084_v0 = vand.u32 4294901760, %v3083_v26 }
  0xc8   : > { %19577 = vmatprep.mubr.f32.mxu1 %v3074_v1 }
  0xc9   : > { %19578 = vmatmul.mubr.f32.vlgmr.msra.gmra.mrb[2].mxu1 %v3084_v0 }
  0xca   : > { %22272 = vmatpush3.bf16.msra.mxu0 %v25289_v9  ;;  %22640 = vmatpush3.bf16.msra.mxu1 %v25176_v32 }
  0xcb   : > { %22274 = vmatprep.subr.bf16.mxu0 %v25299_v15  ;;  %19584 = vmatprep.mubr.f32.mxu1 %v3070_v44 }
  0xcc   : > { %22642 = vmatprep.subr.bf16.mxu1 %v25178_v33 }
  0xce   : > { %22276 = vmatpush3.bf16.msra.mxu0 %v25299_v15 }
  0xcf   : > { %22278 = vmatprep.subr.bf16.mxu0 %v25315_v24 }
  0xd1   : > { %19585 = vmatmul.mubr.f32.vlgmr.msra.gmra.mrb[2].mxu1 %v3080_v18 }
  0xd2   : > { %22280 = vmatpush3.bf16.msra.mxu0 %v25315_v24  ;;  %22644 = vmatpush3.bf16.msra.mxu1 %v25178_v33  ;;  %v25443_v33 = vsub.f32 %v25218_v45, %v1633_v50  ;;  %v25458_v45 = vsub.f32 %v25234_v52, %v1639_v56 }
  0xd3   : > { %22282 = vmatprep.subr.bf16.mxu0 %v25325_v29  ;;  %19591 = vmatprep.mubr.f32.mxu1 %v3071_v20 }
  0xd4   : > { %22646 = vmatprep.subr.bf16.mxu1 %v25164_v11 }
  0xd9   : > { %19592 = vmatmul.mubr.f32.vlgmr.msra.gmra.mrb[2].mxu1 %v3081_v21 }
  0xda   : > { %22648 = vmatpush3.bf16.msra.mxu1 %v25164_v11  ;;  %19598 = vmatprep.mubr.f32.mxu1 %v3072_v14 }
  0xdb   : > { %22650 = vmatprep.subr.bf16.mxu1 %v25192_v38 }
  0xe1   : > { %19599 = vmatmul.mubr.f32.vlgmr.msra.gmra.mrb[2].mxu1 %v3082_v13  ;;  %v1744_v13 = vand.u32 4294901760, %v25443_v33 }
  0xe2   : > { %22652 = vmatpush3.bf16.msra.mxu1 %v25192_v38  ;;  %19605 = vmatprep.mubr.f32.mxu1 %v3070_v44  ;;  %v25451_v38 = vsub.f32 %v25223_v46, %v1636_v51 }
  0xe3   : > { %22654 = vmatprep.subr.bf16.mxu1 %v25164_v11  ;;  %v1745_v12 = vsub.f32 %v25443_v33, %v1744_v13 }
  0xe4   : > { %v1751_v10 = vand.u32 4294901760, %v25451_v38 }
  0xe5   : > { %v1746_v20 = vand.u32 4294901760, %v1745_v12 }
  0xe6   : > { %v1752_v52 = vsub.f32 %v25451_v38, %v1751_v10 }
  0xe9   : > { %19606 = vmatmul.mubr.f32.vlgmr.msra.gmra.mrb[2].mxu1 %v3080_v18 }
  0xea   : > { %22656 = vmatpush3.bf16.msra.mxu1 %v25164_v11  ;;  %19612 = vmatprep.mubr.f32.mxu1 %v3070_v44  ;;  %v25463_v11 = vsub.f32 %v25239_v53, %v1642_v57  ;;  %v1758_v53 = vand.u32 4294901760, %v25458_v45 }
  0xec   : > { %v1765_v56 = vand.u32 4294901760, %v25463_v11 }
  0xee   : > { %v22385_v16 = vpack.c.bf16 %v1765_v56, %v1758_v53 }
  0xf1   : > { %19613 = vmatmul.mubr.f32.vlgmr.msra.gmra.mrb[2].mxu1 %v3080_v18 }
 0x180   : > { %v19152_v32 = vpop.f32.mrb[0].mxu1 }
 0x181   : > { %v1599_v0 = vpop.f32.mrb[1].mxu1 }
 0x184   : > { %v25438_v1 = vpop.f32.mrb[0].mxu0 }
 0x185   : > { %v25446_v26 = vpop.f32.mrb[1].mxu0 }
 0x188   : > { %v19117_v27 = vpop.f32.mrb[2].mxu0 }
 0x189   : > { %v24415_v14 = vadd.f32 %v19152_v32, %v19117_v27  ;;  %v1180_v36 = vpop.f32.mrb[3].mxu0  ;;  %v1753_v32 = vand.u32 4294901760, %v1752_v52  ;;  %v1766_v27 = vsub.f32 %v25463_v11, %v1765_v56  ;;  %v25648_v52 = vld [vmem:[%s29889_s1 + $0x50] sm:$0xff]  ;;  %v25659_v56 = vld [vmem:[%s29889_s1 + $0x60] sm:$0xff] }
 0x18a   : > { %v24416_v50 = vadd.f32 %v1599_v0, %v1180_v36  ;;  %v1759_v0 = vsub.f32 %v25458_v45, %v1758_v53  ;;  %v25653_v53 = vld [vmem:[%s29889_s1 + $0x58] sm:$0xff] }
 0x18b   : > { %v25465_v46 = vand.u32 4294901760, %v24415_v14  ;;  %v22285_v43 = vpack.c.bf16 %v1753_v32, %v1746_v20  ;;  %v1767_v35 = vand.u32 4294901760, %v1766_v27  ;;  %v2344_v32 = vand.u32 4294901760, %v25653_v53 }
 0x18c   : > { %v25467_v51 = vand.u32 4294901760, %v24416_v50  ;;  %v1760_v42 = vand.u32 4294901760, %v1759_v0  ;;  %v25676_v0 = vand.u32 4294901760, %v25438_v1  ;;  %v2347_v27 = vand.u32 4294901760, %v25659_v56 }
 0x18d   : > { %v25473_v44 = vsub.f32 %v24415_v14, %v25465_v46 }
 0x18e   : > { %v1708_v57 = vsub.f32 %v24416_v50, %v25467_v51  ;;  %v22289_v12 = vpack.c.bf16 %v1767_v35, %v1760_v42  ;;  %v22321_v35 = vpack.c.bf16 %v25463_v11, %v25458_v45  ;;  %v22377_v42 = vpack.c.bf16 %v1737_v23, %v1730_v22  ;;  %v1090_v45 = vld [vmem:[%s29889_s1 + $0x40] sm:$0xff]  ;;  %v1091_v11 = vld [vmem:[%s29889_s1 + $0x48] sm:$0xff] }
 0x18f   : > { %v1719_v47 = vand.u32 4294901760, %v25473_v44  ;;  %v22389_v22 = vpack.c.bf16 %v29890_v17, %v1772_v34  ;;  %v29891_v23 = vand.u32 4294901760, %v25337_v37  ;;  %v22401_v34 = vpack.c.bf16 %v29896_v31, %v29895_v30 }
 0x190   : > { %v1709_v18 = vand.u32 4294901760, %v1708_v57  ;;  %v29897_v37 = vand.u32 4294901760, %v25379_v40 }
 0x191   : > { %v1720_v21 = vsub.f32 %v25473_v44, %v1719_v47 }
 0x192   : > { %v1710_v14 = vsub.f32 %v1708_v57, %v1709_v18 }
 0x193   : > { %v1721_v50 = vand.u32 4294901760, %v1720_v21  ;;  %v2341_v21 = vand.u32 4294901760, %v25648_v52 }
 0x194   : > { %v1711_v36 = vand.u32 4294901760, %v1710_v14 }
 0x196   : > { %19185 = vmatprep.mubr.f32.mxu0 %v1711_v36 }
 0x197   : > { %19186 = vmatmul.mubr.f32.vlgmr.msra.gmra.mrb[4].mxu0 %v1721_v50 }
 0x198   : > { %22284 = vmatpush3.bf16.msra.mxu0 %v25325_v29  ;;  %19220 = vmatprep.mubr.f32.mxu0 %v25467_v51  ;;  %v22317_v29 = vpack.c.bf16 %v25451_v38, %v25443_v33  ;;  %v1089_v38 = vld [vmem:[%s29889_s1 + $0x38] sm:$0xff] }
 0x199   : > { %22286 = vmatprep.subr.bf16.mxu0 %v22285_v43 }
 0x19c   : > { %22288 = vmatpush3.bf16.msra.mxu0 %v22285_v43  ;;  %v22381_v43 = vpack.c.bf16 %v1751_v10, %v1744_v13  ;;  %v2332_v10 = vand.u32 4294901760, %v1089_v38 }
 0x19d   : > { %22290 = vmatprep.subr.bf16.mxu0 %v22289_v12 }
 0x19e   : > { %v25728_v31 = vsub.f32 %v1089_v38, %v2332_v10 }
 0x1a0   : > { %22292 = vmatpush3.bf16.msra.mxu0 %v22289_v12  ;;  %v25684_v12 = vpack.c.bf16 %v2344_v32, %v2341_v21 }
 0x1a1   : > { %22294 = vmatprep.subr.bf16.mxu0 %v25356_v60 }
 0x1a4   : > { %22296 = vmatpush3.bf16.msra.mxu0 %v25356_v60  ;;  %v29892_v60 = vand.u32 4294901760, %v25339_v39  ;;  %v29898_v39 = vand.u32 4294901760, %v25381_v41  ;;  %v2320_v41 = vand.u32 4294901760, %v1085_v7 }
 0x1a5   : > { %22298 = vmatprep.subr.bf16.mxu0 %v25360_v2 }
 0x1a8   : > { %22300 = vmatpush3.bf16.msra.mxu0 %v25360_v2  ;;  %v22393_v2 = vpack.c.bf16 %v29892_v60, %v29891_v23 }
 0x1a9   : > { %22302 = vmatprep.subr.bf16.mxu0 %v25374_v28 }
 0x1ac   : > { %22304 = vmatpush3.bf16.msra.mxu0 %v25374_v28  ;;  %v29893_v28 = vand.u32 4294901760, %v25352_v54  ;;  %v25584_v54 = vand.u32 4294901760, %v25446_v26 }
 0x1ad   : > { %22306 = vmatprep.subr.bf16.mxu0 %v25394_v19 }
 0x1b0   : > { %22308 = vmatpush3.bf16.msra.mxu0 %v25394_v19  ;;  %v29894_v19 = vand.u32 4294901760, %v25354_v59 }
 0x1b1   : > { %22310 = vmatprep.subr.bf16.mxu0 %v25396_v48 }
 0x1b4   : > { %22312 = vmatpush3.bf16.msra.mxu0 %v25396_v48  ;;  %v22397_v48 = vpack.c.bf16 %v29894_v19, %v29893_v28 }
 0x1b5   : > { %22314 = vmatprep.subr.bf16.mxu0 %v25400_v61 }
 0x1b7   : > { %19221 = vmatmul.mubr.f32.vlgmr.msra.gmra.mrb[4].mxu0 %v25465_v46 }
 0x1b8   : > { %22316 = vmatpush3.bf16.msra.mxu0 %v25400_v61  ;;  %19255 = vmatprep.mubr.f32.mxu0 %v1708_v57  ;;  %v22405_v61 = vpack.c.bf16 %v29898_v39, %v29897_v37  ;;  %v25664_v57 = vld [vmem:[%s29889_s1 + $0x68] sm:$0xff] }
 0x1b9   : > { %22318 = vmatprep.subr.bf16.mxu0 %v22317_v29  ;;  %v2350_v14 = vand.u32 4294901760, %v25664_v57 }
 0x1bb   : > { %v25708_v17 = vpack.c.bf16 %v2350_v14, %v2347_v27 }
 0x1bc   : > { %22320 = vmatpush3.bf16.msra.mxu0 %v22317_v29  ;;  %v25689_v29 = vld [vmem:[%s29889_s1 + $0x70] sm:$0xff] }
 0x1bd   : > { %22322 = vmatprep.subr.bf16.mxu0 %v22321_v35 }
 0x1c0   : > { %22324 = vmatpush3.bf16.msra.mxu0 %v22321_v35  ;;  %v25694_v35 = vld [vmem:[%s29889_s1 + $0x78] sm:$0xff] }
 0x1c1   : > { %22326 = vmatprep.subr.bf16.mxu0 %v25404_v62  ;;  %v2356_v23 = vand.u32 4294901760, %v25694_v35 }
 0x1c4   : > { %22328 = vmatpush3.bf16.msra.mxu0 %v25404_v62 }
 0x1c5   : > { %22330 = vmatprep.subr.bf16.mxu0 %v25408_v3 }
 0x1c8   : > { %22332 = vmatpush3.bf16.msra.mxu0 %v25408_v3  ;;  %v1086_v3 = vld [vmem:[%s29889_s1 + $0x20] sm:$0xff] }
 0x1c9   : > { %22334 = vmatprep.subr.bf16.mxu0 %v25412_v5 }
 0x1cc   : > { %22336 = vmatpush3.bf16.msra.mxu0 %v25412_v5  ;;  %v1087_v5 = vld [vmem:[%s29889_s1 + $0x28] sm:$0xff] }
 0x1cd   : > { %22338 = vmatprep.subr.bf16.mxu0 %v25416_v8 }
 0x1d0   : > { %22340 = vmatpush3.bf16.msra.mxu0 %v25416_v8  ;;  %v2323_v8 = vand.u32 4294901760, %v1086_v3 }
 0x1d1   : > { %22342 = vmatprep.subr.bf16.mxu0 %v25420_v25 }
 0x1d2   : > { %v25722_v19 = vsub.f32 %v1086_v3, %v2323_v8 }
 0x1d4   : > { %22344 = vmatpush3.bf16.msra.mxu0 %v25420_v25  ;;  %v2326_v25 = vand.u32 4294901760, %v1087_v5 }
 0x1d5   : > { %22346 = vmatprep.subr.bf16.mxu0 %v25226_v49 }
 0x1d7   : > { %19256 = vmatmul.mubr.f32.vlgmr.msra.gmra.mrb[4].mxu0 %v25473_v44  ;;  %v2338_v44 = vand.u32 4294901760, %v1091_v11 }
 0x1d8   : > { %22348 = vmatpush3.bf16.msra.mxu0 %v25226_v49  ;;  %19290 = vmatprep.mubr.f32.mxu0 %v1709_v18 }
 0x1d9   : > { %22350 = vmatprep.subr.bf16.mxu0 %v25248_v55  ;;  %v25755_v3 = vsub.f32 %v1091_v11, %v2338_v44  ;;  %v25777_v11 = vsub.f32 %v25653_v53, %v2344_v32 }
 0x1dc   : > { %22352 = vmatpush3.bf16.msra.mxu0 %v25248_v55 }
 0x1dd   : > { %22354 = vmatprep.subr.bf16.mxu0 %v25258_v58 }
 0x1e0   : > { %22356 = vmatpush3.bf16.msra.mxu0 %v25258_v58 }
 0x1e1   : > { %22358 = vmatprep.subr.bf16.mxu0 %v25269_v63 }
 0x1e4   : > { %22360 = vmatpush3.bf16.msra.mxu0 %v25269_v63 }
 0x1e5   : > { %22362 = vmatprep.subr.bf16.mxu0 %v25279_v4 }
 0x1e8   : > { %22364 = vmatpush3.bf16.msra.mxu0 %v25279_v4 }
 0x1e9   : > { %22366 = vmatprep.subr.bf16.mxu0 %v25289_v9 }
 0x1ec   : > { %22368 = vmatpush3.bf16.msra.mxu0 %v25289_v9 }
 0x1ed   : > { %22370 = vmatprep.subr.bf16.mxu0 %v25299_v15 }
 0x1f0   : > { %22372 = vmatpush3.bf16.msra.mxu0 %v25299_v15 }
 0x1f1   : > { %22374 = vmatprep.subr.bf16.mxu0 %v25315_v24 }
 0x1f4   : > { %22376 = vmatpush3.bf16.msra.mxu0 %v25315_v24 }
 0x1f5   : > { %22378 = vmatprep.subr.bf16.mxu0 %v22377_v42 }
 0x1f7   : > { %19291 = vmatmul.mubr.f32.vlgmr.msra.gmra.mrb[4].mxu0 %v1719_v47 }
 0x1f8   : > { %22380 = vmatpush3.bf16.msra.mxu0 %v22377_v42  ;;  %19325 = vmatprep.mubr.f32.mxu0 %v25467_v51 }
 0x1f9   : > { %22382 = vmatprep.subr.bf16.mxu0 %v22381_v43 }
 0x1fc   : > { %22384 = vmatpush3.bf16.msra.mxu0 %v22381_v43  ;;  %v25698_v43 = vsub.f32 %v1085_v7, %v2320_v41  ;;  %v2463_v7 = vand.u32 4294901760, %v25728_v31 }
 0x1fd   : > { %22386 = vmatprep.subr.bf16.mxu0 %v22385_v16 }
 0x1fe   : > { %v2435_v28 = vand.u32 4294901760, %v25698_v43  ;;  %v2464_v38 = vsub.f32 %v25728_v31, %v2463_v7 }
 0x200   : > { %22388 = vmatpush3.bf16.msra.mxu0 %v22385_v16  ;;  %v25702_v16 = vsub.f32 %v25438_v1, %v25676_v0 }
 0x201   : > { %22390 = vmatprep.subr.bf16.mxu0 %v22389_v22 }
 0x204   : > { %22392 = vmatpush3.bf16.msra.mxu0 %v22389_v22  ;;  %v2353_v22 = vand.u32 4294901760, %v25689_v29 }
 0x205   : > { %22394 = vmatprep.subr.bf16.mxu0 %v22393_v2 }
 0x206   : > { %v25736_v37 = vpack.c.bf16 %v2356_v23, %v2353_v22 }
 0x208   : > { %22396 = vmatpush3.bf16.msra.mxu0 %v22393_v2 }
 0x209   : > { %22398 = vmatprep.subr.bf16.mxu0 %v22397_v48 }
 0x20c   : > { %22400 = vmatpush3.bf16.msra.mxu0 %v22397_v48  ;;  %v25724_v48 = vsub.f32 %v1087_v5, %v2326_v25 }
 0x20d   : > { %22402 = vmatprep.subr.bf16.mxu0 %v22401_v34 }
 0x210   : > { %22404 = vmatpush3.bf16.msra.mxu0 %v22401_v34  ;;  %v2403_v34 = vand.u32 4294901760, %v25702_v16 }
 0x211   : > { %22406 = vmatprep.subr.bf16.mxu0 %v22405_v61 }
 0x214   : > { %22408 = vmatpush3.bf16.msra.mxu0 %v22405_v61 }
 0x215   : > { %22410 = vmatprep.subr.bf16.mxu0 %v25226_v49 }
 0x217   : > { %19326 = vmatmul.mubr.f32.vlgmr.msra.gmra.mrb[4].mxu0 %v25465_v46 }
 0x218   : > { %22412 = vmatpush3.bf16.msra.mxu0 %v25226_v49  ;;  %19360 = vmatprep.mubr.f32.mxu0 %v25467_v51  ;;  %v25590_v49 = vsub.f32 %v25446_v26, %v25584_v54  ;;  %v1088_v26 = vld [vmem:[%s29889_s1 + $0x30] sm:$0xff]  ;;  %v2335_v51 = vand.u32 4294901760, %v1090_v45 }
 0x219   : > { %22414 = vmatprep.subr.bf16.mxu0 %v25248_v55  ;;  %v2329_v13 = vand.u32 4294901760, %v1088_v26 }
 0x21a   : > { %v2393_v59 = vand.u32 4294901760, %v25590_v49  ;;  %v25671_v20 = vpack.c.bf16 %v2338_v44, %v2335_v51 }
 0x21b   : > { %v25726_v30 = vsub.f32 %v1088_v26, %v2329_v13 }
 0x21c   : > { %22416 = vmatpush3.bf16.msra.mxu0 %v25248_v55  ;;  %v1082_v55 = vld [vmem:[%s29889_s1] sm:$0xff]  ;;  %v2394_v62 = vsub.f32 %v25590_v49, %v2393_v59 }
 0x21d   : > { %22418 = vmatprep.subr.bf16.mxu0 %v25258_v58 }
 0x21e   : > { %v2395_v33 = vand.u32 4294901760, %v2394_v62  ;;  %v25753_v62 = vsub.f32 %v1090_v45, %v2335_v51  ;;  %v25774_v45 = vsub.f32 %v25648_v52, %v2341_v21  ;;  %v2491_v21 = vand.u32 4294901760, %v25777_v11 }
 0x220   : > { %22420 = vmatpush3.bf16.msra.mxu0 %v25258_v58  ;;  %v1083_v58 = vld [vmem:[%s29889_s1 + $0x8] sm:$0xff]  ;;  %v2484_v53 = vand.u32 4294901760, %v25774_v45 }
 0x221   : > { %22422 = vmatprep.subr.bf16.mxu0 %v25269_v63 }
 0x224   : > { %22424 = vmatpush3.bf16.msra.mxu0 %v25269_v63  ;;  %v2311_v63 = vand.u32 4294901760, %v1082_v55 }
 0x225   : > { %22426 = vmatprep.subr.bf16.mxu0 %v25279_v4 }
 0x226   : > { %v25666_v47 = vsub.f32 %v1082_v55, %v2311_v63 }
 0x228   : > { %22428 = vmatpush3.bf16.msra.mxu0 %v25279_v4  ;;  %v2314_v4 = vand.u32 4294901760, %v1083_v58  ;;  %v2414_v36 = vand.u32 4294901760, %v25666_v47 }
 0x229   : > { %22430 = vmatprep.subr.bf16.mxu0 %v25289_v9 }
 0x22a   : > { %v25609_v40 = vpack.c.bf16 %v2314_v4, %v2311_v63  ;;  %v25668_v18 = vsub.f32 %v1083_v58, %v2314_v4  ;;  %v2415_v60 = vsub.f32 %v25666_v47, %v2414_v36  ;;  %v2436_v58 = vsub.f32 %v25698_v43, %v2435_v28 }
 0x22b   : > { %v2442_v63 = vand.u32 4294901760, %v25722_v19  ;;  %v2449_v4 = vand.u32 4294901760, %v25724_v48 }
 0x22c   : > { %22432 = vmatpush3.bf16.msra.mxu0 %v25289_v9  ;;  %v2317_v9 = vand.u32 4294901760, %v1084_v6  ;;  %v2421_v50 = vand.u32 4294901760, %v25668_v18  ;;  %v2416_v39 = vand.u32 4294901760, %v2415_v60 }
 0x22d   : > { %22434 = vmatprep.subr.bf16.mxu0 %v25299_v15 }
 0x22e   : > { %v25696_v42 = vsub.f32 %v1084_v6, %v2317_v9  ;;  %v2422_v1 = vsub.f32 %v25668_v18, %v2421_v50  ;;  %v2456_v6 = vand.u32 4294901760, %v25726_v30 }
 0x230   : > { %22436 = vmatpush3.bf16.msra.mxu0 %v25299_v15  ;;  %v25622_v15 = vpack.c.bf16 %v2320_v41, %v2317_v9  ;;  %v2428_v2 = vand.u32 4294901760, %v25696_v42  ;;  %v2423_v61 = vand.u32 4294901760, %v2422_v1  ;;  %v2404_v9 = vsub.f32 %v25702_v16, %v2403_v34 }
 0x231   : > { %22438 = vmatprep.subr.bf16.mxu0 %v25315_v24  ;;  %v2457_v26 = vsub.f32 %v25726_v30, %v2456_v6 }
 0x232   : > { %v2429_v55 = vsub.f32 %v25696_v42, %v2428_v2  ;;  %v22473_v41 = vpack.c.bf16 %v2423_v61, %v2416_v39  ;;  %v2405_v51 = vand.u32 4294901760, %v2404_v9  ;;  %v2465_v61 = vand.u32 4294901760, %v2464_v38 }
 0x233   : > { %v2458_v39 = vand.u32 4294901760, %v2457_v26  ;;  %v25796_v9 = vsub.f32 %v25664_v57, %v2350_v14  ;;  %v25809_v57 = vsub.f32 %v25689_v29, %v2353_v22  ;;  %v25814_v14 = vsub.f32 %v25694_v35, %v2356_v23  ;;  %v25816_v26 = vpop.f32.mrb[2].mxu1 }
 0x234   : > { %22440 = vmatpush3.bf16.msra.mxu0 %v25315_v24  ;;  %v25633_v24 = vpack.c.bf16 %v2326_v25, %v2323_v8  ;;  %v2430_v5 = vand.u32 4294901760, %v2429_v55  ;;  %v2437_v8 = vand.u32 4294901760, %v2436_v58  ;;  %v2443_v25 = vsub.f32 %v25722_v19, %v2442_v63  ;;  %v25818_v38 = vpop.f32.mrb[3].mxu1 }
 0x235   : > { %22442 = vmatprep.subr.bf16.mxu0 %v25609_v40  ;;  %v25791_v58 = vsub.f32 %v25659_v56, %v2347_v27  ;;  %v2505_v27 = vand.u32 4294901760, %v25796_v9  ;;  %v2512_v35 = vand.u32 4294901760, %v25809_v57  ;;  %v2519_v22 = vand.u32 4294901760, %v25814_v14 }
 0x236   : > { %v22477_v44 = vpack.c.bf16 %v2437_v8, %v2430_v5  ;;  %v2444_v60 = vand.u32 4294901760, %v2443_v25  ;;  %v2485_v25 = vsub.f32 %v25774_v45, %v2484_v53 }
 0x237   : > { %19361 = vmatmul.mubr.f32.vlgmr.msra.gmra.mrb[4].mxu0 %v25465_v46  ;;  %v25643_v46 = vpack.c.bf16 %v2332_v10, %v2329_v13  ;;  %v2470_v13 = vand.u32 4294901760, %v25753_v62  ;;  %v2477_v10 = vand.u32 4294901760, %v25755_v3  ;;  %v2498_v56 = vand.u32 4294901760, %v25791_v58 }
 0x238   : > { %22444 = vmatpush3.bf16.msra.mxu0 %v25609_v40  ;;  %19395 = vmatprep.mubr.f32.mxu0 %v2395_v33  ;;  %v2450_v33 = vsub.f32 %v25724_v48, %v2449_v4  ;;  %v2506_v29 = vsub.f32 %v25796_v9, %v2505_v27 }
 0x239   : > { %22446 = vmatprep.subr.bf16.mxu0 %v25622_v15  ;;  %v2471_v55 = vsub.f32 %v25753_v62, %v2470_v13  ;;  %v2478_v52 = vsub.f32 %v25755_v3, %v2477_v10 }
 0x23a   : > { %v2451_v1 = vand.u32 4294901760, %v2450_v33  ;;  %v2492_v33 = vsub.f32 %v25777_v11, %v2491_v21 }
 0x23b   : > { %v2472_v5 = vand.u32 4294901760, %v2471_v55  ;;  %v2479_v8 = vand.u32 4294901760, %v2478_v52  ;;  %v2513_v55 = vsub.f32 %v25809_v57, %v2512_v35  ;;  %v2520_v52 = vsub.f32 %v25814_v14, %v2519_v22 }
 0x23c   : > { %22448 = vmatpush3.bf16.msra.mxu0 %v25622_v15  ;;  %v22481_v32 = vpack.c.bf16 %v2451_v1, %v2444_v60  ;;  %v2493_v60 = vand.u32 4294901760, %v2492_v33  ;;  %v2499_v1 = vsub.f32 %v25791_v58, %v2498_v56  ;;  %v22509_v33 = vpack.c.bf16 %v25698_v43, %v25696_v42 }
 0x23d   : > { %22450 = vmatprep.subr.bf16.mxu0 %v25633_v24  ;;  %v22593_v42 = vpack.c.bf16 %v2505_v27, %v2498_v56  ;;  %v22597_v43 = vpack.c.bf16 %v2519_v22, %v2512_v35  ;;  %v25998_v56 = vld [vmem:[%s29889_s1 + $0x168] sm:$0xff]  ;;  %v26010_v22 = vand.u32 4294901760, %v25816_v26 }
 0x240   : > { %22452 = vmatpush3.bf16.msra.mxu0 %v25633_v24 }
 0x241   : > { %22454 = vmatprep.subr.bf16.mxu0 %v25643_v46 }
 0x244   : > { %22456 = vmatpush3.bf16.msra.mxu0 %v25643_v46 }
 0x245   : > { %22458 = vmatprep.subr.bf16.mxu0 %v25671_v20 }
 0x248   : > { %22460 = vmatpush3.bf16.msra.mxu0 %v25671_v20 }
 0x249   : > { %22462 = vmatprep.subr.bf16.mxu0 %v25684_v12 }
 0x24c   : > { %22464 = vmatpush3.bf16.msra.mxu0 %v25684_v12 }
 0x24d   : > { %22466 = vmatprep.subr.bf16.mxu0 %v25708_v17 }
 0x250   : > { %22468 = vmatpush3.bf16.msra.mxu0 %v25708_v17 }
 0x251   : > { %22470 = vmatprep.subr.bf16.mxu0 %v25736_v37 }
 0x254   : > { %22472 = vmatpush3.bf16.msra.mxu0 %v25736_v37 }
 0x255   : > { %22474 = vmatprep.subr.bf16.mxu0 %v22473_v41 }
 0x257   : > { %19396 = vmatmul.mubr.f32.vlgmr.msra.gmra.mrb[4].mxu0 %v2405_v51  ;;  %v22489_v51 = vpack.c.bf16 %v2479_v8, %v2472_v5  ;;  %v2514_v5 = vand.u32 4294901760, %v2513_v55  ;;  %v2521_v8 = vand.u32 4294901760, %v2520_v52 }
 0x258   : > { %22476 = vmatpush3.bf16.msra.mxu0 %v22473_v41  ;;  %19430 = vmatprep.mubr.f32.mxu0 %v25584_v54  ;;  %v22485_v41 = vpack.c.bf16 %v2465_v61, %v2458_v39  ;;  %v2500_v39 = vand.u32 4294901760, %v2499_v1  ;;  %v2507_v61 = vand.u32 4294901760, %v2506_v29  ;;  %v22525_v1 = vpack.c.bf16 %v25777_v11, %v25774_v45  ;;  %v17416_v45 = vld [vmem:[%s29889_s1 + $0x148] sm:$0xff] }
 0x259   : > { %22478 = vmatprep.subr.bf16.mxu0 %v22477_v44  ;;  %v22529_v29 = vpack.c.bf16 %v25796_v9, %v25791_v58  ;;  %v25987_v58 = vld [vmem:[%s29889_s1 + $0x158] sm:$0xff]  ;;  %v25993_v9 = vld [vmem:[%s29889_s1 + $0x160] sm:$0xff] }
 0x25a   : > { %v3556_v35 = vand.u32 4294901760, %v25987_v58 }
 0x25c   : > { %22480 = vmatpush3.bf16.msra.mxu0 %v22477_v44  ;;  %v2486_v44 = vand.u32 4294901760, %v2485_v25  ;;  %v22505_v25 = vpack.c.bf16 %v25668_v18, %v25666_v47  ;;  %v22577_v47 = vpack.c.bf16 %v2449_v4, %v2442_v63  ;;  %v22581_v18 = vpack.c.bf16 %v2463_v7, %v2456_v6  ;;  %v17413_v7 = vld [vmem:[%s29889_s1 + $0x130] sm:$0xff] }
 0x25d   : > { %22482 = vmatprep.subr.bf16.mxu0 %v22481_v32 }
 0x25e   : > { %v22493_v23 = vpack.c.bf16 %v2493_v60, %v2486_v44  ;;  %v22517_v44 = vpack.c.bf16 %v25728_v31, %v25726_v30  ;;  %v22521_v60 = vpack.c.bf16 %v25755_v3, %v25753_v62  ;;  %v17411_v31 = vld [vmem:[%s29889_s1 + $0x120] sm:$0xff]  ;;  %v17414_v62 = vld [vmem:[%s29889_s1 + $0x138] sm:$0xff]  ;;  %v3541_v3 = vand.u32 4294901760, %v17413_v7 }
 0x25f   : > { %v3535_v63 = vand.u32 4294901760, %v17411_v31 }
 0x260   : > { %22484 = vmatpush3.bf16.msra.mxu0 %v22481_v32  ;;  %v22497_v32 = vpack.c.bf16 %v2507_v61, %v2500_v39  ;;  %v3559_v39 = vand.u32 4294901760, %v25993_v9  ;;  %v3562_v61 = vand.u32 4294901760, %v25998_v56 }
 0x261   : > { %22486 = vmatprep.subr.bf16.mxu0 %v22485_v41 }
 0x264   : > { %22488 = vmatpush3.bf16.msra.mxu0 %v22485_v41  ;;  %v22501_v41 = vpack.c.bf16 %v2521_v8, %v2514_v5  ;;  %v26023_v5 = vld [vmem:[%s29889_s1 + $0x170] sm:$0xff]  ;;  %v26028_v8 = vld [vmem:[%s29889_s1 + $0x178] sm:$0xff] }
 0x265   : > { %22490 = vmatprep.subr.bf16.mxu0 %v22489_v51 }
 0x268   : > { %22492 = vmatpush3.bf16.msra.mxu0 %v22489_v51  ;;  %v22513_v51 = vpack.c.bf16 %v25724_v48, %v25722_v19 }
 0x269   : > { %22494 = vmatprep.subr.bf16.mxu0 %v22493_v23 }
 0x26c   : > { %22496 = vmatpush3.bf16.msra.mxu0 %v22493_v23  ;;  %v22533_v23 = vpack.c.bf16 %v25814_v14, %v25809_v57 }
 0x26d   : > { %22498 = vmatprep.subr.bf16.mxu0 %v22497_v32 }
 0x270   : > { %22500 = vmatpush3.bf16.msra.mxu0 %v22497_v32 }
 0x271   : > { %22502 = vmatprep.subr.bf16.mxu0 %v22501_v41 }
 0x274   : > { %22504 = vmatpush3.bf16.msra.mxu0 %v22501_v41 }
 0x275   : > { %22506 = vmatprep.subr.bf16.mxu0 %v22505_v25 }
 0x277   : > { %19431 = vmatmul.mubr.f32.vlgmr.msra.gmra.mrb[4].mxu0 %v25676_v0 }
 0x278   : > { %22508 = vmatpush3.bf16.msra.mxu0 %v22505_v25  ;;  %19465 = vmatprep.mubr.f32.mxu0 %v25590_v49  ;;  %v22569_v49 = vpack.c.bf16 %v2421_v50, %v2414_v36  ;;  %v22585_v36 = vpack.c.bf16 %v2477_v10, %v2470_v13  ;;  %v22589_v50 = vpack.c.bf16 %v2491_v21, %v2484_v53  ;;  %v3544_v13 = vand.u32 4294901760, %v17414_v62  ;;  %v17415_v10 = vld [vmem:[%s29889_s1 + $0x140] sm:$0xff]  ;;  %v25982_v21 = vld [vmem:[%s29889_s1 + $0x150] sm:$0xff] }
 0x279   : > { %22510 = vmatprep.subr.bf16.mxu0 %v22509_v33  ;;  %v3547_v11 = vand.u32 4294901760, %v17415_v10  ;;  %v3550_v53 = vand.u32 4294901760, %v17416_v45 }
 0x27b   : > { %v26005_v14 = vpack.c.bf16 %v3550_v53, %v3547_v11 }
 0x27c   : > { %22512 = vmatpush3.bf16.msra.mxu0 %v22509_v33  ;;  %v26036_v33 = vsub.f32 %v25816_v26, %v26010_v22 }
 0x27d   : > { %22514 = vmatprep.subr.bf16.mxu0 %v22513_v51 }
 0x280   : > { %22516 = vmatpush3.bf16.msra.mxu0 %v22513_v51  ;;  %v26042_v51 = vpack.c.bf16 %v3562_v61, %v3559_v39 }
 0x281   : > { %22518 = vmatprep.subr.bf16.mxu0 %v22517_v44 }
 0x284   : > { %22520 = vmatpush3.bf16.msra.mxu0 %v22517_v44  ;;  %v3565_v44 = vand.u32 4294901760, %v26023_v5 }
 0x285   : > { %22522 = vmatprep.subr.bf16.mxu0 %v22521_v60 }
 0x288   : > { %22524 = vmatpush3.bf16.msra.mxu0 %v22521_v60  ;;  %v3568_v60 = vand.u32 4294901760, %v26028_v8 }
 0x289   : > { %22526 = vmatprep.subr.bf16.mxu0 %v22525_v1 }
 0x28c   : > { %22528 = vmatpush3.bf16.msra.mxu0 %v22525_v1 }
 0x28d   : > { %22530 = vmatprep.subr.bf16.mxu0 %v22529_v29 }
 0x290   : > { %22532 = vmatpush3.bf16.msra.mxu0 %v22529_v29 }
 0x291   : > { %22534 = vmatprep.subr.bf16.mxu0 %v22533_v23 }
 0x294   : > { %22536 = vmatpush3.bf16.msra.mxu0 %v22533_v23 }
 0x295   : > { %22538 = vmatprep.subr.bf16.mxu0 %v25609_v40 }
 0x297   : > { %19466 = vmatmul.mubr.f32.vlgmr.msra.gmra.mrb[4].mxu0 %v25702_v16  ;;  %v25918_v16 = vand.u32 4294901760, %v25818_v38 }
 0x298   : > { %22540 = vmatpush3.bf16.msra.mxu0 %v25609_v40  ;;  %19500 = vmatprep.mubr.f32.mxu0 %v2393_v59  ;;  %v22573_v59 = vpack.c.bf16 %v2435_v28, %v2428_v2  ;;  %v17409_v2 = vld [vmem:[%s29889_s1 + $0x110] sm:$0xff]  ;;  %v17410_v28 = vld [vmem:[%s29889_s1 + $0x118] sm:$0xff] }
 0x299   : > { %22542 = vmatprep.subr.bf16.mxu0 %v25622_v15  ;;  %v3532_v48 = vand.u32 4294901760, %v17410_v28 }
 0x29b   : > { %v26032_v25 = vsub.f32 %v17410_v28, %v3532_v48 }
 0x29c   : > { %22544 = vmatpush3.bf16.msra.mxu0 %v25622_v15 }
 0x29d   : > { %22546 = vmatprep.subr.bf16.mxu0 %v25633_v24  ;;  %v3647_v23 = vand.u32 4294901760, %v26032_v25 }
 0x2a0   : > { %22548 = vmatpush3.bf16.msra.mxu0 %v25633_v24 }
 0x2a1   : > { %22550 = vmatprep.subr.bf16.mxu0 %v25643_v46 }
 0x2a4   : > { %22552 = vmatpush3.bf16.msra.mxu0 %v25643_v46 }
 0x2a5   : > { %22554 = vmatprep.subr.bf16.mxu0 %v25671_v20 }
 0x2a8   : > { %22556 = vmatpush3.bf16.msra.mxu0 %v25671_v20 }
 0x2a9   : > { %22558 = vmatprep.subr.bf16.mxu0 %v25684_v12 }
 0x2ac   : > { %22560 = vmatpush3.bf16.msra.mxu0 %v25684_v12 }
 0x2ad   : > { %22562 = vmatprep.subr.bf16.mxu0 %v25708_v17 }
 0x2b0   : > { %22564 = vmatpush3.bf16.msra.mxu0 %v25708_v17 }
 0x2b1   : > { %22566 = vmatprep.subr.bf16.mxu0 %v25736_v37 }
 0x2b4   : > { %22568 = vmatpush3.bf16.msra.mxu0 %v25736_v37 }
 0x2b5   : > { %22570 = vmatprep.subr.bf16.mxu0 %v22569_v49 }
 0x2b7   : > { %19501 = vmatmul.mubr.f32.vlgmr.msra.gmra.mrb[4].mxu0 %v2403_v34  ;;  %v17412_v34 = vld [vmem:[%s29889_s1 + $0x128] sm:$0xff] }
 0x2b8   : > { %22572 = vmatpush3.bf16.msra.mxu0 %v22569_v49  ;;  %19535 = vmatprep.mubr.f32.mxu0 %v25584_v54  ;;  %v3538_v4 = vand.u32 4294901760, %v17412_v34  ;;  %v26056_v49 = vsub.f32 %v17411_v31, %v3535_v63  ;;  %v26089_v31 = vsub.f32 %v17416_v45, %v3550_v53  ;;  %v26111_v45 = vsub.f32 %v25987_v58, %v3556_v35 }
 0x2b9   : > { %22574 = vmatprep.subr.bf16.mxu0 %v22573_v59 }
 0x2bc   : > { %22576 = vmatpush3.bf16.msra.mxu0 %v22573_v59  ;;  %v26058_v59 = vsub.f32 %v17412_v34, %v3538_v4 }
 0x2bd   : > { %22578 = vmatprep.subr.bf16.mxu0 %v22577_v47 }
 0x2c0   : > { %22580 = vmatpush3.bf16.msra.mxu0 %v22577_v47  ;;  %v26060_v47 = vsub.f32 %v17413_v7, %v3541_v3 }
 0x2c1   : > { %22582 = vmatprep.subr.bf16.mxu0 %v22581_v18 }
 0x2c4   : > { %22584 = vmatpush3.bf16.msra.mxu0 %v22581_v18  ;;  %v26062_v18 = vsub.f32 %v17414_v62, %v3544_v13 }
 0x2c5   : > { %22586 = vmatprep.subr.bf16.mxu0 %v22585_v36 }
 0x2c6   : > { %v3675_v28 = vand.u32 4294901760, %v26062_v18 }
 0x2c8   : > { %22588 = vmatpush3.bf16.msra.mxu0 %v22585_v36  ;;  %v3615_v36 = vand.u32 4294901760, %v26036_v33  ;;  %v3676_v62 = vsub.f32 %v26062_v18, %v3675_v28 }
 0x2c9   : > { %22590 = vmatprep.subr.bf16.mxu0 %v22589_v50 }
 0x2cc   : > { %22592 = vmatpush3.bf16.msra.mxu0 %v22589_v50  ;;  %v26070_v50 = vpack.c.bf16 %v3568_v60, %v3565_v44 }
 0x2cd   : > { %22594 = vmatprep.subr.bf16.mxu0 %v22593_v42 }
 0x2d0   : > { %22596 = vmatpush3.bf16.msra.mxu0 %v22593_v42 }
 0x2d1   : > { %22598 = vmatprep.subr.bf16.mxu0 %v22597_v43 }
 0x2d4   : > { %22600 = vmatpush3.bf16.msra.mxu0 %v22597_v43 }
 0x2d5   : > { %22602 = vmatprep.subr.bf16.mxu0 %v25609_v40 }
 0x2d7   : > { %19536 = vmatmul.mubr.f32.vlgmr.msra.gmra.mrb[4].mxu0 %v25676_v0 }
 0x2d8   : > { %22604 = vmatpush3.bf16.msra.mxu0 %v25609_v40  ;;  %19570 = vmatprep.mubr.f32.mxu0 %v25584_v54  ;;  %v25924_v54 = vsub.f32 %v25818_v38, %v25918_v16  ;;  %v17407_v40 = vld [vmem:[%s29889_s1 + $0x100] sm:$0xff]  ;;  %v3553_v38 = vand.u32 4294901760, %v25982_v21 }
 0x2d9   : > { %22606 = vmatprep.subr.bf16.mxu0 %v25622_v15 }
 0x2da   : > { %v26018_v32 = vpack.c.bf16 %v3556_v35, %v3553_v38 }
 0x2dc   : > { %22608 = vmatpush3.bf16.msra.mxu0 %v25622_v15  ;;  %v17408_v15 = vld [vmem:[%s29889_s1 + $0x108] sm:$0xff] }
 0x2dd   : > { %22610 = vmatprep.subr.bf16.mxu0 %v25633_v24 }
 0x2e0   : > { %22612 = vmatpush3.bf16.msra.mxu0 %v25633_v24  ;;  %v3523_v24 = vand.u32 4294901760, %v17407_v40 }
 0x2e1   : > { %22614 = vmatprep.subr.bf16.mxu0 %v25643_v46 }
 0x2e2   : > { %v26000_v27 = vsub.f32 %v17407_v40, %v3523_v24 }
 0x2e4   : > { %22616 = vmatpush3.bf16.msra.mxu0 %v25643_v46  ;;  %v3526_v46 = vand.u32 4294901760, %v17408_v15  ;;  %v3626_v55 = vand.u32 4294901760, %v26000_v27 }
 0x2e5   : > { %22618 = vmatprep.subr.bf16.mxu0 %v25671_v20 }
 0x2e6   : > { %v25943_v19 = vpack.c.bf16 %v3526_v46, %v3523_v24  ;;  %v26002_v57 = vsub.f32 %v17408_v15, %v3526_v46  ;;  %v3627_v1 = vsub.f32 %v26000_v27, %v3626_v55  ;;  %v3648_v15 = vsub.f32 %v26032_v25, %v3647_v23 }
 0x2e7   : > { %v3654_v24 = vand.u32 4294901760, %v26056_v49  ;;  %v3661_v46 = vand.u32 4294901760, %v26058_v59 }
 0x2e8   : > { %22620 = vmatpush3.bf16.msra.mxu0 %v25671_v20  ;;  %v3605_v20 = vand.u32 4294901760, %v25924_v54  ;;  %v3633_v52 = vand.u32 4294901760, %v26002_v57  ;;  %v3628_v42 = vand.u32 4294901760, %v3627_v1 }
 0x2e9   : > { %22622 = vmatprep.subr.bf16.mxu0 %v25684_v12 }
 0x2ea   : > { %v3606_v30 = vsub.f32 %v25924_v54, %v3605_v20  ;;  %v3634_v26 = vsub.f32 %v26002_v57, %v3633_v52 }
 0x2ec   : > { %22624 = vmatpush3.bf16.msra.mxu0 %v25684_v12  ;;  %v3529_v12 = vand.u32 4294901760, %v17409_v2  ;;  %v3607_v6 = vand.u32 4294901760, %v3606_v30  ;;  %v3635_v43 = vand.u32 4294901760, %v3634_v26  ;;  %v26087_v30 = vsub.f32 %v17415_v10, %v3547_v11 }
 0x2ed   : > { %22626 = vmatprep.subr.bf16.mxu0 %v25708_v17  ;;  %v26108_v10 = vsub.f32 %v25982_v21, %v3553_v38  ;;  %v3703_v38 = vand.u32 4294901760, %v26111_v45 }
 0x2ee   : > { %v26030_v41 = vsub.f32 %v17409_v2, %v3529_v12  ;;  %v3668_v2 = vand.u32 4294901760, %v26060_v47 }
 0x2ef   : > { %v3696_v58 = vand.u32 4294901760, %v26108_v10 }
 0x2f0   : > { %22628 = vmatpush3.bf16.msra.mxu0 %v25708_v17  ;;  %v25956_v17 = vpack.c.bf16 %v3532_v48, %v3529_v12  ;;  %v3640_v29 = vand.u32 4294901760, %v26030_v41  ;;  %v3616_v12 = vsub.f32 %v26036_v33, %v3615_v36  ;;  %v22689_v48 = vpack.c.bf16 %v3635_v43, %v3628_v42 }
 0x2f1   : > { %22630 = vmatprep.subr.bf16.mxu0 %v25736_v37  ;;  %v3669_v7 = vsub.f32 %v26060_v47, %v3668_v2  ;;  %v3677_v43 = vand.u32 4294901760, %v3676_v62 }
 0x2f2   : > { %v3641_v40 = vsub.f32 %v26030_v41, %v3640_v29  ;;  %v3617_v11 = vand.u32 4294901760, %v3616_v12  ;;  %v26130_v12 = vsub.f32 %v25998_v56, %v3562_v61  ;;  %v26143_v56 = vsub.f32 %v26023_v5, %v3565_v44 }
 0x2f3   : > { %v3670_v42 = vand.u32 4294901760, %v3669_v7  ;;  %v26148_v61 = vsub.f32 %v26028_v8, %v3568_v60 }
 0x2f4   : > { %22632 = vmatpush3.bf16.msra.mxu0 %v25736_v37  ;;  %v25967_v37 = vpack.c.bf16 %v3538_v4, %v3535_v63  ;;  %v3642_v34 = vand.u32 4294901760, %v3641_v40  ;;  %v3649_v63 = vand.u32 4294901760, %v3648_v15  ;;  %v3655_v4 = vsub.f32 %v26056_v49, %v3654_v24 }
 0x2f5   : > { %22658 = vmatprep.subr.bf16.mxu0 %v25943_v19  ;;  %v26125_v15 = vsub.f32 %v25993_v9, %v3559_v39  ;;  %v3717_v39 = vand.u32 4294901760, %v26130_v12  ;;  %v3724_v5 = vand.u32 4294901760, %v26143_v56  ;;  %v3731_v44 = vand.u32 4294901760, %v26148_v61 }
 0x2f6   : > { %v22693_v53 = vpack.c.bf16 %v3649_v63, %v3642_v34  ;;  %v3656_v1 = vand.u32 4294901760, %v3655_v4  ;;  %v3697_v4 = vsub.f32 %v26108_v10, %v3696_v58 }
 0x2f7   : > { %19571 = vmatmul.mubr.f32.vlgmr.msra.gmra.mrb[4].mxu0 %v25676_v0  ;;  %v25977_v0 = vpack.c.bf16 %v3544_v13, %v3541_v3  ;;  %v3682_v3 = vand.u32 4294901760, %v26087_v30  ;;  %v3689_v13 = vand.u32 4294901760, %v26089_v31  ;;  %v3710_v9 = vand.u32 4294901760, %v26125_v15 }
 0x2f8   : > { %22660 = vmatpush3.bf16.msra.mxu0 %v25943_v19  ;;  %19647 = vmatprep.mubr.f32.mxu0 %v3607_v6  ;;  %v3662_v6 = vsub.f32 %v26058_v59, %v3661_v46  ;;  %v3698_v62 = vand.u32 4294901760, %v3697_v4  ;;  %v22729_v4 = vpack.c.bf16 %v26058_v59, %v26056_v49 }
 0x2f9   : > { %22662 = vmatprep.subr.bf16.mxu0 %v25956_v17  ;;  %v3683_v40 = vsub.f32 %v26087_v30, %v3682_v3  ;;  %v3690_v21 = vsub.f32 %v26089_v31, %v3689_v13 }
 0x2fa   : > { %v3663_v26 = vand.u32 4294901760, %v3662_v6  ;;  %v3704_v6 = vsub.f32 %v26111_v45, %v3703_v38 }
 0x2fb   : > { %v3684_v34 = vand.u32 4294901760, %v3683_v40  ;;  %v3691_v63 = vand.u32 4294901760, %v3690_v21 }
 0x2fc   : > { %22664 = vmatpush3.bf16.msra.mxu0 %v25956_v17  ;;  %v22697_v35 = vpack.c.bf16 %v3663_v26, %v3656_v1  ;;  %v3718_v1 = vsub.f32 %v26130_v12, %v3717_v39 }
 0x2fd   : > { %22666 = vmatprep.subr.bf16.mxu0 %v25967_v37  ;;  %v22705_v7 = vpack.c.bf16 %v3691_v63, %v3684_v34  ;;  %v22721_v34 = vpack.c.bf16 %v26002_v57, %v26000_v27  ;;  %v22725_v63 = vpack.c.bf16 %v26032_v25, %v26030_v41  ;;  %v22793_v27 = vpack.c.bf16 %v3661_v46, %v3654_v24 }
 0x2fe   : > { %v3719_v26 = vand.u32 4294901760, %v3718_v1  ;;  %v22797_v57 = vpack.c.bf16 %v3675_v28, %v3668_v2  ;;  %v22809_v41 = vpack.c.bf16 %v3717_v39, %v3710_v9  ;;  %v22813_v25 = vpack.c.bf16 %v3731_v44, %v3724_v5 }
 0x300   : > { %22668 = vmatpush3.bf16.msra.mxu0 %v25967_v37 }
 0x301   : > { %22670 = vmatprep.subr.bf16.mxu0 %v25977_v0 }
 0x304   : > { %22672 = vmatpush3.bf16.msra.mxu0 %v25977_v0 }
 0x305   : > { %22674 = vmatprep.subr.bf16.mxu0 %v26005_v14 }
 0x308   : > { %22676 = vmatpush3.bf16.msra.mxu0 %v26005_v14 }
 0x309   : > { %22678 = vmatprep.subr.bf16.mxu0 %v26018_v32 }
 0x30c   : > { %22680 = vmatpush3.bf16.msra.mxu0 %v26018_v32 }
 0x30d   : > { %22682 = vmatprep.subr.bf16.mxu0 %v26042_v51 }
 0x310   : > { %22684 = vmatpush3.bf16.msra.mxu0 %v26042_v51 }
 0x311   : > { %22686 = vmatprep.subr.bf16.mxu0 %v26070_v50 }
 0x314   : > { %22688 = vmatpush3.bf16.msra.mxu0 %v26070_v50 }
 0x315   : > { %22690 = vmatprep.subr.bf16.mxu0 %v22689_v48 }
 0x317   : > { %19648 = vmatmul.mubr.f32.vlgmr.msra.gmra.mrb[4].mxu0 %v3617_v11  ;;  %v3705_v11 = vand.u32 4294901760, %v3704_v6  ;;  %v22733_v6 = vpack.c.bf16 %v26062_v18, %v26060_v47 }
 0x318   : > { %22692 = vmatpush3.bf16.msra.mxu0 %v22689_v48  ;;  %19682 = vmatprep.mubr.f32.mxu0 %v25918_v16  ;;  %v22701_v48 = vpack.c.bf16 %v3677_v43, %v3670_v42  ;;  %v3725_v42 = vsub.f32 %v26143_v56, %v3724_v5  ;;  %v3732_v43 = vsub.f32 %v26148_v61, %v3731_v44  ;;  %v17424_v5 = vld [vmem:[%s29809_s5 + $0x10] sm:$0xff] }
 0x319   : > { %22694 = vmatprep.subr.bf16.mxu0 %v22693_v53  ;;  %v22709_v8 = vpack.c.bf16 %v3705_v11, %v3698_v62  ;;  %v22741_v62 = vpack.c.bf16 %v26111_v45, %v26108_v10  ;;  %v22745_v11 = vpack.c.bf16 %v26130_v12, %v26125_v15  ;;  %v4753_v44 = vsel %vm573_vm0, %v17424_v5, 0 }
 0x31a   : > { %v3726_v21 = vand.u32 4294901760, %v3725_v42 }
 0x31c   : > { %22696 = vmatpush3.bf16.msra.mxu0 %v22693_v53  ;;  %v3711_v53 = vsub.f32 %v26125_v15, %v3710_v9 }
 0x31d   : > { %22698 = vmatprep.subr.bf16.mxu0 %v22697_v35 }
 0x31e   : > { %v3712_v60 = vand.u32 4294901760, %v3711_v53  ;;  %v22749_v53 = vpack.c.bf16 %v26148_v61, %v26143_v56 }
 0x320   : > { %22700 = vmatpush3.bf16.msra.mxu0 %v22697_v35  ;;  %v22713_v40 = vpack.c.bf16 %v3719_v26, %v3712_v60  ;;  %v3733_v35 = vand.u32 4294901760, %v3732_v43  ;;  %v4825_v60 = vand.u32 4294901760, %v4753_v44 }
 0x321   : > { %22702 = vmatprep.subr.bf16.mxu0 %v22701_v48 }
 0x322   : > { %v4826_v43 = vsub.f32 %v4753_v44, %v4825_v60 }
 0x324   : > { %22704 = vmatpush3.bf16.msra.mxu0 %v22701_v48  ;;  %v22717_v48 = vpack.c.bf16 %v3733_v35, %v3726_v21  ;;  %v4827_v21 = vand.u32 4294901760, %v4826_v43 }
 0x325   : > { %22706 = vmatprep.subr.bf16.mxu0 %v22705_v7 }
 0x328   : > { %22708 = vmatpush3.bf16.msra.mxu0 %v22705_v7  ;;  %v22737_v7 = vpack.c.bf16 %v26089_v31, %v26087_v30 }
 0x329   : > { %22710 = vmatprep.subr.bf16.mxu0 %v22709_v8 }
 0x32c   : > { %22712 = vmatpush3.bf16.msra.mxu0 %v22709_v8  ;;  %v17425_v8 = vld [vmem:[%s29809_s5 + $0x18] sm:$0xff] }
 0x32d   : > { %22714 = vmatprep.subr.bf16.mxu0 %v22713_v40  ;;  %v4756_v26 = vsel %vm573_vm0, %v17425_v8, 0 }
 0x32e   : > { %v4835_v42 = vand.u32 4294901760, %v4756_v26 }
 0x330   : > { %22716 = vmatpush3.bf16.msra.mxu0 %v22713_v40  ;;  %v4836_v40 = vsub.f32 %v4756_v26, %v4835_v42 }
 0x331   : > { %22718 = vmatprep.subr.bf16.mxu0 %v22717_v48 }
 0x332   : > { %v4837_v35 = vand.u32 4294901760, %v4836_v40 }
 0x334   : > { %22720 = vmatpush3.bf16.msra.mxu0 %v22717_v48  ;;  %v4828_v48 = vsub.f32 %v4826_v43, %v4827_v21 }
 0x335   : > { %22722 = vmatprep.subr.bf16.mxu0 %v22721_v34 }
 0x337   : > { %19683 = vmatmul.mubr.f32.vlgmr.msra.gmra.mrb[4].mxu0 %v26010_v22 }
 0x338   : > { %22724 = vmatpush3.bf16.msra.mxu0 %v22721_v34  ;;  %19717 = vmatprep.mubr.f32.mxu0 %v25924_v54  ;;  %v22785_v54 = vpack.c.bf16 %v3633_v52, %v3626_v55  ;;  %v22801_v55 = vpack.c.bf16 %v3689_v13, %v3682_v3  ;;  %v22805_v52 = vpack.c.bf16 %v3703_v38, %v3696_v58 }
 0x339   : > { %22726 = vmatprep.subr.bf16.mxu0 %v22725_v63  ;;  %v4838_v34 = vsub.f32 %v4836_v40, %v4837_v35 }
 0x33c   : > { %22728 = vmatpush3.bf16.msra.mxu0 %v22725_v63  ;;  %v4829_v63 = vand.u32 4294901760, %v4828_v48 }
 0x33d   : > { %22730 = vmatprep.subr.bf16.mxu0 %v22729_v4 }
 0x340   : > { %22732 = vmatpush3.bf16.msra.mxu0 %v22729_v4  ;;  %v4839_v4 = vand.u32 4294901760, %v4838_v34 }
 0x341   : > { %22734 = vmatprep.subr.bf16.mxu0 %v22733_v6 }
 0x344   : > { %22736 = vmatpush3.bf16.msra.mxu0 %v22733_v6  ;;  %v17426_v6 = vld [vmem:[%s29808_s4 + $0x80] sm:$0xff] }
 0x345   : > { %22738 = vmatprep.subr.bf16.mxu0 %v22737_v7 }
 0x348   : > { %22740 = vmatpush3.bf16.msra.mxu0 %v22737_v7  ;;  %v17427_v7 = vld [vmem:[%s29808_s4 + $0x88] sm:$0xff] }
 0x349   : > { %22742 = vmatprep.subr.bf16.mxu0 %v22741_v62 }
 0x34c   : > { %22744 = vmatpush3.bf16.msra.mxu0 %v22741_v62  ;;  %v17428_v62 = vld [vmem:[%s29808_s4 + $0x90] sm:$0xff] }
 0x34d   : > { %22746 = vmatprep.subr.bf16.mxu0 %v22745_v11 }
 0x350   : > { %22748 = vmatpush3.bf16.msra.mxu0 %v22745_v11  ;;  %v5278_v11 = vand.u32 4294901760, %v17426_v6 }
 0x351   : > { %22750 = vmatprep.subr.bf16.mxu0 %v22749_v53 }
 0x354   : > { %22752 = vmatpush3.bf16.msra.mxu0 %v22749_v53  ;;  %v5281_v53 = vand.u32 4294901760, %v17427_v7 }
 0x355   : > { %22754 = vmatprep.subr.bf16.mxu0 %v25943_v19 }
 0x357   : > { %19718 = vmatmul.mubr.f32.vlgmr.msra.gmra.mrb[4].mxu0 %v26036_v33  ;;  %v4224_v33 = vld [vmem:[%s29809_s5 + $0x8] sm:$0xff] }
 0x358   : > { %22756 = vmatpush3.bf16.msra.mxu0 %v25943_v19  ;;  %19752 = vmatprep.mubr.f32.mxu0 %v3605_v20  ;;  %v22789_v20 = vpack.c.bf16 %v3647_v23, %v3640_v29  ;;  %v17423_v29 = vld [vmem:[%s29807_s3] ss:$0 sm:$0xff] }
 0x359   : > { %22758 = vmatprep.subr.bf16.mxu0 %v25956_v17 }
 0x35c   : > { %22760 = vmatpush3.bf16.msra.mxu0 %v25956_v17 }
 0x35d   : > { %22762 = vmatprep.subr.bf16.mxu0 %v25967_v37 }
 0x360   : > { %22764 = vmatpush3.bf16.msra.mxu0 %v25967_v37 }
 0x361   : > { %22766 = vmatprep.subr.bf16.mxu0 %v25977_v0 }
 0x364   : > { %22768 = vmatpush3.bf16.msra.mxu0 %v25977_v0 }
 0x365   : > { %22770 = vmatprep.subr.bf16.mxu0 %v26005_v14 }
 0x368   : > { %22772 = vmatpush3.bf16.msra.mxu0 %v26005_v14 }
 0x369   : > { %22774 = vmatprep.subr.bf16.mxu0 %v26018_v32 }
 0x36c   : > { %22776 = vmatpush3.bf16.msra.mxu0 %v26018_v32 }
 0x36d   : > { %22778 = vmatprep.subr.bf16.mxu0 %v26042_v51 }
 0x370   : > { %22780 = vmatpush3.bf16.msra.mxu0 %v26042_v51 }
 0x371   : > { %22782 = vmatprep.subr.bf16.mxu0 %v26070_v50 }
 0x374   : > { %22784 = vmatpush3.bf16.msra.mxu0 %v26070_v50 }
 0x375   : > { %22786 = vmatprep.subr.bf16.mxu0 %v22785_v54 }
 0x377   : > { %19753 = vmatmul.mubr.f32.vlgmr.msra.gmra.mrb[4].mxu0 %v3615_v36 }
 0x378   : > { %22788 = vmatpush3.bf16.msra.mxu0 %v22785_v54  ;;  %19787 = vmatprep.mubr.f32.mxu0 %v25918_v16  ;;  %v17429_v54 = vld [vmem:[%s29808_s4 + $0x98] sm:$0xff] }
 0x379   : > { %22790 = vmatprep.subr.bf16.mxu0 %v22789_v20 }
 0x37c   : > { %22792 = vmatpush3.bf16.msra.mxu0 %v22789_v20  ;;  %v5284_v20 = vand.u32 4294901760, %v17428_v62 }
 0x37d   : > { %22794 = vmatprep.subr.bf16.mxu0 %v22793_v27 }
 0x37e   : > { %v26456_v5 = vsub.f32 %v17428_v62, %v5284_v20 }
 0x380   : > { %22796 = vmatpush3.bf16.msra.mxu0 %v22793_v27  ;;  %v26333_v27 = vld [vmem:[%s29808_s4 + $0xa0] sm:$0xff]  ;;  %v5395_v26 = vand.u32 4294901760, %v26456_v5 }
 0x381   : > { %22798 = vmatprep.subr.bf16.mxu0 %v22797_v57 }
 0x384   : > { %22800 = vmatpush3.bf16.msra.mxu0 %v22797_v57  ;;  %v26338_v57 = vld [vmem:[%s29808_s4 + $0xa8] sm:$0xff] }
 0x385   : > { %22802 = vmatprep.subr.bf16.mxu0 %v22801_v55 }
 0x388   : > { %22804 = vmatpush3.bf16.msra.mxu0 %v22801_v55  ;;  %v5287_v55 = vand.u32 4294901760, %v17429_v54 }
 0x389   : > { %22806 = vmatprep.subr.bf16.mxu0 %v22805_v52 }
 0x38a   : > { %v26458_v44 = vsub.f32 %v17429_v54, %v5287_v55 }
 0x38c   : > { %22808 = vmatpush3.bf16.msra.mxu0 %v22805_v52  ;;  %v26340_v52 = vpack.c.bf16 %v5281_v53, %v5278_v11 }
 0x38d   : > { %22810 = vmatprep.subr.bf16.mxu0 %v22809_v41 }
 0x390   : > { %22812 = vmatpush3.bf16.msra.mxu0 %v22809_v41  ;;  %v5290_v41 = vand.u32 4294901760, %v26333_v27 }
 0x391   : > { %22814 = vmatprep.subr.bf16.mxu0 %v22813_v25 }
 0x394   : > { %22816 = vmatpush3.bf16.msra.mxu0 %v22813_v25  ;;  %v5293_v25 = vand.u32 4294901760, %v26338_v57 }
 0x395   : > { %22818 = vmatprep.subr.bf16.mxu0 %v25943_v19 }
 0x397   : > { %19788 = vmatmul.mubr.f32.vlgmr.msra.gmra.mrb[4].mxu0 %v26010_v22 }
 0x398   : > { %22820 = vmatpush3.bf16.msra.mxu0 %v25943_v19  ;;  %19822 = vmatprep.mubr.f32.mxu0 %v25918_v16  ;;  %v4223_v16 = vld [vmem:[%s29809_s5] sm:$0xff] }
 0x399   : > { %22822 = vmatprep.subr.bf16.mxu0 %v25956_v17  ;;  %v4226_v19 = vsel %vm573_vm0, %v4223_v16, 0  ;;  %v26344_v16 = vpack.c.bf16 %v5287_v55, %v5284_v20 }
 0x39c   : > { %22824 = vmatpush3.bf16.msra.mxu0 %v25956_v17  ;;  %v26259_v17 = vand.u32 4294901760, %v4226_v19 }
 0x39d   : > { %22826 = vmatprep.subr.bf16.mxu0 %v25967_v37 }
 0x3a0   : > { %22828 = vmatpush3.bf16.msra.mxu0 %v25967_v37  ;;  %v4299_v37 = vsub.f32 %v4226_v19, %v26259_v17  ;;  %v26349_v19 = vld [vmem:[%s29808_s4 + $0xb0] sm:$0xff] }
 0x3a1   : > { %22830 = vmatprep.subr.bf16.mxu0 %v25977_v0 }
 0x3a4   : > { %22832 = vmatpush3.bf16.msra.mxu0 %v25977_v0  ;;  %v4300_v0 = vand.u32 4294901760, %v4299_v37 }
 0x3a5   : > { %22834 = vmatprep.subr.bf16.mxu0 %v26005_v14 }
 0x3a8   : > { %22836 = vmatpush3.bf16.msra.mxu0 %v26005_v14  ;;  %v4301_v14 = vsub.f32 %v4299_v37, %v4300_v0 }
 0x3a9   : > { %22838 = vmatprep.subr.bf16.mxu0 %v26018_v32 }
 0x3ac   : > { %22840 = vmatpush3.bf16.msra.mxu0 %v26018_v32  ;;  %v4302_v32 = vand.u32 4294901760, %v4301_v14 }
 0x3ad   : > { %22842 = vmatprep.subr.bf16.mxu0 %v26042_v51 }
 0x3ae   : > { %19829 = vmatprep.mubr.f32.mxu1 %v4302_v32  ;;  %v26366_v32 = vld [vmem:[%s29808_s4 + $0xc0] sm:$0xff] }
 0x3b0   : > { %22844 = vmatpush3.bf16.msra.mxu0 %v26042_v51 }
 0x3b1   : > { %22846 = vmatprep.subr.bf16.mxu0 %v26070_v50 }
 0x3b4   : > { %22848 = vmatpush3.bf16.msra.mxu0 %v26070_v50 }
 0x3b7   : > { %19823 = vmatmul.mubr.f32.vlgmr.msra.gmra.mrb[4].mxu0 %v26010_v22  ;;  %v4229_v22 = vsel %vm573_vm0, %v4224_v33, 0  ;;  %v26371_v33 = vld [vmem:[%s29808_s4 + $0xc8] sm:$0xff] }
 0x3b8   : > { %v26266_v51 = vand.u32 4294901760, %v4229_v22 }
 0x3ba   : > { %v4309_v23 = vsub.f32 %v4229_v22, %v26266_v51 }
 0x3bc   : > { %v4310_v50 = vand.u32 4294901760, %v4309_v23 }
 0x3be   : > { %v4311_v31 = vsub.f32 %v4309_v23, %v4310_v50 }
 0x3c0   : > { %v4312_v15 = vand.u32 4294901760, %v4311_v31  ;;  %v26426_v31 = vsub.f32 %v17427_v7, %v5281_v53 }
 0x48a   : > { %v19824_v49 = vpop.f32.mrb[4].mxu0 }
 0x48b   : > { %v4216_v59 = vadd.f32 %v19824_v49, %v17423_v29  ;;  %v4196_v47 = vpop.f32.mrb[5].mxu0  ;;  %v26393_v49 = vld [vmem:[%s29808_s4 + $0xd0] sm:$0xff] }
 0x48c   : > { %v4215_v18 = vadd.f32 %v17423_v29, %v4196_v47  ;;  %v5305_v29 = vand.u32 4294901760, %v26371_v33  ;;  %v5308_v47 = vand.u32 4294901760, %v26393_v49 }
 0x48d   : > { %vm4218_vm1 = vcmp.gt.f32.partialorder %v4216_v59, 0.0  ;;  %v4220_v36 = vmul.f32 0.01, %v4216_v59 }
 0x48e   : > { %vm4217_vm2 = vcmp.gt.f32.partialorder %v4215_v18, 0.0  ;;  %v4219_v24 = vmul.f32 0.01, %v4215_v18 }
 0x48f   : > { %v4222_v46 = vsel %vm4218_vm1, %v4216_v59, %v4220_v36  ;;  %v26398_v59 = vld [vmem:[%s29808_s4 + $0xd8] sm:$0xff] }
 0x490   : > { %v4235_v2 = vand.u32 4294901760, %v4222_v46  ;;  %v4221_v28 = vsel %vm4217_vm2, %v4215_v18, %v4219_v24  ;;  %v5311_v18 = vand.u32 4294901760, %v26398_v59  ;;  %v26412_v24 = vld [vmem:[%s29808_s4 + $0xe8] sm:$0xff] }
 0x491   : > { %v4232_v30 = vand.u32 4294901760, %v4221_v28 }
 0x492   : > { %v4327_v3 = vsub.f32 %v4222_v46, %v4235_v2  ;;  %v26402_v36 = vpack.c.bf16 %v5311_v18, %v5308_v47 }
 0x493   : > { %v26272_v13 = vpack.c.bf16 %v4235_v2, %v4232_v30  ;;  %v4320_v10 = vsub.f32 %v4221_v28, %v4232_v30  ;;  %v5317_v2 = vand.u32 4294901760, %v26412_v24  ;;  %v26424_v30 = vsub.f32 %v17426_v6, %v5278_v11 }
 0x494   : > { %v4328_v45 = vand.u32 4294901760, %v4327_v3 }
 0x495   : > { %v4321_v58 = vand.u32 4294901760, %v4320_v10  ;;  %v26274_v38 = vpack.c.bf16 %v4327_v3, %v4320_v10  ;;  %22850 = vmatprep.subr.bf16.mxu1 %v26272_v13 }
 0x496   : > { %v4329_v12 = vsub.f32 %v4327_v3, %v4328_v45  ;;  %22852 = vmatpush3.bf16.msra.mxu1 %v26272_v13  ;;  %v26431_v3 = vld [vmem:[%s29808_s4 + $0xf0] sm:$0xff] }
 0x497   : > { %v4322_v9 = vsub.f32 %v4320_v10, %v4321_v58  ;;  %v26278_v39 = vpack.c.bf16 %v4328_v45, %v4321_v58  ;;  %v26436_v10 = vld [vmem:[%s29808_s4 + $0xf8] sm:$0xff]  ;;  %v5320_v45 = vand.u32 4294901760, %v26431_v3 }
 0x498   : > { %v4330_v56 = vand.u32 4294901760, %v4329_v12  ;;  %v5323_v58 = vand.u32 4294901760, %v26436_v10  ;;  %v5388_v12 = vand.u32 4294901760, %v26426_v31 }
 0x499   : > { %v4323_v61 = vand.u32 4294901760, %v4322_v9  ;;  %19830 = vmatmul.mubr.f32.vlgmr.msra.gmra.mrb[4].mxu1 %v4312_v15  ;;  %v5381_v15 = vand.u32 4294901760, %v26424_v30 }
 0x49a   : > { %19836 = vmatprep.mubr.f32.mxu1 %v26259_v17  ;;  %v26448_v9 = vpack.c.bf16 %v5323_v58, %v5320_v45 }
 0x49b   : > { %v26281_v1 = vpack.c.bf16 %v4330_v56, %v4323_v61  ;;  %v5382_v56 = vsub.f32 %v26424_v30, %v5381_v15  ;;  %v5389_v61 = vsub.f32 %v26426_v31, %v5388_v12 }
 0x49d   : > { %22854 = vmatprep.subr.bf16.mxu1 %v26281_v1  ;;  %v5383_v8 = vand.u32 4294901760, %v5382_v56 }
 0x49e   : > { %22856 = vmatpush3.bf16.msra.mxu1 %v26281_v1 }
 0x49f   : > { %22858 = vmatprep.subr.bf16.mxu1 %v26274_v38 }
 0x4a1   : > { %19837 = vmatmul.mubr.f32.vlgmr.msra.gmra.mrb[4].mxu1 %v26266_v51 }
 0x4a2   : > { %22860 = vmatpush3.bf16.msra.mxu1 %v26274_v38  ;;  %19843 = vmatprep.mubr.f32.mxu1 %v4299_v37  ;;  %v26359_v37 = vpack.c.bf16 %v5293_v25, %v5290_v41 }
 0x4a3   : > { %22862 = vmatprep.subr.bf16.mxu1 %v26272_v13 }
 0x4a9   : > { %19844 = vmatmul.mubr.f32.vlgmr.msra.gmra.mrb[4].mxu1 %v4309_v23 }
 0x4aa   : > { %22864 = vmatpush3.bf16.msra.mxu1 %v26272_v13  ;;  %19850 = vmatprep.mubr.f32.mxu1 %v4300_v0  ;;  %v5296_v0 = vand.u32 4294901760, %v26349_v19 }
 0x4ab   : > { %22866 = vmatprep.subr.bf16.mxu1 %v26278_v39 }
 0x4ac   : > { %v26488_v11 = vsub.f32 %v26349_v19, %v5296_v0 }
 0x4b1   : > { %19851 = vmatmul.mubr.f32.vlgmr.msra.gmra.mrb[4].mxu1 %v4310_v50  ;;  %v26407_v50 = vld [vmem:[%s29808_s4 + $0xe0] sm:$0xff] }
 0x4b2   : > { %22868 = vmatpush3.bf16.msra.mxu1 %v26278_v39  ;;  %19857 = vmatprep.mubr.f32.mxu1 %v26259_v17  ;;  %v5314_v46 = vand.u32 4294901760, %v26407_v50 }
 0x4b3   : > { %22870 = vmatprep.subr.bf16.mxu1 %v26272_v13 }
 0x4b4   : > { %v26422_v28 = vpack.c.bf16 %v5317_v2, %v5314_v46 }
 0x4b9   : > { %19858 = vmatmul.mubr.f32.vlgmr.msra.gmra.mrb[4].mxu1 %v26266_v51 }
 0x4ba   : > { %22872 = vmatpush3.bf16.msra.mxu1 %v26272_v13  ;;  %19864 = vmatprep.mubr.f32.mxu1 %v26259_v17  ;;  %v26354_v17 = vld [vmem:[%s29808_s4 + $0xb8] sm:$0xff] }
 0x4bb   : > { %22874 = vmatprep.subr.bf16.mxu1 %v26272_v13  ;;  %v5299_v14 = vand.u32 4294901760, %v26354_v17 }
 0x4bd   : > { %v26375_v22 = vpack.c.bf16 %v5299_v14, %v5296_v0  ;;  %v26491_v53 = vsub.f32 %v26354_v17, %v5299_v14  ;;  %v26513_v0 = vsub.f32 %v26371_v33, %v5305_v29 }
 0x4bf   : > { %v29849_v55 = vand.u32 4294901760, %v26491_v53 }
 0x4c1   : > { %19865 = vmatmul.mubr.f32.vlgmr.msra.gmra.mrb[4].mxu1 %v26266_v51  ;;  %v5302_v51 = vand.u32 4294901760, %v26366_v32  ;;  %v5431_v19 = vsub.f32 %v26491_v53, %v29849_v55 }
 0x4c2   : > { %22876 = vmatpush3.bf16.msra.mxu1 %v26272_v13  ;;  %19871 = vmatprep.mubr.f32.mxu1 %v4829_v63 }
 0x4c3   : > { %22878 = vmatprep.subr.bf16.mxu1 %v26281_v1  ;;  %v26385_v23 = vpack.c.bf16 %v5305_v29, %v5302_v51  ;;  %v26508_v17 = vsub.f32 %v26366_v32, %v5302_v51  ;;  %v5432_v56 = vand.u32 4294901760, %v5431_v19  ;;  %v26523_v32 = vsub.f32 %v26393_v49, %v5308_v47 }
 0x4c4   : > { %v26526_v51 = vsub.f32 %v26398_v59, %v5311_v18  ;;  %v26542_v59 = vsub.f32 %v26407_v50, %v5314_v46  ;;  %v26547_v47 = vsub.f32 %v26412_v24, %v5317_v2  ;;  %v26560_v24 = vsub.f32 %v26431_v3, %v5320_v45 }
 0x4c5   : > { %19872 = vmatmul.mubr.f32.vlgmr.msra.gmra.mrb[6].mxu1 %v4839_v4  ;;  %v26565_v46 = vsub.f32 %v26436_v10, %v5323_v58  ;;  %v22961_v10 = vpack.c.bf16 %v26426_v31, %v26424_v30  ;;  %v22965_v58 = vpack.c.bf16 %v26458_v44, %v26456_v5  ;;  %v29899_v31 = vand.u32 4294901760, %v26488_v11 }
 0x4c6   : > { %22880 = vmatpush3.bf16.msra.mxu1 %v26281_v1  ;;  %19878 = vmatprep.mubr.f32.mxu1 %v4825_v60 }
 0x4c7   : > { %22882 = vmatprep.subr.bf16.mxu1 %v26274_v38 }
 0x4cd   : > { %19879 = vmatmul.mubr.f32.vlgmr.msra.gmra.mrb[6].mxu1 %v4835_v42 }
 0x4ce   : > { %22884 = vmatpush3.bf16.msra.mxu1 %v26274_v38  ;;  %19885 = vmatprep.mubr.f32.mxu1 %v4826_v43 }
 0x4cf   : > { %22886 = vmatprep.subr.bf16.mxu1 %v26272_v13 }
 0x4d5   : > { %19886 = vmatmul.mubr.f32.vlgmr.msra.gmra.mrb[6].mxu1 %v4836_v40  ;;  %v5396_v40 = vsub.f32 %v26456_v5, %v5395_v26  ;;  %v29901_v5 = vand.u32 4294901760, %v26508_v17 }
 0x4d6   : > { %22888 = vmatpush3.bf16.msra.mxu1 %v26272_v13  ;;  %19892 = vmatprep.mubr.f32.mxu1 %v4827_v21  ;;  %v26470_v21 = vsub.f32 %v26333_v27, %v5290_v41 }
 0x4d7   : > { %22890 = vmatprep.subr.bf16.mxu1 %v26278_v39  ;;  %v5397_v34 = vand.u32 4294901760, %v5396_v40 }
 0x4d8   : > { %v5409_v63 = vand.u32 4294901760, %v26470_v21 }
 0x4da   : > { %v5410_v7 = vsub.f32 %v26470_v21, %v5409_v63 }
 0x4dc   : > { %v5411_v20 = vand.u32 4294901760, %v5410_v7 }
 0x4dd   : > { %19893 = vmatmul.mubr.f32.vlgmr.msra.gmra.mrb[6].mxu1 %v4837_v35  ;;  %v26473_v35 = vsub.f32 %v26338_v57, %v5293_v25  ;;  %v29850_v57 = vand.u32 4294901760, %v26488_v11 }
 0x4de   : > { %22892 = vmatpush3.bf16.msra.mxu1 %v26278_v39  ;;  %19899 = vmatprep.mubr.f32.mxu1 %v4825_v60 }
 0x4df   : > { %22894 = vmatprep.subr.bf16.mxu1 %v26272_v13  ;;  %v5416_v4 = vand.u32 4294901760, %v26473_v35  ;;  %v5424_v25 = vsub.f32 %v26488_v11, %v29850_v57 }
 0x4e1   : > { %v5417_v62 = vsub.f32 %v26473_v35, %v5416_v4  ;;  %v5425_v14 = vand.u32 4294901760, %v5424_v25  ;;  %v29843_v25 = vand.u32 4294901760, %v26547_v47  ;;  %v23033_v30 = vpack.c.bf16 %v5416_v4, %v5409_v63 }
 0x4e2   : > { %v29905_v63 = vand.u32 4294901760, %v26542_v59  ;;  %v29906_v4 = vand.u32 4294901760, %v26547_v47 }
 0x4e3   : > { %v5418_v27 = vand.u32 4294901760, %v5417_v62  ;;  %v5473_v50 = vsub.f32 %v26547_v47, %v29843_v25 }
 0x4e5   : > { %19900 = vmatmul.mubr.f32.vlgmr.msra.gmra.mrb[6].mxu1 %v4835_v42  ;;  %v26497_v41 = vpack.c.bf16 %v5418_v27, %v5411_v20  ;;  %v29844_v27 = vand.u32 4294901760, %v26542_v59 }
 0x4e6   : > { %22896 = vmatpush3.bf16.msra.mxu1 %v26272_v13  ;;  %19906 = vmatprep.mubr.f32.mxu1 %v4825_v60  ;;  %v5390_v60 = vand.u32 4294901760, %v5389_v61  ;;  %v29848_v61 = vand.u32 4294901760, %v26508_v17 }
 0x4e7   : > { %22898 = vmatprep.subr.bf16.mxu1 %v26340_v52 }
 0x4e8   : > { %v26464_v43 = vpack.c.bf16 %v5390_v60, %v5383_v8  ;;  %v29847_v8 = vand.u32 4294901760, %v26513_v0  ;;  %v26517_v60 = vpack.c.bf16 %v5432_v56, %v5425_v14  ;;  %v5438_v40 = vsub.f32 %v26508_v17, %v29848_v61 }
 0x4e9   : > { %v5466_v14 = vsub.f32 %v26542_v59, %v29844_v27  ;;  %v5474_v56 = vand.u32 4294901760, %v5473_v50  ;;  %v22981_v50 = vpack.c.bf16 %v26526_v51, %v26523_v32 }
 0x4ea   : > { %v5445_v33 = vsub.f32 %v26513_v0, %v29847_v8  ;;  %v5439_v29 = vand.u32 4294901760, %v5438_v40  ;;  %v29842_v40 = vand.u32 4294901760, %v26560_v24 }
 0x4eb   : > { %v5467_v2 = vand.u32 4294901760, %v5466_v14  ;;  %v22977_v14 = vpack.c.bf16 %v26513_v0, %v26508_v17 }
 0x4ed   : > { %19907 = vmatmul.mubr.f32.vlgmr.msra.gmra.mrb[6].mxu1 %v4835_v42  ;;  %v5402_v42 = vand.u32 4294901760, %v26458_v44 }
 0x4ee   : > { %22900 = vmatpush3.bf16.msra.mxu1 %v26340_v52 }
 0x4ef   : > { %22902 = vmatprep.subr.bf16.mxu1 %v26344_v16  ;;  %v5403_v48 = vsub.f32 %v26458_v44, %v5402_v42  ;;  %v29902_v44 = vand.u32 4294901760, %v26513_v0  ;;  %v4735_v0 = vld [vmem:[%s29808_s4 + $0x10] sm:$0xff] }
 0x4f1   : > { %v5404_v6 = vand.u32 4294901760, %v5403_v48  ;;  %v29846_v48 = vand.u32 4294901760, %v26523_v32 }
 0x4f2   : > { %22904 = vmatpush3.bf16.msra.mxu1 %v26344_v16 }
 0x4f3   : > { %22906 = vmatprep.subr.bf16.mxu1 %v26359_v37  ;;  %v26493_v54 = vpack.c.bf16 %v5404_v6, %v5397_v34  ;;  %v29845_v34 = vand.u32 4294901760, %v26526_v51  ;;  %v5446_v6 = vand.u32 4294901760, %v5445_v33  ;;  %v5452_v7 = vsub.f32 %v26523_v32, %v29846_v48 }
 0x4f4   : > { %v29841_v33 = vand.u32 4294901760, %v26565_v46 }
 0x4f5   : > { %v5459_v49 = vsub.f32 %v26526_v51, %v29845_v34  ;;  %v22945_v18 = vpack.c.bf16 %v5446_v6, %v5439_v29  ;;  %v5453_v62 = vand.u32 4294901760, %v5452_v7  ;;  %v22953_v29 = vpack.c.bf16 %v5474_v56, %v5467_v2 }
 0x4f6   : > { %22908 = vmatpush3.bf16.msra.mxu1 %v26359_v37  ;;  %v5480_v6 = vsub.f32 %v26560_v24, %v29842_v40  ;;  %v5487_v3 = vsub.f32 %v26565_v46, %v29841_v33  ;;  %v22985_v2 = vpack.c.bf16 %v26547_v47, %v26542_v59  ;;  %v22989_v56 = vpack.c.bf16 %v26565_v46, %v26560_v24 }
 0x4f7   : > { %22910 = vmatprep.subr.bf16.mxu1 %v26375_v22  ;;  %v5460_v20 = vand.u32 4294901760, %v5459_v49 }
 0x4f8   : > { %v5481_v45 = vand.u32 4294901760, %v5480_v6  ;;  %v5488_v7 = vand.u32 4294901760, %v5487_v3 }
 0x4f9   : > { %v22949_v19 = vpack.c.bf16 %v5460_v20, %v5453_v62  ;;  %v22969_v62 = vpack.c.bf16 %v26473_v35, %v26470_v21  ;;  %v22973_v20 = vpack.c.bf16 %v26491_v53, %v26488_v11  ;;  %v29904_v21 = vand.u32 4294901760, %v26526_v51  ;;  %v4737_v51 = vld [vmem:[%s29808_s4 + $0x20] sm:$0xff] }
 0x4fa   : > { %22912 = vmatpush3.bf16.msra.mxu1 %v26375_v22  ;;  %v22957_v49 = vpack.c.bf16 %v5488_v7, %v5481_v45  ;;  %v23049_v11 = vpack.c.bf16 %v29906_v4, %v29905_v63 }
 0x4fb   : > { %22914 = vmatprep.subr.bf16.mxu1 %v26385_v23 }
 0x4fe   : > { %22916 = vmatpush3.bf16.msra.mxu1 %v26385_v23 }
 0x4ff   : > { %22918 = vmatprep.subr.bf16.mxu1 %v26402_v36 }
 0x502   : > { %22920 = vmatpush3.bf16.msra.mxu1 %v26402_v36 }
 0x503   : > { %22922 = vmatprep.subr.bf16.mxu1 %v26422_v28 }
 0x506   : > { %22924 = vmatpush3.bf16.msra.mxu1 %v26422_v28 }
 0x507   : > { %22926 = vmatprep.subr.bf16.mxu1 %v26448_v9 }
 0x50a   : > { %22928 = vmatpush3.bf16.msra.mxu1 %v26448_v9 }
 0x50b   : > { %22930 = vmatprep.subr.bf16.mxu1 %v26464_v43 }
 0x594   : > { %v26591_v6 = vpop.f32.mrb[4].mxu1 }
 0x595   : > { %v26593_v3 = vpop.f32.mrb[5].mxu1 }
 0x5c0   : > { %v19908_v45 = vpop.f32.mrb[6].mxu1 }
 0x5c1   : > { %v26595_v7 = vand.u32 4294901760, %v19908_v45  ;;  %v5250_v33 = vpop.f32.mrb[7].mxu1 }
 0x5c2   : > { %v26597_v40 = vand.u32 4294901760, %v5250_v33 }
 0x5c3   : > { %v26600_v25 = vsub.f32 %v19908_v45, %v26595_v7 }
 0x5c4   : > { %v5359_v27 = vsub.f32 %v5250_v33, %v26597_v40 }
 0x5c5   : > { %v5370_v34 = vand.u32 4294901760, %v26600_v25 }
 0x5c6   : > { %v5360_v48 = vand.u32 4294901760, %v5359_v27 }
 0x5c7   : > { %v5371_v8 = vsub.f32 %v26600_v25, %v5370_v34 }
 0x5c8   : > { %v5361_v61 = vsub.f32 %v5359_v27, %v5360_v48 }
 0x5c9   : > { %v5372_v57 = vand.u32 4294901760, %v5371_v8 }
 0x5ca   : > { %v5362_v55 = vand.u32 4294901760, %v5361_v61  ;;  %v4736_v61 = vld [vmem:[%s29808_s4 + $0x18] sm:$0xff] }
 0x5cc   : > { %19941 = vmatprep.mubr.f32.mxu1 %v5362_v55 }
 0x5cd   : > { %19942 = vmatmul.mubr.f32.vlgmr.msra.gmra.mrb[8].mxu1 %v5372_v57  ;;  %v29908_v57 = vand.u32 4294901760, %v26565_v46  ;;  %v4742_v46 = vld [vmem:[%s29808_s4 + $0x48] sm:$0xff] }
 0x5ce   : > { %22932 = vmatpush3.bf16.msra.mxu1 %v26464_v43  ;;  %19976 = vmatprep.mubr.f32.mxu1 %v26597_v40  ;;  %v23025_v43 = vpack.c.bf16 %v5388_v12, %v5381_v15  ;;  %v29900_v15 = vand.u32 4294901760, %v26491_v53  ;;  %v29907_v53 = vand.u32 4294901760, %v26560_v24  ;;  %v4741_v24 = vld [vmem:[%s29808_s4 + $0x40] sm:$0xff] }
 0x5cf   : > { %22934 = vmatprep.subr.bf16.mxu1 %v26493_v54  ;;  %v5986_v33 = vand.u32 4294901760, %v4741_v24 }
 0x5d0   : > { %v23037_v12 = vpack.c.bf16 %v29900_v15, %v29899_v31  ;;  %v23053_v55 = vpack.c.bf16 %v29908_v57, %v29907_v53  ;;  %v26785_v31 = vld [vmem:[%s29808_s4 + $0x70] sm:$0xff]  ;;  %v26790_v15 = vld [vmem:[%s29808_s4 + $0x78] sm:$0xff] }
 0x5d2   : > { %22936 = vmatpush3.bf16.msra.mxu1 %v26493_v54  ;;  %v23029_v54 = vpack.c.bf16 %v5402_v42, %v5395_v26  ;;  %v23041_v26 = vpack.c.bf16 %v29902_v44, %v29901_v5  ;;  %v29903_v42 = vand.u32 4294901760, %v26523_v32 }
 0x5d3   : > { %22938 = vmatprep.subr.bf16.mxu1 %v26497_v41 }
 0x5d4   : > { %v23045_v35 = vpack.c.bf16 %v29904_v21, %v29903_v42  ;;  %v6004_v42 = vand.u32 4294901760, %v26785_v31  ;;  %v6007_v21 = vand.u32 4294901760, %v26790_v15 }
 0x5d6   : > { %22940 = vmatpush3.bf16.msra.mxu1 %v26497_v41  ;;  %v26680_v41 = vand.u32 4294901760, %v26593_v3 }
 0x5d7   : > { %22942 = vmatprep.subr.bf16.mxu1 %v26517_v60 }
 0x5da   : > { %22944 = vmatpush3.bf16.msra.mxu1 %v26517_v60  ;;  %v5971_v60 = vand.u32 4294901760, %v4736_v61 }
 0x5db   : > { %22946 = vmatprep.subr.bf16.mxu1 %v22945_v18 }
 0x5dc   : > { %v26794_v5 = vsub.f32 %v4736_v61, %v5971_v60 }
 0x5de   : > { %22948 = vmatpush3.bf16.msra.mxu1 %v22945_v18  ;;  %v4739_v18 = vld [vmem:[%s29808_s4 + $0x30] sm:$0xff]  ;;  %v6086_v4 = vand.u32 4294901760, %v26794_v5 }
 0x5df   : > { %22950 = vmatprep.subr.bf16.mxu1 %v22949_v19 }
 0x5e0   : > { %v6087_v61 = vsub.f32 %v26794_v5, %v6086_v4 }
 0x5e2   : > { %22952 = vmatpush3.bf16.msra.mxu1 %v22949_v19 }
 0x5e3   : > { %22954 = vmatprep.subr.bf16.mxu1 %v22953_v29 }
 0x5e6   : > { %22956 = vmatpush3.bf16.msra.mxu1 %v22953_v29  ;;  %v5989_v29 = vand.u32 4294901760, %v4742_v46 }
 0x5e7   : > { %22958 = vmatprep.subr.bf16.mxu1 %v22957_v49 }
 0x5ea   : > { %22960 = vmatpush3.bf16.msra.mxu1 %v22957_v49  ;;  %v26744_v49 = vld [vmem:[%s29808_s4 + $0x50] sm:$0xff] }
 0x5eb   : > { %22962 = vmatprep.subr.bf16.mxu1 %v22961_v10 }
 0x5ed   : > { %19977 = vmatmul.mubr.f32.vlgmr.msra.gmra.mrb[8].mxu1 %v26595_v7 }
 0x5ee   : > { %22964 = vmatpush3.bf16.msra.mxu1 %v22961_v10  ;;  %20011 = vmatprep.mubr.f32.mxu1 %v5359_v27  ;;  %v4740_v27 = vld [vmem:[%s29808_s4 + $0x38] sm:$0xff] }
 0x5ef   : > { %22966 = vmatprep.subr.bf16.mxu1 %v22965_v58  ;;  %v5983_v19 = vand.u32 4294901760, %v4740_v27  ;;  %v26749_v10 = vld [vmem:[%s29808_s4 + $0x58] sm:$0xff] }
 0x5f2   : > { %22968 = vmatpush3.bf16.msra.mxu1 %v22965_v58  ;;  %v26755_v58 = vld [vmem:[%s29808_s4 + $0x60] sm:$0xff] }
 0x5f3   : > { %22970 = vmatprep.subr.bf16.mxu1 %v22969_v62  ;;  %v5998_v45 = vand.u32 4294901760, %v26755_v58 }
 0x5f6   : > { %22972 = vmatpush3.bf16.msra.mxu1 %v22969_v62  ;;  %v26760_v62 = vld [vmem:[%s29808_s4 + $0x68] sm:$0xff] }
 0x5f7   : > { %22974 = vmatprep.subr.bf16.mxu1 %v22973_v20 }
 0x5fa   : > { %22976 = vmatpush3.bf16.msra.mxu1 %v22973_v20 }
 0x5fb   : > { %22978 = vmatprep.subr.bf16.mxu1 %v22977_v14 }
 0x5fe   : > { %22980 = vmatpush3.bf16.msra.mxu1 %v22977_v14 }
 0x5ff   : > { %22982 = vmatprep.subr.bf16.mxu1 %v22981_v50 }
 0x602   : > { %22984 = vmatpush3.bf16.msra.mxu1 %v22981_v50  ;;  %v26767_v50 = vpack.c.bf16 %v5989_v29, %v5986_v33 }
 0x603   : > { %22986 = vmatprep.subr.bf16.mxu1 %v22985_v2 }
 0x606   : > { %22988 = vmatpush3.bf16.msra.mxu1 %v22985_v2  ;;  %v5992_v2 = vand.u32 4294901760, %v26744_v49 }
 0x607   : > { %22990 = vmatprep.subr.bf16.mxu1 %v22989_v56 }
 0x60a   : > { %22992 = vmatpush3.bf16.msra.mxu1 %v22989_v56  ;;  %v5995_v56 = vand.u32 4294901760, %v26749_v10 }
 0x60b   : > { %22994 = vmatprep.subr.bf16.mxu1 %v26340_v52 }
 0x60d   : > { %20012 = vmatmul.mubr.f32.vlgmr.msra.gmra.mrb[8].mxu1 %v26600_v25  ;;  %v5980_v25 = vand.u32 4294901760, %v4739_v18 }
 0x60e   : > { %22996 = vmatpush3.bf16.msra.mxu1 %v26340_v52  ;;  %20046 = vmatprep.mubr.f32.mxu1 %v5360_v48  ;;  %v4738_v48 = vld [vmem:[%s29808_s4 + $0x28] sm:$0xff] }
 0x60f   : > { %22998 = vmatprep.subr.bf16.mxu1 %v26344_v16  ;;  %v5977_v59 = vand.u32 4294901760, %v4738_v48  ;;  %v26822_v57 = vsub.f32 %v4739_v18, %v5980_v25 }
 0x611   : > { %v26820_v53 = vsub.f32 %v4738_v48, %v5977_v59 }
 0x612   : > { %23000 = vmatpush3.bf16.msra.mxu1 %v26344_v16 }
 0x613   : > { %23002 = vmatprep.subr.bf16.mxu1 %v26359_v37 }
 0x616   : > { %23004 = vmatpush3.bf16.msra.mxu1 %v26359_v37 }
 0x617   : > { %23006 = vmatprep.subr.bf16.mxu1 %v26375_v22 }
 0x61a   : > { %23008 = vmatpush3.bf16.msra.mxu1 %v26375_v22 }
 0x61b   : > { %23010 = vmatprep.subr.bf16.mxu1 %v26385_v23 }
 0x61e   : > { %23012 = vmatpush3.bf16.msra.mxu1 %v26385_v23 }
 0x61f   : > { %23014 = vmatprep.subr.bf16.mxu1 %v26402_v36 }
 0x622   : > { %23016 = vmatpush3.bf16.msra.mxu1 %v26402_v36 }
 0x623   : > { %23018 = vmatprep.subr.bf16.mxu1 %v26422_v28 }
 0x626   : > { %23020 = vmatpush3.bf16.msra.mxu1 %v26422_v28 }
 0x627   : > { %23022 = vmatprep.subr.bf16.mxu1 %v26448_v9 }
 0x62a   : > { %23024 = vmatpush3.bf16.msra.mxu1 %v26448_v9 }
 0x62b   : > { %23026 = vmatprep.subr.bf16.mxu1 %v23025_v43 }
 0x62d   : > { %20047 = vmatmul.mubr.f32.vlgmr.msra.gmra.mrb[8].mxu1 %v5370_v34  ;;  %v5974_v34 = vand.u32 4294901760, %v4737_v51 }
 0x62e   : > { %23028 = vmatpush3.bf16.msra.mxu1 %v23025_v43  ;;  %20081 = vmatprep.mubr.f32.mxu1 %v26597_v40 }
 0x62f   : > { %23030 = vmatprep.subr.bf16.mxu1 %v23029_v54 }
 0x632   : > { %23032 = vmatpush3.bf16.msra.mxu1 %v23029_v54 }
 0x633   : > { %23034 = vmatprep.subr.bf16.mxu1 %v23033_v30 }
 0x636   : > { %23036 = vmatpush3.bf16.msra.mxu1 %v23033_v30  ;;  %v26780_v30 = vpack.c.bf16 %v5995_v56, %v5992_v2 }
 0x637   : > { %23038 = vmatprep.subr.bf16.mxu1 %v23037_v12 }
 0x63a   : > { %23040 = vmatpush3.bf16.msra.mxu1 %v23037_v12 }
 0x63b   : > { %23042 = vmatprep.subr.bf16.mxu1 %v23041_v26 }
 0x63e   : > { %23044 = vmatpush3.bf16.msra.mxu1 %v23041_v26 }
 0x63f   : > { %23046 = vmatprep.subr.bf16.mxu1 %v23045_v35 }
 0x642   : > { %23048 = vmatpush3.bf16.msra.mxu1 %v23045_v35 }
 0x643   : > { %23050 = vmatprep.subr.bf16.mxu1 %v23049_v11 }
 0x646   : > { %23052 = vmatpush3.bf16.msra.mxu1 %v23049_v11  ;;  %v26818_v11 = vsub.f32 %v4737_v51, %v5974_v34 }
 0x647   : > { %23054 = vmatprep.subr.bf16.mxu1 %v23053_v55 }
 0x64a   : > { %23056 = vmatpush3.bf16.msra.mxu1 %v23053_v55  ;;  %v26824_v55 = vsub.f32 %v4740_v27, %v5983_v19  ;;  %v6088_v27 = vand.u32 4294901760, %v6087_v61 }
 0x64b   : > { %23058 = vmatprep.subr.bf16.mxu1 %v26340_v52 }
 0x64c   : > { %v29852_v51 = vand.u32 4294901760, %v26824_v55 }
 0x64d   : > { %20082 = vmatmul.mubr.f32.vlgmr.msra.gmra.mrb[8].mxu1 %v26595_v7 }
 0x64e   : > { %23060 = vmatpush3.bf16.msra.mxu1 %v26340_v52  ;;  %20116 = vmatprep.mubr.f32.mxu1 %v26597_v40  ;;  %v26686_v52 = vsub.f32 %v26593_v3, %v26680_v41  ;;  %v26739_v40 = vpack.c.bf16 %v5983_v19, %v5980_v25  ;;  %v26772_v3 = vand.u32 4294901760, %v26591_v6 }
 0x64f   : > { %23062 = vmatprep.subr.bf16.mxu1 %v26344_v16 }
 0x650   : > { %v6044_v17 = vand.u32 4294901760, %v26686_v52  ;;  %v26798_v44 = vsub.f32 %v26591_v6, %v26772_v3 }
 0x652   : > { %23064 = vmatpush3.bf16.msra.mxu1 %v26344_v16  ;;  %v4733_v16 = vld [vmem:[%s29808_s4] sm:$0xff]  ;;  %v6045_v32 = vsub.f32 %v26686_v52, %v6044_v17 }
 0x653   : > { %23066 = vmatprep.subr.bf16.mxu1 %v26359_v37 }
 0x654   : > { %v6046_v47 = vand.u32 4294901760, %v6045_v32  ;;  %v29851_v32 = vand.u32 4294901760, %v26822_v57 }
 0x656   : > { %23068 = vmatpush3.bf16.msra.mxu1 %v26359_v37  ;;  %v4734_v37 = vld [vmem:[%s29808_s4 + $0x8] sm:$0xff] }
 0x657   : > { %23070 = vmatprep.subr.bf16.mxu1 %v26375_v22 }
 0x65a   : > { %23072 = vmatpush3.bf16.msra.mxu1 %v26375_v22  ;;  %v5962_v22 = vand.u32 4294901760, %v4733_v16 }
 0x65b   : > { %23074 = vmatprep.subr.bf16.mxu1 %v26385_v23 }
 0x65c   : > { %v26762_v20 = vsub.f32 %v4733_v16, %v5962_v22  ;;  %v6054_v16 = vand.u32 4294901760, %v26798_v44 }
 0x65e   : > { %23076 = vmatpush3.bf16.msra.mxu1 %v26385_v23  ;;  %v5965_v23 = vand.u32 4294901760, %v4734_v37  ;;  %v6065_v43 = vand.u32 4294901760, %v26762_v20  ;;  %v6055_v48 = vsub.f32 %v26798_v44, %v6054_v16 }
 0x65f   : > { %23078 = vmatprep.subr.bf16.mxu1 %v26402_v36 }
 0x660   : > { %v26705_v8 = vpack.c.bf16 %v5965_v23, %v5962_v22  ;;  %v26764_v14 = vsub.f32 %v4734_v37, %v5965_v23  ;;  %v6066_v35 = vsub.f32 %v26762_v20, %v6065_v43  ;;  %v26832_v37 = vpack.c.bf16 %v6007_v21, %v6004_v42 }
 0x662   : > { %23080 = vmatpush3.bf16.msra.mxu1 %v26402_v36  ;;  %v5968_v36 = vand.u32 4294901760, %v4735_v0  ;;  %v6072_v54 = vand.u32 4294901760, %v26764_v14  ;;  %v6067_v22 = vand.u32 4294901760, %v6066_v35  ;;  %v6108_v35 = vsub.f32 %v26822_v57, %v29851_v32 }
 0x663   : > { %23082 = vmatprep.subr.bf16.mxu1 %v26422_v28 }
 0x664   : > { %v26792_v12 = vsub.f32 %v4735_v0, %v5968_v36  ;;  %v6073_v6 = vsub.f32 %v26764_v14, %v6072_v54  ;;  %v6109_v32 = vand.u32 4294901760, %v6108_v35 }
 0x666   : > { %23084 = vmatpush3.bf16.msra.mxu1 %v26422_v28  ;;  %v26718_v28 = vpack.c.bf16 %v5971_v60, %v5968_v36  ;;  %v6079_v63 = vand.u32 4294901760, %v26792_v12  ;;  %v6074_v23 = vand.u32 4294901760, %v6073_v6  ;;  %v6093_v36 = vand.u32 4294901760, %v26818_v11 }
 0x667   : > { %23086 = vmatprep.subr.bf16.mxu1 %v26448_v9  ;;  %v29853_v60 = vand.u32 4294901760, %v26820_v53  ;;  %v26873_v6 = vsub.f32 %v26749_v10, %v5995_v56 }
 0x668   : > { %v6080_v0 = vsub.f32 %v26792_v12, %v6079_v63  ;;  %v6094_v25 = vsub.f32 %v26818_v11, %v6093_v36 }
 0x669   : > { %v6101_v19 = vsub.f32 %v26820_v53, %v29853_v60 }
 0x66a   : > { %23088 = vmatpush3.bf16.msra.mxu1 %v26448_v9  ;;  %v26729_v9 = vpack.c.bf16 %v5977_v59, %v5974_v34  ;;  %v23121_v34 = vpack.c.bf16 %v6074_v23, %v6067_v22  ;;  %v26849_v59 = vsub.f32 %v4741_v24, %v5986_v33  ;;  %v6081_v18 = vand.u32 4294901760, %v6080_v0 }
 0x66b   : > { %23090 = vmatprep.subr.bf16.mxu1 %v26705_v8  ;;  %v6115_v24 = vsub.f32 %v26824_v55, %v29852_v51  ;;  %v6056_v22 = vand.u32 4294901760, %v6055_v48  ;;  %v6095_v0 = vand.u32 4294901760, %v6094_v25  ;;  %v6102_v61 = vand.u32 4294901760, %v6101_v19 }
 0x66c   : > { %v23125_v23 = vpack.c.bf16 %v6088_v27, %v6081_v18  ;;  %v26887_v48 = vsub.f32 %v26755_v58, %v5998_v45 }
 0x66d   : > { %20117 = vmatmul.mubr.f32.vlgmr.msra.gmra.mrb[8].mxu1 %v26595_v7  ;;  %v6001_v7 = vand.u32 4294901760, %v26760_v62  ;;  %v6116_v51 = vand.u32 4294901760, %v6115_v24  ;;  %v23129_v56 = vpack.c.bf16 %v6102_v61, %v6095_v0 }
 0x66e   : > { %23092 = vmatpush3.bf16.msra.mxu1 %v26705_v8  ;;  %20151 = vmatprep.mubr.f32.mxu1 %v6046_v47  ;;  %v26851_v47 = vsub.f32 %v4742_v46, %v5989_v29  ;;  %v6121_v46 = vand.u32 4294901760, %v26849_v59  ;;  %v26870_v29 = vsub.f32 %v26744_v49, %v5992_v2  ;;  %v6142_v2 = vand.u32 4294901760, %v26873_v6 }
 0x66f   : > { %23094 = vmatprep.subr.bf16.mxu1 %v26718_v28  ;;  %v26804_v26 = vpack.c.bf16 %v6001_v7, %v5998_v45  ;;  %v23133_v18 = vpack.c.bf16 %v6116_v51, %v6109_v32  ;;  %v6149_v58 = vand.u32 4294901760, %v26887_v48 }
 0x670   : > { %v6128_v33 = vand.u32 4294901760, %v26851_v47  ;;  %v6122_v60 = vsub.f32 %v26849_v59, %v6121_v46  ;;  %v6135_v10 = vand.u32 4294901760, %v26870_v29  ;;  %v6143_v35 = vsub.f32 %v26873_v6, %v6142_v2 }
 0x671   : > { %v6150_v24 = vsub.f32 %v26887_v48, %v6149_v58 }
 0x672   : > { %23096 = vmatpush3.bf16.msra.mxu1 %v26718_v28  ;;  %v6129_v49 = vsub.f32 %v26851_v47, %v6128_v33  ;;  %v6123_v27 = vand.u32 4294901760, %v6122_v60  ;;  %v6136_v19 = vsub.f32 %v26870_v29, %v6135_v10  ;;  %v6144_v51 = vand.u32 4294901760, %v6143_v35 }
 0x673   : > { %23098 = vmatprep.subr.bf16.mxu1 %v26729_v9  ;;  %v23161_v35 = vpack.c.bf16 %v26820_v53, %v26818_v11  ;;  %v17442_v11 = vld [vmem:[%s29809_s5 + $0x20] sm:$0xff] }
 0x674   : > { %v6130_v25 = vand.u32 4294901760, %v6129_v49  ;;  %v6137_v32 = vand.u32 4294901760, %v6136_v19  ;;  %v23157_v19 = vpack.c.bf16 %v26794_v5, %v26792_v12  ;;  %v23233_v5 = vpack.c.bf16 %v6128_v33, %v6121_v46  ;;  %v27052_v46 = vld [vmem:[%s29808_s4 + $0x118] sm:$0xff] }
 0x675   : > { %v7183_v33 = vand.u32 4294901760, %v27052_v46 }
 0x676   : > { %23100 = vmatpush3.bf16.msra.mxu1 %v26729_v9  ;;  %v23137_v60 = vpack.c.bf16 %v6130_v25, %v6123_v27  ;;  %v23153_v25 = vpack.c.bf16 %v26764_v14, %v26762_v20  ;;  %v29909_v20 = vand.u32 4294901760, %v26820_v53  ;;  %v6649_v53 = vsel %vm573_vm0, %v17442_v11, 0 }
 0x677   : > { %23102 = vmatprep.subr.bf16.mxu1 %v26739_v40 }
 0x678   : > { %v23225_v14 = vpack.c.bf16 %v29909_v20, %v6093_v36 }
 0x67a   : > { %23104 = vmatpush3.bf16.msra.mxu1 %v26739_v40 }
 0x67b   : > { %23106 = vmatprep.subr.bf16.mxu1 %v26767_v50 }
 0x67e   : > { %23108 = vmatpush3.bf16.msra.mxu1 %v26767_v50 }
 0x67f   : > { %23110 = vmatprep.subr.bf16.mxu1 %v26780_v30 }
 0x682   : > { %23112 = vmatpush3.bf16.msra.mxu1 %v26780_v30 }
 0x683   : > { %23114 = vmatprep.subr.bf16.mxu1 %v26804_v26 }
 0x686   : > { %23116 = vmatpush3.bf16.msra.mxu1 %v26804_v26 }
 0x687   : > { %23118 = vmatprep.subr.bf16.mxu1 %v26832_v37 }
 0x68a   : > { %23120 = vmatpush3.bf16.msra.mxu1 %v26832_v37 }
 0x68b   : > { %23122 = vmatprep.subr.bf16.mxu1 %v23121_v34 }
 0x68d   : > { %20152 = vmatmul.mubr.f32.vlgmr.msra.gmra.mrb[8].mxu1 %v6056_v22 }
 0x68e   : > { %23124 = vmatpush3.bf16.msra.mxu1 %v23121_v34  ;;  %20186 = vmatprep.mubr.f32.mxu1 %v26680_v41  ;;  %v26892_v34 = vsub.f32 %v26760_v62, %v6001_v7  ;;  %v26905_v62 = vsub.f32 %v26785_v31, %v6004_v42  ;;  %v26910_v7 = vsub.f32 %v26790_v15, %v6007_v21  ;;  %v6151_v21 = vand.u32 4294901760, %v6150_v24 }
 0x68f   : > { %23126 = vmatprep.subr.bf16.mxu1 %v23125_v23  ;;  %v23141_v15 = vpack.c.bf16 %v6144_v51, %v6137_v32  ;;  %v23169_v32 = vpack.c.bf16 %v26851_v47, %v26849_v59  ;;  %v23173_v51 = vpack.c.bf16 %v26873_v6, %v26870_v29  ;;  %v27061_v29 = vld [vmem:[%s29808_s4 + $0x120] sm:$0xff]  ;;  %v27066_v6 = vld [vmem:[%s29808_s4 + $0x128] sm:$0xff] }
 0x690   : > { %v6156_v45 = vand.u32 4294901760, %v26892_v34  ;;  %v6163_v31 = vand.u32 4294901760, %v26905_v62  ;;  %v6170_v42 = vand.u32 4294901760, %v26910_v7  ;;  %v23177_v24 = vpack.c.bf16 %v26892_v34, %v26887_v48  ;;  %v27079_v48 = vld [vmem:[%s29808_s4 + $0x130] sm:$0xff] }
 0x692   : > { %23128 = vmatpush3.bf16.msra.mxu1 %v23125_v23  ;;  %v6157_v22 = vsub.f32 %v26892_v34, %v6156_v45  ;;  %v6164_v0 = vsub.f32 %v26905_v62, %v6163_v31  ;;  %v6171_v61 = vsub.f32 %v26910_v7, %v6170_v42  ;;  %v27084_v34 = vld [vmem:[%s29808_s4 + $0x138] sm:$0xff] }
 0x693   : > { %23130 = vmatprep.subr.bf16.mxu1 %v23129_v56 }
 0x694   : > { %v6158_v23 = vand.u32 4294901760, %v6157_v22  ;;  %v6172_v27 = vand.u32 4294901760, %v6171_v61  ;;  %v23181_v22 = vpack.c.bf16 %v26910_v7, %v26905_v62  ;;  %v7195_v62 = vand.u32 4294901760, %v27084_v34  ;;  %v27099_v7 = vld [vmem:[%s29808_s4 + $0x140] sm:$0xff]  ;;  %v17455_v61 = vld [vmem:[%s29808_s4 + $0x158] sm:$0xff] }
 0x696   : > { %23132 = vmatpush3.bf16.msra.mxu1 %v23129_v56  ;;  %v23145_v49 = vpack.c.bf16 %v6158_v23, %v6151_v21  ;;  %v6165_v56 = vand.u32 4294901760, %v6164_v0  ;;  %v17454_v0 = vld [vmem:[%s29808_s4 + $0x150] sm:$0xff] }
 0x697   : > { %23134 = vmatprep.subr.bf16.mxu1 %v23133_v18 }
 0x69a   : > { %23136 = vmatpush3.bf16.msra.mxu1 %v23133_v18  ;;  %v23149_v18 = vpack.c.bf16 %v6172_v27, %v6165_v56  ;;  %v7207_v56 = vand.u32 4294901760, %v17455_v61 }
 0x69b   : > { %23138 = vmatprep.subr.bf16.mxu1 %v23137_v60 }
 0x69c   : > { %v27174_v11 = vsub.f32 %v17455_v61, %v7207_v56 }
 0x69e   : > { %23140 = vmatpush3.bf16.msra.mxu1 %v23137_v60  ;;  %v23165_v60 = vpack.c.bf16 %v26824_v55, %v26822_v57 }
 0x69f   : > { %23142 = vmatprep.subr.bf16.mxu1 %v23141_v15 }
 0x6a2   : > { %23144 = vmatpush3.bf16.msra.mxu1 %v23141_v15  ;;  %v7198_v15 = vand.u32 4294901760, %v27099_v7 }
 0x6a3   : > { %23146 = vmatprep.subr.bf16.mxu1 %v23145_v49 }
 0x6a6   : > { %23148 = vmatpush3.bf16.msra.mxu1 %v23145_v49  ;;  %v7204_v49 = vand.u32 4294901760, %v17454_v0 }
 0x6a7   : > { %23150 = vmatprep.subr.bf16.mxu1 %v23149_v18 }
 0x6a8   : > { %v27133_v27 = vpack.c.bf16 %v7207_v56, %v7204_v49 }
 0x6aa   : > { %23152 = vmatpush3.bf16.msra.mxu1 %v23149_v18  ;;  %v17456_v18 = vld [vmem:[%s29808_s4 + $0x160] sm:$0xff] }
 0x6ab   : > { %23154 = vmatprep.subr.bf16.mxu1 %v23153_v25 }
 0x6ad   : > { %20187 = vmatmul.mubr.f32.vlgmr.msra.gmra.mrb[8].mxu1 %v26772_v3 }
 0x6ae   : > { %23156 = vmatpush3.bf16.msra.mxu1 %v23153_v25  ;;  %20221 = vmatprep.mubr.f32.mxu1 %v26686_v52  ;;  %v23217_v52 = vpack.c.bf16 %v6072_v54, %v6065_v43  ;;  %v29910_v43 = vand.u32 4294901760, %v26822_v57  ;;  %v29911_v54 = vand.u32 4294901760, %v26824_v55  ;;  %v17457_v25 = vld [vmem:[%s29808_s4 + $0x168] sm:$0xff] }
 0x6af   : > { %23158 = vmatprep.subr.bf16.mxu1 %v23157_v19 }
 0x6b0   : > { %v23229_v12 = vpack.c.bf16 %v29911_v54, %v29910_v43 }
 0x6b2   : > { %23160 = vmatpush3.bf16.msra.mxu1 %v23157_v19  ;;  %v7210_v19 = vand.u32 4294901760, %v17456_v18 }
 0x6b3   : > { %23162 = vmatprep.subr.bf16.mxu1 %v23161_v35 }
 0x6b6   : > { %23164 = vmatpush3.bf16.msra.mxu1 %v23161_v35  ;;  %v7213_v35 = vand.u32 4294901760, %v17457_v25 }
 0x6b7   : > { %23166 = vmatprep.subr.bf16.mxu1 %v23165_v60 }
 0x6ba   : > { %23168 = vmatpush3.bf16.msra.mxu1 %v23165_v60  ;;  %v27143_v60 = vpack.c.bf16 %v7213_v35, %v7210_v19 }
 0x6bb   : > { %23170 = vmatprep.subr.bf16.mxu1 %v23169_v32 }
 0x6be   : > { %23172 = vmatpush3.bf16.msra.mxu1 %v23169_v32 }
 0x6bf   : > { %23174 = vmatprep.subr.bf16.mxu1 %v23173_v51 }
 0x6c2   : > { %23176 = vmatpush3.bf16.msra.mxu1 %v23173_v51 }
 0x6c3   : > { %23178 = vmatprep.subr.bf16.mxu1 %v23177_v24 }
 0x6c6   : > { %23180 = vmatpush3.bf16.msra.mxu1 %v23177_v24  ;;  %v17458_v24 = vld [vmem:[%s29808_s4 + $0x170] sm:$0xff] }
 0x6c7   : > { %23182 = vmatprep.subr.bf16.mxu1 %v23181_v22 }
 0x6ca   : > { %23184 = vmatpush3.bf16.msra.mxu1 %v23181_v22  ;;  %v17459_v22 = vld [vmem:[%s29808_s4 + $0x178] sm:$0xff] }
 0x6cb   : > { %23186 = vmatprep.subr.bf16.mxu1 %v26705_v8 }
 0x6cd   : > { %20222 = vmatmul.mubr.f32.vlgmr.msra.gmra.mrb[8].mxu1 %v26798_v44  ;;  %v23237_v44 = vpack.c.bf16 %v6142_v2, %v6135_v10  ;;  %v7186_v10 = vand.u32 4294901760, %v27061_v29  ;;  %v7189_v2 = vand.u32 4294901760, %v27066_v6 }
 0x6ce   : > { %23188 = vmatpush3.bf16.msra.mxu1 %v26705_v8  ;;  %20256 = vmatprep.mubr.f32.mxu1 %v6044_v17  ;;  %v23221_v17 = vpack.c.bf16 %v6086_v4, %v6079_v63  ;;  %v23241_v63 = vpack.c.bf16 %v6156_v45, %v6149_v58  ;;  %v23245_v4 = vpack.c.bf16 %v6170_v42, %v6163_v31  ;;  %v7192_v45 = vand.u32 4294901760, %v27079_v48  ;;  %v27104_v31 = vld [vmem:[%s29808_s4 + $0x148] sm:$0xff] }
 0x6cf   : > { %23190 = vmatprep.subr.bf16.mxu1 %v26718_v28  ;;  %v27092_v58 = vpack.c.bf16 %v7189_v2, %v7186_v10  ;;  %v7201_v21 = vand.u32 4294901760, %v27104_v31 }
 0x6d0   : > { %v27112_v42 = vpack.c.bf16 %v7195_v62, %v7192_v45 }
 0x6d1   : > { %v27122_v23 = vpack.c.bf16 %v7201_v21, %v7198_v15 }
 0x6d2   : > { %23192 = vmatpush3.bf16.msra.mxu1 %v26718_v28 }
 0x6d3   : > { %23194 = vmatprep.subr.bf16.mxu1 %v26729_v9 }
 0x6d6   : > { %23196 = vmatpush3.bf16.msra.mxu1 %v26729_v9 }
 0x6d7   : > { %23198 = vmatprep.subr.bf16.mxu1 %v26739_v40 }
 0x6da   : > { %23200 = vmatpush3.bf16.msra.mxu1 %v26739_v40 }
 0x6db   : > { %23202 = vmatprep.subr.bf16.mxu1 %v26767_v50 }
 0x6de   : > { %23204 = vmatpush3.bf16.msra.mxu1 %v26767_v50 }
 0x6df   : > { %23206 = vmatprep.subr.bf16.mxu1 %v26780_v30 }
 0x6e2   : > { %23208 = vmatpush3.bf16.msra.mxu1 %v26780_v30 }
 0x6e3   : > { %23210 = vmatprep.subr.bf16.mxu1 %v26804_v26 }
 0x6e6   : > { %23212 = vmatpush3.bf16.msra.mxu1 %v26804_v26 }
 0x6e7   : > { %23214 = vmatprep.subr.bf16.mxu1 %v26832_v37 }
 0x6ea   : > { %23216 = vmatpush3.bf16.msra.mxu1 %v26832_v37 }
 0x6eb   : > { %23218 = vmatprep.subr.bf16.mxu1 %v23217_v52 }
 0x6ed   : > { %20257 = vmatmul.mubr.f32.vlgmr.msra.gmra.mrb[8].mxu1 %v6054_v16 }
 0x6ee   : > { %23220 = vmatpush3.bf16.msra.mxu1 %v23217_v52  ;;  %20291 = vmatprep.mubr.f32.mxu1 %v26680_v41  ;;  %v7216_v52 = vand.u32 4294901760, %v17458_v24 }
 0x6ef   : > { %23222 = vmatprep.subr.bf16.mxu1 %v23221_v17 }
 0x6f2   : > { %23224 = vmatpush3.bf16.msra.mxu1 %v23221_v17  ;;  %v7219_v17 = vand.u32 4294901760, %v17459_v22 }
 0x6f3   : > { %23226 = vmatprep.subr.bf16.mxu1 %v23225_v14 }
 0x6f4   : > { %v27159_v43 = vpack.c.bf16 %v7219_v17, %v7216_v52 }
 0x6f6   : > { %23228 = vmatpush3.bf16.msra.mxu1 %v23225_v14 }
 0x6f7   : > { %23230 = vmatprep.subr.bf16.mxu1 %v23229_v12 }
 0x6fa   : > { %23232 = vmatpush3.bf16.msra.mxu1 %v23229_v12 }
 0x6fb   : > { %23234 = vmatprep.subr.bf16.mxu1 %v23233_v5 }
 0x6fe   : > { %23236 = vmatpush3.bf16.msra.mxu1 %v23233_v5 }
 0x6ff   : > { %23238 = vmatprep.subr.bf16.mxu1 %v23237_v44 }
 0x702   : > { %23240 = vmatpush3.bf16.msra.mxu1 %v23237_v44 }
 0x703   : > { %23242 = vmatprep.subr.bf16.mxu1 %v23241_v63 }
 0x706   : > { %23244 = vmatpush3.bf16.msra.mxu1 %v23241_v63 }
 0x707   : > { %23246 = vmatprep.subr.bf16.mxu1 %v23245_v4 }
 0x70a   : > { %23248 = vmatpush3.bf16.msra.mxu1 %v23245_v4  ;;  %v27172_v4 = vsub.f32 %v17454_v0, %v7204_v49 }
 0x70b   : > { %23250 = vmatprep.subr.bf16.mxu1 %v26705_v8 }
 0x70d   : > { %20292 = vmatmul.mubr.f32.vlgmr.msra.gmra.mrb[8].mxu1 %v26772_v3 }
 0x70e   : > { %23252 = vmatpush3.bf16.msra.mxu1 %v26705_v8  ;;  %20326 = vmatprep.mubr.f32.mxu1 %v26680_v41  ;;  %v17443_v41 = vld [vmem:[%s29809_s5 + $0x28] sm:$0xff]  ;;  %v6721_v8 = vand.u32 4294901760, %v6649_v53 }
 0x70f   : > { %23254 = vmatprep.subr.bf16.mxu1 %v26718_v28 }
 0x710   : > { %v6722_v55 = vsub.f32 %v6649_v53, %v6721_v8  ;;  %v7347_v53 = vand.u32 4294901760, %v27172_v4 }
 0x712   : > { %23256 = vmatpush3.bf16.msra.mxu1 %v26718_v28  ;;  %v6652_v28 = vsel %vm573_vm0, %v17443_v41, 0  ;;  %v6723_v16 = vand.u32 4294901760, %v6722_v55  ;;  %v7354_v41 = vand.u32 4294901760, %v27174_v11 }
 0x713   : > { %23258 = vmatprep.subr.bf16.mxu1 %v26729_v9  ;;  %v6731_v57 = vand.u32 4294901760, %v6652_v28 }
 0x716   : > { %23260 = vmatpush3.bf16.msra.mxu1 %v26729_v9  ;;  %v6732_v9 = vsub.f32 %v6652_v28, %v6731_v57  ;;  %v7355_v28 = vsub.f32 %v27174_v11, %v7354_v41 }
 0x717   : > { %23262 = vmatprep.subr.bf16.mxu1 %v26739_v40 }
 0x718   : > { %v6733_v36 = vand.u32 4294901760, %v6732_v9 }
 0x71a   : > { %23264 = vmatpush3.bf16.msra.mxu1 %v26739_v40  ;;  %v6724_v40 = vsub.f32 %v6722_v55, %v6723_v16  ;;  %v6734_v59 = vsub.f32 %v6732_v9, %v6733_v36 }
 0x71b   : > { %23266 = vmatprep.subr.bf16.mxu1 %v26767_v50 }
 0x71c   : > { %v6725_v47 = vand.u32 4294901760, %v6724_v40 }
 0x71e   : > { %23268 = vmatpush3.bf16.msra.mxu1 %v26767_v50  ;;  %v6735_v50 = vand.u32 4294901760, %v6734_v59 }
 0x71f   : > { %23270 = vmatprep.subr.bf16.mxu1 %v26780_v30 }
 0x722   : > { %23272 = vmatpush3.bf16.msra.mxu1 %v26780_v30 }
 0x723   : > { %23274 = vmatprep.subr.bf16.mxu1 %v26804_v26 }
 0x726   : > { %23276 = vmatpush3.bf16.msra.mxu1 %v26804_v26 }
 0x727   : > { %23278 = vmatprep.subr.bf16.mxu1 %v26832_v37 }
 0x72a   : > { %23280 = vmatpush3.bf16.msra.mxu1 %v26832_v37  ;;  %v27047_v37 = vld [vmem:[%s29808_s4 + $0x110] sm:$0xff] }
 0x72b   : > { %23282 = vmatprep.subr.bf16.mxu1 %v26272_v13 }
 0x72d   : > { %20327 = vmatmul.mubr.f32.vlgmr.msra.gmra.mrb[8].mxu1 %v26772_v3  ;;  %v17444_v3 = vld [vmem:[%s29808_s4 + $0x100] sm:$0xff] }
 0x72e   : > { %23284 = vmatpush3.bf16.msra.mxu1 %v26272_v13  ;;  %20333 = vmatprep.mubr.f32.mxu1 %v6725_v47 }
 0x72f   : > { %23286 = vmatprep.subr.bf16.mxu1 %v26281_v1 }
 0x731   : > { %20334 = vmatmul.mubr.f32.vlgmr.msra.gmra.mrb[10].mxu1 %v6735_v50 }
 0x732   : > { %23288 = vmatpush3.bf16.msra.mxu1 %v26281_v1  ;;  %20340 = vmatprep.mubr.f32.mxu1 %v6721_v8  ;;  %v17445_v1 = vld [vmem:[%s29808_s4 + $0x108] sm:$0xff] }
 0x733   : > { %23290 = vmatprep.subr.bf16.mxu1 %v26274_v38  ;;  %v7177_v30 = vand.u32 4294901760, %v17445_v1 }
 0x735   : > { %v27147_v51 = vsub.f32 %v17445_v1, %v7177_v30  ;;  %v27200_v1 = vsub.f32 %v17459_v22, %v7219_v17  ;;  %v27220_v22 = vpack.c.bf16 %v27174_v11, %v27172_v4 }
 0x737   : > { %v7284_v14 = vand.u32 4294901760, %v27147_v51  ;;  %v29854_v61 = vand.u32 4294901760, %v27200_v1 }
 0x739   : > { %20341 = vmatmul.mubr.f32.vlgmr.msra.gmra.mrb[10].mxu1 %v6731_v57  ;;  %v7285_v12 = vsub.f32 %v27147_v51, %v7284_v14 }
 0x73a   : > { %23292 = vmatpush3.bf16.msra.mxu1 %v26274_v38  ;;  %20347 = vmatprep.mubr.f32.mxu1 %v6722_v55  ;;  %v7174_v38 = vand.u32 4294901760, %v17444_v3  ;;  %v27186_v55 = vsub.f32 %v17457_v25, %v7213_v35 }
 0x73b   : > { %23294 = vmatprep.subr.bf16.mxu1 %v26272_v13  ;;  %v7286_v44 = vand.u32 4294901760, %v7285_v12  ;;  %v27238_v12 = vsub.f32 %v27052_v46, %v7183_v33 }
 0x73c   : > { %v27042_v26 = vpack.c.bf16 %v7177_v30, %v7174_v38  ;;  %v27145_v32 = vsub.f32 %v17444_v3, %v7174_v38  ;;  %v29856_v40 = vand.u32 4294901760, %v27186_v55  ;;  %v27198_v3 = vsub.f32 %v17458_v24, %v7216_v52 }
 0x73e   : > { %v7277_v20 = vand.u32 4294901760, %v27145_v32  ;;  %v7369_v50 = vsub.f32 %v27186_v55, %v29856_v40  ;;  %v29855_v0 = vand.u32 4294901760, %v27198_v3  ;;  %v27216_v24 = vpack.c.bf16 %v27147_v51, %v27145_v32 }
 0x73f   : > { %v27228_v17 = vpack.c.bf16 %v27200_v1, %v27198_v3 }
 0x740   : > { %v7278_v54 = vsub.f32 %v27145_v32, %v7277_v20  ;;  %v7370_v30 = vand.u32 4294901760, %v7369_v50  ;;  %v7376_v56 = vsub.f32 %v27198_v3, %v29855_v0 }
 0x741   : > { %20348 = vmatmul.mubr.f32.vlgmr.msra.gmra.mrb[10].mxu1 %v6732_v9 }
 0x742   : > { %23296 = vmatpush3.bf16.msra.mxu1 %v26272_v13  ;;  %20354 = vmatprep.mubr.f32.mxu1 %v6723_v16  ;;  %v7279_v5 = vand.u32 4294901760, %v7278_v54  ;;  %v7356_v16 = vand.u32 4294901760, %v7355_v28  ;;  %v7377_v25 = vand.u32 4294901760, %v7376_v56  ;;  %v27250_v28 = vsub.f32 %v27066_v6, %v7189_v2 }
 0x743   : > { %23298 = vmatprep.subr.bf16.mxu1 %v26278_v39  ;;  %v27267_v6 = vsub.f32 %v27079_v48, %v7192_v45 }
 0x744   : > { %v27169_v63 = vpack.c.bf16 %v7286_v44, %v7279_v5  ;;  %v7298_v44 = vand.u32 4294901760, %v27238_v12 }
 0x749   : > { %20355 = vmatmul.mubr.f32.vlgmr.msra.gmra.mrb[10].mxu1 %v6733_v36 }
 0x74a   : > { %23300 = vmatpush3.bf16.msra.mxu1 %v26278_v39  ;;  %20361 = vmatprep.mubr.f32.mxu1 %v6721_v8  ;;  %v7180_v39 = vand.u32 4294901760, %v27047_v37 }
 0x74b   : > { %23302 = vmatprep.subr.bf16.mxu1 %v26272_v13 }
 0x74c   : > { %v27233_v54 = vsub.f32 %v27047_v37, %v7180_v39 }
 0x74e   : > { %v7291_v5 = vand.u32 4294901760, %v27233_v54 }
 0x750   : > { %v7292_v46 = vsub.f32 %v27233_v54, %v7291_v5 }
 0x751   : > { %20362 = vmatmul.mubr.f32.vlgmr.msra.gmra.mrb[10].mxu1 %v6731_v57 }
 0x752   : > { %23304 = vmatpush3.bf16.msra.mxu1 %v26272_v13  ;;  %20368 = vmatprep.mubr.f32.mxu1 %v6721_v8  ;;  %v27072_v13 = vpack.c.bf16 %v7183_v33, %v7180_v39  ;;  %v7348_v8 = vsub.f32 %v27172_v4, %v7347_v53  ;;  %v7299_v33 = vsub.f32 %v27238_v12, %v7298_v44 }
 0x753   : > { %23306 = vmatprep.subr.bf16.mxu1 %v27042_v26 }
 0x754   : > { %v7349_v9 = vand.u32 4294901760, %v7348_v8  ;;  %v27245_v8 = vsub.f32 %v27061_v29, %v7186_v10  ;;  %v7312_v10 = vand.u32 4294901760, %v27250_v28  ;;  %v7300_v56 = vand.u32 4294901760, %v7299_v33 }
 0x756   : > { %v27190_v59 = vpack.c.bf16 %v7356_v16, %v7349_v9  ;;  %v7305_v29 = vand.u32 4294901760, %v27245_v8  ;;  %v7313_v45 = vsub.f32 %v27250_v28, %v7312_v10 }
 0x758   : > { %v7306_v48 = vsub.f32 %v27245_v8, %v7305_v29  ;;  %v7314_v0 = vand.u32 4294901760, %v7313_v45  ;;  %v23441_v32 = vpack.c.bf16 %v7312_v10, %v7305_v29 }
 0x759   : > { %20369 = vmatmul.mubr.f32.vlgmr.msra.gmra.mrb[10].mxu1 %v6731_v57  ;;  %v27184_v57 = vsub.f32 %v17456_v18, %v7210_v19  ;;  %v7383_v18 = vsub.f32 %v27200_v1, %v29854_v61 }
 0x75a   : > { %23308 = vmatpush3.bf16.msra.mxu1 %v27042_v26  ;;  %v7307_v61 = vand.u32 4294901760, %v7306_v48 }
 0x75b   : > { %23310 = vmatprep.subr.bf16.mxu1 %v27072_v13  ;;  %v29857_v36 = vand.u32 4294901760, %v27184_v57  ;;  %v7384_v19 = vand.u32 4294901760, %v7383_v18  ;;  %v27224_v52 = vpack.c.bf16 %v27186_v55, %v27184_v57 }
 0x75d   : > { %v7362_v47 = vsub.f32 %v27184_v57, %v29857_v36  ;;  %v27212_v35 = vpack.c.bf16 %v7384_v19, %v7377_v25  ;;  %v27296_v19 = vsub.f32 %v27099_v7, %v7198_v15 }
 0x75e   : > { %23312 = vmatpush3.bf16.msra.mxu1 %v27072_v13 }
 0x75f   : > { %23314 = vmatprep.subr.bf16.mxu1 %v27092_v58  ;;  %v7363_v38 = vand.u32 4294901760, %v7362_v47  ;;  %v27275_v47 = vsub.f32 %v27084_v34, %v7195_v62  ;;  %v7319_v34 = vand.u32 4294901760, %v27267_v6 }
 0x761   : > { %v27204_v49 = vpack.c.bf16 %v7370_v30, %v7363_v38  ;;  %v7293_v30 = vand.u32 4294901760, %v7292_v46  ;;  %v7326_v25 = vand.u32 4294901760, %v27275_v47  ;;  %v7320_v40 = vsub.f32 %v27267_v6, %v7319_v34 }
 0x762   : > { %23316 = vmatpush3.bf16.msra.mxu1 %v27092_v58 }
 0x763   : > { %23318 = vmatprep.subr.bf16.mxu1 %v27112_v42  ;;  %v23341_v46 = vpack.c.bf16 %v7300_v56, %v7293_v30  ;;  %v7327_v7 = vsub.f32 %v27275_v47, %v7326_v25  ;;  %v7321_v30 = vand.u32 4294901760, %v7320_v40  ;;  %v23373_v40 = vpack.c.bf16 %v27238_v12, %v27233_v54 }
 0x764   : > { %v23445_v51 = vpack.c.bf16 %v7326_v25, %v7319_v34  ;;  %v29915_v54 = vand.u32 4294901760, %v27200_v1 }
 0x765   : > { %v7328_v56 = vand.u32 4294901760, %v7327_v7 }
 0x766   : > { %23320 = vmatpush3.bf16.msra.mxu1 %v27112_v42 }
 0x767   : > { %23322 = vmatprep.subr.bf16.mxu1 %v27122_v23 }
 0x76a   : > { %23324 = vmatpush3.bf16.msra.mxu1 %v27122_v23 }
 0x76b   : > { %23326 = vmatprep.subr.bf16.mxu1 %v27133_v27 }
 0x76e   : > { %23328 = vmatpush3.bf16.msra.mxu1 %v27133_v27 }
 0x76f   : > { %23330 = vmatprep.subr.bf16.mxu1 %v27143_v60 }
 0x772   : > { %23332 = vmatpush3.bf16.msra.mxu1 %v27143_v60 }
 0x773   : > { %23334 = vmatprep.subr.bf16.mxu1 %v27159_v43 }
 0x776   : > { %23336 = vmatpush3.bf16.msra.mxu1 %v27159_v43 }
 0x777   : > { %23338 = vmatprep.subr.bf16.mxu1 %v27169_v63 }
 0x82c   : > { %v20370_v37 = vpop.f32.mrb[10].mxu1 }
 0x82d   : > { %v27252_v39 = vand.u32 4294901760, %v20370_v37  ;;  %v7146_v9 = vpop.f32.mrb[11].mxu1 }
 0x82e   : > { %v27260_v16 = vand.u32 4294901760, %v7146_v9 }
 0x82f   : > { %v27270_v2 = vsub.f32 %v20370_v37, %v27252_v39  ;;  %v27301_v37 = vsub.f32 %v27104_v31, %v7201_v21  ;;  %v7333_v31 = vand.u32 4294901760, %v27296_v19  ;;  %v23345_v21 = vpack.c.bf16 %v7314_v0, %v7307_v61 }
 0x830   : > { %v27278_v50 = vsub.f32 %v7146_v9, %v27260_v16  ;;  %v23381_v0 = vpack.c.bf16 %v27275_v47, %v27267_v6 }
 0x831   : > { %v7266_v38 = vand.u32 4294901760, %v27270_v2  ;;  %v7340_v15 = vand.u32 4294901760, %v27301_v37  ;;  %v7334_v48 = vsub.f32 %v27296_v19, %v7333_v31  ;;  %v23385_v61 = vpack.c.bf16 %v27301_v37, %v27296_v19  ;;  %v8354_v19 = vld [vmem:[#allocation5 + $0x8] sm:$0xff] }
 0x832   : > { %v7256_v18 = vand.u32 4294901760, %v27278_v50 }
 0x833   : > { %v7267_v62 = vsub.f32 %v27270_v2, %v7266_v38  ;;  %v7341_v45 = vsub.f32 %v27301_v37, %v7340_v15  ;;  %v8356_v37 = vsel %vm573_vm0, %v8354_v19, 0 }
 0x834   : > { %v7257_v9 = vsub.f32 %v27278_v50, %v7256_v18 }
 0x835   : > { %v7268_v36 = vand.u32 4294901760, %v7267_v62  ;;  %v23349_v62 = vpack.c.bf16 %v7328_v56, %v7321_v30  ;;  %v17462_v30 = vld [vmem:[%s29811_s7 + $0x88] sm:$0xff]  ;;  %v17463_v56 = vld [vmem:[%s29811_s7 + $0x90] sm:$0xff] }
 0x836   : > { %v7258_v33 = vand.u32 4294901760, %v7257_v9  ;;  %v7342_v9 = vand.u32 4294901760, %v7341_v45  ;;  %v8838_v45 = vand.u32 4294901760, %v17462_v30 }
 0x838   : > { %20403 = vmatprep.mubr.f32.mxu1 %v7258_v33 }
 0x839   : > { %20404 = vmatmul.mubr.f32.vlgmr.msra.gmra.mrb[8].mxu1 %v7268_v36  ;;  %v7335_v36 = vand.u32 4294901760, %v7334_v48 }
 0x83a   : > { %23340 = vmatpush3.bf16.msra.mxu1 %v27169_v63  ;;  %20438 = vmatprep.mubr.f32.mxu1 %v27260_v16 }
 0x83b   : > { %23342 = vmatprep.subr.bf16.mxu1 %v23341_v46  ;;  %v23353_v63 = vpack.c.bf16 %v7342_v9, %v7335_v36  ;;  %v8841_v36 = vand.u32 4294901760, %v17463_v56  ;;  %v17465_v9 = vld [vmem:[%s29811_s7 + $0xa0] sm:$0xff] }
 0x83e   : > { %23344 = vmatpush3.bf16.msra.mxu1 %v23341_v46  ;;  %v8425_v46 = vand.u32 4294901760, %v8356_v37 }
 0x83f   : > { %23346 = vmatprep.subr.bf16.mxu1 %v23345_v21 }
 0x840   : > { %v8426_v33 = vsub.f32 %v8356_v37, %v8425_v46 }
 0x842   : > { %23348 = vmatpush3.bf16.msra.mxu1 %v23345_v21  ;;  %v8427_v7 = vand.u32 4294901760, %v8426_v33  ;;  %v17461_v21 = vld [vmem:[%s29811_s7 + $0x80] sm:$0xff] }
 0x843   : > { %23350 = vmatprep.subr.bf16.mxu1 %v23349_v62  ;;  %v8835_v48 = vand.u32 4294901760, %v17461_v21 }
 0x846   : > { %23352 = vmatpush3.bf16.msra.mxu1 %v23349_v62  ;;  %v17464_v62 = vld [vmem:[%s29811_s7 + $0x98] sm:$0xff] }
 0x847   : > { %23354 = vmatprep.subr.bf16.mxu1 %v23353_v63 }
 0x84a   : > { %23356 = vmatpush3.bf16.msra.mxu1 %v23353_v63  ;;  %v17466_v63 = vld [vmem:[%s29811_s7 + $0xa8] sm:$0xff] }
 0x84b   : > { %23358 = vmatprep.subr.bf16.mxu1 %v27190_v59 }
 0x84e   : > { %23360 = vmatpush3.bf16.msra.mxu1 %v27190_v59  ;;  %v23377_v59 = vpack.c.bf16 %v27250_v28, %v27245_v8 }
 0x84f   : > { %23362 = vmatprep.subr.bf16.mxu1 %v27204_v49 }
 0x852   : > { %23364 = vmatpush3.bf16.msra.mxu1 %v27204_v49  ;;  %v23433_v49 = vpack.c.bf16 %v7284_v14, %v7277_v20  ;;  %v23449_v20 = vpack.c.bf16 %v7340_v15, %v7333_v31  ;;  %v23453_v14 = vpack.c.bf16 %v7354_v41, %v7347_v53  ;;  %v8428_v31 = vsub.f32 %v8426_v33, %v8427_v7 }
 0x853   : > { %23366 = vmatprep.subr.bf16.mxu1 %v27212_v35 }
 0x854   : > { %v8429_v15 = vand.u32 4294901760, %v8428_v31  ;;  %v17476_v31 = vld [vmem:[%s29811_s7 + $0xf8] sm:$0xff] }
 0x856   : > { %23368 = vmatpush3.bf16.msra.mxu1 %v27212_v35  ;;  %v23437_v35 = vpack.c.bf16 %v7298_v44, %v7291_v5 }
 0x857   : > { %23370 = vmatprep.subr.bf16.mxu1 %v27216_v24 }
 0x859   : > { %20439 = vmatmul.mubr.f32.vlgmr.msra.gmra.mrb[8].mxu1 %v27252_v39 }
 0x85a   : > { %23372 = vmatpush3.bf16.msra.mxu1 %v27216_v24  ;;  %20473 = vmatprep.mubr.f32.mxu1 %v27278_v50  ;;  %v29912_v24 = vand.u32 4294901760, %v27184_v57 }
 0x85b   : > { %23374 = vmatprep.subr.bf16.mxu1 %v23373_v40 }
 0x85e   : > { %23376 = vmatpush3.bf16.msra.mxu1 %v23373_v40  ;;  %v8844_v40 = vand.u32 4294901760, %v17464_v62 }
 0x85f   : > { %23378 = vmatprep.subr.bf16.mxu1 %v23377_v59 }
 0x862   : > { %23380 = vmatpush3.bf16.msra.mxu1 %v23377_v59  ;;  %v8847_v59 = vand.u32 4294901760, %v17465_v9 }
 0x863   : > { %23382 = vmatprep.subr.bf16.mxu1 %v23381_v0 }
 0x866   : > { %23384 = vmatpush3.bf16.msra.mxu1 %v23381_v0  ;;  %v8850_v0 = vand.u32 4294901760, %v17466_v63 }
 0x867   : > { %23386 = vmatprep.subr.bf16.mxu1 %v23385_v61 }
 0x86a   : > { %23388 = vmatpush3.bf16.msra.mxu1 %v23385_v61  ;;  %v27504_v61 = vsub.f32 %v17461_v21, %v8835_v48  ;;  %v8880_v21 = vand.u32 4294901760, %v17476_v31 }
 0x86b   : > { %23390 = vmatprep.subr.bf16.mxu1 %v27220_v22 }
 0x86e   : > { %23392 = vmatpush3.bf16.msra.mxu1 %v27220_v22  ;;  %v29913_v22 = vand.u32 4294901760, %v27186_v55 }
 0x86f   : > { %23394 = vmatprep.subr.bf16.mxu1 %v27224_v52 }
 0x872   : > { %23396 = vmatpush3.bf16.msra.mxu1 %v27224_v52  ;;  %v23457_v52 = vpack.c.bf16 %v29913_v22, %v29912_v24  ;;  %v27523_v22 = vpack.c.bf16 %v8844_v40, %v8841_v36 }
 0x873   : > { %23398 = vmatprep.subr.bf16.mxu1 %v27228_v17 }
 0x876   : > { %23400 = vmatpush3.bf16.msra.mxu1 %v27228_v17  ;;  %v29914_v17 = vand.u32 4294901760, %v27198_v3 }
 0x877   : > { %23402 = vmatprep.subr.bf16.mxu1 %v27042_v26 }
 0x878   : > { %v23461_v12 = vpack.c.bf16 %v29915_v54, %v29914_v17  ;;  %v27527_v17 = vsub.f32 %v17466_v63, %v8850_v0 }
 0x879   : > { %20474 = vmatmul.mubr.f32.vlgmr.msra.gmra.mrb[8].mxu1 %v27270_v2 }
 0x87a   : > { %23404 = vmatpush3.bf16.msra.mxu1 %v27042_v26  ;;  %20508 = vmatprep.mubr.f32.mxu1 %v7256_v18 }
 0x87b   : > { %23406 = vmatprep.subr.bf16.mxu1 %v27072_v13 }
 0x87e   : > { %23408 = vmatpush3.bf16.msra.mxu1 %v27072_v13 }
 0x87f   : > { %23410 = vmatprep.subr.bf16.mxu1 %v27092_v58 }
 0x882   : > { %23412 = vmatpush3.bf16.msra.mxu1 %v27092_v58 }
 0x883   : > { %23414 = vmatprep.subr.bf16.mxu1 %v27112_v42 }
 0x886   : > { %23416 = vmatpush3.bf16.msra.mxu1 %v27112_v42 }
 0x887   : > { %23418 = vmatprep.subr.bf16.mxu1 %v27122_v23 }
 0x88a   : > { %23420 = vmatpush3.bf16.msra.mxu1 %v27122_v23 }
 0x88b   : > { %23422 = vmatprep.subr.bf16.mxu1 %v27133_v27 }
 0x88e   : > { %23424 = vmatpush3.bf16.msra.mxu1 %v27133_v27 }
 0x88f   : > { %23426 = vmatprep.subr.bf16.mxu1 %v27143_v60 }
 0x892   : > { %23428 = vmatpush3.bf16.msra.mxu1 %v27143_v60 }
 0x893   : > { %23430 = vmatprep.subr.bf16.mxu1 %v27159_v43 }
 0x896   : > { %23432 = vmatpush3.bf16.msra.mxu1 %v27159_v43 }
 0x897   : > { %23434 = vmatprep.subr.bf16.mxu1 %v23433_v49 }
 0x899   : > { %20509 = vmatmul.mubr.f32.vlgmr.msra.gmra.mrb[8].mxu1 %v7266_v38 }
 0x89a   : > { %23436 = vmatpush3.bf16.msra.mxu1 %v23433_v49  ;;  %20543 = vmatprep.mubr.f32.mxu1 %v27260_v16  ;;  %v27506_v49 = vsub.f32 %v17462_v30, %v8838_v45 }
 0x89b   : > { %23438 = vmatprep.subr.bf16.mxu1 %v23437_v35 }
 0x89c   : > { %v23582_v24 = vpack.c.bf16 %v27506_v49, %v27504_v61 }
 0x89e   : > { %23440 = vmatpush3.bf16.msra.mxu1 %v23437_v35  ;;  %v27508_v35 = vsub.f32 %v17463_v56, %v8841_v36  ;;  %v27609_v56 = vsub.f32 %v17476_v31, %v8880_v21  ;;  %v8935_v36 = vand.u32 4294901760, %v27506_v49 }
 0x89f   : > { %23442 = vmatprep.subr.bf16.mxu1 %v23441_v32 }
 0x8a2   : > { %23444 = vmatpush3.bf16.msra.mxu1 %v23441_v32  ;;  %v27510_v32 = vpack.c.bf16 %v8838_v45, %v8835_v48 }
 0x8a3   : > { %23446 = vmatprep.subr.bf16.mxu1 %v23445_v51 }
 0x8a6   : > { %23448 = vmatpush3.bf16.msra.mxu1 %v23445_v51  ;;  %v27512_v51 = vsub.f32 %v17464_v62, %v8844_v40  ;;  %v8928_v62 = vand.u32 4294901760, %v27504_v61  ;;  %v8942_v40 = vand.u32 4294901760, %v27508_v35 }
 0x8a7   : > { %23450 = vmatprep.subr.bf16.mxu1 %v23449_v20 }
 0x8a8   : > { %v23585_v54 = vpack.c.bf16 %v27512_v51, %v27508_v35 }
 0x8aa   : > { %23452 = vmatpush3.bf16.msra.mxu1 %v23449_v20  ;;  %v17467_v20 = vld [vmem:[%s29811_s7 + $0xb0] sm:$0xff] }
 0x8ab   : > { %23454 = vmatprep.subr.bf16.mxu1 %v23453_v14 }
 0x8ae   : > { %23456 = vmatpush3.bf16.msra.mxu1 %v23453_v14  ;;  %v17468_v14 = vld [vmem:[%s29811_s7 + $0xb8] sm:$0xff] }
 0x8af   : > { %23458 = vmatprep.subr.bf16.mxu1 %v23457_v52 }
 0x8b2   : > { %23460 = vmatpush3.bf16.msra.mxu1 %v23457_v52  ;;  %v27525_v52 = vsub.f32 %v17465_v9, %v8847_v59  ;;  %v27619_v9 = vpack.c.bf16 %v8935_v36, %v8928_v62 }
 0x8b3   : > { %23462 = vmatprep.subr.bf16.mxu1 %v23461_v12 }
 0x8b6   : > { %23464 = vmatpush3.bf16.msra.mxu1 %v23461_v12  ;;  %v8853_v12 = vand.u32 4294901760, %v17467_v20 }
 0x8b7   : > { %23466 = vmatprep.subr.bf16.mxu1 %v27042_v26 }
 0x8b9   : > { %20544 = vmatmul.mubr.f32.vlgmr.msra.gmra.mrb[8].mxu1 %v27252_v39 }
 0x8ba   : > { %23468 = vmatpush3.bf16.msra.mxu1 %v27042_v26  ;;  %20578 = vmatprep.mubr.f32.mxu1 %v27260_v16  ;;  %v24868_v26 = vmov 0.0|0.0  }
 0x8bb   : > { %23470 = vmatprep.subr.bf16.mxu1 %v27072_v13  ;;  %23497 = vmatprep.subr.bf16.mxu0 %v24868_v26 }
 0x8be   : > { %23472 = vmatpush3.bf16.msra.mxu1 %v27072_v13  ;;  %v24870_v13 = vmov 0.0  }
 0x8bf   : > { %23474 = vmatprep.subr.bf16.mxu1 %v27092_v58  ;;  %20585 = vmatprep.mubr.msk.f32.mxu0 %vm24869_vm3, %v24870_v13 }
 0x8c2   : > { %23476 = vmatpush3.bf16.msra.mxu1 %v27092_v58  ;;  %v7874_v58 = vld [vmem:[#allocation5] sm:$0xff] }
 0x8c3   : > { %23478 = vmatprep.subr.bf16.mxu1 %v27112_v42 }
 0x8c6   : > { %23480 = vmatpush3.bf16.msra.mxu1 %v27112_v42  ;;  %v7876_v42 = vsel %vm573_vm0, %v7874_v58, 0  ;;  %v8856_v58 = vand.u32 4294901760, %v17468_v14 }
 0x8c7   : > { %23482 = vmatprep.subr.bf16.mxu1 %v27122_v23 }
 0x8ca   : > { %23484 = vmatpush3.bf16.msra.mxu1 %v27122_v23  ;;  %v7945_v23 = vand.u32 4294901760, %v7876_v42 }
 0x8cb   : > { %23486 = vmatprep.subr.bf16.mxu1 %v27133_v27 }
 0x8ce   : > { %23488 = vmatpush3.bf16.msra.mxu1 %v27133_v27  ;;  %v17460_v27 = vld [vmem:[%s29810_s6] ss:$0 sm:$0xff] }
 0x8cf   : > { %23490 = vmatprep.subr.bf16.mxu1 %v27143_v60 }
 0x8d2   : > { %23492 = vmatpush3.bf16.msra.mxu1 %v27143_v60  ;;  %v7946_v60 = vsub.f32 %v7876_v42, %v7945_v23  ;;  %v17469_v42 = vld [vmem:[%s29811_s7 + $0xc0] sm:$0xff] }
 0x8d3   : > { %23494 = vmatprep.subr.bf16.mxu1 %v27159_v43 }
 0x8d4   : > { %v7947_v41 = vand.u32 4294901760, %v7946_v60 }
 0x8d6   : > { %23496 = vmatpush3.bf16.msra.mxu1 %v27159_v43  ;;  %v7948_v44 = vsub.f32 %v7946_v60, %v7947_v41 }
 0x8d7   : > { %23581 = vmatprep.subr.bf16.mxu1 %v24868_v26 }
 0x8d8   : > { %v7949_v10 = vand.u32 4294901760, %v7948_v44 }
 0x8d9   : > { %20579 = vmatmul.mubr.f32.vlgmr.msra.gmra.mrb[8].mxu1 %v27252_v39 }
 0x8da   : > { %20767 = vmatprep.mubr.msk.f32.mxu1 %vm24869_vm3, %v24870_v13  ;;  %23583 = vmatpush3.bf16.msra.mxu1 %v23582_v24 }
 0x8db   : > { %23584 = vmatprep.subr.bf16.mxu1 %v24868_v26 }
 0x8de   : > { %23586 = vmatpush3.bf16.msra.mxu1 %v23585_v54 }
 0x8df   : > { %23587 = vmatprep.subr.bf16.mxu1 %v24868_v26 }
 0x9ac   : > { %v20580_v43 = vpop.f32.mrb[8].mxu1 }
 0x9ad   : > { %v7867_v4 = vadd.f32 %v20580_v43, %v17460_v27  ;;  %v7847_v11 = vpop.f32.mrb[9].mxu1  ;;  %v27545_v43 = vsub.f32 %v17467_v20, %v8853_v12  ;;  %v8936_v20 = vsub.f32 %v27506_v49, %v8935_v36 }
 0x9ae   : > { %v7866_v53 = vadd.f32 %v17460_v27, %v7847_v11  ;;  %v27540_v27 = vpack.c.bf16 %v8850_v0, %v8847_v59  ;;  %v8859_v11 = vand.u32 4294901760, %v17469_v42  ;;  %v8949_v59 = vand.u32 4294901760, %v27512_v51 }
 0x9af   : > { %vm7869_vm4 = vcmp.gt.f32.partialorder %v7867_v4, 0.0  ;;  %v7871_v57 = vmul.f32 0.01, %v7867_v4  ;;  %v8929_v0 = vsub.f32 %v27504_v61, %v8928_v62  ;;  %v8937_v54 = vand.u32 4294901760, %v8936_v20 }
 0x9b0   : > { %vm7868_vm5 = vcmp.gt.f32.partialorder %v7866_v53, 0.0  ;;  %v7870_v55 = vmul.f32 0.01, %v7866_v53 }
 0x9b1   : > { %v7873_v3 = vsel %vm7869_vm4, %v7867_v4, %v7871_v57  ;;  %v27547_v4 = vsub.f32 %v17468_v14, %v8856_v58  ;;  %v17472_v57 = vld [vmem:[%s29811_s7 + $0xd8] sm:$0xff]  ;;  %v27629_v14 = vpack.c.bf16 %v8949_v59, %v8942_v40  ;;  %v8930_v24 = vand.u32 4294901760, %v8929_v0 }
 0x9b2   : > { %v7882_v1 = vand.u32 4294901760, %v7873_v3  ;;  %v7872_v5 = vsel %vm7868_vm5, %v7866_v53, %v7870_v55  ;;  %v27557_v55 = vpack.c.bf16 %v8856_v58, %v8853_v12  ;;  %v8956_v12 = vand.u32 4294901760, %v27525_v52 }
 0x9b3   : > { %v7879_v8 = vand.u32 4294901760, %v7872_v5  ;;  %v8963_v58 = vand.u32 4294901760, %v27527_v17 }
 0x9b4   : > { %v7964_v28 = vsub.f32 %v7873_v3, %v7882_v1 }
 0x9b5   : > { %v27429_v39 = vpack.c.bf16 %v7882_v1, %v7879_v8  ;;  %v7957_v16 = vsub.f32 %v7872_v5, %v7879_v8  ;;  %v23591_v1 = vpack.c.bf16 %v27547_v4, %v27545_v43  ;;  %v27562_v5 = vsub.f32 %v17469_v42, %v8859_v11 }
 0x9b6   : > { %v7965_v29 = vand.u32 4294901760, %v7964_v28  ;;  %v8868_v8 = vand.u32 4294901760, %v17472_v57  ;;  %v8943_v42 = vsub.f32 %v27508_v35, %v8942_v40  ;;  %v27638_v61 = vpack.c.bf16 %v8963_v58, %v8956_v12 }
 0x9b7   : > { %v7958_v6 = vand.u32 4294901760, %v7957_v16  ;;  %23499 = vmatpush3.bf16.msra.mxu0 %v27429_v39  ;;  %v27432_v2 = vpack.c.bf16 %v7964_v28, %v7957_v16 }
 0x9b8   : > { %23500 = vmatprep.subr.bf16.mxu0 %v24868_v26  ;;  %v7966_v47 = vsub.f32 %v7964_v28, %v7965_v29  ;;  %v17473_v28 = vld [vmem:[%s29811_s7 + $0xe0] sm:$0xff]  ;;  %v8944_v49 = vand.u32 4294901760, %v8943_v42 }
 0x9b9   : > { %v7959_v50 = vsub.f32 %v7957_v16, %v7958_v6  ;;  %v27435_v38 = vpack.c.bf16 %v7965_v29, %v7958_v6  ;;  %v17474_v16 = vld [vmem:[%s29811_s7 + $0xe8] sm:$0xff] }
 0x9ba   : > { %20586 = vmatmul.mubr.f32.vlgmr.msra.gmra.mrb[6].mxu0 %v7949_v10  ;;  %v7967_v18 = vand.u32 4294901760, %v7966_v47  ;;  %v27581_v47 = vsub.f32 %v17472_v57, %v8868_v8  ;;  %v8977_v57 = vand.u32 4294901760, %v27547_v4 }
 0x9bb   : > { %v7960_v34 = vand.u32 4294901760, %v7959_v50  ;;  %20592 = vmatprep.mubr.msk.f32.mxu0 %vm24869_vm3, %v24870_v13  ;;  %v8871_v50 = vand.u32 4294901760, %v17473_v28 }
 0x9bd   : > { %v27439_v25 = vpack.c.bf16 %v7967_v18, %v7960_v34  ;;  %v8874_v18 = vand.u32 4294901760, %v17474_v16  ;;  %v27590_v37 = vsub.f32 %v17473_v28, %v8871_v50  ;;  %v8984_v28 = vand.u32 4294901760, %v27562_v5 }
 0x9bf   : > { %23502 = vmatpush3.bf16.msra.mxu0 %v27439_v25  ;;  %v27613_v45 = vpack.c.bf16 %v8874_v18, %v8871_v50  ;;  %v8978_v50 = vsub.f32 %v27547_v4, %v8977_v57 }
 0x9c0   : > { %23503 = vmatprep.subr.bf16.mxu0 %v24868_v26 }
 0x9c2   : > { %20593 = vmatmul.mubr.f32.vlgmr.msra.gmra.mrb[6].mxu0 %v7945_v23 }
 0x9c3   : > { %23505 = vmatpush3.bf16.msra.mxu0 %v27432_v2  ;;  %20599 = vmatprep.mubr.msk.f32.mxu0 %vm24869_vm3, %v24870_v13 }
 0x9c4   : > { %23506 = vmatprep.subr.bf16.mxu0 %v24868_v26 }
 0x9ca   : > { %20600 = vmatmul.mubr.f32.vlgmr.msra.gmra.mrb[6].mxu0 %v7946_v60  ;;  %v23588_v60 = vpack.c.bf16 %v27527_v17, %v27525_v52 }
 0x9cb   : > { %23508 = vmatpush3.bf16.msra.mxu0 %v27429_v39  ;;  %20606 = vmatprep.mubr.msk.f32.mxu0 %vm24869_vm3, %v24870_v13 }
 0x9cc   : > { %23509 = vmatprep.subr.bf16.mxu0 %v24868_v26  ;;  %23589 = vmatpush3.bf16.msra.mxu1 %v23588_v60  ;;  %v27636_v60 = vpack.c.bf16 %v8937_v54, %v8930_v24 }
 0x9cd   : > { %23590 = vmatprep.subr.bf16.mxu1 %v24868_v26 }
 0x9d0   : > { %23592 = vmatpush3.bf16.msra.mxu1 %v23591_v1  ;;  %v8964_v1 = vsub.f32 %v27527_v17, %v8963_v58  ;;  %v9005_v17 = vand.u32 4294901760, %v27581_v47 }
 0x9d1   : > { %23593 = vmatprep.subr.bf16.mxu1 %v24868_v26 }
 0x9d2   : > { %20607 = vmatmul.mubr.f32.vlgmr.msra.gmra.mrb[6].mxu0 %v7947_v41  ;;  %v17471_v41 = vld [vmem:[%s29811_s7 + $0xd0] sm:$0xff] }
 0x9d3   : > { %23511 = vmatpush3.bf16.msra.mxu0 %v27435_v38  ;;  %20613 = vmatprep.mubr.msk.f32.mxu0 %vm24869_vm3, %v24870_v13  ;;  %v8865_v3 = vand.u32 4294901760, %v17471_v41 }
 0x9d4   : > { %23512 = vmatprep.subr.bf16.mxu0 %v24868_v26 }
 0x9d5   : > { %v27576_v10 = vsub.f32 %v17471_v41, %v8865_v3  ;;  %v27585_v34 = vpack.c.bf16 %v8868_v8, %v8865_v3  ;;  %v8970_v41 = vand.u32 4294901760, %v27545_v43  ;;  %v8957_v3 = vsub.f32 %v27525_v52, %v8956_v12 }
 0x9d7   : > { %v23597_v19 = vpack.c.bf16 %v27581_v47, %v27576_v10  ;;  %v27646_v8 = vpack.c.bf16 %v8977_v57, %v8970_v41  ;;  %v8958_v35 = vand.u32 4294901760, %v8957_v3  ;;  %v8998_v52 = vand.u32 4294901760, %v27576_v10 }
 0x9d9   : > { %v8999_v40 = vsub.f32 %v27576_v10, %v8998_v52 }
 0x9da   : > { %20614 = vmatmul.mubr.f32.vlgmr.msra.gmra.mrb[6].mxu0 %v7945_v23 }
 0x9db   : > { %23514 = vmatpush3.bf16.msra.mxu0 %v27429_v39  ;;  %20620 = vmatprep.mubr.msk.f32.mxu0 %vm24869_vm3, %v24870_v13  ;;  %v9000_v24 = vand.u32 4294901760, %v8999_v40 }
 0x9dc   : > { %23515 = vmatprep.subr.bf16.mxu0 %v24868_v26 }
 0x9e2   : > { %20621 = vmatmul.mubr.f32.vlgmr.msra.gmra.mrb[6].mxu0 %v7945_v23  ;;  %v17470_v23 = vld [vmem:[%s29811_s7 + $0xc8] sm:$0xff] }
 0x9e3   : > { %23517 = vmatpush3.bf16.msra.mxu0 %v27429_v39  ;;  %20627 = vmatprep.mubr.msk.f32.mxu0 %vm24869_vm3, %v24870_v13  ;;  %v8862_v53 = vand.u32 4294901760, %v17470_v23 }
 0x9e4   : > { %23518 = vmatprep.subr.bf16.mxu0 %v24868_v26 }
 0x9e5   : > { %v27564_v44 = vsub.f32 %v17470_v23, %v8862_v53  ;;  %v27574_v29 = vpack.c.bf16 %v8862_v53, %v8859_v11  ;;  %v8950_v23 = vsub.f32 %v27512_v51, %v8949_v59  ;;  %v8965_v51 = vand.u32 4294901760, %v8964_v1 }
 0x9e6   : > { %20628 = vmatmul.mubr.f32.vlgmr.msra.gmra.mrb[8].mxu0 %v8429_v15  ;;  %v9006_v59 = vsub.f32 %v27581_v47, %v9005_v17 }
 0x9e7   : > { %23520 = vmatpush3.bf16.msra.mxu0 %v27439_v25  ;;  %20634 = vmatprep.mubr.msk.f32.mxu0 %vm24869_vm3, %v24870_v13  ;;  %v23594_v6 = vpack.c.bf16 %v27564_v44, %v27562_v5  ;;  %v8951_v11 = vand.u32 4294901760, %v8950_v23 }
 0x9e8   : > { %23521 = vmatprep.subr.bf16.mxu0 %v24868_v26  ;;  %v9007_v54 = vand.u32 4294901760, %v9006_v59 }
 0x9e9   : > { %23595 = vmatpush3.bf16.msra.mxu1 %v23594_v6  ;;  %v27640_v53 = vpack.c.bf16 %v8951_v11, %v8944_v49  ;;  %v8971_v6 = vsub.f32 %v27545_v43, %v8970_v41  ;;  %v9012_v43 = vand.u32 4294901760, %v27590_v37 }
 0x9ea   : > { %23596 = vmatprep.subr.bf16.mxu1 %v24868_v26  ;;  %v23573_v12 = vpack.c.bf16 %v9007_v54, %v9000_v24  ;;  %v27813_v24 = vld [vmem:[%s29811_s7 + $0x58] sm:$0xff] }
 0x9eb   : > { %v9013_v58 = vsub.f32 %v27590_v37, %v9012_v43 }
 0x9ed   : > { %23598 = vmatpush3.bf16.msra.mxu1 %v23597_v19  ;;  %v9014_v49 = vand.u32 4294901760, %v9013_v58  ;;  %v27833_v58 = vld [vmem:[%s29811_s7 + $0x60] sm:$0xff] }
 0x9ee   : > { %20635 = vmatmul.mubr.f32.vlgmr.msra.gmra.mrb[8].mxu0 %v8425_v46  ;;  %23599 = vmatprep.subr.bf16.mxu1 %v24868_v26 }
 0x9ef   : > { %23523 = vmatpush3.bf16.msra.mxu0 %v27432_v2  ;;  %20641 = vmatprep.mubr.msk.f32.mxu0 %vm24869_vm3, %v24870_v13 }
 0x9f0   : > { %23524 = vmatprep.subr.bf16.mxu0 %v24868_v26 }
 0x9f6   : > { %20642 = vmatmul.mubr.f32.vlgmr.msra.gmra.mrb[8].mxu0 %v8426_v33 }
 0x9f7   : > { %23526 = vmatpush3.bf16.msra.mxu0 %v27429_v39  ;;  %20648 = vmatprep.mubr.msk.f32.mxu0 %vm24869_vm3, %v24870_v13 }
 0x9f8   : > { %23527 = vmatprep.subr.bf16.mxu0 %v24868_v26 }
 0x9fe   : > { %20649 = vmatmul.mubr.f32.vlgmr.msra.gmra.mrb[8].mxu0 %v8427_v7  ;;  %v17475_v7 = vld [vmem:[%s29811_s7 + $0xf0] sm:$0xff] }
 0x9ff   : > { %23529 = vmatpush3.bf16.msra.mxu0 %v27435_v38  ;;  %20655 = vmatprep.mubr.msk.f32.mxu0 %vm24869_vm3, %v24870_v13  ;;  %v8877_v15 = vand.u32 4294901760, %v17475_v7 }
 0xa00   : > { %23530 = vmatprep.subr.bf16.mxu0 %v24868_v26 }
 0xa01   : > { %v27607_v30 = vsub.f32 %v17475_v7, %v8877_v15  ;;  %v27622_v63 = vpack.c.bf16 %v8880_v21, %v8877_v15  ;;  %v8979_v7 = vand.u32 4294901760, %v8978_v50  ;;  %v8985_v15 = vsub.f32 %v27562_v5, %v8984_v28 }
 0xa03   : > { %v23603_v48 = vpack.c.bf16 %v27609_v56, %v27607_v30  ;;  %v8986_v62 = vand.u32 4294901760, %v8985_v15  ;;  %v9026_v5 = vand.u32 4294901760, %v27607_v30  ;;  %v27761_v15 = vld [vmem:[%s29811_s7 + $0x30] sm:$0xff] }
 0xa05   : > { %v9027_v10 = vsub.f32 %v27607_v30, %v9026_v5 }
 0xa06   : > { %20656 = vmatmul.mubr.f32.vlgmr.msra.gmra.mrb[8].mxu0 %v8425_v46 }
 0xa07   : > { %23532 = vmatpush3.bf16.msra.mxu0 %v27429_v39  ;;  %20662 = vmatprep.mubr.msk.f32.mxu0 %vm24869_vm3, %v24870_v13  ;;  %v9028_v57 = vand.u32 4294901760, %v9027_v10 }
 0xa08   : > { %23533 = vmatprep.subr.bf16.mxu0 %v24868_v26 }
 0xa0e   : > { %20663 = vmatmul.mubr.f32.vlgmr.msra.gmra.mrb[8].mxu0 %v8425_v46  ;;  %v27592_v46 = vsub.f32 %v17474_v16, %v8874_v18  ;;  %v8991_v16 = vand.u32 4294901760, %v27564_v44  ;;  %v23564_v18 = vpack.c.bf16 %v8965_v51, %v8958_v35 }
 0xa0f   : > { %20697 = vmatprep.mubr.msk.f32.mxu0 %vm24869_vm3, %v24870_v13  ;;  %23535 = vmatpush3.bf16.msra.mxu0 %v27510_v32 }
 0xa10   : > { %23536 = vmatprep.subr.bf16.mxu0 %v24868_v26  ;;  %v23600_v33 = vpack.c.bf16 %v27592_v46, %v27590_v37  ;;  %v23642_v19 = vpack.c.bf16 %v8991_v16, %v8984_v28  ;;  %v8992_v21 = vsub.f32 %v27564_v44, %v8991_v16  ;;  %v9019_v4 = vand.u32 4294901760, %v27592_v46 }
 0xa11   : > { %v9033_v44 = vand.u32 4294901760, %v27609_v56 }
 0xa12   : > { %23601 = vmatpush3.bf16.msra.mxu1 %v23600_v33  ;;  %v8972_v33 = vand.u32 4294901760, %v8971_v6  ;;  %v8993_v36 = vand.u32 4294901760, %v8992_v21  ;;  %v23648_v20 = vpack.c.bf16 %v9019_v4, %v9012_v43  ;;  %v9020_v42 = vsub.f32 %v27592_v46, %v9019_v4  ;;  %v27766_v21 = vld [vmem:[%s29811_s7 + $0x38] sm:$0xff]  ;;  %v27784_v43 = vld [vmem:[%s29811_s7 + $0x40] sm:$0xff]  ;;  %v27789_v4 = vld [vmem:[%s29811_s7 + $0x48] sm:$0xff] }
 0xa13   : > { %23538 = vmatpush3.bf16.msra.mxu0 %v27523_v22  ;;  %23602 = vmatprep.subr.bf16.mxu1 %v24868_v26  ;;  %v23651_v23 = vpack.c.bf16 %v9033_v44, %v9026_v5  ;;  %v9034_v47 = vsub.f32 %v27609_v56, %v9033_v44  ;;  %v9500_v59 = vand.u32 4294901760, %v27784_v43  ;;  %v9509_v5 = vand.u32 4294901760, %v27813_v24 }
 0xa14   : > { %23539 = vmatprep.subr.bf16.mxu0 %v24868_v26  ;;  %v23567_v31 = vpack.c.bf16 %v8979_v7, %v8972_v33  ;;  %v23570_v0 = vpack.c.bf16 %v8993_v36, %v8986_v62  ;;  %v9021_v11 = vand.u32 4294901760, %v9020_v42  ;;  %v27737_v33 = vld [vmem:[%s29811_s7 + $0x20] sm:$0xff]  ;;  %v27742_v7 = vld [vmem:[%s29811_s7 + $0x28] sm:$0xff]  ;;  %v9494_v62 = vand.u32 4294901760, %v27761_v15 }
 0xa15   : > { %v9035_v3 = vand.u32 4294901760, %v9034_v47  ;;  %v9497_v36 = vand.u32 4294901760, %v27766_v21  ;;  %v27838_v42 = vld [vmem:[%s29811_s7 + $0x68] sm:$0xff]  ;;  %v27859_v47 = vld [vmem:[%s29811_s7 + $0x70] sm:$0xff] }
 0xa16   : > { %23604 = vmatpush3.bf16.msra.mxu1 %v23603_v48  ;;  %v23645_v48 = vpack.c.bf16 %v9005_v17, %v8998_v52  ;;  %v23576_v41 = vpack.c.bf16 %v9021_v11, %v9014_v49  ;;  %v9488_v52 = vand.u32 4294901760, %v27737_v33  ;;  %v9491_v17 = vand.u32 4294901760, %v27742_v7 }
 0xa17   : > { %23541 = vmatpush3.bf16.msra.mxu0 %v27540_v27  ;;  %23629 = vmatprep.subr.bf16.mxu1 %v24868_v26  ;;  %v27666_v1 = vpack.c.bf16 %v9035_v3, %v9028_v57  ;;  %v27800_v40 = vpack.c.bf16 %v9497_v36, %v9494_v62  ;;  %v9512_v49 = vand.u32 4294901760, %v27833_v58  ;;  %v9515_v11 = vand.u32 4294901760, %v27838_v42 }
 0xa18   : > { %23542 = vmatprep.subr.bf16.mxu0 %v24868_v26  ;;  %v9518_v3 = vand.u32 4294901760, %v27859_v47 }
 0xa19   : > { %v27873_v57 = vpack.c.bf16 %v9515_v11, %v9512_v49 }
 0xa1b   : > { %23544 = vmatpush3.bf16.msra.mxu0 %v27557_v55 }
 0xa1c   : > { %23545 = vmatprep.subr.bf16.mxu0 %v24868_v26 }
 0xa1f   : > { %23547 = vmatpush3.bf16.msra.mxu0 %v27574_v29 }
 0xa20   : > { %23548 = vmatprep.subr.bf16.mxu0 %v24868_v26 }
 0xa23   : > { %23550 = vmatpush3.bf16.msra.mxu0 %v27585_v34 }
 0xa24   : > { %23551 = vmatprep.subr.bf16.mxu0 %v24868_v26 }
 0xa27   : > { %23553 = vmatpush3.bf16.msra.mxu0 %v27613_v45 }
 0xa28   : > { %23554 = vmatprep.subr.bf16.mxu0 %v24868_v26 }
 0xa2b   : > { %23556 = vmatpush3.bf16.msra.mxu0 %v27622_v63 }
 0xa2c   : > { %23557 = vmatprep.subr.bf16.mxu0 %v24868_v26 }
 0xab5   : > { %v27668_v35 = vpop.f32.mrb[6].mxu0 }
 0xab6   : > { %v20622_v51 = vpop.f32.mrb[7].mxu0  ;;  %v27827_v44 = vand.u32 4294901760, %v27668_v35 }
 0xab8   : > { %v27853_v10 = vsub.f32 %v27668_v35, %v27827_v44 }
 0xaba   : > { %v9558_v35 = vand.u32 4294901760, %v27853_v10 }
 0xae1   : > { %v8813_v28 = vpop.f32.mrb[8].mxu0 }
 0xae2   : > { %v27670_v16 = vand.u32 4294901760, %v8813_v28  ;;  %v20664_v37 = vpop.f32.mrb[9].mxu0 }
 0xae4   : > { %v27673_v46 = vsub.f32 %v8813_v28, %v27670_v16 }
 0xae6   : > { %v8917_v6 = vand.u32 4294901760, %v27673_v46  ;;  %20768 = vmatmul.mubr.f32.vlgmr.msra.gmra.mrb[12].mxu1 %v27673_v46 }
 0xae7   : > { %23631 = vmatpush3.bf16.msra.mxu1 %v27619_v9  ;;  %20837 = vmatprep.mubr.msk.f32.mxu1 %vm24869_vm3, %v24870_v13  ;;  %v27703_v9 = vld [vmem:[%s29811_s7] sm:$0xff] }
 0xae8   : > { %v8918_v30 = vsub.f32 %v27673_v46, %v8917_v6  ;;  %23632 = vmatprep.subr.bf16.mxu1 %v24868_v26 }
 0xaea   : > { %v8919_v56 = vand.u32 4294901760, %v8918_v30  ;;  %v9559_v30 = vsub.f32 %v27853_v10, %v9558_v35 }
 0xaeb   : > { %23634 = vmatpush3.bf16.msra.mxu1 %v27629_v14  ;;  %v27708_v14 = vld [vmem:[%s29811_s7 + $0x8] sm:$0xff] }
 0xaec   : > { %20698 = vmatmul.mubr.f32.vlgmr.msra.gmra.mrb[10].mxu0 %v8919_v56  ;;  %23635 = vmatprep.subr.bf16.mxu1 %v24868_v26 }
 0xaed   : > { %23559 = vmatpush3.bf16.msra.mxu0 %v27636_v60  ;;  %20732 = vmatprep.mubr.msk.f32.mxu0 %vm24869_vm3, %v24870_v13  ;;  %v9476_v60 = vand.u32 4294901760, %v27703_v9 }
 0xaee   : > { %23560 = vmatprep.subr.bf16.mxu0 %v24868_v26 }
 0xaef   : > { %23637 = vmatpush3.bf16.msra.mxu1 %v27638_v61  ;;  %v9479_v61 = vand.u32 4294901760, %v27708_v14  ;;  %v27884_v51 = vsub.f32 %v27703_v9, %v9476_v60 }
 0xaf0   : > { %23638 = vmatprep.subr.bf16.mxu1 %v24868_v26 }
 0xaf1   : > { %23562 = vmatpush3.bf16.msra.mxu0 %v27640_v53  ;;  %v27717_v53 = vld [vmem:[%s29811_s7 + $0x10] sm:$0xff]  ;;  %v27729_v50 = vpack.c.bf16 %v9479_v61, %v9476_v60  ;;  %v27889_v28 = vsub.f32 %v27708_v14, %v9479_v61  ;;  %v9560_v60 = vand.u32 4294901760, %v9559_v30  ;;  %v27919_v61 = vsub.f32 %v27737_v33, %v9488_v52 }
 0xaf2   : > { %23563 = vmatprep.subr.bf16.mxu0 %v24868_v26 }
 0xaf3   : > { %23640 = vmatpush3.bf16.msra.mxu1 %v27646_v8  ;;  %v27722_v8 = vld [vmem:[%s29811_s7 + $0x18] sm:$0xff]  ;;  %v23726_v14 = vpack.c.bf16 %v27889_v28, %v27884_v51 }
 0xaf4   : > { %23641 = vmatprep.subr.bf16.mxu1 %v24868_v26 }
 0xaf5   : > { %23565 = vmatpush3.bf16.msra.mxu0 %v23564_v18  ;;  %v9482_v18 = vand.u32 4294901760, %v27717_v53 }
 0xaf6   : > { %23566 = vmatprep.subr.bf16.mxu0 %v24868_v26 }
 0xaf7   : > { %23643 = vmatpush3.bf16.msra.mxu1 %v23642_v19  ;;  %v9485_v19 = vand.u32 4294901760, %v27722_v8  ;;  %v27903_v56 = vsub.f32 %v27717_v53, %v9482_v18  ;;  %v27924_v53 = vsub.f32 %v27742_v7, %v9491_v17  ;;  %v27955_v7 = vsub.f32 %v27784_v43, %v9500_v59 }
 0xaf8   : > { %23644 = vmatprep.subr.bf16.mxu1 %v24868_v26  ;;  %v9569_v43 = vand.u32 4294901760, %v27884_v51 }
 0xaf9   : > { %23568 = vmatpush3.bf16.msra.mxu0 %v23567_v31  ;;  %v27751_v31 = vpack.c.bf16 %v9485_v19, %v9482_v18  ;;  %v27908_v9 = vsub.f32 %v27722_v8, %v9485_v19  ;;  %v27936_v18 = vsub.f32 %v27761_v15, %v9494_v62  ;;  %v27941_v19 = vsub.f32 %v27766_v21, %v9497_v36 }
 0xafa   : > { %23569 = vmatprep.subr.bf16.mxu0 %v24868_v26  ;;  %v23732_v33 = vpack.c.bf16 %v27924_v53, %v27919_v61  ;;  %v27990_v15 = vsub.f32 %v27838_v42, %v9515_v11  ;;  %v9597_v42 = vand.u32 4294901760, %v27919_v61 }
 0xafb   : > { %23646 = vmatpush3.bf16.msra.mxu1 %v23645_v48  ;;  %v27775_v48 = vpack.c.bf16 %v9491_v17, %v9488_v52  ;;  %v23729_v8 = vpack.c.bf16 %v27908_v9, %v27903_v56  ;;  %v23735_v46 = vpack.c.bf16 %v27941_v19, %v27936_v18  ;;  %v9618_v30 = vand.u32 4294901760, %v27941_v19 }
 0xafc   : > { %23647 = vmatprep.subr.bf16.mxu1 %v24868_v26 }
 0xafd   : > { %23571 = vmatpush3.bf16.msra.mxu0 %v23570_v0  ;;  %v9503_v0 = vand.u32 4294901760, %v27789_v4 }
 0xafe   : > { %23572 = vmatprep.subr.bf16.mxu0 %v24868_v26 }
 0xaff   : > { %23649 = vmatpush3.bf16.msra.mxu1 %v23648_v20  ;;  %v27808_v20 = vld [vmem:[%s29811_s7 + $0x50] sm:$0xff]  ;;  %v27822_v54 = vpack.c.bf16 %v9503_v0, %v9500_v59  ;;  %v27960_v52 = vsub.f32 %v27789_v4, %v9503_v0  ;;  %v9576_v4 = vand.u32 4294901760, %v27889_v28  ;;  %v9570_v59 = vsub.f32 %v27884_v51, %v9569_v43 }
 0xb00   : > { %23650 = vmatprep.subr.bf16.mxu1 %v24868_v26 }
 0xb01   : > { %23574 = vmatpush3.bf16.msra.mxu0 %v23573_v12  ;;  %v9506_v12 = vand.u32 4294901760, %v27808_v20  ;;  %v23738_v17 = vpack.c.bf16 %v27960_v52, %v27955_v7  ;;  %v9577_v0 = vsub.f32 %v27889_v28, %v9576_v4  ;;  %v9611_v28 = vand.u32 4294901760, %v27936_v18 }
 0xb02   : > { %23575 = vmatprep.subr.bf16.mxu0 %v24868_v26 }
 0xb03   : > { %23652 = vmatpush3.bf16.msra.mxu1 %v23651_v23  ;;  %v27847_v23 = vpack.c.bf16 %v9509_v5, %v9506_v12 }
 0xb04   : > { %23677 = vmatprep.subr.bf16.mxu1 %v24868_v26 }
 0xb05   : > { %23577 = vmatpush3.bf16.msra.mxu0 %v23576_v41  ;;  %v27864_v41 = vld [vmem:[%s29811_s7 + $0x78] sm:$0xff] }
 0xb06   : > { %20838 = vmatmul.mubr.f32.vlgmr.msra.gmra.mrb[14].mxu1 %v27670_v16  ;;  %23578 = vmatprep.subr.bf16.mxu0 %v24868_v26 }
 0xb07   : > { %23679 = vmatpush3.bf16.msra.mxu1 %v27729_v50  ;;  %20907 = vmatprep.mubr.msk.f32.mxu1 %vm24869_vm3, %v24870_v13 }
 0xb08   : > { %23680 = vmatprep.subr.bf16.mxu1 %v24868_v26 }
 0xb09   : > { %23580 = vmatpush3.bf16.msra.mxu0 %v27666_v1  ;;  %v9521_v1 = vand.u32 4294901760, %v27864_v41 }
 0xb0a   : > { %23605 = vmatprep.subr.bf16.mxu0 %v24868_v26 }
 0xb0b   : > { %23682 = vmatpush3.bf16.msra.mxu1 %v27751_v31  ;;  %v27892_v37 = vpack.c.bf16 %v9521_v1, %v9518_v3  ;;  %v28001_v62 = vsub.f32 %v27864_v41, %v9521_v1 }
 0xb0c   : > { %20733 = vmatmul.mubr.f32.vlgmr.msra.gmra.mrb[12].mxu0 %v27670_v16  ;;  %23683 = vmatprep.subr.bf16.mxu1 %v24868_v26 }
 0xb0d   : > { %23607 = vmatpush3.bf16.msra.mxu0 %v27510_v32  ;;  %20802 = vmatprep.mubr.msk.f32.mxu0 %vm24869_vm3, %v24870_v13 }
 0xb0e   : > { %23608 = vmatprep.subr.bf16.mxu0 %v24868_v26 }
 0xb0f   : > { %23685 = vmatpush3.bf16.msra.mxu1 %v27775_v48 }
 0xb10   : > { %23686 = vmatprep.subr.bf16.mxu1 %v24868_v26 }
 0xb11   : > { %23610 = vmatpush3.bf16.msra.mxu0 %v27523_v22 }
 0xb12   : > { %23611 = vmatprep.subr.bf16.mxu0 %v24868_v26 }
 0xb13   : > { %23688 = vmatpush3.bf16.msra.mxu1 %v27800_v40 }
 0xb14   : > { %23689 = vmatprep.subr.bf16.mxu1 %v24868_v26 }
 0xb15   : > { %23613 = vmatpush3.bf16.msra.mxu0 %v27540_v27 }
 0xb16   : > { %23614 = vmatprep.subr.bf16.mxu0 %v24868_v26 }
 0xb17   : > { %23691 = vmatpush3.bf16.msra.mxu1 %v27822_v54 }
 0xb18   : > { %23692 = vmatprep.subr.bf16.mxu1 %v24868_v26 }
 0xb19   : > { %23616 = vmatpush3.bf16.msra.mxu0 %v27557_v55 }
 0xb1a   : > { %23617 = vmatprep.subr.bf16.mxu0 %v24868_v26 }
 0xb1b   : > { %23694 = vmatpush3.bf16.msra.mxu1 %v27847_v23 }
 0xb1c   : > { %23695 = vmatprep.subr.bf16.mxu1 %v24868_v26 }
 0xb1d   : > { %23619 = vmatpush3.bf16.msra.mxu0 %v27574_v29 }
 0xb1e   : > { %23620 = vmatprep.subr.bf16.mxu0 %v24868_v26 }
 0xb1f   : > { %23697 = vmatpush3.bf16.msra.mxu1 %v27873_v57 }
 0xb20   : > { %23698 = vmatprep.subr.bf16.mxu1 %v24868_v26 }
 0xb21   : > { %23622 = vmatpush3.bf16.msra.mxu0 %v27585_v34 }
 0xb22   : > { %23623 = vmatprep.subr.bf16.mxu0 %v24868_v26 }
 0xb23   : > { %23700 = vmatpush3.bf16.msra.mxu1 %v27892_v37 }
 0xb24   : > { %23725 = vmatprep.subr.bf16.mxu1 %v24868_v26 }
 0xb25   : > { %23625 = vmatpush3.bf16.msra.mxu0 %v27613_v45 }
 0xb26   : > { %20908 = vmatmul.mubr.f32.vlgmr.msra.gmra.mrb[16].mxu1 %v9560_v60  ;;  %23626 = vmatprep.subr.bf16.mxu0 %v24868_v26  ;;  %v9619_v60 = vsub.f32 %v27941_v19, %v9618_v30 }
 0xb27   : > { %23727 = vmatpush3.bf16.msra.mxu1 %v23726_v14  ;;  %20977 = vmatprep.mubr.msk.f32.mxu1 %vm24869_vm3, %v24870_v13 }
 0xb28   : > { %23728 = vmatprep.subr.bf16.mxu1 %v24868_v26 }
 0xb29   : > { %23628 = vmatpush3.bf16.msra.mxu0 %v27622_v63 }
 0xb2a   : > { %23653 = vmatprep.subr.bf16.mxu0 %v24868_v26 }
 0xb2b   : > { %23730 = vmatpush3.bf16.msra.mxu1 %v23729_v8 }
 0xb2c   : > { %20803 = vmatmul.mubr.f32.vlgmr.msra.gmra.mrb[14].mxu0 %v8917_v6  ;;  %23731 = vmatprep.subr.bf16.mxu1 %v24868_v26  ;;  %v27975_v6 = vsub.f32 %v27813_v24, %v9509_v5  ;;  %v9590_v24 = vand.u32 4294901760, %v27908_v9  ;;  %v9578_v5 = vand.u32 4294901760, %v9577_v0 }
 0xb2d   : > { %23655 = vmatpush3.bf16.msra.mxu0 %v27510_v32  ;;  %20872 = vmatprep.mubr.msk.f32.mxu0 %vm24869_vm3, %v24870_v13  ;;  %v27970_v32 = vsub.f32 %v27808_v20, %v9506_v12  ;;  %v9583_v20 = vand.u32 4294901760, %v27903_v56  ;;  %v9571_v12 = vand.u32 4294901760, %v9570_v59 }
 0xb2e   : > { %23656 = vmatprep.subr.bf16.mxu0 %v24868_v26 }
 0xb2f   : > { %23733 = vmatpush3.bf16.msra.mxu1 %v23732_v33  ;;  %v23741_v21 = vpack.c.bf16 %v27975_v6, %v27970_v32  ;;  %v23777_v11 = vpack.c.bf16 %v9590_v24, %v9583_v20  ;;  %v23702_v41 = vpack.c.bf16 %v9578_v5, %v9571_v12  ;;  %v10117_v33 = vld [vmem:[#allocation5 + $0x10] sm:$0xff]  ;;  %v9660_v12 = vand.u32 4294901760, %v27990_v15 }
 0xb30   : > { %23734 = vmatprep.subr.bf16.mxu1 %v24868_v26 }
 0xb31   : > { %23658 = vmatpush3.bf16.msra.mxu0 %v27523_v22  ;;  %v27985_v22 = vsub.f32 %v27833_v58, %v9512_v49  ;;  %v9591_v58 = vsub.f32 %v27908_v9, %v9590_v24  ;;  %v9604_v49 = vand.u32 4294901760, %v27924_v53 }
 0xb32   : > { %23659 = vmatprep.subr.bf16.mxu0 %v24868_v26 }
 0xb33   : > { %23736 = vmatpush3.bf16.msra.mxu1 %v23735_v46  ;;  %v23744_v36 = vpack.c.bf16 %v27990_v15, %v27985_v22  ;;  %v9592_v1 = vand.u32 4294901760, %v9591_v58  ;;  %v23780_v51 = vpack.c.bf16 %v9604_v49, %v9597_v42  ;;  %v9653_v24 = vand.u32 4294901760, %v27985_v22 }
 0xb34   : > { %23737 = vmatprep.subr.bf16.mxu1 %v24868_v26  ;;  %v9661_v58 = vsub.f32 %v27990_v15, %v9660_v12 }
 0xb35   : > { %23661 = vmatpush3.bf16.msra.mxu0 %v27540_v27  ;;  %v27998_v27 = vsub.f32 %v27859_v47, %v9518_v3  ;;  %v9605_v47 = vsub.f32 %v27924_v53, %v9604_v49  ;;  %v9625_v53 = vand.u32 4294901760, %v27955_v7  ;;  %v23792_v49 = vpack.c.bf16 %v9660_v12, %v9653_v24 }
 0xb36   : > { %23662 = vmatprep.subr.bf16.mxu0 %v24868_v26 }
 0xb37   : > { %23739 = vmatpush3.bf16.msra.mxu1 %v23738_v17  ;;  %v9606_v9 = vand.u32 4294901760, %v9605_v47  ;;  %v9626_v19 = vsub.f32 %v27955_v7, %v9625_v53 }
 0xb38   : > { %23740 = vmatprep.subr.bf16.mxu1 %v24868_v26 }
 0xb39   : > { %23664 = vmatpush3.bf16.msra.mxu0 %v27557_v55  ;;  %v23747_v55 = vpack.c.bf16 %v28001_v62, %v27998_v27  ;;  %v9627_v0 = vand.u32 4294901760, %v9626_v19 }
 0xb3a   : > { %23665 = vmatprep.subr.bf16.mxu0 %v24868_v26 }
 0xb3b   : > { %23742 = vmatpush3.bf16.msra.mxu1 %v23741_v21  ;;  %v9639_v21 = vand.u32 4294901760, %v27970_v32 }
 0xb3c   : > { %23743 = vmatprep.subr.bf16.mxu1 %v24868_v26 }
 0xb3d   : > { %23667 = vmatpush3.bf16.msra.mxu0 %v27574_v29  ;;  %v23774_v29 = vpack.c.bf16 %v9576_v4, %v9569_v43  ;;  %v10119_v43 = vsel %vm573_vm0, %v10117_v33, 0  ;;  %v9640_v4 = vsub.f32 %v27970_v32, %v9639_v21  ;;  %v17484_v33 = vld [vmem:[%s29811_s7 + $0x138] sm:$0xff] }
 0xb3e   : > { %23668 = vmatprep.subr.bf16.mxu0 %v24868_v26 }
 0xb3f   : > { %23745 = vmatpush3.bf16.msra.mxu1 %v23744_v36  ;;  %v9646_v36 = vand.u32 4294901760, %v27975_v6  ;;  %v9641_v5 = vand.u32 4294901760, %v9640_v4  ;;  %v10619_v4 = vand.u32 4294901760, %v17484_v33 }
 0xb40   : > { %23746 = vmatprep.subr.bf16.mxu1 %v24868_v26 }
 0xb41   : > { %23670 = vmatpush3.bf16.msra.mxu0 %v27585_v34  ;;  %v9584_v34 = vsub.f32 %v27903_v56, %v9583_v20  ;;  %v9647_v59 = vsub.f32 %v27975_v6, %v9646_v36  ;;  %v23789_v20 = vpack.c.bf16 %v9646_v36, %v9639_v21  ;;  %v28209_v12 = vsub.f32 %v17484_v33, %v10619_v4 }
 0xb42   : > { %23671 = vmatprep.subr.bf16.mxu0 %v24868_v26 }
 0xb43   : > { %23748 = vmatpush3.bf16.msra.mxu1 %v23747_v55  ;;  %v9585_v3 = vand.u32 4294901760, %v9584_v34  ;;  %v9648_v32 = vand.u32 4294901760, %v9647_v59  ;;  %v9654_v34 = vsub.f32 %v27985_v22, %v9653_v24 }
 0xb44   : > { %23773 = vmatprep.subr.bf16.mxu1 %v24868_v26 }
 0xb45   : > { %23673 = vmatpush3.bf16.msra.mxu0 %v27613_v45  ;;  %v9598_v45 = vsub.f32 %v27919_v61, %v9597_v42  ;;  %v23705_v14 = vpack.c.bf16 %v9592_v1, %v9585_v3  ;;  %v23783_v61 = vpack.c.bf16 %v9618_v30, %v9611_v28  ;;  %v23717_v47 = vpack.c.bf16 %v9648_v32, %v9641_v5  ;;  %v28214_v5 = vld [vmem:[%s29811_s7 + $0x140] sm:$0xff]  ;;  %v28219_v32 = vld [vmem:[%s29811_s7 + $0x148] sm:$0xff] }
 0xb46   : > { %20978 = vmatmul.mubr.f32.vlgmr.msra.gmra.mrb[18].mxu1 %v27853_v10  ;;  %23674 = vmatprep.subr.bf16.mxu0 %v24868_v26  ;;  %v9662_v3 = vand.u32 4294901760, %v9661_v58  ;;  %v17480_v10 = vld [vmem:[%s29811_s7 + $0x118] sm:$0xff] }
 0xb47   : > { %23775 = vmatpush3.bf16.msra.mxu1 %v23774_v29  ;;  %21047 = vmatprep.mubr.msk.f32.mxu1 %vm24869_vm3, %v24870_v13  ;;  %v9599_v56 = vand.u32 4294901760, %v9598_v45  ;;  %v28056_v29 = vand.u32 4294901760, %v10119_v43  ;;  %v9674_v45 = vand.u32 4294901760, %v28001_v62 }
 0xb48   : > { %23776 = vmatprep.subr.bf16.mxu1 %v24868_v26 }
 0xb49   : > { %23676 = vmatpush3.bf16.msra.mxu0 %v27622_v63  ;;  %v9612_v63 = vsub.f32 %v27936_v18, %v9611_v28  ;;  %v23708_v8 = vpack.c.bf16 %v9606_v9, %v9599_v56  ;;  %v9620_v18 = vand.u32 4294901760, %v9619_v60  ;;  %v10189_v42 = vsub.f32 %v10119_v43, %v28056_v29 }
 0xb4a   : > { %23701 = vmatprep.subr.bf16.mxu0 %v24868_v26  ;;  %v9675_v15 = vsub.f32 %v28001_v62, %v9674_v45  ;;  %v10607_v60 = vand.u32 4294901760, %v17480_v10 }
 0xb4b   : > { %23778 = vmatpush3.bf16.msra.mxu1 %v23777_v11  ;;  %v9613_v46 = vand.u32 4294901760, %v9612_v63  ;;  %v9667_v11 = vand.u32 4294901760, %v27998_v27  ;;  %v10190_v1 = vand.u32 4294901760, %v10189_v42 }
 0xb4c   : > { %20873 = vmatmul.mubr.f32.vlgmr.msra.gmra.mrb[16].mxu0 %v27670_v16  ;;  %23779 = vmatprep.subr.bf16.mxu1 %v24868_v26  ;;  %v9632_v16 = vand.u32 4294901760, %v27960_v52  ;;  %v9676_v56 = vand.u32 4294901760, %v9675_v15  ;;  %v28193_v21 = vsub.f32 %v17480_v10, %v10607_v60  ;;  %v10625_v15 = vand.u32 4294901760, %v28219_v32 }
 0xb4d   : > { %23703 = vmatpush3.bf16.msra.mxu0 %v23702_v41  ;;  %20942 = vmatprep.mubr.msk.f32.mxu0 %vm24869_vm3, %v24870_v13  ;;  %v23711_v7 = vpack.c.bf16 %v9620_v18, %v9613_v46  ;;  %v9655_v41 = vand.u32 4294901760, %v9654_v34  ;;  %v9668_v22 = vsub.f32 %v27998_v27, %v9667_v11  ;;  %v10191_v9 = vsub.f32 %v10189_v42, %v10190_v1 }
 0xb4e   : > { %23704 = vmatprep.subr.bf16.mxu0 %v24868_v26  ;;  %v9633_v17 = vsub.f32 %v27960_v52, %v9632_v16  ;;  %v23786_v55 = vpack.c.bf16 %v9632_v16, %v9625_v53  ;;  %v17483_v53 = vld [vmem:[%s29811_s7 + $0x130] sm:$0xff] }
 0xb4f   : > { %23781 = vmatpush3.bf16.msra.mxu1 %v23780_v51  ;;  %v23795_v51 = vpack.c.bf16 %v9674_v45, %v9667_v11  ;;  %v23720_v28 = vpack.c.bf16 %v9662_v3, %v9655_v41  ;;  %v9669_v30 = vand.u32 4294901760, %v9668_v22  ;;  %v10192_v62 = vand.u32 4294901760, %v10191_v9  ;;  %v28256_v9 = vld [vmem:[%s29811_s7 + $0x158] sm:$0xff] }
 0xb50   : > { %23782 = vmatprep.subr.bf16.mxu1 %v24868_v26  ;;  %v9634_v52 = vand.u32 4294901760, %v9633_v17  ;;  %v10616_v46 = vand.u32 4294901760, %v17483_v53  ;;  %v10622_v22 = vand.u32 4294901760, %v28214_v5 }
 0xb51   : > { %23706 = vmatpush3.bf16.msra.mxu0 %v23705_v14  ;;  %v23723_v27 = vpack.c.bf16 %v9676_v56, %v9669_v30 }
 0xb52   : > { %23707 = vmatprep.subr.bf16.mxu0 %v24868_v26  ;;  %v23714_v6 = vpack.c.bf16 %v9634_v52, %v9627_v0  ;;  %v10712_v52 = vand.u32 4294901760, %v28193_v21  ;;  %v28207_v24 = vsub.f32 %v17483_v53, %v10616_v46 }
 0xb53   : > { %23784 = vmatpush3.bf16.msra.mxu1 %v23783_v61  ;;  %v17482_v61 = vld [vmem:[%s29811_s7 + $0x128] sm:$0xff] }
 0xb54   : > { %23785 = vmatprep.subr.bf16.mxu1 %v24868_v26  ;;  %v10713_v58 = vsub.f32 %v28193_v21, %v10712_v52  ;;  %v10733_v45 = vand.u32 4294901760, %v28207_v24 }
 0xb55   : > { %23709 = vmatpush3.bf16.msra.mxu0 %v23708_v8  ;;  %v10613_v8 = vand.u32 4294901760, %v17482_v61 }
 0xb56   : > { %23710 = vmatprep.subr.bf16.mxu0 %v24868_v26  ;;  %v10714_v3 = vand.u32 4294901760, %v10713_v58  ;;  %v10734_v30 = vsub.f32 %v28207_v24, %v10733_v45 }
 0xb57   : > { %23787 = vmatpush3.bf16.msra.mxu1 %v23786_v55  ;;  %v28198_v55 = vsub.f32 %v17482_v61, %v10613_v8 }
 0xb58   : > { %23788 = vmatprep.subr.bf16.mxu1 %v24868_v26 }
 0xb59   : > { %23712 = vmatpush3.bf16.msra.mxu0 %v23711_v7 }
 0xb5a   : > { %23713 = vmatprep.subr.bf16.mxu0 %v24868_v26 }
 0xb5b   : > { %23790 = vmatpush3.bf16.msra.mxu1 %v23789_v20  ;;  %v10726_v20 = vand.u32 4294901760, %v28198_v55 }
 0xb5c   : > { %23791 = vmatprep.subr.bf16.mxu1 %v24868_v26 }
 0xb5d   : > { %23715 = vmatpush3.bf16.msra.mxu0 %v23714_v6  ;;  %v10727_v11 = vsub.f32 %v28198_v55, %v10726_v20 }
 0xb5e   : > { %23716 = vmatprep.subr.bf16.mxu0 %v24868_v26 }
 0xb5f   : > { %23793 = vmatpush3.bf16.msra.mxu1 %v23792_v49 }
 0xb60   : > { %23794 = vmatprep.subr.bf16.mxu1 %v24868_v26 }
 0xb61   : > { %23718 = vmatpush3.bf16.msra.mxu0 %v23717_v47  ;;  %v10740_v47 = vand.u32 4294901760, %v28209_v12 }
 0xb62   : > { %23719 = vmatprep.subr.bf16.mxu0 %v24868_v26 }
 0xb63   : > { %23796 = vmatpush3.bf16.msra.mxu1 %v23795_v51  ;;  %v10741_v56 = vsub.f32 %v28209_v12, %v10740_v47 }
 0xb64   : > { %23821 = vmatprep.subr.bf16.mxu1 %v24868_v26 }
 0xb65   : > { %23721 = vmatpush3.bf16.msra.mxu0 %v23720_v28  ;;  %v10728_v28 = vand.u32 4294901760, %v10727_v11 }
 0xb66   : > { %21048 = vmatmul.mubr.f32.vlgmr.msra.gmra.mrb[20].mxu1 %v27827_v44  ;;  %23722 = vmatprep.subr.bf16.mxu0 %v24868_v26 }
 0xb67   : > { %23823 = vmatpush3.bf16.msra.mxu1 %v27429_v39  ;;  %21089 = vmatprep.mubr.msk.f32.mxu1 %vm24869_vm3, %v24870_v13 }
 0xb68   : > { %23824 = vmatprep.subr.bf16.mxu1 %v24868_v26 }
 0xb69   : > { %23724 = vmatpush3.bf16.msra.mxu0 %v23723_v27 }
 0xb6a   : > { %21090 = vmatmul.mubr.f32.vlgmr.msra.gmra.mrb[22].mxu1 %v10192_v62  ;;  %23749 = vmatprep.subr.bf16.mxu0 %v24868_v26  ;;  %v28261_v62 = vsub.f32 %v28214_v5, %v10622_v22 }
 0xb6b   : > { %23826 = vmatpush3.bf16.msra.mxu1 %v27439_v25  ;;  %21096 = vmatprep.mubr.msk.f32.mxu1 %vm24869_vm3, %v24870_v13  ;;  %v17478_v25 = vld [vmem:[%s29811_s7 + $0x108] sm:$0xff] }
 0xb6c   : > { %20943 = vmatmul.mubr.f32.vlgmr.msra.gmra.mrb[18].mxu0 %v27827_v44  ;;  %23827 = vmatprep.subr.bf16.mxu1 %v24868_v26 }
 0xb6d   : > { %23751 = vmatpush3.bf16.msra.mxu0 %v27729_v50  ;;  %21012 = vmatprep.mubr.msk.f32.mxu0 %vm24869_vm3, %v24870_v13 }
 0xb6e   : > { %23752 = vmatprep.subr.bf16.mxu0 %v24868_v26 }
 0xb71   : > { %23754 = vmatpush3.bf16.msra.mxu0 %v27751_v31 }
 0xb72   : > { %21097 = vmatmul.mubr.f32.vlgmr.msra.gmra.mrb[22].mxu1 %v28056_v29  ;;  %23755 = vmatprep.subr.bf16.mxu0 %v24868_v26 }
 0xb73   : > { %23829 = vmatpush3.bf16.msra.mxu1 %v27432_v2  ;;  %21103 = vmatprep.mubr.msk.f32.mxu1 %vm24869_vm3, %v24870_v13 }
 0xb74   : > { %23830 = vmatprep.subr.bf16.mxu1 %v24868_v26 }
 0xb75   : > { %23757 = vmatpush3.bf16.msra.mxu0 %v27775_v48 }
 0xb76   : > { %23758 = vmatprep.subr.bf16.mxu0 %v24868_v26 }
 0xb79   : > { %23760 = vmatpush3.bf16.msra.mxu0 %v27800_v40 }
 0xb7a   : > { %21104 = vmatmul.mubr.f32.vlgmr.msra.gmra.mrb[22].mxu1 %v10189_v42  ;;  %23761 = vmatprep.subr.bf16.mxu0 %v24868_v26 }
 0xb7b   : > { %23832 = vmatpush3.bf16.msra.mxu1 %v27429_v39  ;;  %21110 = vmatprep.mubr.msk.f32.mxu1 %vm24869_vm3, %v24870_v13 }
 0xb7c   : > { %23833 = vmatprep.subr.bf16.mxu1 %v24868_v26 }
 0xb7d   : > { %23763 = vmatpush3.bf16.msra.mxu0 %v27822_v54 }
 0xb7e   : > { %23764 = vmatprep.subr.bf16.mxu0 %v24868_v26 }
 0xb81   : > { %23766 = vmatpush3.bf16.msra.mxu0 %v27847_v23 }
 0xb82   : > { %21111 = vmatmul.mubr.f32.vlgmr.msra.gmra.mrb[22].mxu1 %v10190_v1  ;;  %23767 = vmatprep.subr.bf16.mxu0 %v24868_v26  ;;  %v28243_v1 = vld [vmem:[%s29811_s7 + $0x150] sm:$0xff] }
 0xb83   : > { %23835 = vmatpush3.bf16.msra.mxu1 %v27435_v38  ;;  %21117 = vmatprep.mubr.msk.f32.mxu1 %vm24869_vm3, %v24870_v13  ;;  %v17477_v38 = vld [vmem:[%s29811_s7 + $0x100] sm:$0xff] }
 0xb84   : > { %23836 = vmatprep.subr.bf16.mxu1 %v24868_v26 }
 0xb85   : > { %23769 = vmatpush3.bf16.msra.mxu0 %v27873_v57 }
 0xb86   : > { %23770 = vmatprep.subr.bf16.mxu0 %v24868_v26 }
 0xb89   : > { %23772 = vmatpush3.bf16.msra.mxu0 %v27892_v37 }
 0xb8a   : > { %21118 = vmatmul.mubr.f32.vlgmr.msra.gmra.mrb[22].mxu1 %v28056_v29  ;;  %23797 = vmatprep.subr.bf16.mxu0 %v24868_v26 }
 0xb8b   : > { %23838 = vmatpush3.bf16.msra.mxu1 %v27429_v39  ;;  %21124 = vmatprep.mubr.msk.f32.mxu1 %vm24869_vm3, %v24870_v13 }
 0xb8c   : > { %21013 = vmatmul.mubr.f32.vlgmr.msra.gmra.mrb[20].mxu0 %v9558_v35  ;;  %23863 = vmatprep.subr.bf16.mxu1 %v24868_v26  ;;  %v17481_v35 = vld [vmem:[%s29811_s7 + $0x120] sm:$0xff] }
 0xb8d   : > { %23799 = vmatpush3.bf16.msra.mxu0 %v27729_v50  ;;  %21082 = vmatprep.mubr.msk.f32.mxu0 %vm24869_vm3, %v24870_v13  ;;  %v10598_v50 = vand.u32 4294901760, %v17477_v38  ;;  %v10610_v16 = vand.u32 4294901760, %v17481_v35 }
 0xb8e   : > { %23800 = vmatprep.subr.bf16.mxu0 %v24868_v26 }
 0xb8f   : > { %v28196_v36 = vsub.f32 %v17481_v35, %v10610_v16  ;;  %v28228_v42 = vpack.c.bf16 %v10613_v8, %v10610_v16  ;;  %v10631_v35 = vand.u32 4294901760, %v28256_v9 }
 0xb91   : > { %23802 = vmatpush3.bf16.msra.mxu0 %v27751_v31  ;;  %v10601_v31 = vand.u32 4294901760, %v17478_v25  ;;  %v28289_v53 = vsub.f32 %v28256_v9, %v10631_v35 }
 0xb92   : > { %21125 = vmatmul.mubr.f32.vlgmr.msra.gmra.mrb[22].mxu1 %v28056_v29  ;;  %23803 = vmatprep.subr.bf16.mxu0 %v24868_v26  ;;  %v10719_v29 = vand.u32 4294901760, %v28196_v36 }
 0xb93   : > { %21194 = vmatprep.mubr.msk.f32.mxu1 %vm24869_vm3, %v24870_v13 }
 0xb94   : > { %v10720_v49 = vsub.f32 %v28196_v36, %v10719_v29 }
 0xb95   : > { %23805 = vmatpush3.bf16.msra.mxu0 %v27775_v48 }
 0xb96   : > { %23806 = vmatprep.subr.bf16.mxu0 %v24868_v26  ;;  %v10721_v51 = vand.u32 4294901760, %v10720_v49 }
 0xb99   : > { %23808 = vmatpush3.bf16.msra.mxu0 %v27800_v40  ;;  %v28158_v40 = vsub.f32 %v17477_v38, %v10598_v50  ;;  %v28269_v38 = vpack.c.bf16 %v10619_v4, %v10616_v46 }
 0xb9a   : > { %23809 = vmatprep.subr.bf16.mxu0 %v24868_v26 }
 0xb9d   : > { %23811 = vmatpush3.bf16.msra.mxu0 %v27822_v54  ;;  %v28160_v54 = vsub.f32 %v17478_v25, %v10601_v31  ;;  %v23870_v25 = vpack.c.bf16 %v10728_v28, %v10721_v51  ;;  %v17491_v28 = vld [vmem:[%s29811_s7 + $0x170] sm:$0xff] }
 0xb9e   : > { %23812 = vmatprep.subr.bf16.mxu0 %v24868_v26 }
 0xb9f   : > { %v10698_v14 = vand.u32 4294901760, %v28160_v54 }
 0xba1   : > { %23814 = vmatpush3.bf16.msra.mxu0 %v27847_v23  ;;  %v17479_v23 = vld [vmem:[%s29811_s7 + $0x110] sm:$0xff]  ;;  %v10699_v19 = vsub.f32 %v28160_v54, %v10698_v14 }
 0xba2   : > { %23815 = vmatprep.subr.bf16.mxu0 %v24868_v26  ;;  %v10604_v63 = vand.u32 4294901760, %v17479_v23 }
 0xba3   : > { %v10700_v7 = vand.u32 4294901760, %v10699_v19 }
 0xba4   : > { %v28191_v17 = vsub.f32 %v17479_v23, %v10604_v63  ;;  %v28200_v43 = vpack.c.bf16 %v10607_v60, %v10604_v63  ;;  %v10747_v23 = vand.u32 4294901760, %v28261_v62 }
 0xba5   : > { %23817 = vmatpush3.bf16.msra.mxu0 %v27873_v57  ;;  %v28168_v57 = vpack.c.bf16 %v10601_v31, %v10598_v50  ;;  %v10735_v50 = vand.u32 4294901760, %v10734_v30  ;;  %v10628_v31 = vand.u32 4294901760, %v28243_v1  ;;  %v17492_v30 = vld [vmem:[%s29811_s7 + $0x178] sm:$0xff] }
 0xba6   : > { %23818 = vmatprep.subr.bf16.mxu0 %v24868_v26  ;;  %v10705_v0 = vand.u32 4294901760, %v28191_v17  ;;  %v10748_v60 = vsub.f32 %v28261_v62, %v10747_v23 }
 0xba7   : > { %v28280_v63 = vsub.f32 %v28243_v1, %v10628_v31  ;;  %v28350_v5 = vpack.c.bf16 %v10631_v35, %v10628_v31  ;;  %v23891_v31 = vpack.c.bf16 %v28193_v21, %v28191_v17  ;;  %v23894_v35 = vpack.c.bf16 %v28198_v55, %v28196_v36 }
 0xba8   : > { %v10706_v34 = vsub.f32 %v28191_v17, %v10705_v0  ;;  %v10749_v33 = vand.u32 4294901760, %v10748_v60  ;;  %v29918_v21 = vand.u32 4294901760, %v28289_v53 }
 0xba9   : > { %23820 = vmatpush3.bf16.msra.mxu0 %v27892_v37  ;;  %v10691_v37 = vand.u32 4294901760, %v28158_v40  ;;  %v29863_v16 = vand.u32 4294901760, %v28280_v63  ;;  %v29917_v17 = vand.u32 4294901760, %v28280_v63 }
 0xbaa   : > { %23839 = vmatprep.subr.bf16.mxu0 %v24868_v26  ;;  %v10707_v41 = vand.u32 4294901760, %v10706_v34 }
 0xbab   : > { %v10692_v18 = vsub.f32 %v28158_v40, %v10691_v37  ;;  %v10762_v19 = vsub.f32 %v28280_v63, %v29863_v16  ;;  %v23951_v36 = vpack.c.bf16 %v29918_v21, %v29917_v17 }
 0xbac   : > { %21083 = vmatmul.mubr.f32.vlgmr.msra.gmra.mrb[22].mxu0 %v27827_v44  ;;  %v23867_v27 = vpack.c.bf16 %v10714_v3, %v10707_v41 }
 0xbad   : > { %21159 = vmatprep.mubr.msk.f32.mxu0 %vm24869_vm3, %v24870_v13  ;;  %23841 = vmatpush3.bf16.msra.mxu0 %v28168_v57  ;;  %v10693_v59 = vand.u32 4294901760, %v10692_v18  ;;  %v29862_v18 = vand.u32 4294901760, %v28289_v53 }
 0xbae   : > { %23842 = vmatprep.subr.bf16.mxu0 %v24868_v26 }
 0xbaf   : > { %v23864_v6 = vpack.c.bf16 %v10700_v7, %v10693_v59  ;;  %v10769_v4 = vsub.f32 %v28289_v53, %v29862_v18  ;;  %v10763_v59 = vand.u32 4294901760, %v10762_v19  ;;  %v17489_v7 = vld [vmem:[%s29811_s7 + $0x160] sm:$0xff] }
 0xbb0   : > { %v10634_v49 = vand.u32 4294901760, %v17489_v7 }
 0xbb1   : > { %23844 = vmatpush3.bf16.msra.mxu0 %v28200_v43  ;;  %23865 = vmatpush3.bf16.msra.mxu1 %v23864_v6  ;;  %v17490_v6 = vld [vmem:[%s29811_s7 + $0x168] sm:$0xff]  ;;  %v10770_v58 = vand.u32 4294901760, %v10769_v4 }
 0xbb2   : > { %23845 = vmatprep.subr.bf16.mxu0 %v24868_v26  ;;  %23866 = vmatprep.subr.bf16.mxu1 %v24868_v26  ;;  %v10637_v11 = vand.u32 4294901760, %v17490_v6  ;;  %v28308_v41 = vsub.f32 %v17489_v7, %v10634_v49 }
 0xbb3   : > { %v23879_v51 = vpack.c.bf16 %v10770_v58, %v10763_v59 }
 0xbb4   : > { %v28310_v3 = vsub.f32 %v17490_v6, %v10637_v11  ;;  %v29861_v9 = vand.u32 4294901760, %v28308_v41  ;;  %v28338_v6 = vpack.c.bf16 %v10625_v15, %v10622_v22  ;;  %v29919_v55 = vand.u32 4294901760, %v28308_v41 }
 0xbb5   : > { %23847 = vmatpush3.bf16.msra.mxu0 %v28228_v42  ;;  %23868 = vmatpush3.bf16.msra.mxu1 %v23867_v27 }
 0xbb6   : > { %23848 = vmatprep.subr.bf16.mxu0 %v24868_v26  ;;  %23869 = vmatprep.subr.bf16.mxu1 %v24868_v26  ;;  %v29860_v27 = vand.u32 4294901760, %v28310_v3  ;;  %v10776_v60 = vsub.f32 %v28308_v41, %v29861_v9 }
 0xbb9   : > { %v28148_v39 = vpop.f32.mrb[12].mxu1  ;;  %23850 = vmatpush3.bf16.msra.mxu0 %v28269_v38  ;;  %23871 = vmatpush3.bf16.msra.mxu1 %v23870_v25  ;;  %v10640_v25 = vand.u32 4294901760, %v17491_v28 }
 0xbba   : > { %v20769_v2 = vpop.f32.mrb[13].mxu1  ;;  %23851 = vmatprep.subr.bf16.mxu0 %v24868_v26  ;;  %23872 = vmatprep.subr.bf16.mxu1 %v24868_v26 }
 0xbbb   : > { %v28266_v2 = vsub.f32 %v28219_v32, %v10625_v15 }
 0xbbd   : > { %v29864_v10 = vand.u32 4294901760, %v28266_v2  ;;  %23853 = vmatpush3.bf16.msra.mxu0 %v28338_v6 }
 0xbbe   : > { %23854 = vmatprep.subr.bf16.mxu0 %v24868_v26 }
 0xbbf   : > { %v28156_v48 = vpop.f32.mrb[10].mxu0  ;;  %v10755_v61 = vsub.f32 %v28266_v2, %v29864_v10 }
 0xbc0   : > { %v20699_v44 = vpop.f32.mrb[11].mxu0 }
 0xbc1   : > { %v10742_v44 = vand.u32 4294901760, %v10741_v56  ;;  %v10756_v46 = vand.u32 4294901760, %v10755_v61  ;;  %v10783_v61 = vsub.f32 %v28310_v3, %v29860_v27  ;;  %23856 = vmatpush3.bf16.msra.mxu0 %v28350_v5 }
 0xbc2   : > { %23857 = vmatprep.subr.bf16.mxu0 %v24868_v26 }
 0xbc3   : > { %v23873_v8 = vpack.c.bf16 %v10742_v44, %v10735_v50  ;;  %v23876_v34 = vpack.c.bf16 %v10756_v46, %v10749_v33  ;;  %v10643_v50 = vand.u32 4294901760, %v17492_v30  ;;  %v10777_v46 = vand.u32 4294901760, %v10776_v60 }
 0xbc4   : > { %v10784_v19 = vand.u32 4294901760, %v10783_v61  ;;  %v23897_v60 = vpack.c.bf16 %v28209_v12, %v28207_v24 }
 0xbc5   : > { %23874 = vmatpush3.bf16.msra.mxu1 %v23873_v8  ;;  %v28327_v8 = vsub.f32 %v17491_v28, %v10640_v25  ;;  %v28329_v33 = vsub.f32 %v17492_v30, %v10643_v50  ;;  %v28362_v1 = vpack.c.bf16 %v10643_v50, %v10640_v25  ;;  %v23900_v50 = vpack.c.bf16 %v28266_v2, %v28261_v62 }
 0xbc6   : > { %23875 = vmatprep.subr.bf16.mxu1 %v24868_v26 }
 0xbc7   : > { %v29859_v4 = vand.u32 4294901760, %v28327_v8  ;;  %v29858_v59 = vand.u32 4294901760, %v28329_v33 }
 0xbc9   : > { %23877 = vmatpush3.bf16.msra.mxu1 %v23876_v34  ;;  %v23882_v34 = vpack.c.bf16 %v10784_v19, %v10777_v46  ;;  %v10790_v58 = vsub.f32 %v28327_v8, %v29859_v4 }
 0xbca   : > { %23878 = vmatprep.subr.bf16.mxu1 %v24868_v26 }
 0xbcb   : > { %v10791_v32 = vand.u32 4294901760, %v10790_v58  ;;  %v23909_v58 = vpack.c.bf16 %v28329_v33, %v28327_v8 }
 0xbcd   : > { %23880 = vmatpush3.bf16.msra.mxu1 %v23879_v51  ;;  %v10797_v51 = vsub.f32 %v28329_v33, %v29858_v59 }
 0xbce   : > { %23881 = vmatprep.subr.bf16.mxu1 %v24868_v26 }
 0xbcf   : > { %v10798_v22 = vand.u32 4294901760, %v10797_v51 }
 0xbd1   : > { %23883 = vmatpush3.bf16.msra.mxu1 %v23882_v34  ;;  %v23906_v34 = vpack.c.bf16 %v28310_v3, %v28308_v41  ;;  %v11250_v41 = vld [vmem:[%s29815_s11] sm:$0xff] }
 0xbd2   : > { %23884 = vmatprep.subr.bf16.mxu1 %v24868_v26 }
 0xbd9   : > { %v9384_v56 = vpop.f32.mrb[14].mxu1 }
 0xbda   : > { %v20839_v44 = vpop.f32.mrb[15].mxu1 }
 0xbdb   : > { %v23885_v44 = vpack.c.bf16 %v10798_v22, %v10791_v32 }
 0xbdd   : > { %23886 = vmatpush3.bf16.msra.mxu1 %v23885_v44 }
 0xbde   : > { %23911 = vmatprep.subr.bf16.mxu1 %v24868_v26 }
 0xbdf   : > { %v9072_v7 = vpop.f32.mrb[12].mxu0 }
 0xbe0   : > { %v9073_v28 = vadd.f32 %v9072_v7, %v28156_v48  ;;  %v20734_v30 = vpop.f32.mrb[13].mxu0  ;;  %v28358_v48 = vpack.c.bf16 %v10637_v11, %v10634_v49  ;;  %v23903_v7 = vpack.c.bf16 %v28289_v53, %v28280_v63 }
 0xbe2   : > { %v9177_v15 = vadd.f32 %v28148_v39, %v9073_v28  ;;  %23859 = vmatpush3.bf16.msra.mxu0 %v28358_v48  ;;  %v23888_v39 = vpack.c.bf16 %v28160_v54, %v28158_v40  ;;  %v23942_v40 = vpack.c.bf16 %v10726_v20, %v10719_v29  ;;  %v23945_v54 = vpack.c.bf16 %v10740_v47, %v10733_v45 }
 0xbe3   : > { %23860 = vmatprep.subr.bf16.mxu0 %v24868_v26  ;;  %v29922_v29 = vand.u32 4294901760, %v28329_v33 }
 0xbe6   : > { %23862 = vmatpush3.bf16.msra.mxu0 %v28362_v1 }
 0xbe7   : > { %23887 = vmatprep.subr.bf16.mxu0 %v24868_v26 }
 0xbf9   : > { %v9562_v49 = vpop.f32.mrb[16].mxu1 }
 0xbfa   : > { %v20909_v11 = vpop.f32.mrb[17].mxu1 }
 0xbff   : > { %v9265_v25 = vpop.f32.mrb[14].mxu0 }
 0xc00   : > { %v9266_v61 = vadd.f32 %v9265_v25, %v9177_v15  ;;  %v20804_v46 = vpop.f32.mrb[15].mxu0 }
 0xc02   : > { %v9385_v19 = vadd.f32 %v9384_v56, %v9266_v61 }
 0xc19   : > { %v9817_v51 = vpop.f32.mrb[18].mxu1 }
 0xc1a   : > { %v20979_v28 = vpop.f32.mrb[19].mxu1 }
 0xc1f   : > { %v9471_v30 = vpop.f32.mrb[16].mxu0 }
 0xc20   : > { %v9472_v32 = vadd.f32 %v9471_v30, %v9385_v19  ;;  %v20874_v22 = vpop.f32.mrb[17].mxu0 }
 0xc22   : > { %v9563_v44 = vadd.f32 %v9562_v49, %v9472_v32 }
 0xc39   : > { %v10025_v11 = vpop.f32.mrb[20].mxu1 }
 0xc3a   : > { %v21049_v59 = vpop.f32.mrb[21].mxu1 }
 0xc3f   : > { %v9713_v15 = vpop.f32.mrb[18].mxu0 }
 0xc40   : > { %v9714_v25 = vadd.f32 %v9713_v15, %v9563_v44  ;;  %v20944_v56 = vpop.f32.mrb[19].mxu0 }
 0xc42   : > { %v9818_v61 = vadd.f32 %v9817_v51, %v9714_v25 }
 0xc5f   : > { %v9906_v46 = vpop.f32.mrb[20].mxu0 }
 0xc60   : > { %v9907_v4 = vadd.f32 %v9906_v46, %v9818_v61  ;;  %v21014_v27 = vpop.f32.mrb[21].mxu0 }
 0xc62   : > { %v10026_v9 = vadd.f32 %v10025_v11, %v9907_v4 }
 0xc65   : > { %v10576_v18 = vpop.f32.mrb[22].mxu1 }
 0xc66   : > { %v28382_v16 = vand.u32 4294901760, %v10576_v18  ;;  %v21126_v10 = vpop.f32.mrb[23].mxu1 }
 0xc68   : > { %v10679_v28 = vsub.f32 %v10576_v18, %v28382_v16  ;;  %21195 = vmatmul.mubr.f32.vlgmr.msra.gmra.mrb[24].mxu1 %v28382_v16 }
 0xc69   : > { %23913 = vmatpush3.bf16.msra.mxu1 %v28168_v57  ;;  %21264 = vmatprep.mubr.msk.f32.mxu1 %vm24869_vm3, %v24870_v13 }
 0xc6a   : > { %v10680_v59 = vand.u32 4294901760, %v10679_v28  ;;  %23914 = vmatprep.subr.bf16.mxu1 %v24868_v26 }
 0xc6c   : > { %v10681_v49 = vsub.f32 %v10679_v28, %v10680_v59 }
 0xc6d   : > { %23916 = vmatpush3.bf16.msra.mxu1 %v28200_v43 }
 0xc6e   : > { %v10682_v27 = vand.u32 4294901760, %v10681_v49  ;;  %23917 = vmatprep.subr.bf16.mxu1 %v24868_v26  ;;  %v12162_v49 = vld [vmem:[#allocation7 + $0x48] sm:$0xff] }
 0xc70   : > { %21160 = vmatmul.mubr.f32.vlgmr.msra.gmra.mrb[24].mxu0 %v10682_v27 }
 0xc71   : > { %23889 = vmatpush3.bf16.msra.mxu0 %v23888_v39  ;;  %23919 = vmatpush3.bf16.msra.mxu1 %v28228_v42 }
 0xc72   : > { %23890 = vmatprep.subr.bf16.mxu0 %v24868_v26  ;;  %23920 = vmatprep.subr.bf16.mxu1 %v24868_v26 }
 0xc73   : > { %21229 = vmatprep.mubr.msk.f32.mxu0 %vm24869_vm3, %v24870_v13 }
 0xc75   : > { %23892 = vmatpush3.bf16.msra.mxu0 %v23891_v31  ;;  %23922 = vmatpush3.bf16.msra.mxu1 %v28269_v38 }
 0xc76   : > { %23893 = vmatprep.subr.bf16.mxu0 %v24868_v26  ;;  %23923 = vmatprep.subr.bf16.mxu1 %v24868_v26 }
 0xc79   : > { %23895 = vmatpush3.bf16.msra.mxu0 %v23894_v35  ;;  %23925 = vmatpush3.bf16.msra.mxu1 %v28338_v6 }
 0xc7a   : > { %23896 = vmatprep.subr.bf16.mxu0 %v24868_v26  ;;  %23926 = vmatprep.subr.bf16.mxu1 %v24868_v26 }
 0xc7d   : > { %23898 = vmatpush3.bf16.msra.mxu0 %v23897_v60  ;;  %23928 = vmatpush3.bf16.msra.mxu1 %v28350_v5 }
 0xc7e   : > { %23899 = vmatprep.subr.bf16.mxu0 %v24868_v26  ;;  %23929 = vmatprep.subr.bf16.mxu1 %v24868_v26 }
 0xc7f   : > { %v10112_v10 = vpop.f32.mrb[22].mxu0 }
 0xc80   : > { %v28406_v18 = vadd.f32 %v10112_v10, %v10026_v9  ;;  %v21084_v4 = vpop.f32.mrb[23].mxu0  ;;  %v23936_v9 = vpack.c.bf16 %v10698_v14, %v10691_v37  ;;  %v29916_v37 = vand.u32 4294901760, %v28266_v2  ;;  %v12177_v10 = vand.u32 4294901760, %v12162_v49 }
 0xc81   : > { %23901 = vmatpush3.bf16.msra.mxu0 %v23900_v50  ;;  %23931 = vmatpush3.bf16.msra.mxu1 %v28358_v48  ;;  %v28556_v4 = vld [vmem:[#allocation7 + $0x58] sm:$0xff] }
 0xc82   : > { %23902 = vmatprep.subr.bf16.mxu0 %v24868_v26  ;;  %23932 = vmatprep.subr.bf16.mxu1 %v24868_v26  ;;  %v23948_v14 = vpack.c.bf16 %v29916_v37, %v10747_v23  ;;  %v28565_v37 = vld [vmem:[#allocation7 + $0x60] sm:$0xff] }
 0xc85   : > { %23904 = vmatpush3.bf16.msra.mxu0 %v23903_v7  ;;  %23934 = vmatpush3.bf16.msra.mxu1 %v28362_v1 }
 0xc86   : > { %23905 = vmatprep.subr.bf16.mxu0 %v24868_v26  ;;  %23959 = vmatprep.subr.bf16.mxu1 %v24868_v26 }
 0xc88   : > { %21265 = vmatmul.mubr.f32.vlgmr.msra.gmra.mrb[26].mxu1 %v10680_v59  ;;  %v12161_v59 = vld [vmem:[#allocation7 + $0x40] sm:$0xff] }
 0xc89   : > { %23907 = vmatpush3.bf16.msra.mxu0 %v23906_v34  ;;  %23961 = vmatpush3.bf16.msra.mxu1 %v28168_v57  ;;  %v23939_v57 = vpack.c.bf16 %v10712_v52, %v10705_v0  ;;  %v29921_v52 = vand.u32 4294901760, %v28327_v8  ;;  %v11253_v8 = vsel %vm11251_vm6, %v11250_v41, 0  ;;  %v17493_v34 = vld [vmem:[%s29813_s9] ss:$0 sm:$0xff]  ;;  %v12174_v27 = vand.u32 4294901760, %v12161_v59 }
 0xc8a   : > { %23908 = vmatprep.subr.bf16.mxu0 %v24868_v26  ;;  %23962 = vmatprep.subr.bf16.mxu1 %v24868_v26 }
 0xc8b   : > { %21334 = vmatprep.mubr.msk.f32.mxu1 %vm24869_vm3, %v24870_v13  ;;  %v23957_v20 = vpack.c.bf16 %v29922_v29, %v29921_v52 }
 0xc8d   : > { %23910 = vmatpush3.bf16.msra.mxu0 %v23909_v58  ;;  %23964 = vmatpush3.bf16.msra.mxu1 %v28200_v43  ;;  %v29920_v43 = vand.u32 4294901760, %v28310_v3 }
 0xc8e   : > { %23935 = vmatprep.subr.bf16.mxu0 %v24868_v26  ;;  %23965 = vmatprep.subr.bf16.mxu1 %v24868_v26 }
 0xc8f   : > { %v23954_v0 = vpack.c.bf16 %v29920_v43, %v29919_v55  ;;  %v12186_v43 = vand.u32 4294901760, %v28565_v37 }
 0xc90   : > { %21230 = vmatmul.mubr.f32.vlgmr.msra.gmra.mrb[26].mxu0 %v10679_v28 }
 0xc91   : > { %23937 = vmatpush3.bf16.msra.mxu0 %v23936_v9  ;;  %23967 = vmatpush3.bf16.msra.mxu1 %v28228_v42  ;;  %v28559_v9 = vsub.f32 %v12161_v59, %v12174_v27 }
 0xc92   : > { %23938 = vmatprep.subr.bf16.mxu0 %v24868_v26  ;;  %23968 = vmatprep.subr.bf16.mxu1 %v24868_v26 }
 0xc93   : > { %21299 = vmatprep.mubr.msk.f32.mxu0 %vm24869_vm3, %v24870_v13  ;;  %v12259_v17 = vand.u32 4294901760, %v28559_v9 }
 0xc95   : > { %23940 = vmatpush3.bf16.msra.mxu0 %v23939_v57  ;;  %23970 = vmatpush3.bf16.msra.mxu1 %v28269_v38  ;;  %v28561_v57 = vsub.f32 %v12162_v49, %v12177_v10  ;;  %v12260_v52 = vsub.f32 %v28559_v9, %v12259_v17 }
 0xc96   : > { %23941 = vmatprep.subr.bf16.mxu0 %v24868_v26  ;;  %23971 = vmatprep.subr.bf16.mxu1 %v24868_v26 }
 0xc97   : > { %v12266_v21 = vand.u32 4294901760, %v28561_v57 }
 0xc99   : > { %23943 = vmatpush3.bf16.msra.mxu0 %v23942_v40  ;;  %23973 = vmatpush3.bf16.msra.mxu1 %v28338_v6  ;;  %v12267_v29 = vsub.f32 %v28561_v57, %v12266_v21 }
 0xc9a   : > { %23944 = vmatprep.subr.bf16.mxu0 %v24868_v26  ;;  %23974 = vmatprep.subr.bf16.mxu1 %v24868_v26 }
 0xc9d   : > { %23946 = vmatpush3.bf16.msra.mxu0 %v23945_v54  ;;  %23976 = vmatpush3.bf16.msra.mxu1 %v28350_v5  ;;  %v28493_v5 = vand.u32 4294901760, %v11253_v8  ;;  %v12183_v54 = vand.u32 4294901760, %v28556_v4 }
 0xc9e   : > { %23947 = vmatprep.subr.bf16.mxu0 %v24868_v26  ;;  %23977 = vmatprep.subr.bf16.mxu1 %v24868_v26 }
 0xc9f   : > { %v28583_v55 = vsub.f32 %v28556_v4, %v12183_v54 }
 0xca1   : > { %23949 = vmatpush3.bf16.msra.mxu0 %v23948_v14  ;;  %23979 = vmatpush3.bf16.msra.mxu1 %v28358_v48  ;;  %v28567_v14 = vld [vmem:[#allocation7 + $0x68] sm:$0xff] }
 0xca2   : > { %23950 = vmatprep.subr.bf16.mxu0 %v24868_v26  ;;  %23980 = vmatprep.subr.bf16.mxu1 %v24868_v26 }
 0xca5   : > { %23952 = vmatpush3.bf16.msra.mxu0 %v23951_v36  ;;  %23982 = vmatpush3.bf16.msra.mxu1 %v28362_v1  ;;  %v28498_v1 = vsub.f32 %v11253_v8, %v28493_v5 }
 0xca6   : > { %23953 = vmatprep.subr.bf16.mxu0 %v24868_v26  ;;  %21367 = vmatprep.subr.mxu1 %v24870_v13 }
 0xca7   : > { %v11323_v19 = vand.u32 4294901760, %v28498_v1 }
 0xca8   : > { %21335 = vmatmul.mubr.f32.vlgmr.msra.gmra.mrb[28].mxu1 %v28382_v16 }
 0xca9   : > { %23955 = vmatpush3.bf16.msra.mxu0 %v23954_v0  ;;  %21369 = vmatprep.mubr.msk.f32.mxu1 %vm24869_vm3, %v24870_v13  ;;  %v11324_v30 = vsub.f32 %v28498_v1, %v11323_v19  ;;  %v12189_v0 = vand.u32 4294901760, %v28567_v14 }
 0xcaa   : > { %23956 = vmatprep.subr.bf16.mxu0 %v24868_v26 }
 0xcab   : > { %v11325_v11 = vand.u32 4294901760, %v11324_v30 }
 0xcad   : > { %23958 = vmatpush3.bf16.msra.mxu0 %v23957_v20 }
 0xcae   : > { %21337 = vmatprep.subr.mxu0 %v24870_v13 }
 0xcb0   : > { %21300 = vmatmul.mubr.f32.vlgmr.msra.gmra.mrb[28].mxu0 %v28382_v16  ;;  %v17494_v16 = vld [vmem:[%s29815_s11 + $0x8] sm:$0xff] }
 0xcb1   : > { %21339 = vmatprep.mubr.msk.f32.mxu0 %vm24869_vm3, %v24870_v13  ;;  %v11712_v33 = vsel %vm11251_vm6, %v17494_v16, 0 }
 0xcb2   : > { %v28495_v48 = vand.u32 4294901760, %v11712_v33 }
 0xcb4   : > { %v28501_v39 = vsub.f32 %v11712_v33, %v28495_v48 }
 0xcb6   : > { %v11782_v7 = vand.u32 4294901760, %v28501_v39 }
 0xcb8   : > { %v11783_v32 = vsub.f32 %v28501_v39, %v11782_v7 }
 0xcba   : > { %v11784_v15 = vand.u32 4294901760, %v11783_v32 }
 0xd3b   : > { %v10835_v24 = vpop.f32.mrb[24].mxu1 }
 0xd3c   : > { %v21196_v12 = vpop.f32.mrb[25].mxu1 }
 0xd3d   : > { %v28602_v12 = vsub.f32 %v28565_v37, %v12186_v43 }
 0xd43   : > { %v10684_v42 = vpop.f32.mrb[24].mxu0 }
 0xd44   : > { %v10836_v45 = vadd.f32 %v10835_v24, %v10684_v42  ;;  %v21161_v47 = vpop.f32.mrb[25].mxu0  ;;  %v12280_v24 = vand.u32 4294901760, %v28583_v55  ;;  %v28607_v42 = vsub.f32 %v28567_v14, %v12189_v0  ;;  %v24008_v14 = vpack.c.bf16 %v28561_v57, %v28559_v9 }
 0xd45   : > { %v12268_v47 = vand.u32 4294901760, %v12267_v29 }
 0xd5b   : > { %v11028_v62 = vpop.f32.mrb[26].mxu1 }
 0xd5c   : > { %v21266_v2 = vpop.f32.mrb[27].mxu1 }
 0xd5d   : > { %v12281_v2 = vsub.f32 %v28583_v55, %v12280_v24 }
 0xd5f   : > { %v12282_v16 = vand.u32 4294901760, %v12281_v2  ;;  %v28709_v2 = vld [vmem:[#allocation7 + $0x18] sm:$0xff] }
 0xd63   : > { %v10939_v38 = vpop.f32.mrb[26].mxu0 }
 0xd64   : > { %v10940_v23 = vadd.f32 %v10939_v38, %v10836_v45  ;;  %v21231_v63 = vpop.f32.mrb[27].mxu0  ;;  %v12261_v45 = vand.u32 4294901760, %v12260_v52  ;;  %v12287_v38 = vand.u32 4294901760, %v28602_v12 }
 0xd66   : > { %v11029_v53 = vadd.f32 %v11028_v62, %v10940_v23  ;;  %v12294_v23 = vand.u32 4294901760, %v28607_v42  ;;  %v23996_v63 = vpack.c.bf16 %v12268_v47, %v12261_v45 }
 0xd68   : > { %v12295_v8 = vsub.f32 %v28607_v42, %v12294_v23 }
 0xd7b   : > { %v11234_v3 = vpop.f32.mrb[28].mxu1 }
 0xd7c   : > { %v21336_v6 = vpop.f32.mrb[29].mxu1 }
 0xd83   : > { %v11147_v31 = vpop.f32.mrb[28].mxu0 }
 0xd84   : > { %v11148_v35 = vadd.f32 %v11147_v31, %v11029_v53  ;;  %v21301_v60 = vpop.f32.mrb[29].mxu0  ;;  %v28627_v53 = vpack.c.bf16 %v12177_v10, %v12174_v27 }
 0xd86   : > { %v11235_v50 = vadd.f32 %v11234_v3, %v11148_v35  ;;  %v12288_v3 = vsub.f32 %v28602_v12, %v12287_v38 }
 0xd88   : > { %v11238_v58 = vadd.f32 %v11235_v50, %v28406_v18  ;;  %v28554_v18 = vld [vmem:[#allocation7 + $0x50] sm:$0xff]  ;;  %v12289_v6 = vand.u32 4294901760, %v12288_v3  ;;  %v12723_v3 = vand.u32 4294901760, %v28709_v2 }
 0xd89   : > { %v12180_v40 = vand.u32 4294901760, %v28554_v18 }
 0xd8a   : > { %v11246_v51 = vadd.f32 %v17493_v34, %v11238_v58 }
 0xd8b   : > { %v28578_v36 = vsub.f32 %v28554_v18, %v12180_v40  ;;  %v28658_v32 = vpack.c.bf16 %v12183_v54, %v12180_v40 }
 0xd8c   : > { %vm11247_vm7 = vcmp.gt.f32.partialorder %v11246_v51, 0.0  ;;  %v11248_v22 = vmul.f32 0.01, %v11246_v51 }
 0xd8d   : > { %v12273_v20 = vand.u32 4294901760, %v28578_v36  ;;  %v24011_v47 = vpack.c.bf16 %v28583_v55, %v28578_v36 }
 0xd8e   : > { %v11249_v44 = vsel %vm11247_vm7, %v11246_v51, %v11248_v22 }
 0xd8f   : > { %v28511_v25 = vand.u32 4294901760, %v11249_v44  ;;  %v12274_v62 = vsub.f32 %v28578_v36, %v12273_v20 }
 0xd91   : > { %v28514_v56 = vsub.f32 %v11249_v44, %v28511_v25  ;;  %21338 = vmatpush3.msra.mxu0 %v28511_v25  ;;  %21368 = vmatpush3.msra.mxu1 %v28511_v25  ;;  %v12275_v41 = vand.u32 4294901760, %v12274_v62  ;;  %v28667_v44 = vpack.c.bf16 %v12189_v0, %v12186_v43  ;;  %v28697_v43 = vld [vmem:[#allocation7] sm:$0xff]  ;;  %v28699_v0 = vld [vmem:[#allocation7 + $0x8] sm:$0xff]  ;;  %v28707_v62 = vld [vmem:[#allocation7 + $0x10] sm:$0xff] }
 0xd92   : > { %21340 = vmatmul.mubr.f32.vlgmr.msra.gmra.mrb[30].mxu0 %v11325_v11  ;;  %21370 = vmatmul.mubr.f32.vlgmr.msra.gmra.mrb[30].mxu1 %v11784_v15  ;;  %v12714_v29 = vand.u32 4294901760, %v28697_v43  ;;  %v12717_v45 = vand.u32 4294901760, %v28699_v0 }
 0xd93   : > { %21342 = vmatprep.subr.mxu0 %v24870_v13  ;;  %21372 = vmatprep.subr.mxu1 %v24870_v13  ;;  %v28521_v61 = vand.u32 4294901760, %v28514_v56  ;;  %v23999_v33 = vpack.c.bf16 %v12282_v16, %v12275_v41  ;;  %v12720_v16 = vand.u32 4294901760, %v28707_v62 }
 0xd94   : > { %21344 = vmatprep.mubr.msk.f32.mxu0 %vm24869_vm3, %v24870_v13  ;;  %21374 = vmatprep.mubr.msk.f32.mxu1 %vm24869_vm3, %v24870_v13  ;;  %v28723_v41 = vsub.f32 %v28699_v0, %v12717_v45 }
 0xd95   : > { %v11335_v46 = vsub.f32 %v28514_v56, %v28521_v61 }
 0xd97   : > { %v28529_v28 = vand.u32 4294901760, %v11335_v46 }
 0xd99   : > { %21343 = vmatpush3.msra.mxu0 %v28529_v28  ;;  %21373 = vmatpush3.msra.mxu1 %v28529_v28 }
 0xd9a   : > { %21345 = vmatmul.mubr.f32.vlgmr.msra.gmra.mrb[30].mxu0 %v28493_v5  ;;  %21347 = vmatprep.subr.mxu0 %v24870_v13 }
 0xd9b   : > { %21375 = vmatmul.mubr.f32.vlgmr.msra.gmra.mrb[30].mxu1 %v28495_v48  ;;  %21377 = vmatprep.subr.mxu1 %v24870_v13 }
 0xd9c   : > { %21348 = vmatpush3.msra.mxu0 %v28514_v56  ;;  %21378 = vmatpush3.msra.mxu1 %v28514_v56 }
 0xd9d   : > { %21349 = vmatprep.mubr.msk.f32.mxu0 %vm24869_vm3, %v24870_v13  ;;  %21352 = vmatprep.subr.mxu0 %v24870_v13 }
 0xd9e   : > { %21379 = vmatprep.mubr.msk.f32.mxu1 %vm24869_vm3, %v24870_v13  ;;  %21382 = vmatprep.subr.mxu1 %v24870_v13 }
 0xda2   : > { %21350 = vmatmul.mubr.f32.vlgmr.msra.gmra.mrb[30].mxu0 %v28498_v1  ;;  %v12296_v1 = vand.u32 4294901760, %v12295_v8  ;;  %v24014_v8 = vpack.c.bf16 %v28607_v42, %v28602_v12 }
 0xda3   : > { %21353 = vmatpush3.msra.mxu0 %v28511_v25  ;;  %21380 = vmatmul.mubr.f32.vlgmr.msra.gmra.mrb[30].mxu1 %v28501_v39  ;;  %v12168_v39 = vld [vmem:[#allocation7 + $0x78] sm:$0xff] }
 0xda4   : > { %21383 = vmatpush3.msra.mxu1 %v28511_v25  ;;  %21354 = vmatprep.mubr.msk.f32.mxu0 %vm24869_vm3, %v24870_v13  ;;  %v12195_v35 = vand.u32 4294901760, %v12168_v39 }
 0xda5   : > { %21357 = vmatprep.subr.mxu0 %v24870_v13  ;;  %21384 = vmatprep.mubr.msk.f32.mxu1 %vm24869_vm3, %v24870_v13 }
 0xda6   : > { %21387 = vmatprep.subr.mxu1 %v24870_v13  ;;  %v28648_v50 = vsub.f32 %v12168_v39, %v12195_v35  ;;  %v28746_v39 = vsub.f32 %v28709_v2, %v12723_v3 }
 0xdaa   : > { %21355 = vmatmul.mubr.f32.vlgmr.msra.gmra.mrb[30].mxu0 %v11323_v19 }
 0xdab   : > { %21358 = vmatpush3.msra.mxu0 %v28521_v61  ;;  %21385 = vmatmul.mubr.f32.vlgmr.msra.gmra.mrb[30].mxu1 %v11782_v7  ;;  %v12308_v7 = vand.u32 4294901760, %v28648_v50 }
 0xdac   : > { %21388 = vmatpush3.msra.mxu1 %v28521_v61  ;;  %21359 = vmatprep.mubr.msk.f32.mxu0 %vm24869_vm3, %v24870_v13 }
 0xdad   : > { %21362 = vmatprep.subr.mxu0 %v24870_v13  ;;  %21389 = vmatprep.mubr.msk.f32.mxu1 %vm24869_vm3, %v24870_v13  ;;  %v12309_v58 = vsub.f32 %v28648_v50, %v12308_v7 }
 0xdae   : > { %21392 = vmatprep.subr.mxu1 %v24870_v13 }
 0xdaf   : > { %v12310_v30 = vand.u32 4294901760, %v12309_v58  ;;  %v12820_v58 = vand.u32 4294901760, %v28746_v39 }
 0xdb2   : > { %21360 = vmatmul.mubr.f32.vlgmr.msra.gmra.mrb[30].mxu0 %v28493_v5 }
 0xdb3   : > { %21363 = vmatpush3.msra.mxu0 %v28511_v25  ;;  %21390 = vmatmul.mubr.f32.vlgmr.msra.gmra.mrb[30].mxu1 %v28495_v48 }
 0xdb4   : > { %21393 = vmatpush3.msra.mxu1 %v28511_v25  ;;  %21394 = vmatprep.mubr.msk.f32.mxu1 %vm24869_vm3, %v24870_v13 }
 0xdb5   : > { %21364 = vmatprep.mubr.msk.f32.mxu0 %vm24869_vm3, %v24870_v13  ;;  %23995 = vmatprep.subr.bf16.mxu1 %v24868_v26 }
 0xdb6   : > { %23983 = vmatprep.subr.bf16.mxu0 %v24868_v26 }
 0xdba   : > { %21365 = vmatmul.mubr.f32.vlgmr.msra.gmra.mrb[30].mxu0 %v28493_v5  ;;  %v24002_v5 = vpack.c.bf16 %v12296_v1, %v12289_v6  ;;  %v28734_v6 = vld [vmem:[#allocation7 + $0x28] sm:$0xff] }
 0xdbb   : > { %21395 = vmatmul.mubr.f32.vlgmr.msra.gmra.mrb[30].mxu1 %v28495_v48  ;;  %23985 = vmatpush3.bf16.msra.mxu0 %v28627_v53  ;;  %v12167_v48 = vld [vmem:[#allocation7 + $0x70] sm:$0xff] }
 0xdbc   : > { %23997 = vmatpush3.bf16.msra.mxu1 %v23996_v63  ;;  %23986 = vmatprep.subr.bf16.mxu0 %v24868_v26  ;;  %v12192_v31 = vand.u32 4294901760, %v12167_v48  ;;  %v28718_v63 = vsub.f32 %v28697_v43, %v12714_v29 }
 0xdbd   : > { %23998 = vmatprep.subr.bf16.mxu1 %v24868_v26  ;;  %21432 = vmatprep.mubr.msk.f32.mxu1 %vm24869_vm3, %v24870_v13 }
 0xdbe   : > { %21413 = vmatprep.mubr.msk.f32.mxu0 %vm24869_vm3, %v24870_v13  ;;  %v28646_v60 = vsub.f32 %v12167_v48, %v12192_v31  ;;  %v28671_v11 = vpack.c.bf16 %v12195_v35, %v12192_v31  ;;  %v12799_v1 = vand.u32 4294901760, %v28718_v63  ;;  %v28741_v48 = vsub.f32 %v28707_v62, %v12720_v16 }
 0xdbf   : > { %23988 = vmatpush3.bf16.msra.mxu0 %v28658_v32  ;;  %v12729_v35 = vand.u32 4294901760, %v28734_v6  ;;  %v24080_v62 = vpack.c.bf16 %v28723_v41, %v28718_v63 }
 0xdc0   : > { %24000 = vmatpush3.bf16.msra.mxu1 %v23999_v33  ;;  %v12301_v19 = vand.u32 4294901760, %v28646_v60  ;;  %23989 = vmatprep.subr.bf16.mxu0 %v24868_v26  ;;  %v24017_v15 = vpack.c.bf16 %v28648_v50, %v28646_v60  ;;  %v28732_v33 = vld [vmem:[#allocation7 + $0x20] sm:$0xff]  ;;  %v28755_v50 = vld [vmem:[#allocation7 + $0x38] sm:$0xff] }
 0xdc1   : > { %24001 = vmatprep.subr.bf16.mxu1 %v24868_v26  ;;  %v12726_v31 = vand.u32 4294901760, %v28732_v33  ;;  %v28780_v57 = vsub.f32 %v28734_v6, %v12729_v35  ;;  %v17495_v6 = vld [vmem:[%s29815_s11 + $0x10] sm:$0xff] }
 0xdc2   : > { %v12302_v34 = vsub.f32 %v28646_v60, %v12301_v19  ;;  %v28677_v46 = vpack.c.bf16 %v12308_v7, %v12301_v19  ;;  %v28753_v60 = vld [vmem:[#allocation7 + $0x30] sm:$0xff]  ;;  %v24032_v19 = vpack.c.bf16 %v12266_v21, %v12259_v17  ;;  %v12735_v21 = vand.u32 4294901760, %v28755_v50 }
 0xdc3   : > { %23991 = vmatpush3.bf16.msra.mxu0 %v28667_v44  ;;  %v28775_v9 = vsub.f32 %v28732_v33, %v12726_v31  ;;  %v12732_v17 = vand.u32 4294901760, %v28753_v60  ;;  %v12834_v55 = vand.u32 4294901760, %v28780_v57 }
 0xdc4   : > { %24003 = vmatpush3.bf16.msra.mxu1 %v24002_v5  ;;  %v12303_v51 = vand.u32 4294901760, %v12302_v34  ;;  %23992 = vmatprep.subr.bf16.mxu0 %v24868_v26  ;;  %v12806_v5 = vand.u32 4294901760, %v28723_v41  ;;  %v12813_v34 = vand.u32 4294901760, %v28741_v48 }
 0xdc5   : > { %24004 = vmatprep.subr.bf16.mxu1 %v24868_v26  ;;  %v12827_v36 = vand.u32 4294901760, %v28775_v9 }
 0xdc6   : > { %v24005_v22 = vpack.c.bf16 %v12310_v30, %v12303_v51  ;;  %v12807_v7 = vsub.f32 %v28723_v41, %v12806_v5  ;;  %v24035_v51 = vpack.c.bf16 %v12280_v24, %v12273_v20  ;;  %v28803_v20 = vsub.f32 %v28753_v60, %v12732_v17 }
 0xdc7   : > { %23994 = vmatpush3.bf16.msra.mxu0 %v28671_v11  ;;  %v28808_v24 = vsub.f32 %v28755_v50, %v12735_v21  ;;  %v24107_v50 = vpack.c.bf16 %v12820_v58, %v12813_v34  ;;  %v24110_v41 = vpack.c.bf16 %v12834_v55, %v12827_v36 }
 0xdc8   : > { %24006 = vmatpush3.bf16.msra.mxu1 %v24005_v22  ;;  %24007 = vmatprep.subr.bf16.mxu0 %v24868_v26  ;;  %v12814_v22 = vsub.f32 %v28741_v48, %v12813_v34 }
 0xdc9   : > { %24019 = vmatprep.subr.bf16.mxu1 %v24868_v26  ;;  %v12848_v12 = vand.u32 4294901760, %v28808_v24  ;;  %v24089_v33 = vpack.c.bf16 %v28808_v24, %v28803_v20 }
 0xe8d   : > { %v28679_v59 = vpop.f32.mrb[30].mxu0 }
 0xe8e   : > { %v12156_v49 = vpop.f32.mrb[30].mxu1  ;;  %v21366_v27 = vpop.f32.mrb[31].mxu0 }
 0xe8f   : > { %v12171_v10 = vsel %vm12169_vm8, %v12156_v49, 0  ;;  %v21396_v18 = vpop.f32.mrb[31].mxu1  ;;  %v12815_v27 = vand.u32 4294901760, %v12814_v22 }
 0xe90   : > { %v28682_v4 = vand.u32 4294901760, %v12171_v10  ;;  %v12828_v18 = vsub.f32 %v28775_v9, %v12827_v36 }
 0xe92   : > { %v28685_v40 = vsub.f32 %v12171_v10, %v28682_v4  ;;  %21433 = vmatmul.mubr.f32.vlgmr.msra.gmra.mrb[32].mxu1 %v28682_v4 }
 0xe93   : > { %24021 = vmatpush3.bf16.msra.mxu1 %v28627_v53  ;;  %21470 = vmatprep.mubr.msk.f32.mxu1 %vm24869_vm3, %v24870_v13 }
 0xe94   : > { %v12248_v54 = vand.u32 4294901760, %v28685_v40  ;;  %24022 = vmatprep.subr.bf16.mxu1 %v24868_v26 }
 0xe96   : > { %v12249_v37 = vsub.f32 %v28685_v40, %v12248_v54 }
 0xe97   : > { %24024 = vmatpush3.bf16.msra.mxu1 %v28658_v32 }
 0xe98   : > { %v12250_v52 = vand.u32 4294901760, %v12249_v37  ;;  %24025 = vmatprep.subr.bf16.mxu1 %v24868_v26  ;;  %v12849_v37 = vsub.f32 %v28808_v24, %v12848_v12 }
 0xe9a   : > { %21414 = vmatmul.mubr.f32.vlgmr.msra.gmra.mrb[32].mxu0 %v12250_v52  ;;  %v24056_v52 = vpack.c.bf16 %v12717_v45, %v12714_v29  ;;  %v24065_v29 = vpack.c.bf16 %v12735_v21, %v12732_v17  ;;  %v13707_v17 = vld [vmem:[#allocation7 + $0xa8] sm:$0xff] }
 0xe9b   : > { %24009 = vmatpush3.bf16.msra.mxu0 %v24008_v14  ;;  %24027 = vmatpush3.bf16.msra.mxu1 %v28667_v44  ;;  %v12711_v14 = vsel %vm12169_vm8, %v28679_v59, 0 }
 0xe9c   : > { %24010 = vmatprep.subr.bf16.mxu0 %v24868_v26  ;;  %24028 = vmatprep.subr.bf16.mxu1 %v24868_v26 }
 0xe9d   : > { %21451 = vmatprep.mubr.msk.f32.mxu0 %vm24869_vm3, %v24870_v13 }
 0xe9f   : > { %24012 = vmatpush3.bf16.msra.mxu0 %v24011_v47  ;;  %24030 = vmatpush3.bf16.msra.mxu1 %v28671_v11 }
 0xea0   : > { %24013 = vmatprep.subr.bf16.mxu0 %v24868_v26  ;;  %24043 = vmatprep.subr.bf16.mxu1 %v24868_v26 }
 0xea2   : > { %21471 = vmatmul.mubr.f32.vlgmr.msra.gmra.mrb[34].mxu1 %v12248_v54  ;;  %v12841_v54 = vand.u32 4294901760, %v28803_v20 }
 0xea3   : > { %24015 = vmatpush3.bf16.msra.mxu0 %v24014_v8  ;;  %24045 = vmatpush3.bf16.msra.mxu1 %v28627_v53  ;;  %v12800_v53 = vsub.f32 %v28718_v63, %v12799_v1 }
 0xea4   : > { %24016 = vmatprep.subr.bf16.mxu0 %v24868_v26  ;;  %24046 = vmatprep.subr.bf16.mxu1 %v24868_v26 }
 0xea5   : > { %21508 = vmatprep.mubr.msk.f32.mxu1 %vm24869_vm3, %v24870_v13  ;;  %v12801_v30 = vand.u32 4294901760, %v12800_v53  ;;  %v28847_v53 = vand.u32 4294901760, %v12711_v14 }
 0xea7   : > { %24018 = vmatpush3.bf16.msra.mxu0 %v24017_v15  ;;  %24048 = vmatpush3.bf16.msra.mxu1 %v28658_v32  ;;  %v12808_v32 = vand.u32 4294901760, %v12807_v7  ;;  %v12821_v15 = vsub.f32 %v28746_v39, %v12820_v58  ;;  %v12787_v43 = vsub.f32 %v12711_v14, %v28847_v53  ;;  %v13705_v58 = vld [vmem:[#allocation7 + $0x98] sm:$0xff] }
 0xea8   : > { %24031 = vmatprep.subr.bf16.mxu0 %v24868_v26  ;;  %24049 = vmatprep.subr.bf16.mxu1 %v24868_v26  ;;  %v13723_v21 = vand.u32 4294901760, %v13705_v58 }
 0xea9   : > { %v24068_v49 = vpack.c.bf16 %v12808_v32, %v12801_v30  ;;  %v12822_v10 = vand.u32 4294901760, %v12821_v15  ;;  %v12788_v0 = vand.u32 4294901760, %v12787_v43 }
 0xeaa   : > { %21452 = vmatmul.mubr.f32.vlgmr.msra.gmra.mrb[34].mxu0 %v28685_v40  ;;  %v12835_v40 = vsub.f32 %v28780_v57, %v12834_v55  ;;  %v28964_v36 = vsub.f32 %v13705_v58, %v13723_v21 }
 0xeab   : > { %24033 = vmatpush3.bf16.msra.mxu0 %v24032_v19  ;;  %24051 = vmatpush3.bf16.msra.mxu1 %v28667_v44  ;;  %v24038_v44 = vpack.c.bf16 %v12294_v23, %v12287_v38  ;;  %v24071_v42 = vpack.c.bf16 %v12822_v10, %v12815_v27  ;;  %v12829_v38 = vand.u32 4294901760, %v12828_v18  ;;  %v12850_v19 = vand.u32 4294901760, %v12849_v37 }
 0xeac   : > { %24034 = vmatprep.subr.bf16.mxu0 %v24868_v26  ;;  %24052 = vmatprep.subr.bf16.mxu1 %v24868_v26  ;;  %v12836_v23 = vand.u32 4294901760, %v12835_v40  ;;  %v12789_v45 = vsub.f32 %v12787_v43, %v12788_v0  ;;  %v13820_v27 = vand.u32 4294901760, %v28964_v36 }
 0xead   : > { %21489 = vmatprep.mubr.msk.f32.mxu0 %vm24869_vm3, %v24870_v13 }
 0xeae   : > { %v24074_v47 = vpack.c.bf16 %v12836_v23, %v12829_v38  ;;  %v12790_v2 = vand.u32 4294901760, %v12789_v45 }
 0xeaf   : > { %24036 = vmatpush3.bf16.msra.mxu0 %v24035_v51  ;;  %24054 = vmatpush3.bf16.msra.mxu1 %v28671_v11  ;;  %v12842_v11 = vsub.f32 %v28803_v20, %v12841_v54  ;;  %v13729_v51 = vand.u32 4294901760, %v13707_v17 }
 0xeb0   : > { %24037 = vmatprep.subr.bf16.mxu0 %v24868_v26  ;;  %24067 = vmatprep.subr.bf16.mxu1 %v24868_v26 }
 0xeb1   : > { %v12843_v8 = vand.u32 4294901760, %v12842_v11  ;;  %v28968_v20 = vsub.f32 %v13707_v17, %v13729_v51 }
 0xeb2   : > { %21509 = vmatmul.mubr.f32.vlgmr.msra.gmra.mrb[36].mxu1 %v28682_v4 }
 0xeb3   : > { %24039 = vmatpush3.bf16.msra.mxu0 %v24038_v44  ;;  %24069 = vmatpush3.bf16.msra.mxu1 %v24068_v49  ;;  %v24077_v59 = vpack.c.bf16 %v12850_v19, %v12843_v8  ;;  %v13834_v18 = vand.u32 4294901760, %v28968_v20 }
 0xeb4   : > { %24040 = vmatprep.subr.bf16.mxu0 %v24868_v26  ;;  %24070 = vmatprep.subr.bf16.mxu1 %v24868_v26 }
 0xeb5   : > { %21546 = vmatprep.mubr.msk.f32.mxu1 %vm24869_vm3, %v24870_v13  ;;  %v13835_v14 = vsub.f32 %v28968_v20, %v13834_v18 }
 0xeb7   : > { %24042 = vmatpush3.bf16.msra.mxu0 %v28677_v46  ;;  %24072 = vmatpush3.bf16.msra.mxu1 %v24071_v42  ;;  %v24059_v46 = vpack.c.bf16 %v12723_v3, %v12720_v16  ;;  %v24083_v16 = vpack.c.bf16 %v28746_v39, %v28741_v48  ;;  %v24086_v3 = vpack.c.bf16 %v28780_v57, %v28775_v9  ;;  %v13706_v57 = vld [vmem:[#allocation7 + $0xa0] sm:$0xff] }
 0xeb8   : > { %24055 = vmatprep.subr.bf16.mxu0 %v24868_v26  ;;  %24073 = vmatprep.subr.bf16.mxu1 %v24868_v26  ;;  %v13821_v42 = vsub.f32 %v28964_v36, %v13820_v27 }
 0xeba   : > { %21490 = vmatmul.mubr.f32.vlgmr.msra.gmra.mrb[36].mxu0 %v28682_v4  ;;  %v24062_v4 = vpack.c.bf16 %v12729_v35, %v12726_v31  ;;  %v24104_v31 = vpack.c.bf16 %v12806_v5, %v12799_v1  ;;  %v13253_v35 = vsel %vm11251_vm6, %v17495_v6, 0  ;;  %v24113_v5 = vpack.c.bf16 %v12848_v12, %v12841_v54 }
 0xebb   : > { %24057 = vmatpush3.bf16.msra.mxu0 %v24056_v52  ;;  %24075 = vmatpush3.bf16.msra.mxu1 %v24074_v47  ;;  %v13321_v60 = vand.u32 4294901760, %v13253_v35 }
 0xebc   : > { %24058 = vmatprep.subr.bf16.mxu0 %v24868_v26  ;;  %24076 = vmatprep.subr.bf16.mxu1 %v24868_v26 }
 0xebd   : > { %21527 = vmatprep.mubr.msk.f32.mxu0 %vm24869_vm3, %v24870_v13  ;;  %v13322_v63 = vsub.f32 %v13253_v35, %v13321_v60 }
 0xebf   : > { %24060 = vmatpush3.bf16.msra.mxu0 %v24059_v46  ;;  %24078 = vmatpush3.bf16.msra.mxu1 %v24077_v59  ;;  %v13323_v1 = vand.u32 4294901760, %v13322_v63  ;;  %v13708_v59 = vld [vmem:[#allocation7 + $0xb0] sm:$0xff] }
 0xec0   : > { %24061 = vmatprep.subr.bf16.mxu0 %v24868_v26  ;;  %24091 = vmatprep.subr.bf16.mxu1 %v24868_v26 }
 0xec1   : > { %v13324_v48 = vsub.f32 %v13322_v63, %v13323_v1 }
 0xec2   : > { %21547 = vmatmul.mubr.f32.vlgmr.msra.gmra.mrb[38].mxu1 %v28847_v53 }
 0xec3   : > { %24063 = vmatpush3.bf16.msra.mxu0 %v24062_v4  ;;  %24093 = vmatpush3.bf16.msra.mxu1 %v24056_v52  ;;  %v13325_v39 = vand.u32 4294901760, %v13324_v48 }
 0xec4   : > { %24064 = vmatprep.subr.bf16.mxu0 %v24868_v26  ;;  %24094 = vmatprep.subr.bf16.mxu1 %v24868_v26 }
 0xec5   : > { %21584 = vmatprep.mubr.msk.f32.mxu1 %vm24869_vm3, %v24870_v13 }
 0xec7   : > { %24066 = vmatpush3.bf16.msra.mxu0 %v24065_v29  ;;  %24096 = vmatpush3.bf16.msra.mxu1 %v24059_v46 }
 0xec8   : > { %24079 = vmatprep.subr.bf16.mxu0 %v24868_v26  ;;  %24097 = vmatprep.subr.bf16.mxu1 %v24868_v26 }
 0xeca   : > { %21528 = vmatmul.mubr.f32.vlgmr.msra.gmra.mrb[38].mxu0 %v12790_v2 }
 0xecb   : > { %24081 = vmatpush3.bf16.msra.mxu0 %v24080_v62  ;;  %24099 = vmatpush3.bf16.msra.mxu1 %v24062_v4 }
 0xecc   : > { %24082 = vmatprep.subr.bf16.mxu0 %v24868_v26  ;;  %24100 = vmatprep.subr.bf16.mxu1 %v24868_v26 }
 0xecd   : > { %21565 = vmatprep.mubr.msk.f32.mxu0 %vm24869_vm3, %v24870_v13 }
 0xecf   : > { %24084 = vmatpush3.bf16.msra.mxu0 %v24083_v16  ;;  %24102 = vmatpush3.bf16.msra.mxu1 %v24065_v29 }
 0xed0   : > { %24085 = vmatprep.subr.bf16.mxu0 %v24868_v26  ;;  %24115 = vmatprep.subr.bf16.mxu1 %v24868_v26 }
 0xed2   : > { %21585 = vmatmul.mubr.f32.vlgmr.msra.gmra.mrb[40].mxu1 %v12788_v0 }
 0xed3   : > { %24087 = vmatpush3.bf16.msra.mxu0 %v24086_v3  ;;  %24117 = vmatpush3.bf16.msra.mxu1 %v24056_v52  ;;  %v13822_v52 = vand.u32 4294901760, %v13821_v42 }
 0xed4   : > { %24088 = vmatprep.subr.bf16.mxu0 %v24868_v26  ;;  %24118 = vmatprep.subr.bf16.mxu1 %v24868_v26 }
 0xed5   : > { %21622 = vmatprep.mubr.msk.f32.mxu1 %vm24869_vm3, %v24870_v13 }
 0xed7   : > { %24090 = vmatpush3.bf16.msra.mxu0 %v24089_v33  ;;  %24120 = vmatpush3.bf16.msra.mxu1 %v24059_v46 }
 0xed8   : > { %24103 = vmatprep.subr.bf16.mxu0 %v24868_v26  ;;  %24121 = vmatprep.subr.bf16.mxu1 %v24868_v26 }
 0xeda   : > { %21566 = vmatmul.mubr.f32.vlgmr.msra.gmra.mrb[40].mxu0 %v12787_v43  ;;  %v13709_v43 = vld [vmem:[#allocation7 + $0xb8] sm:$0xff] }
 0xedb   : > { %24105 = vmatpush3.bf16.msra.mxu0 %v24104_v31  ;;  %24123 = vmatpush3.bf16.msra.mxu1 %v24062_v4  ;;  %v13732_v4 = vand.u32 4294901760, %v13708_v59  ;;  %v13735_v0 = vand.u32 4294901760, %v13709_v43 }
 0xedc   : > { %24106 = vmatprep.subr.bf16.mxu0 %v24868_v26  ;;  %24124 = vmatprep.subr.bf16.mxu1 %v24868_v26 }
 0xedd   : > { %21603 = vmatprep.mubr.msk.f32.mxu0 %vm24869_vm3, %v24870_v13  ;;  %v29001_v45 = vsub.f32 %v13709_v43, %v13735_v0  ;;  %v29016_v48 = vpack.c.bf16 %v13735_v0, %v13732_v4 }
 0xedf   : > { %24108 = vmatpush3.bf16.msra.mxu0 %v24107_v50  ;;  %24126 = vmatpush3.bf16.msra.mxu1 %v24065_v29  ;;  %v28999_v29 = vsub.f32 %v13708_v59, %v13732_v4  ;;  %v13848_v2 = vand.u32 4294901760, %v29001_v45 }
 0xee0   : > { %24109 = vmatprep.subr.bf16.mxu0 %v24868_v26  ;;  %24127 = vmatprep.subr.bf16.mxu1 %v24868_v26 }
 0xee1   : > { %v13841_v62 = vand.u32 4294901760, %v28999_v29  ;;  %v13849_v3 = vsub.f32 %v29001_v45, %v13848_v2 }
 0xee2   : > { %21623 = vmatmul.mubr.f32.vlgmr.msra.gmra.mrb[42].mxu1 %v28847_v53 }
 0xee3   : > { %24111 = vmatpush3.bf16.msra.mxu0 %v24110_v41  ;;  %21671 = vmatprep.mubr.msk.f32.mxu1 %vm24869_vm3, %v24870_v13  ;;  %v13842_v16 = vsub.f32 %v28999_v29, %v13841_v62  ;;  %v13850_v35 = vand.u32 4294901760, %v13849_v3 }
 0xee4   : > { %24112 = vmatprep.subr.bf16.mxu0 %v24868_v26 }
 0xee5   : > { %v13843_v31 = vand.u32 4294901760, %v13842_v16 }
 0xee7   : > { %24114 = vmatpush3.bf16.msra.mxu0 %v24113_v5  ;;  %v24149_v50 = vpack.c.bf16 %v13850_v35, %v13843_v31 }
 0xee8   : > { %21625 = vmatprep.subr.mxu0 %v24870_v13 }
 0xeea   : > { %21604 = vmatmul.mubr.f32.vlgmr.msra.gmra.mrb[42].mxu0 %v28847_v53  ;;  %v13836_v53 = vand.u32 4294901760, %v13835_v14 }
 0xeeb   : > { %21626 = vmatpush3.msra.mxu0 %v28511_v25  ;;  %21627 = vmatprep.mubr.msk.f32.mxu0 %vm24869_vm3, %v24870_v13 }
 0xeec   : > { %21630 = vmatprep.subr.mxu0 %v24870_v13 }
 0xeee   : > { %21628 = vmatmul.mubr.f32.vlgmr.msra.gmra.mrb[44].mxu0 %v13325_v39 }
 0xeef   : > { %21631 = vmatpush3.msra.mxu0 %v28529_v28  ;;  %21632 = vmatprep.mubr.msk.f32.mxu0 %vm24869_vm3, %v24870_v13  ;;  %v13703_v28 = vld [vmem:[#allocation7 + $0x88] sm:$0xff] }
 0xef0   : > { %21635 = vmatprep.subr.mxu0 %v24870_v13  ;;  %v13717_v34 = vand.u32 4294901760, %v13703_v28 }
 0xef2   : > { %v28958_v32 = vsub.f32 %v13703_v28, %v13717_v34 }
 0xef4   : > { %v13806_v44 = vand.u32 4294901760, %v28958_v32 }
 0xef6   : > { %21633 = vmatmul.mubr.f32.vlgmr.msra.gmra.mrb[44].mxu0 %v13321_v60  ;;  %v13807_v54 = vsub.f32 %v28958_v32, %v13806_v44 }
 0xef7   : > { %21636 = vmatpush3.msra.mxu0 %v28514_v56  ;;  %21637 = vmatprep.mubr.msk.f32.mxu0 %vm24869_vm3, %v24870_v13  ;;  %v13702_v56 = vld [vmem:[#allocation7 + $0x80] sm:$0xff] }
 0xef8   : > { %21640 = vmatprep.subr.mxu0 %v24870_v13  ;;  %v13714_v7 = vand.u32 4294901760, %v13702_v56  ;;  %v13808_v11 = vand.u32 4294901760, %v13807_v54 }
 0xefa   : > { %v28956_v30 = vsub.f32 %v13702_v56, %v13714_v7  ;;  %v28962_v15 = vpack.c.bf16 %v13717_v34, %v13714_v7 }
 0xefc   : > { %v13799_v24 = vand.u32 4294901760, %v28956_v30  ;;  %24129 = vmatpush3.bf16.msra.mxu1 %v28962_v15  ;;  %v24152_v39 = vpack.c.bf16 %v28958_v32, %v28956_v30 }
 0xefd   : > { %24130 = vmatprep.subr.bf16.mxu1 %v24868_v26 }
 0xefe   : > { %21638 = vmatmul.mubr.f32.vlgmr.msra.gmra.mrb[44].mxu0 %v13322_v63  ;;  %v13800_v40 = vsub.f32 %v28956_v30, %v13799_v24 }
 0xeff   : > { %21641 = vmatpush3.msra.mxu0 %v28511_v25  ;;  %21642 = vmatprep.mubr.msk.f32.mxu0 %vm24869_vm3, %v24870_v13 }
 0xf00   : > { %21645 = vmatprep.subr.mxu0 %v24870_v13  ;;  %v13801_v23 = vand.u32 4294901760, %v13800_v40 }
 0xf02   : > { %v24140_v47 = vpack.c.bf16 %v13808_v11, %v13801_v23 }
 0xf06   : > { %21643 = vmatmul.mubr.f32.vlgmr.msra.gmra.mrb[44].mxu0 %v13323_v1 }
 0xf07   : > { %21646 = vmatpush3.msra.mxu0 %v28521_v61  ;;  %21647 = vmatprep.mubr.msk.f32.mxu0 %vm24869_vm3, %v24870_v13  ;;  %v13704_v61 = vld [vmem:[#allocation7 + $0x90] sm:$0xff] }
 0xf08   : > { %21650 = vmatprep.subr.mxu0 %v24870_v13  ;;  %v13720_v9 = vand.u32 4294901760, %v13704_v61 }
 0xf0a   : > { %v28960_v22 = vsub.f32 %v13704_v61, %v13720_v9 }
 0xf0c   : > { %v13813_v49 = vand.u32 4294901760, %v28960_v22  ;;  %v24155_v61 = vpack.c.bf16 %v28964_v36, %v28960_v22 }
 0xf0e   : > { %21648 = vmatmul.mubr.f32.vlgmr.msra.gmra.mrb[44].mxu0 %v13321_v60  ;;  %v13814_v12 = vsub.f32 %v28960_v22, %v13813_v49  ;;  %v29036_v40 = vpack.c.bf16 %v13820_v27, %v13813_v49 }
 0xf0f   : > { %21651 = vmatpush3.msra.mxu0 %v28511_v25  ;;  %21652 = vmatprep.mubr.msk.f32.mxu0 %vm24869_vm3, %v24870_v13  ;;  %v13726_v25 = vand.u32 4294901760, %v13706_v57 }
 0xf10   : > { %24139 = vmatprep.subr.bf16.mxu0 %v24868_v26  ;;  %v13815_v37 = vand.u32 4294901760, %v13814_v12 }
 0xf11   : > { %v28966_v55 = vsub.f32 %v13706_v57, %v13726_v25  ;;  %v29012_v63 = vpack.c.bf16 %v13729_v51, %v13726_v25  ;;  %v24161_v57 = vpack.c.bf16 %v29001_v45, %v28999_v29 }
 0xf12   : > { %v24143_v8 = vpack.c.bf16 %v13822_v52, %v13815_v37 }
 0xf13   : > { %v13827_v10 = vand.u32 4294901760, %v28966_v55  ;;  %v24158_v7 = vpack.c.bf16 %v28968_v20, %v28966_v55 }
 0xf15   : > { %v13828_v38 = vsub.f32 %v28966_v55, %v13827_v10 }
 0xf16   : > { %21653 = vmatmul.mubr.f32.vlgmr.msra.gmra.mrb[44].mxu0 %v13321_v60  ;;  %v29007_v60 = vpack.c.bf16 %v13723_v21, %v13720_v9  ;;  %v24176_v21 = vpack.c.bf16 %v13806_v44, %v13799_v24 }
 0xf17   : > { %21690 = vmatprep.mubr.msk.f32.mxu0 %vm24869_vm3, %v24870_v13  ;;  %24141 = vmatpush3.bf16.msra.mxu0 %v24140_v47  ;;  %v13829_v19 = vand.u32 4294901760, %v13828_v38  ;;  %v29038_v38 = vpack.c.bf16 %v13848_v2, %v13841_v62 }
 0xf18   : > { %24142 = vmatprep.subr.bf16.mxu0 %v24868_v26  ;;  %24132 = vmatpush3.bf16.msra.mxu1 %v29007_v60 }
 0xf19   : > { %v24146_v46 = vpack.c.bf16 %v13836_v53, %v13829_v19  ;;  %24133 = vmatprep.subr.bf16.mxu1 %v24868_v26 }
 0xf1b   : > { %24144 = vmatpush3.bf16.msra.mxu0 %v24143_v8 }
 0xf1c   : > { %24145 = vmatprep.subr.bf16.mxu0 %v24868_v26  ;;  %24135 = vmatpush3.bf16.msra.mxu1 %v29012_v63 }
 0xf1d   : > { %24136 = vmatprep.subr.bf16.mxu1 %v24868_v26 }
 0xf1f   : > { %24147 = vmatpush3.bf16.msra.mxu0 %v24146_v46 }
 0xf20   : > { %24148 = vmatprep.subr.bf16.mxu0 %v24868_v26  ;;  %24138 = vmatpush3.bf16.msra.mxu1 %v29016_v48 }
 0xf21   : > { %24151 = vmatprep.subr.bf16.mxu1 %v24868_v26 }
 0xf23   : > { %24150 = vmatpush3.bf16.msra.mxu0 %v24149_v50 }
 0xf24   : > { %24163 = vmatprep.subr.bf16.mxu0 %v24868_v26 }
 0xf65   : > { %v12363_v33 = vpop.f32.mrb[32].mxu1 }
 0xf66   : > { %v21434_v6 = vpop.f32.mrb[33].mxu1 }
 0xf6d   : > { %v12252_v41 = vpop.f32.mrb[32].mxu0 }
 0xf6e   : > { %v12364_v1 = vadd.f32 %v12363_v33, %v12252_v41  ;;  %v21415_v5 = vpop.f32.mrb[33].mxu0  ;;  %v17497_v41 = vld [vmem:[%s29923_s16 + $0x4] sm:$0xf] }
 0xf75   : > { %v12532_v56 = vpop.f32.mrb[34].mxu1 }
 0xf76   : > { %v21472_v28 = vpop.f32.mrb[35].mxu1 }
 0xf7d   : > { %v12451_v34 = vpop.f32.mrb[34].mxu0 }
 0xf7e   : > { %v12452_v58 = vadd.f32 %v12451_v34, %v12364_v1  ;;  %v21453_v9 = vpop.f32.mrb[35].mxu0 }
 0xf80   : > { %v12533_v17 = vadd.f32 %v12532_v56, %v12452_v58 }
 0xf85   : > { %v12706_v25 = vpop.f32.mrb[36].mxu1 }
 0xf86   : > { %v21510_v51 = vpop.f32.mrb[37].mxu1 }
 0xf8d   : > { %v12627_v54 = vpop.f32.mrb[36].mxu0 }
 0xf8e   : > { %v12628_v12 = vadd.f32 %v12627_v54, %v12533_v17  ;;  %v21491_v42 = vpop.f32.mrb[37].mxu0 }
 0xf90   : > { %v12707_v23 = vadd.f32 %v12706_v25, %v12628_v12  ;;  %v17496_v25 = vld [vmem:[%s29924_s8] ss:$0 sm:$0xff]  ;;  %s29927_s8 = sld [smem:[#allocation21_spill]] }
 0xf95   : > { %v12903_v11 = vpop.f32.mrb[38].mxu1 }
 0xf96   : > { %v21548_v37 = vpop.f32.mrb[39].mxu1  ;;  %s29760_s1 = scalar_lea.hbm %s29927_s8, %s17517_s15 }
 0xf9d   : > { %v12792_v30 = vpop.f32.mrb[38].mxu0 }
 0xf9e   : > { %v12793_v14 = vadd.f32 %v12792_v30, %v12707_v23  ;;  %v21529_v32 = vpop.f32.mrb[39].mxu0 }
 0xfa0   : > { %v12904_v24 = vadd.f32 %v12903_v11, %v12793_v14 }
 0xfa5   : > { %v13072_v44 = vpop.f32.mrb[40].mxu1 }
 0xfa6   : > { %v21586_v52 = vpop.f32.mrb[41].mxu1 }
 0xfa7   : > { %v17499_v52 = vld [vmem:[%s29925_s30 + $0x48] sm:$0xff] }
 0xfad   : > { %v12991_v47 = vpop.f32.mrb[40].mxu0 }
 0xfae   : > { %v12992_v22 = vadd.f32 %v12991_v47, %v12904_v24  ;;  %v21567_v8 = vpop.f32.mrb[41].mxu0 }
 0xfaf   : > { %v29163_v8 = vld [vmem:[%s29925_s30 + $0x50] sm:$0xff] }
 0xfb0   : > { %v13073_v36 = vadd.f32 %v13072_v44, %v12992_v22  ;;  %v17498_v44 = vld [vmem:[%s29925_s30 + $0x40] sm:$0xff]  ;;  %v15187_v22 = vand.u32 4294901760, %v17499_v52 }
 0xfb1   : > { %v15184_v47 = vand.u32 4294901760, %v17498_v44 }
 0xfb5   : > { %v13246_v49 = vpop.f32.mrb[42].mxu1 }
 0xfb6   : > { %v21624_v27 = vpop.f32.mrb[43].mxu1 }
 0xfb7   : > { %v29173_v27 = vsub.f32 %v17499_v52, %v15187_v22 }
 0xfbd   : > { %v13167_v19 = vpop.f32.mrb[42].mxu0 }
 0xfbe   : > { %v13168_v53 = vadd.f32 %v13167_v19, %v13073_v36  ;;  %v21605_v46 = vpop.f32.mrb[43].mxu0  ;;  %v29168_v36 = vld [vmem:[%s29925_s30 + $0x58] sm:$0xff]  ;;  %v15190_v19 = vand.u32 4294901760, %v29163_v8 }
 0xfbf   : > { %v29180_v46 = vld [vmem:[%s29925_s30 + $0x60] sm:$0xff] }
 0xfc0   : > { %v29040_v59 = vadd.f32 %v13246_v49, %v13168_v53  ;;  %v29171_v49 = vsub.f32 %v17498_v44, %v15184_v47  ;;  %v15193_v53 = vand.u32 4294901760, %v29168_v36 }
 0xfe9   : > { %v13697_v43 = vpop.f32.mrb[44].mxu0 }
 0xfea   : > { %v13711_v4 = vsel %vm12169_vm8, %v13697_v43, 0  ;;  %v21654_v0 = vpop.f32.mrb[45].mxu0  ;;  %v15269_v43 = vand.u32 4294901760, %v29171_v49 }
 0xfeb   : > { %v13786_v29 = vand.u32 4294901760, %v13711_v4  ;;  %v29196_v0 = vsub.f32 %v29163_v8, %v15190_v19 }
 0xfed   : > { %v13787_v45 = vsub.f32 %v13711_v4, %v13786_v29  ;;  %21691 = vmatmul.mubr.f32.vlgmr.msra.gmra.mrb[46].mxu0 %v13786_v29  ;;  %v15276_v4 = vand.u32 4294901760, %v29173_v27 }
 0xfee   : > { %24165 = vmatpush3.bf16.msra.mxu0 %v28962_v15  ;;  %21728 = vmatprep.mubr.msk.f32.mxu0 %vm24869_vm3, %v24870_v13 }
 0xfef   : > { %v13788_v62 = vand.u32 4294901760, %v13787_v45  ;;  %24166 = vmatprep.subr.bf16.mxu0 %v24868_v26 }
 0xff1   : > { %v13789_v2 = vsub.f32 %v13787_v45, %v13788_v62 }
 0xff2   : > { %24168 = vmatpush3.bf16.msra.mxu0 %v29007_v60 }
 0xff3   : > { %v13790_v16 = vand.u32 4294901760, %v13789_v2  ;;  %24169 = vmatprep.subr.bf16.mxu0 %v24868_v26  ;;  %v15270_v2 = vsub.f32 %v29171_v49, %v15269_v43 }
 0xff5   : > { %21672 = vmatmul.mubr.f32.vlgmr.msra.gmra.mrb[44].mxu1 %v13790_v16  ;;  %v15277_v16 = vsub.f32 %v29173_v27, %v15276_v4 }
 0xff6   : > { %24153 = vmatpush3.bf16.msra.mxu1 %v24152_v39  ;;  %24171 = vmatpush3.bf16.msra.mxu0 %v29012_v63 }
 0xff7   : > { %24154 = vmatprep.subr.bf16.mxu1 %v24868_v26  ;;  %24172 = vmatprep.subr.bf16.mxu0 %v24868_v26 }
 0xff8   : > { %21709 = vmatprep.mubr.msk.f32.mxu1 %vm24869_vm3, %v24870_v13 }
 0xffa   : > { %24156 = vmatpush3.bf16.msra.mxu1 %v24155_v61  ;;  %24174 = vmatpush3.bf16.msra.mxu0 %v29016_v48 }
 0xffb   : > { %24157 = vmatprep.subr.bf16.mxu1 %v24868_v26  ;;  %24187 = vmatprep.subr.bf16.mxu0 %v24868_v26 }
 0xffd   : > { %21729 = vmatmul.mubr.f32.vlgmr.msra.gmra.mrb[48].mxu0 %v13788_v62 }
 0xffe   : > { %24159 = vmatpush3.bf16.msra.mxu1 %v24158_v7  ;;  %24189 = vmatpush3.bf16.msra.mxu0 %v28962_v15  ;;  %v24182_v15 = vpack.c.bf16 %v13834_v18, %v13827_v10 }
 0xfff   : > { %24160 = vmatprep.subr.bf16.mxu1 %v24868_v26  ;;  %24190 = vmatprep.subr.bf16.mxu0 %v24868_v26 }
0x1000   : > { %21766 = vmatprep.mubr.msk.f32.mxu0 %vm24869_vm3, %v24870_v13 }
0x1002   : > { %24162 = vmatpush3.bf16.msra.mxu1 %v24161_v57  ;;  %24192 = vmatpush3.bf16.msra.mxu0 %v29007_v60 }
0x1003   : > { %24175 = vmatprep.subr.bf16.mxu1 %v24868_v26  ;;  %24193 = vmatprep.subr.bf16.mxu0 %v24868_v26 }
0x1005   : > { %21710 = vmatmul.mubr.f32.vlgmr.msra.gmra.mrb[46].mxu1 %v13787_v45  ;;  %v15196_v45 = vand.u32 4294901760, %v29180_v46 }
0x1006   : > { %24177 = vmatpush3.bf16.msra.mxu1 %v24176_v21  ;;  %24195 = vmatpush3.bf16.msra.mxu0 %v29012_v63  ;;  %v14262_v63 = vld [vmem:[%s29923_s16] sm:$0xf] }
0x1007   : > { %24178 = vmatprep.subr.bf16.mxu1 %v24868_v26  ;;  %24196 = vmatprep.subr.bf16.mxu0 %v24868_v26  ;;  %v14264_v5 = vsel %vm11251_vm6, %v14262_v63, 0 }
0x1008   : > { %21747 = vmatprep.mubr.msk.f32.mxu1 %vm24869_vm3, %v24870_v13  ;;  %v29093_v56 = vand.u32 4294901760, %v14264_v5 }
0x100a   : > { %24180 = vmatpush3.bf16.msra.mxu1 %v29036_v40  ;;  %24198 = vmatpush3.bf16.msra.mxu0 %v29016_v48  ;;  %v14723_v48 = vsel %vm11251_vm6, %v17497_v41, 0  ;;  %v29098_v61 = vsub.f32 %v14264_v5, %v29093_v56 }
0x100b   : > { %24181 = vmatprep.subr.bf16.mxu1 %v24868_v26  ;;  %21799 = vmatprep.subr.mxu0 %v24870_v13  ;;  %v29095_v28 = vand.u32 4294901760, %v14723_v48 }
0x100c   : > { %v14334_v17 = vand.u32 4294901760, %v29098_v61 }
0x100d   : > { %21767 = vmatmul.mubr.f32.vlgmr.msra.gmra.mrb[50].mxu0 %v13786_v29  ;;  %v29101_v7 = vsub.f32 %v14723_v48, %v29095_v28 }
0x100e   : > { %24183 = vmatpush3.bf16.msra.mxu1 %v24182_v15  ;;  %21801 = vmatprep.mubr.msk.f32.mxu0 %vm24869_vm3, %v24870_v13  ;;  %v14335_v54 = vsub.f32 %v29098_v61, %v14334_v17  ;;  %v15283_v15 = vand.u32 4294901760, %v29196_v0 }
0x100f   : > { %24184 = vmatprep.subr.bf16.mxu1 %v24868_v26  ;;  %v14793_v21 = vand.u32 4294901760, %v29101_v7 }
0x1010   : > { %v14336_v23 = vand.u32 4294901760, %v14335_v54 }
0x1011   : > { %v14794_v12 = vsub.f32 %v29101_v7, %v14793_v21 }
0x1012   : > { %24186 = vmatpush3.bf16.msra.mxu1 %v29038_v38 }
0x1013   : > { %21769 = vmatprep.subr.mxu1 %v24870_v13  ;;  %v14795_v11 = vand.u32 4294901760, %v14794_v12  ;;  %v29282_v12 = vpack.c.bf16 %v15193_v53, %v15190_v19 }
0x1015   : > { %21748 = vmatmul.mubr.f32.vlgmr.msra.gmra.mrb[48].mxu1 %v13786_v29  ;;  %v29201_v29 = vsub.f32 %v29168_v36, %v15193_v53 }
0x1016   : > { %21771 = vmatprep.mubr.msk.f32.mxu1 %vm24869_vm3, %v24870_v13 }
0x10c0   : > { %v13903_v55 = vpop.f32.mrb[46].mxu0 }
0x10c1   : > { %v21692_v20 = vpop.f32.mrb[47].mxu0 }
0x10c2   : > { %v29220_v20 = vsub.f32 %v29180_v46, %v15196_v45 }
0x10c8   : > { %v13792_v10 = vpop.f32.mrb[44].mxu1 }
0x10c9   : > { %v13904_v18 = vadd.f32 %v13903_v55, %v13792_v10  ;;  %v21673_v3 = vpop.f32.mrb[45].mxu1  ;;  %v15290_v55 = vand.u32 4294901760, %v29201_v29 }
0x10ca   : > { %v15278_v3 = vand.u32 4294901760, %v15277_v16 }
0x10d0   : > { %v14072_v33 = vpop.f32.mrb[48].mxu0 }
0x10d1   : > { %v21730_v6 = vpop.f32.mrb[49].mxu0 }
0x10d2   : > { %v15291_v6 = vsub.f32 %v29201_v29, %v15290_v55 }
0x10d4   : > { %v15292_v41 = vand.u32 4294901760, %v15291_v6  ;;  %v29345_v6 = vld [vmem:[%s29925_s30 + $0x18] sm:$0xff] }
0x10d8   : > { %v13991_v31 = vpop.f32.mrb[46].mxu1 }
0x10d9   : > { %v13992_v35 = vadd.f32 %v13991_v31, %v13904_v18  ;;  %v21711_v60 = vpop.f32.mrb[47].mxu1  ;;  %v15271_v18 = vand.u32 4294901760, %v15270_v2  ;;  %v15297_v31 = vand.u32 4294901760, %v29220_v20 }
0x10db   : > { %v14073_v50 = vadd.f32 %v14072_v33, %v13992_v35  ;;  %v15284_v33 = vsub.f32 %v29196_v0, %v15283_v15  ;;  %v24212_v60 = vpack.c.bf16 %v15278_v3, %v15271_v18  ;;  %v24227_v3 = vpack.c.bf16 %v29201_v29, %v29196_v0 }
0x10dd   : > { %v15285_v63 = vand.u32 4294901760, %v15284_v33  ;;  %v29340_v33 = vld [vmem:[%s29925_s30 + $0x10] sm:$0xff] }
0x10df   : > { %v24215_v48 = vpack.c.bf16 %v15292_v41, %v15285_v63  ;;  %v15730_v41 = vand.u32 4294901760, %v29340_v33 }
0x10e0   : > { %v14246_v1 = vpop.f32.mrb[50].mxu0 }
0x10e1   : > { %v21768_v39 = vpop.f32.mrb[51].mxu0 }
0x10e8   : > { %v14167_v34 = vpop.f32.mrb[48].mxu1 }
0x10e9   : > { %v14168_v58 = vadd.f32 %v14167_v34, %v14073_v50  ;;  %v21749_v9 = vpop.f32.mrb[49].mxu1  ;;  %v29245_v50 = vpack.c.bf16 %v15187_v22, %v15184_v47 }
0x10eb   : > { %v14247_v57 = vadd.f32 %v14246_v1, %v14168_v58  ;;  %v15298_v1 = vsub.f32 %v29220_v20, %v15297_v31 }
0x10ed   : > { %v14250_v51 = vadd.f32 %v14247_v57, %v29040_v59  ;;  %v29185_v59 = vld [vmem:[%s29925_s30 + $0x68] sm:$0xff]  ;;  %v15299_v39 = vand.u32 4294901760, %v15298_v1  ;;  %v15733_v1 = vand.u32 4294901760, %v29345_v6 }
0x10ee   : > { %v15199_v62 = vand.u32 4294901760, %v29185_v59 }
0x10ef   : > { %v14258_v40 = vadd.f32 %v17496_v25, %v14250_v51 }
0x10f0   : > { %v29225_v10 = vsub.f32 %v29185_v59, %v15199_v62  ;;  %v24224_v59 = vpack.c.bf16 %v29173_v27, %v29171_v49 }
0x10f1   : > { %vm14259_vm9 = vcmp.gt.f32.partialorder %v14258_v40, 0.0  ;;  %v14260_v42 = vmul.f32 0.01, %v14258_v40 }
0x10f2   : > { %v15304_v35 = vand.u32 4294901760, %v29225_v10 }
0x10f3   : > { %v14261_v38 = vsel %vm14259_vm9, %v14258_v40, %v14260_v42 }
0x10f4   : > { %v29111_v37 = vand.u32 4294901760, %v14261_v38  ;;  %v15305_v5 = vsub.f32 %v29225_v10, %v15304_v35 }
0x10f6   : > { %v29114_v30 = vsub.f32 %v14261_v38, %v29111_v37  ;;  %21770 = vmatpush3.msra.mxu1 %v29111_v37  ;;  %21800 = vmatpush3.msra.mxu0 %v29111_v37  ;;  %v29291_v38 = vpack.c.bf16 %v15199_v62, %v15196_v45  ;;  %v29324_v45 = vld [vmem:[%s29925_s30] sm:$0xff]  ;;  %v29329_v62 = vld [vmem:[%s29925_s30 + $0x8] sm:$0xff] }
0x10f7   : > { %21772 = vmatmul.mubr.f32.vlgmr.msra.gmra.mrb[50].mxu1 %v14336_v23  ;;  %21802 = vmatmul.mubr.f32.vlgmr.msra.gmra.mrb[52].mxu0 %v14795_v11  ;;  %v15724_v16 = vand.u32 4294901760, %v29324_v45  ;;  %v15727_v18 = vand.u32 4294901760, %v29329_v62 }
0x10f8   : > { %21774 = vmatprep.subr.mxu1 %v24870_v13  ;;  %21804 = vmatprep.subr.mxu0 %v24870_v13  ;;  %v29121_v14 = vand.u32 4294901760, %v29114_v30 }
0x10f9   : > { %21776 = vmatprep.mubr.msk.f32.mxu1 %vm24869_vm3, %v24870_v13  ;;  %21806 = vmatprep.mubr.msk.f32.mxu0 %vm24869_vm3, %v24870_v13  ;;  %v29359_v63 = vsub.f32 %v29329_v62, %v15727_v18 }
0x10fa   : > { %v14346_v32 = vsub.f32 %v29114_v30, %v29121_v14 }
0x10fc   : > { %v29129_v24 = vand.u32 4294901760, %v14346_v32 }
0x10fe   : > { %21775 = vmatpush3.msra.mxu1 %v29129_v24  ;;  %21805 = vmatpush3.msra.mxu0 %v29129_v24 }
0x10ff   : > { %21777 = vmatmul.mubr.f32.vlgmr.msra.gmra.mrb[50].mxu1 %v29093_v56  ;;  %21779 = vmatprep.subr.mxu1 %v24870_v13 }
0x1100   : > { %21807 = vmatmul.mubr.f32.vlgmr.msra.gmra.mrb[52].mxu0 %v29095_v28  ;;  %21809 = vmatprep.subr.mxu0 %v24870_v13 }
0x1101   : > { %21780 = vmatpush3.msra.mxu1 %v29114_v30  ;;  %21810 = vmatpush3.msra.mxu0 %v29114_v30 }
0x1102   : > { %21781 = vmatprep.mubr.msk.f32.mxu1 %vm24869_vm3, %v24870_v13  ;;  %21784 = vmatprep.subr.mxu1 %v24870_v13 }
0x1103   : > { %21811 = vmatprep.mubr.msk.f32.mxu0 %vm24869_vm3, %v24870_v13  ;;  %21814 = vmatprep.subr.mxu0 %v24870_v13 }
0x1107   : > { %21782 = vmatmul.mubr.f32.vlgmr.msra.gmra.mrb[50].mxu1 %v29098_v61  ;;  %v15306_v61 = vand.u32 4294901760, %v15305_v5  ;;  %v24230_v5 = vpack.c.bf16 %v29225_v10, %v29220_v20 }
0x1108   : > { %21785 = vmatpush3.msra.mxu1 %v29111_v37  ;;  %21812 = vmatmul.mubr.f32.vlgmr.msra.gmra.mrb[52].mxu0 %v29101_v7  ;;  %v17505_v7 = vld [vmem:[%s29925_s30 + $0x78] sm:$0xff] }
0x1109   : > { %21815 = vmatpush3.msra.mxu0 %v29111_v37  ;;  %21786 = vmatprep.mubr.msk.f32.mxu1 %vm24869_vm3, %v24870_v13  ;;  %v15205_v58 = vand.u32 4294901760, %v17505_v7 }
0x110a   : > { %21789 = vmatprep.subr.mxu1 %v24870_v13  ;;  %21816 = vmatprep.mubr.msk.f32.mxu0 %vm24869_vm3, %v24870_v13 }
0x110b   : > { %21819 = vmatprep.subr.mxu0 %v24870_v13  ;;  %v29272_v57 = vsub.f32 %v17505_v7, %v15205_v58  ;;  %v29388_v7 = vsub.f32 %v29345_v6, %v15733_v1 }
0x110f   : > { %21787 = vmatmul.mubr.f32.vlgmr.msra.gmra.mrb[50].mxu1 %v14334_v17 }
0x1110   : > { %21790 = vmatpush3.msra.mxu1 %v29121_v14  ;;  %21817 = vmatmul.mubr.f32.vlgmr.msra.gmra.mrb[52].mxu0 %v14793_v21  ;;  %v15318_v21 = vand.u32 4294901760, %v29272_v57 }
0x1111   : > { %21820 = vmatpush3.msra.mxu0 %v29121_v14  ;;  %21791 = vmatprep.mubr.msk.f32.mxu1 %vm24869_vm3, %v24870_v13 }
0x1112   : > { %21794 = vmatprep.subr.mxu1 %v24870_v13  ;;  %21821 = vmatprep.mubr.msk.f32.mxu0 %vm24869_vm3, %v24870_v13  ;;  %v15319_v51 = vsub.f32 %v29272_v57, %v15318_v21 }
0x1113   : > { %21824 = vmatprep.subr.mxu0 %v24870_v13 }
0x1114   : > { %v15320_v54 = vand.u32 4294901760, %v15319_v51  ;;  %v15830_v51 = vand.u32 4294901760, %v29388_v7 }
0x1117   : > { %21792 = vmatmul.mubr.f32.vlgmr.msra.gmra.mrb[50].mxu1 %v29093_v56 }
0x1118   : > { %21795 = vmatpush3.msra.mxu1 %v29111_v37  ;;  %21822 = vmatmul.mubr.f32.vlgmr.msra.gmra.mrb[52].mxu0 %v29095_v28 }
0x1119   : > { %21825 = vmatpush3.msra.mxu0 %v29111_v37  ;;  %21826 = vmatprep.mubr.msk.f32.mxu0 %vm24869_vm3, %v24870_v13 }
0x111a   : > { %21796 = vmatprep.mubr.msk.f32.mxu1 %vm24869_vm3, %v24870_v13  ;;  %24211 = vmatprep.subr.bf16.mxu0 %v24868_v26 }
0x111b   : > { %24199 = vmatprep.subr.bf16.mxu1 %v24868_v26 }
0x111f   : > { %21797 = vmatmul.mubr.f32.vlgmr.msra.gmra.mrb[50].mxu1 %v29093_v56  ;;  %v24218_v56 = vpack.c.bf16 %v15306_v61, %v15299_v39  ;;  %v29376_v39 = vld [vmem:[%s29925_s30 + $0x28] sm:$0xff] }
0x1120   : > { %21827 = vmatmul.mubr.f32.vlgmr.msra.gmra.mrb[52].mxu0 %v29095_v28  ;;  %24201 = vmatpush3.bf16.msra.mxu1 %v29245_v50  ;;  %v17504_v28 = vld [vmem:[%s29925_s30 + $0x70] sm:$0xff] }
0x1121   : > { %24213 = vmatpush3.bf16.msra.mxu0 %v24212_v60  ;;  %24202 = vmatprep.subr.bf16.mxu1 %v24868_v26  ;;  %v15202_v34 = vand.u32 4294901760, %v17504_v28  ;;  %v29354_v60 = vsub.f32 %v29324_v45, %v15724_v16 }
0x1122   : > { %24214 = vmatprep.subr.bf16.mxu0 %v24868_v26  ;;  %21864 = vmatprep.mubr.msk.f32.mxu0 %vm24869_vm3, %v24870_v13 }
0x1123   : > { %21845 = vmatprep.mubr.msk.f32.mxu1 %vm24869_vm3, %v24870_v13  ;;  %v29270_v9 = vsub.f32 %v17504_v28, %v15202_v34  ;;  %v29295_v23 = vpack.c.bf16 %v15205_v58, %v15202_v34  ;;  %v15809_v61 = vand.u32 4294901760, %v29354_v60  ;;  %v29383_v28 = vsub.f32 %v29340_v33, %v15730_v41 }
0x1124   : > { %24204 = vmatpush3.bf16.msra.mxu1 %v29282_v12  ;;  %v15739_v58 = vand.u32 4294901760, %v29376_v39  ;;  %v24296_v33 = vpack.c.bf16 %v29359_v63, %v29354_v60 }
0x1125   : > { %24216 = vmatpush3.bf16.msra.mxu0 %v24215_v48  ;;  %v15311_v17 = vand.u32 4294901760, %v29270_v9  ;;  %24205 = vmatprep.subr.bf16.mxu1 %v24868_v26  ;;  %v24233_v11 = vpack.c.bf16 %v29272_v57, %v29270_v9  ;;  %v29371_v48 = vld [vmem:[%s29925_s30 + $0x20] sm:$0xff]  ;;  %v29403_v57 = vld [vmem:[%s29925_s30 + $0x38] sm:$0xff] }
0x1126   : > { %24217 = vmatprep.subr.bf16.mxu0 %v24868_v26  ;;  %v15736_v34 = vand.u32 4294901760, %v29371_v48  ;;  %v29428_v27 = vsub.f32 %v29376_v39, %v15739_v58  ;;  %v17506_v39 = vld [vmem:[%s29923_s16 + $0x8] sm:$0xf] }
0x1127   : > { %v15312_v25 = vsub.f32 %v29270_v9, %v15311_v17  ;;  %v29301_v32 = vpack.c.bf16 %v15318_v21, %v15311_v17  ;;  %v29398_v9 = vld [vmem:[%s29925_s30 + $0x30] sm:$0xff]  ;;  %v15810_v17 = vsub.f32 %v29354_v60, %v15809_v61 }
0x1128   : > { %24207 = vmatpush3.bf16.msra.mxu1 %v29291_v38  ;;  %v29423_v49 = vsub.f32 %v29371_v48, %v15736_v34  ;;  %v15844_v29 = vand.u32 4294901760, %v29428_v27 }
0x1129   : > { %24219 = vmatpush3.bf16.msra.mxu0 %v24218_v56  ;;  %v15313_v40 = vand.u32 4294901760, %v15312_v25  ;;  %24208 = vmatprep.subr.bf16.mxu1 %v24868_v26  ;;  %v15816_v56 = vand.u32 4294901760, %v29359_v63  ;;  %v15823_v25 = vand.u32 4294901760, %v29383_v28 }
0x112a   : > { %24220 = vmatprep.subr.bf16.mxu0 %v24868_v26  ;;  %v15837_v0 = vand.u32 4294901760, %v29423_v49 }
0x112b   : > { %v24221_v42 = vpack.c.bf16 %v15320_v54, %v15313_v40  ;;  %v15817_v21 = vsub.f32 %v29359_v63, %v15816_v56  ;;  %v24251_v40 = vpack.c.bf16 %v15290_v55, %v15283_v15  ;;  %v15811_v54 = vand.u32 4294901760, %v15810_v17 }
0x112c   : > { %24210 = vmatpush3.bf16.msra.mxu1 %v29295_v23  ;;  %v24326_v63 = vpack.c.bf16 %v15844_v29, %v15837_v0 }
0x112d   : > { %24222 = vmatpush3.bf16.msra.mxu0 %v24221_v42  ;;  %24223 = vmatprep.subr.bf16.mxu1 %v24868_v26  ;;  %v15824_v42 = vsub.f32 %v29383_v28, %v15823_v25 }
0x112e   : > { %24235 = vmatprep.subr.bf16.mxu0 %v24868_v26 }
0x11f2   : > { %v29303_v44 = vpop.f32.mrb[50].mxu1 }
0x11f3   : > { %v15167_v52 = vpop.f32.mrb[52].mxu0  ;;  %v21798_v47 = vpop.f32.mrb[51].mxu1 }
0x11f4   : > { %v15181_v22 = vsel %vm12169_vm8, %v15167_v52, 0  ;;  %v21828_v8 = vpop.f32.mrb[53].mxu0  ;;  %v15825_v47 = vand.u32 4294901760, %v15824_v42 }
0x11f5   : > { %v29306_v36 = vand.u32 4294901760, %v15181_v22  ;;  %v15838_v8 = vsub.f32 %v29423_v49, %v15837_v0 }
0x11f7   : > { %v29309_v19 = vsub.f32 %v15181_v22, %v29306_v36  ;;  %21865 = vmatmul.mubr.f32.vlgmr.msra.gmra.mrb[54].mxu0 %v29306_v36 }
0x11f8   : > { %24237 = vmatpush3.bf16.msra.mxu0 %v29245_v50  ;;  %21902 = vmatprep.mubr.msk.f32.mxu0 %vm24869_vm3, %v24870_v13 }
0x11f9   : > { %v15258_v53 = vand.u32 4294901760, %v29309_v19  ;;  %24238 = vmatprep.subr.bf16.mxu0 %v24868_v26 }
0x11fb   : > { %v15259_v46 = vsub.f32 %v29309_v19, %v15258_v53 }
0x11fc   : > { %24240 = vmatpush3.bf16.msra.mxu0 %v29282_v12 }
0x11fd   : > { %v15260_v2 = vand.u32 4294901760, %v15259_v46  ;;  %24241 = vmatprep.subr.bf16.mxu0 %v24868_v26 }
0x11ff   : > { %21846 = vmatmul.mubr.f32.vlgmr.msra.gmra.mrb[52].mxu1 %v15260_v2  ;;  %v24272_v2 = vpack.c.bf16 %v15727_v18, %v15724_v16 }
0x1200   : > { %24225 = vmatpush3.bf16.msra.mxu1 %v24224_v59  ;;  %24243 = vmatpush3.bf16.msra.mxu0 %v29291_v38  ;;  %v15721_v59 = vsel %vm12169_vm8, %v29303_v44, 0 }
0x1201   : > { %24226 = vmatprep.subr.bf16.mxu1 %v24868_v26  ;;  %24244 = vmatprep.subr.bf16.mxu0 %v24868_v26  ;;  %v29495_v17 = vand.u32 4294901760, %v15721_v59 }
0x1202   : > { %21883 = vmatprep.mubr.msk.f32.mxu1 %vm24869_vm3, %v24870_v13 }
0x1203   : > { %v15797_v45 = vsub.f32 %v15721_v59, %v29495_v17 }
0x1204   : > { %24228 = vmatpush3.bf16.msra.mxu1 %v24227_v3  ;;  %24246 = vmatpush3.bf16.msra.mxu0 %v29295_v23 }
0x1205   : > { %24229 = vmatprep.subr.bf16.mxu1 %v24868_v26  ;;  %24259 = vmatprep.subr.bf16.mxu0 %v24868_v26  ;;  %v15798_v62 = vand.u32 4294901760, %v15797_v45 }
0x1207   : > { %21903 = vmatmul.mubr.f32.vlgmr.msra.gmra.mrb[56].mxu0 %v15258_v53  ;;  %v15799_v18 = vsub.f32 %v15797_v45, %v15798_v62 }
0x1208   : > { %24231 = vmatpush3.bf16.msra.mxu1 %v24230_v5  ;;  %24261 = vmatpush3.bf16.msra.mxu0 %v29245_v50  ;;  %v24248_v50 = vpack.c.bf16 %v15276_v4, %v15269_v43  ;;  %v15742_v43 = vand.u32 4294901760, %v29398_v9  ;;  %v15745_v4 = vand.u32 4294901760, %v29403_v57 }
0x1209   : > { %24232 = vmatprep.subr.bf16.mxu1 %v24868_v26  ;;  %24262 = vmatprep.subr.bf16.mxu0 %v24868_v26  ;;  %v15800_v6 = vand.u32 4294901760, %v15799_v18 }
0x120a   : > { %21940 = vmatprep.mubr.msk.f32.mxu0 %vm24869_vm3, %v24870_v13  ;;  %v29451_v15 = vsub.f32 %v29398_v9, %v15742_v43  ;;  %v29456_v55 = vsub.f32 %v29403_v57, %v15745_v4  ;;  %v24281_v16 = vpack.c.bf16 %v15745_v4, %v15742_v43  ;;  %v24323_v57 = vpack.c.bf16 %v15830_v51, %v15823_v25  ;;  %v17510_v25 = vld [vmem:[%s29925_s30 + $0x98] sm:$0xff] }
0x120b   : > { %v16733_v43 = vand.u32 4294901760, %v17510_v25 }
0x120c   : > { %24234 = vmatpush3.bf16.msra.mxu1 %v24233_v11  ;;  %24264 = vmatpush3.bf16.msra.mxu0 %v29282_v12  ;;  %v15818_v12 = vand.u32 4294901760, %v15817_v21  ;;  %v15831_v11 = vsub.f32 %v29388_v7, %v15830_v51  ;;  %v15851_v53 = vand.u32 4294901760, %v29451_v15  ;;  %v15858_v20 = vand.u32 4294901760, %v29456_v55 }
0x120d   : > { %24247 = vmatprep.subr.bf16.mxu1 %v24868_v26  ;;  %24265 = vmatprep.subr.bf16.mxu0 %v24868_v26  ;;  %v24305_v48 = vpack.c.bf16 %v29456_v55, %v29451_v15  ;;  %v29630_v0 = vsub.f32 %v17510_v25, %v16733_v43 }
0x120e   : > { %v24284_v52 = vpack.c.bf16 %v15818_v12, %v15811_v54  ;;  %v15832_v22 = vand.u32 4294901760, %v15831_v11  ;;  %v15859_v46 = vsub.f32 %v29456_v55, %v15858_v20 }
0x120f   : > { %21884 = vmatmul.mubr.f32.vlgmr.msra.gmra.mrb[54].mxu1 %v29309_v19  ;;  %v15845_v19 = vsub.f32 %v29428_v27, %v15844_v29 }
0x1210   : > { %24249 = vmatpush3.bf16.msra.mxu1 %v24248_v50  ;;  %24267 = vmatpush3.bf16.msra.mxu0 %v29291_v38  ;;  %v24254_v38 = vpack.c.bf16 %v15304_v35, %v15297_v31  ;;  %v24287_v10 = vpack.c.bf16 %v15832_v22, %v15825_v47  ;;  %v15839_v31 = vand.u32 4294901760, %v15838_v8  ;;  %v15860_v50 = vand.u32 4294901760, %v15859_v46 }
0x1211   : > { %24250 = vmatprep.subr.bf16.mxu1 %v24868_v26  ;;  %24268 = vmatprep.subr.bf16.mxu0 %v24868_v26  ;;  %v15846_v35 = vand.u32 4294901760, %v15845_v19  ;;  %v16830_v47 = vand.u32 4294901760, %v29630_v0 }
0x1212   : > { %21921 = vmatprep.mubr.msk.f32.mxu1 %vm24869_vm3, %v24870_v13 }
0x1213   : > { %v24290_v3 = vpack.c.bf16 %v15846_v35, %v15839_v31 }
0x1214   : > { %24252 = vmatpush3.bf16.msra.mxu1 %v24251_v40  ;;  %24270 = vmatpush3.bf16.msra.mxu0 %v29295_v23  ;;  %v15852_v23 = vsub.f32 %v29451_v15, %v15851_v53 }
0x1215   : > { %24253 = vmatprep.subr.bf16.mxu1 %v24868_v26  ;;  %24283 = vmatprep.subr.bf16.mxu0 %v24868_v26 }
0x1216   : > { %v15853_v5 = vand.u32 4294901760, %v15852_v23 }
0x1217   : > { %21941 = vmatmul.mubr.f32.vlgmr.msra.gmra.mrb[58].mxu0 %v29306_v36 }
0x1218   : > { %24255 = vmatpush3.bf16.msra.mxu1 %v24254_v38  ;;  %24285 = vmatpush3.bf16.msra.mxu0 %v24284_v52  ;;  %v24293_v44 = vpack.c.bf16 %v15860_v50, %v15853_v5 }
0x1219   : > { %24256 = vmatprep.subr.bf16.mxu1 %v24868_v26  ;;  %24286 = vmatprep.subr.bf16.mxu0 %v24868_v26 }
0x121a   : > { %21978 = vmatprep.mubr.msk.f32.mxu0 %vm24869_vm3, %v24870_v13 }
0x121c   : > { %24258 = vmatpush3.bf16.msra.mxu1 %v29301_v32  ;;  %24288 = vmatpush3.bf16.msra.mxu0 %v24287_v10  ;;  %v24275_v32 = vpack.c.bf16 %v15733_v1, %v15730_v41  ;;  %v24299_v41 = vpack.c.bf16 %v29388_v7, %v29383_v28  ;;  %v24302_v1 = vpack.c.bf16 %v29428_v27, %v29423_v49  ;;  %v17511_v49 = vld [vmem:[%s29925_s30 + $0xa0] sm:$0xff]  ;;  %v17512_v27 = vld [vmem:[%s29925_s30 + $0xa8] sm:$0xff] }
0x121d   : > { %24271 = vmatprep.subr.bf16.mxu1 %v24868_v26  ;;  %24289 = vmatprep.subr.bf16.mxu0 %v24868_v26  ;;  %v16736_v4 = vand.u32 4294901760, %v17511_v49  ;;  %v16739_v40 = vand.u32 4294901760, %v17512_v27  ;;  %v16831_v10 = vsub.f32 %v29630_v0, %v16830_v47 }
0x121f   : > { %21922 = vmatmul.mubr.f32.vlgmr.msra.gmra.mrb[56].mxu1 %v29306_v36  ;;  %v24278_v36 = vpack.c.bf16 %v15739_v58, %v15736_v34  ;;  %v24320_v34 = vpack.c.bf16 %v15816_v56, %v15809_v61  ;;  %v16263_v58 = vsel %vm11251_vm6, %v17506_v39, 0  ;;  %v24329_v56 = vpack.c.bf16 %v15858_v20, %v15851_v53 }
0x1220   : > { %24273 = vmatpush3.bf16.msra.mxu1 %v24272_v2  ;;  %24291 = vmatpush3.bf16.msra.mxu0 %v24290_v3  ;;  %v16331_v9 = vand.u32 4294901760, %v16263_v58  ;;  %v29632_v29 = vsub.f32 %v17511_v49, %v16736_v4  ;;  %v29634_v15 = vsub.f32 %v17512_v27, %v16739_v40 }
0x1221   : > { %24274 = vmatprep.subr.bf16.mxu1 %v24868_v26  ;;  %24292 = vmatprep.subr.bf16.mxu0 %v24868_v26 }
0x1222   : > { %21959 = vmatprep.mubr.msk.f32.mxu1 %vm24869_vm3, %v24870_v13  ;;  %v16332_v60 = vsub.f32 %v16263_v58, %v16331_v9  ;;  %v16837_v22 = vand.u32 4294901760, %v29632_v29  ;;  %v16844_v8 = vand.u32 4294901760, %v29634_v15 }
0x1224   : > { %24276 = vmatpush3.bf16.msra.mxu1 %v24275_v32  ;;  %24294 = vmatpush3.bf16.msra.mxu0 %v24293_v44  ;;  %v16333_v61 = vand.u32 4294901760, %v16332_v60  ;;  %v16838_v31 = vsub.f32 %v29632_v29, %v16837_v22  ;;  %v16845_v59 = vsub.f32 %v29634_v15, %v16844_v8  ;;  %v17513_v44 = vld [vmem:[%s29925_s30 + $0xb0] sm:$0xff] }
0x1225   : > { %24277 = vmatprep.subr.bf16.mxu1 %v24868_v26  ;;  %24307 = vmatprep.subr.bf16.mxu0 %v24868_v26 }
0x1226   : > { %v16334_v28 = vsub.f32 %v16332_v60, %v16333_v61  ;;  %v16839_v50 = vand.u32 4294901760, %v16838_v31 }
0x1227   : > { %21979 = vmatmul.mubr.f32.vlgmr.msra.gmra.mrb[60].mxu0 %v29495_v17 }
0x1228   : > { %24279 = vmatpush3.bf16.msra.mxu1 %v24278_v36  ;;  %24309 = vmatpush3.bf16.msra.mxu0 %v24272_v2  ;;  %v16335_v7 = vand.u32 4294901760, %v16334_v28 }
0x1229   : > { %24280 = vmatprep.subr.bf16.mxu1 %v24868_v26  ;;  %24310 = vmatprep.subr.bf16.mxu0 %v24868_v26 }
0x122a   : > { %22016 = vmatprep.mubr.msk.f32.mxu0 %vm24869_vm3, %v24870_v13 }
0x122c   : > { %24282 = vmatpush3.bf16.msra.mxu1 %v24281_v16  ;;  %24312 = vmatpush3.bf16.msra.mxu0 %v24275_v32 }
0x122d   : > { %24295 = vmatprep.subr.bf16.mxu1 %v24868_v26  ;;  %24313 = vmatprep.subr.bf16.mxu0 %v24868_v26 }
0x122f   : > { %21960 = vmatmul.mubr.f32.vlgmr.msra.gmra.mrb[58].mxu1 %v15800_v6 }
0x1230   : > { %24297 = vmatpush3.bf16.msra.mxu1 %v24296_v33  ;;  %24315 = vmatpush3.bf16.msra.mxu0 %v24278_v36 }
0x1231   : > { %24298 = vmatprep.subr.bf16.mxu1 %v24868_v26  ;;  %24316 = vmatprep.subr.bf16.mxu0 %v24868_v26 }
0x1232   : > { %21997 = vmatprep.mubr.msk.f32.mxu1 %vm24869_vm3, %v24870_v13 }
0x1234   : > { %24300 = vmatpush3.bf16.msra.mxu1 %v24299_v41  ;;  %24318 = vmatpush3.bf16.msra.mxu0 %v24281_v16 }
0x1235   : > { %24301 = vmatprep.subr.bf16.mxu1 %v24868_v26  ;;  %24331 = vmatprep.subr.bf16.mxu0 %v24868_v26 }
0x1237   : > { %22017 = vmatmul.mubr.f32.vlgmr.msra.gmra.mrb[62].mxu0 %v15798_v62 }
0x1238   : > { %24303 = vmatpush3.bf16.msra.mxu1 %v24302_v1  ;;  %24333 = vmatpush3.bf16.msra.mxu0 %v24272_v2  ;;  %v16832_v2 = vand.u32 4294901760, %v16831_v10 }
0x1239   : > { %24304 = vmatprep.subr.bf16.mxu1 %v24868_v26  ;;  %24334 = vmatprep.subr.bf16.mxu0 %v24868_v26 }
0x123a   : > { %22054 = vmatprep.mubr.msk.f32.mxu0 %vm24869_vm3, %v24870_v13 }
0x123c   : > { %24306 = vmatpush3.bf16.msra.mxu1 %v24305_v48  ;;  %24336 = vmatpush3.bf16.msra.mxu0 %v24275_v32 }
0x123d   : > { %24319 = vmatprep.subr.bf16.mxu1 %v24868_v26  ;;  %24337 = vmatprep.subr.bf16.mxu0 %v24868_v26 }
0x123f   : > { %21998 = vmatmul.mubr.f32.vlgmr.msra.gmra.mrb[60].mxu1 %v15797_v45  ;;  %v17514_v45 = vld [vmem:[%s29925_s30 + $0xb8] sm:$0xff] }
0x1240   : > { %24321 = vmatpush3.bf16.msra.mxu1 %v24320_v34  ;;  %24339 = vmatpush3.bf16.msra.mxu0 %v24278_v36  ;;  %v16742_v36 = vand.u32 4294901760, %v17513_v44  ;;  %v16745_v62 = vand.u32 4294901760, %v17514_v45 }
0x1241   : > { %24322 = vmatprep.subr.bf16.mxu1 %v24868_v26  ;;  %24340 = vmatprep.subr.bf16.mxu0 %v24868_v26 }
0x1242   : > { %22035 = vmatprep.mubr.msk.f32.mxu1 %vm24869_vm3, %v24870_v13  ;;  %v29673_v18 = vsub.f32 %v17514_v45, %v16745_v62  ;;  %v29688_v28 = vpack.c.bf16 %v16745_v62, %v16742_v36 }
0x1244   : > { %24324 = vmatpush3.bf16.msra.mxu1 %v24323_v57  ;;  %24342 = vmatpush3.bf16.msra.mxu0 %v24281_v16  ;;  %v29671_v16 = vsub.f32 %v17513_v44, %v16742_v36  ;;  %v16858_v6 = vand.u32 4294901760, %v29673_v18 }
0x1245   : > { %24325 = vmatprep.subr.bf16.mxu1 %v24868_v26  ;;  %24343 = vmatprep.subr.bf16.mxu0 %v24868_v26 }
0x1246   : > { %v16851_v33 = vand.u32 4294901760, %v29671_v16  ;;  %v16859_v1 = vsub.f32 %v29673_v18, %v16858_v6  ;;  %v24377_v49 = vpack.c.bf16 %v29673_v18, %v29671_v16 }
0x1247   : > { %22055 = vmatmul.mubr.f32.vlgmr.msra.gmra.mrb[64].mxu0 %v29495_v17 }
0x1248   : > { %24327 = vmatpush3.bf16.msra.mxu1 %v24326_v63  ;;  %22103 = vmatprep.mubr.msk.f32.mxu0 %vm24869_vm3, %v24870_v13  ;;  %v16852_v41 = vsub.f32 %v29671_v16, %v16851_v33  ;;  %v16860_v58 = vand.u32 4294901760, %v16859_v1  ;;  %v29710_v31 = vpack.c.bf16 %v16858_v6, %v16851_v33 }
0x1249   : > { %24328 = vmatprep.subr.bf16.mxu1 %v24868_v26 }
0x124a   : > { %v16853_v34 = vand.u32 4294901760, %v16852_v41 }
0x124c   : > { %24330 = vmatpush3.bf16.msra.mxu1 %v24329_v56  ;;  %v24365_v57 = vpack.c.bf16 %v16860_v58, %v16853_v34 }
0x124d   : > { %22057 = vmatprep.subr.mxu1 %v24870_v13 }
0x124f   : > { %22036 = vmatmul.mubr.f32.vlgmr.msra.gmra.mrb[62].mxu1 %v29495_v17  ;;  %v16846_v17 = vand.u32 4294901760, %v16845_v59 }
0x1250   : > { %22058 = vmatpush3.msra.mxu1 %v29111_v37  ;;  %22059 = vmatprep.mubr.msk.f32.mxu1 %vm24869_vm3, %v24870_v13 }
0x1251   : > { %22062 = vmatprep.subr.mxu1 %v24870_v13  ;;  %v24362_v32 = vpack.c.bf16 %v16846_v17, %v16839_v50 }
0x1253   : > { %22060 = vmatmul.mubr.f32.vlgmr.msra.gmra.mrb[64].mxu1 %v16335_v7 }
0x1254   : > { %22063 = vmatpush3.msra.mxu1 %v29129_v24  ;;  %22064 = vmatprep.mubr.msk.f32.mxu1 %vm24869_vm3, %v24870_v13 }
0x1255   : > { %22067 = vmatprep.subr.mxu1 %v24870_v13 }
0x125b   : > { %22065 = vmatmul.mubr.f32.vlgmr.msra.gmra.mrb[64].mxu1 %v16331_v9 }
0x125c   : > { %22068 = vmatpush3.msra.mxu1 %v29114_v30  ;;  %22069 = vmatprep.mubr.msk.f32.mxu1 %vm24869_vm3, %v24870_v13  ;;  %v17507_v30 = vld [vmem:[%s29925_s30 + $0x80] sm:$0xff] }
0x125d   : > { %22072 = vmatprep.subr.mxu1 %v24870_v13  ;;  %v16724_v24 = vand.u32 4294901760, %v17507_v30 }
0x125f   : > { %v29622_v54 = vsub.f32 %v17507_v30, %v16724_v24 }
0x1261   : > { %v16809_v55 = vand.u32 4294901760, %v29622_v54 }
0x1263   : > { %22070 = vmatmul.mubr.f32.vlgmr.msra.gmra.mrb[64].mxu1 %v16332_v60  ;;  %v16810_v19 = vsub.f32 %v29622_v54, %v16809_v55  ;;  %v29684_v60 = vpack.c.bf16 %v16739_v40, %v16736_v4 }
0x1264   : > { %22073 = vmatpush3.msra.mxu1 %v29111_v37  ;;  %22074 = vmatprep.mubr.msk.f32.mxu1 %vm24869_vm3, %v24870_v13 }
0x1265   : > { %22077 = vmatprep.subr.mxu1 %v24870_v13  ;;  %v16811_v35 = vand.u32 4294901760, %v16810_v19 }
0x126b   : > { %22075 = vmatmul.mubr.f32.vlgmr.msra.gmra.mrb[64].mxu1 %v16333_v61 }
0x126c   : > { %22078 = vmatpush3.msra.mxu1 %v29121_v14  ;;  %22079 = vmatprep.mubr.msk.f32.mxu1 %vm24869_vm3, %v24870_v13  ;;  %v17508_v14 = vld [vmem:[%s29925_s30 + $0x88] sm:$0xff] }
0x126d   : > { %22082 = vmatprep.subr.mxu1 %v24870_v13  ;;  %v16727_v21 = vand.u32 4294901760, %v17508_v14 }
0x126f   : > { %v29624_v12 = vsub.f32 %v17508_v14, %v16727_v21  ;;  %v29628_v11 = vpack.c.bf16 %v16727_v21, %v16724_v24  ;;  %v24374_v24 = vpack.c.bf16 %v29634_v15, %v29632_v29 }
0x1271   : > { %v16816_v38 = vand.u32 4294901760, %v29624_v12  ;;  %24345 = vmatpush3.bf16.msra.mxu0 %v29628_v11  ;;  %v24368_v7 = vpack.c.bf16 %v29624_v12, %v29622_v54 }
0x1272   : > { %24346 = vmatprep.subr.bf16.mxu0 %v24868_v26 }
0x1273   : > { %22080 = vmatmul.mubr.f32.vlgmr.msra.gmra.mrb[64].mxu1 %v16331_v9  ;;  %v16817_v53 = vsub.f32 %v29624_v12, %v16816_v38 }
0x1274   : > { %22083 = vmatpush3.msra.mxu1 %v29111_v37  ;;  %22084 = vmatprep.mubr.msk.f32.mxu1 %vm24869_vm3, %v24870_v13  ;;  %v17509_v37 = vld [vmem:[%s29925_s30 + $0x90] sm:$0xff] }
0x1275   : > { %24355 = vmatprep.subr.bf16.mxu1 %v24868_v26  ;;  %v16730_v51 = vand.u32 4294901760, %v17509_v37  ;;  %v16818_v23 = vand.u32 4294901760, %v16817_v53 }
0x1277   : > { %v29626_v42 = vsub.f32 %v17509_v37, %v16730_v51  ;;  %v24356_v3 = vpack.c.bf16 %v16818_v23, %v16811_v35 }
0x1279   : > { %v16823_v52 = vand.u32 4294901760, %v29626_v42  ;;  %v24371_v37 = vpack.c.bf16 %v29630_v0, %v29626_v42 }
0x127b   : > { %22085 = vmatmul.mubr.f32.vlgmr.msra.gmra.mrb[64].mxu1 %v16331_v9  ;;  %v16824_v20 = vsub.f32 %v29626_v42, %v16823_v52  ;;  %v29679_v9 = vpack.c.bf16 %v16733_v43, %v16730_v51  ;;  %v24392_v43 = vpack.c.bf16 %v16816_v38, %v16809_v55  ;;  %v29708_v19 = vpack.c.bf16 %v16830_v47, %v16823_v52 }
0x127c   : > { %22122 = vmatprep.mubr.msk.f32.mxu1 %vm24869_vm3, %v24870_v13  ;;  %24357 = vmatpush3.bf16.msra.mxu1 %v24356_v3 }
0x127d   : > { %v16825_v46 = vand.u32 4294901760, %v16824_v20  ;;  %24358 = vmatprep.subr.bf16.mxu1 %v24868_v26  ;;  %24348 = vmatpush3.bf16.msra.mxu0 %v29679_v9 }
0x127e   : > { %24349 = vmatprep.subr.bf16.mxu0 %v24868_v26 }
0x127f   : > { %v24359_v5 = vpack.c.bf16 %v16832_v2, %v16825_v46 }
0x1281   : > { %24360 = vmatpush3.bf16.msra.mxu1 %v24359_v5  ;;  %24351 = vmatpush3.bf16.msra.mxu0 %v29684_v60 }
0x1282   : > { %24361 = vmatprep.subr.bf16.mxu1 %v24868_v26  ;;  %24352 = vmatprep.subr.bf16.mxu0 %v24868_v26 }
0x1285   : > { %24363 = vmatpush3.bf16.msra.mxu1 %v24362_v32  ;;  %24354 = vmatpush3.bf16.msra.mxu0 %v29688_v28 }
0x1286   : > { %24364 = vmatprep.subr.bf16.mxu1 %v24868_v26  ;;  %24367 = vmatprep.subr.bf16.mxu0 %v24868_v26 }
0x1289   : > { %24366 = vmatpush3.bf16.msra.mxu1 %v24365_v57 }
0x128a   : > { %24379 = vmatprep.subr.bf16.mxu1 %v24868_v26 }
0x12ca   : > { %v15373_v48 = vpop.f32.mrb[54].mxu0 }
0x12cb   : > { %v21866_v39 = vpop.f32.mrb[55].mxu0 }
0x12d2   : > { %v15262_v63 = vpop.f32.mrb[52].mxu1 }
0x12d3   : > { %v15374_v61 = vadd.f32 %v15373_v48, %v15262_v63  ;;  %v21847_v56 = vpop.f32.mrb[53].mxu1 }
0x12da   : > { %v15542_v30 = vpop.f32.mrb[56].mxu0 }
0x12db   : > { %v21904_v14 = vpop.f32.mrb[57].mxu0 }
0x12e2   : > { %v15461_v21 = vpop.f32.mrb[54].mxu1 }
0x12e3   : > { %v15462_v25 = vadd.f32 %v15461_v21, %v15374_v61  ;;  %v21885_v51 = vpop.f32.mrb[55].mxu1 }
0x12e5   : > { %v15543_v27 = vadd.f32 %v15542_v30, %v15462_v25 }
0x12ea   : > { %v15716_v4 = vpop.f32.mrb[58].mxu0 }
0x12eb   : > { %v21942_v40 = vpop.f32.mrb[59].mxu0 }
0x12f2   : > { %v15637_v53 = vpop.f32.mrb[56].mxu1 }
0x12f3   : > { %v15638_v20 = vadd.f32 %v15637_v53, %v15543_v27  ;;  %v21923_v10 = vpop.f32.mrb[57].mxu1 }
0x12f5   : > { %v15717_v35 = vadd.f32 %v15716_v4, %v15638_v20 }
0x12fa   : > { %v15913_v23 = vpop.f32.mrb[60].mxu0 }
0x12fb   : > { %v21980_v46 = vpop.f32.mrb[61].mxu0 }
0x1302   : > { %v15802_v54 = vpop.f32.mrb[58].mxu1 }
0x1303   : > { %v15803_v59 = vadd.f32 %v15802_v54, %v15717_v35  ;;  %v21961_v12 = vpop.f32.mrb[59].mxu1 }
0x1305   : > { %v15914_v55 = vadd.f32 %v15913_v23, %v15803_v59 }
0x130a   : > { %v16082_v38 = vpop.f32.mrb[62].mxu0 }
0x130b   : > { %v22018_v2 = vpop.f32.mrb[63].mxu0 }
0x1312   : > { %v16001_v3 = vpop.f32.mrb[60].mxu1 }
0x1313   : > { %v16002_v42 = vadd.f32 %v16001_v3, %v15914_v55  ;;  %v21999_v5 = vpop.f32.mrb[61].mxu1 }
0x1315   : > { %v16083_v0 = vadd.f32 %v16082_v38, %v16002_v42 }
0x131a   : > { %v16256_v52 = vpop.f32.mrb[64].mxu0 }
0x131b   : > { %v22056_v47 = vpop.f32.mrb[65].mxu0 }
0x1322   : > { %v16177_v50 = vpop.f32.mrb[62].mxu1 }
0x1323   : > { %v16178_v17 = vadd.f32 %v16177_v50, %v16083_v0  ;;  %v22037_v32 = vpop.f32.mrb[63].mxu1 }
0x1325   : > { %v29712_v44 = vadd.f32 %v16256_v52, %v16178_v17 }
0x134e   : > { %v16707_v45 = vpop.f32.mrb[64].mxu1 }
0x134f   : > { %v16721_v36 = vsel %vm12169_vm8, %v16707_v45, 0  ;;  %v22086_v62 = vpop.f32.mrb[65].mxu1 }
0x1350   : > { %v16796_v16 = vand.u32 4294901760, %v16721_v36 }
0x1352   : > { %v16797_v18 = vsub.f32 %v16721_v36, %v16796_v16  ;;  %22123 = vmatmul.mubr.f32.vlgmr.msra.gmra.mrb[66].mxu1 %v16796_v16 }
0x1353   : > { %24381 = vmatpush3.bf16.msra.mxu1 %v29628_v11  ;;  %22160 = vmatprep.mubr.msk.f32.mxu1 %vm24869_vm3, %v24870_v13 }
0x1354   : > { %v16798_v33 = vand.u32 4294901760, %v16797_v18  ;;  %24382 = vmatprep.subr.bf16.mxu1 %v24868_v26 }
0x1356   : > { %v16799_v6 = vsub.f32 %v16797_v18, %v16798_v33 }
0x1357   : > { %24384 = vmatpush3.bf16.msra.mxu1 %v29679_v9 }
0x1358   : > { %v16800_v41 = vand.u32 4294901760, %v16799_v6  ;;  %24385 = vmatprep.subr.bf16.mxu1 %v24868_v26 }
0x135a   : > { %22104 = vmatmul.mubr.f32.vlgmr.msra.gmra.mrb[66].mxu0 %v16800_v41 }
0x135b   : > { %24369 = vmatpush3.bf16.msra.mxu0 %v24368_v7  ;;  %24387 = vmatpush3.bf16.msra.mxu1 %v29684_v60 }
0x135c   : > { %24370 = vmatprep.subr.bf16.mxu0 %v24868_v26  ;;  %24388 = vmatprep.subr.bf16.mxu1 %v24868_v26 }
0x135d   : > { %22141 = vmatprep.mubr.msk.f32.mxu0 %vm24869_vm3, %v24870_v13 }
0x135f   : > { %24372 = vmatpush3.bf16.msra.mxu0 %v24371_v37  ;;  %24390 = vmatpush3.bf16.msra.mxu1 %v29688_v28 }
0x1360   : > { %24373 = vmatprep.subr.bf16.mxu0 %v24868_v26  ;;  %24403 = vmatprep.subr.bf16.mxu1 %v24868_v26 }
0x1362   : > { %22161 = vmatmul.mubr.f32.vlgmr.msra.gmra.mrb[68].mxu1 %v16798_v33 }
0x1363   : > { %24375 = vmatpush3.bf16.msra.mxu0 %v24374_v24  ;;  %24405 = vmatpush3.bf16.msra.mxu1 %v29628_v11  ;;  %v24398_v11 = vpack.c.bf16 %v16844_v8, %v16837_v22 }
0x1364   : > { %24376 = vmatprep.subr.bf16.mxu0 %v24868_v26  ;;  %24406 = vmatprep.subr.bf16.mxu1 %v24868_v26 }
0x1365   : > { %22198 = vmatprep.mubr.msk.f32.mxu1 %vm24869_vm3, %v24870_v13 }
0x1367   : > { %24378 = vmatpush3.bf16.msra.mxu0 %v24377_v49  ;;  %24408 = vmatpush3.bf16.msra.mxu1 %v29679_v9 }
0x1368   : > { %24391 = vmatprep.subr.bf16.mxu0 %v24868_v26  ;;  %24409 = vmatprep.subr.bf16.mxu1 %v24868_v26 }
0x136a   : > { %22142 = vmatmul.mubr.f32.vlgmr.msra.gmra.mrb[68].mxu0 %v16797_v18 }
0x136b   : > { %24393 = vmatpush3.bf16.msra.mxu0 %v24392_v43  ;;  %24411 = vmatpush3.bf16.msra.mxu1 %v29684_v60 }
0x136c   : > { %24394 = vmatprep.subr.bf16.mxu0 %v24868_v26  ;;  %24412 = vmatprep.subr.bf16.mxu1 %v24868_v26 }
0x136d   : > { %22179 = vmatprep.mubr.msk.f32.mxu0 %vm24869_vm3, %v24870_v13 }
0x136f   : > { %24396 = vmatpush3.bf16.msra.mxu0 %v29708_v19  ;;  %24414 = vmatpush3.bf16.msra.mxu1 %v29688_v28  ;;  %v17515_v28 = vld [vmem:[%s29926_s29] ss:$0 sm:$0xff]  ;;  %s24797_s29 = scalar_lea.vmem %s24796_s18, 128 }
0x1370   : > { %24397 = vmatprep.subr.bf16.mxu0 %v24868_v26  ;;  %p24799_p9 = scmp.lt.s32.totalorder %s24797_s29, %s24791_s19 }
0x1372   : > { %22199 = vmatmul.mubr.f32.vlgmr.msra.gmra.mrb[70].mxu1 %v16796_v16  ;;  %p24800_p12 = por %p24799_p9, %p24798_p7 }
0x1373   : > { %24399 = vmatpush3.bf16.msra.mxu0 %v24398_v11 }
0x1374   : > { %24400 = vmatprep.subr.bf16.mxu0 %v24868_v26  ;;  %p24801_p1 = pnand %p24800_p12, %p24794_p3 }
0x1377   : > { %24402 = vmatpush3.bf16.msra.mxu0 %v29710_v31 }
0x137a   : > { %22180 = vmatmul.mubr.f32.vlgmr.msra.gmra.mrb[70].mxu0 %v16796_v16 }
0x1425   : > { %v16913_v13 = vpop.f32.mrb[66].mxu1 }
0x1426   : > { %v22124_v1 = vpop.f32.mrb[67].mxu1 }
0x142d   : > { %v16802_v48 = vpop.f32.mrb[66].mxu0 }
0x142e   : > { %v16914_v39 = vadd.f32 %v16913_v13, %v16802_v48  ;;  %v22105_v34 = vpop.f32.mrb[67].mxu0 }
0x1435   : > { %v17082_v29 = vpop.f32.mrb[68].mxu1 }
0x1436   : > { %v22162_v58 = vpop.f32.mrb[69].mxu1 }
0x143d   : > { %v17001_v15 = vpop.f32.mrb[68].mxu0 }
0x143e   : > { %v17002_v22 = vadd.f32 %v17001_v15, %v16914_v39  ;;  %v22143_v8 = vpop.f32.mrb[69].mxu0 }
0x1440   : > { %v17083_v9 = vadd.f32 %v17082_v29, %v17002_v22 }
0x1445   : > { %v17256_v57 = vpop.f32.mrb[70].mxu1 }
0x1446   : > { %v22200_v60 = vpop.f32.mrb[71].mxu1 }
0x144d   : > { %v17177_v26 = vpop.f32.mrb[70].mxu0 }
0x144e   : > { %v17178_v63 = vadd.f32 %v17177_v26, %v17083_v9  ;;  %v22181_v61 = vpop.f32.mrb[71].mxu0 }
0x1450   : > { %v17257_v56 = vadd.f32 %v17256_v57, %v17178_v63 }
0x1452   : > { %v17260_v7 = vadd.f32 %v17257_v56, %v29712_v44 }
0x1454   : > { %v17268_v30 = vadd.f32 %v17515_v28, %v17260_v7 }
0x1456   : > { %17270 = vst.msk [vmem:[%s568_s27] sm:$0xf] %vm17269_vm10, %v17268_v30 }
0x1457   : > { %24804 = shalt.err (!%p24801_p1)
}
0x1458   : > { %s24805_s21 = scalar_lea.hbm %s29760_s1, 64  ;;  %s24809_s17 = scalar_lea.hbm %s29927_s8, 128 }
0x1459   : > { %p24806_p13 = scmp.ne.s32.totalorder %s29760_s1, %s24805_s21  ;;  %p24810_p4 = scmp.lt.u32.totalorder %s29760_s1, %s29927_s8 }
0x145a   : > { %p24811_p5 = scmp.lt.u32.totalorder %s24809_s17, %s24805_s21  ;;  %p24813_p8 = scmp.lt.u32.totalorder %s24805_s21, %s29760_s1 }
0x145b   : > { %p24807_p6 = pnand %p24806_p13, %p29928_p0 }
0x145c   : > { %p24812_p11 = por %p24811_p5, %p24810_p4 }
0x145d   : > { %p24808_p10 = pneg %p24807_p6 }
0x145e   : > { %p24814_p2 = por %p24813_p8, %p24812_p11 }
0x1460   : > { %p24815_p3 = pnand %p24814_p2, %p24808_p10 }
0x1462   : > { %24818 = shalt.err (!%p24815_p3)
}
0x1463   : > { %24643 = dma.vmem_to_hbm [thread:$0]  (%p29928_p0), %s29762_s13, 64, %s29760_s1, %s17272_s26  }
0x1464 PF: > { %s29929_s19 = sld [smem:[#allocation12_spill]]  ;;  %s29930_s18 = sld [smem:[#allocation13_spill]] }
0x1465   : > { %p29932_p9 = scmp.ge.s32.totalorder %s24861_s24, 2 }
0x146a   : > { %s17297_s29 = sand.u32 1, %s29929_s19   ;;  %p29931_p7 = scmp.ne.s32.totalorder %s29930_s18, 0 }
0x146b   : > { %s17298_s15 = scalar_lea.sflag [#allocation4], %s17297_s29 }
0x146c   : > { %p24657_p12 = pnand %p29932_p9, %p29931_p7 }
0x146e   : > { %24844 = dma.done.wait (!%p24657_p12), %s17298_s15, 64  }
0x146f   : > { %24846 = vsyncadd (!%p24657_p12), %s17298_s15, 4294967232  ;;  %p30_p1 = scmp.ge.s32.totalorder %s25073_s14, 4   ;;  %s29933_s21 = smov %s24853_s22 }
0x1470   : > { %s29934_s22 = smov %s24857_s23  ;;  %s29935_s23 = smov %s25089_s20 }
0x1471   : > { %s29936_s24 = smov %s25073_s14  ;;  %32 = sbr.rel (!%p30_p1) target bundleno = 15 (0xf), region = 157 }
0x1478   :  { %17303 = vsyncpa [#allocation3], 1 }
0x1479   :  { %17305 = vsyncpa [#allocation3 + $0x1], 1 }
0x147a   :  { %17306 = vsyncpa [#allocation6], 1 }
0x147b   :  { %17307 = vsyncpa [#allocation4], 1 }
0x147c   :  { %17309 = vsyncpa [#allocation4 + $0x1], 1 }

</bundles_post_ra>
